<compile_context>
chip_gen: v5e
topology: v5e:2x2
jax: 0.10.0
libtpu: 0.0.40
codegen_flags: <defaults>
</compile_context>

<pallas_src>
import math
from functools import partial

import jax
import jax.numpy as jnp
from jax import lax
from jax.experimental import pallas as pl
from jax.experimental.pallas import tpu as pltpu

NUM_LANES = 128


def _round_up(x, m):
    return ((x + m - 1) // m) * m


# ------------------------- Pallas flash-attention kernel -------------------------

def _flash_attn_kernel(qi_tab_ref, ki_tab_ref,        # scalar-prefetch tables (SMEM)
                       q_ref, k_ref, v_ref,           # VMEM input tiles
                       o_ref,                         # VMEM output tile
                       m_scr, l_scr, acc_scr,         # VMEM scratch
                       *, n_rep, blk, head_dim):
    # Grid: (B, KVH, t) where t walks only the causally-active (qi, ki) tile pairs,
    # ki innermost within each qi group.
    t = pl.program_id(2)
    qi = qi_tab_ref[t]
    ki = ki_tab_ref[t]
    m_rows = n_rep * blk

    @pl.when(ki == 0)
    def _init():
        m_scr[...] = jnp.full(m_scr.shape, -jnp.inf, dtype=m_scr.dtype)
        l_scr[...] = jnp.zeros(l_scr.shape, dtype=l_scr.dtype)
        acc_scr[...] = jnp.zeros(acc_scr.shape, dtype=acc_scr.dtype)

    def _attend(on_diagonal):
        # Q tile stacks the n_rep query heads that share this KV head on the row axis.
        # (merging the leading dims is a layout-preserving reshape: blk % 16 == 0.)
        q = q_ref[0, 0].reshape(m_rows, head_dim)     # (n_rep*blk, D) bf16, pre-scaled
        k = k_ref[0, 0]                               # (blk, D) bf16
        v = v_ref[0, 0]                               # (blk, D) bf16

        # scores = (q/sqrt(D)) @ k^T  -> (n_rep*blk, blk) fp32 (bf16 MXU, f32 accumulate)
        s = lax.dot_general(q, k, (((1,), (1,)), ((), ())),
                            preferred_element_type=jnp.float32)

        if on_diagonal:
            # TQ == TK and qi == ki: tile-local causal mask, identical for every head,
            # applied as an additive bias tiled across the n_rep stacked heads.
            row = lax.broadcasted_iota(jnp.int32, (blk, blk), 0)
            col = lax.broadcasted_iota(jnp.int32, (blk, blk), 1)
            bias = jnp.where(col <= row, 0.0, -1e30).astype(jnp.float32)
            s = s + jnp.tile(bias, (n_rep, 1))

        # Online softmax update; running stats are lane-replicated (m_rows, 128) f32.
        m_prev = m_scr[...]
        l_prev = l_scr[...]
        m_curr = jnp.max(s, axis=-1, keepdims=True)            # (m_rows, 1)
        m_next = jnp.maximum(m_prev, m_curr)                   # (m_rows, 128)
        alpha = jnp.exp(m_prev - m_next)                       # (m_rows, 128)
        p = jnp.exp(s - m_next[:, :1])                         # (m_rows, blk) fp32
        l_scr[...] = alpha * l_prev + jnp.sum(p, axis=-1, keepdims=True)
        m_scr[...] = m_next

        # PV matmul with bf16 operands, fp32 accumulate.
        pv = lax.dot_general(p.astype(v.dtype), v, (((1,), (0,)), ((), ())),
                             preferred_element_type=jnp.float32)   # (m_rows, D)
        a = alpha if head_dim == NUM_LANES else alpha[:, :1]
        acc_scr[...] = a * acc_scr[...] + pv

    @pl.when(ki < qi)            # strictly below the diagonal: no mask needed
    def _off_diag():
        _attend(on_diagonal=False)

    @pl.when(ki == qi)           # diagonal (last active kv tile): mask, finalize, store
    def _diag():
        _attend(on_diagonal=True)
        l = l_scr[...]
        # Causal rows always have l >= 1, so the approx reciprocal is safe.
        # TODO(synk): guard l == 0 if sliding-window / padding masks are ever added.
        inv = pl.reciprocal(l, approx=True)
        inv = inv * (2.0 - l * inv)       # one Newton step -> ~fp32 accuracy
        acc = acc_scr[...]
        pieces = []
        for r in range(n_rep):            # static loop over the heads in this KV group
            inv_r = inv[r * blk:(r + 1) * blk, :]
            acc_r = acc[r * blk:(r + 1) * blk, :]
            sc = inv_r if head_dim == NUM_LANES else inv_r[:, :1]
            pieces.append((acc_r * sc).astype(o_ref.dtype))
        # Lane-dense (blk, n_rep*D) store (lane-aligned concat, no cross-lane relayout).
        o_ref[0] = jnp.concatenate(pieces, axis=-1)


def flash_attention_pallas(q, k, v, scale, *, block_size=256,
                           compute_dtype=jnp.bfloat16):
    """Causal GQA flash attention.

    q: [B, H, S, D]; k, v: [B, KVH, S, D] (KV heads NOT repeated).
    Returns the attention output in [B, S, H*D] layout (heads contiguous on the lane
    axis), ready for o_proj — no post-kernel transpose/reshape needed.
    """
    B, H, S, D = q.shape
    Bk, KVH, Sk, Dk = k.shape
    assert v.shape == k.shape and Bk == B and Sk == S and Dk == D
    assert H % KVH == 0
    n_rep = H // KVH
    assert D % NUM_LANES == 0, "head_dim must be a multiple of 128 (Qwen2 uses 128)"
    assert block_size % NUM_LANES == 0

    out_dtype = q.dtype

    # Feed the MXU bf16 (fp32 accumulation inside the kernel) and fold 1/sqrt(D) into q
    # once, hoisting the per-kv-step scale multiply out of the kernel's inner loop.
    q = (q * scale).astype(compute_dtype)
    k = k.astype(compute_dtype)
    v = v.astype(compute_dtype)

    # GQA head blocking: group the n_rep query heads that share each KV head.
    q = q.reshape(B, KVH, n_rep, S, D)              # metadata-only reshape

    # Pad the sequence to a tile multiple (replaces the old full-extent fallback).
    blk = min(block_size, _round_up(S, NUM_LANES))
    s_pad = _round_up(S, blk)
    if s_pad != S:
        pad = s_pad - S
        q = jnp.pad(q, ((0, 0), (0, 0), (0, 0), (0, pad), (0, 0)))
        k = jnp.pad(k, ((0, 0), (0, 0), (0, pad), (0, 0)))
        v = jnp.pad(v, ((0, 0), (0, 0), (0, pad), (0, 0)))
    nq = s_pad // blk

    # Flattened lower-triangle grid: only the nq*(nq+1)/2 causally-active (qi, ki) tiles,
    # ki innermost within each qi group (so ki==0 inits and ki==qi finalizes).
    qi_list, ki_list = [], []
    for qi in range(nq):
        for ki in range(qi + 1):
            qi_list.append(qi)
            ki_list.append(ki)
    qi_tab = jnp.asarray(qi_list, dtype=jnp.int32)
    ki_tab = jnp.asarray(ki_list, dtype=jnp.int32)
    n_active = len(qi_list)

    def q_index(b, g, t, qi_ref, ki_ref):
        return (b, g, 0, qi_ref[t], 0)

    def kv_index(b, g, t, qi_ref, ki_ref):
        # n_rep query heads share this single K/V tile fetch.
        return (b, g, ki_ref[t], 0)

    def o_index(b, g, t, qi_ref, ki_ref):
        # Output [B, S_pad, H*D]; KV group g owns lanes [g*n_rep*D, (g+1)*n_rep*D).
        return (b, qi_ref[t], g)

    kernel = partial(_flash_attn_kernel, n_rep=n_rep, blk=blk, head_dim=D)
    m_rows = n_rep * blk

    out = pl.pallas_call(
        kernel,
        out_shape=jax.ShapeDtypeStruct((B, s_pad, H * D), out_dtype),
        grid_spec=pltpu.PrefetchScalarGridSpec(
            num_scalar_prefetch=2,
            grid=(B, KVH, n_active),
            in_specs=[
                pl.BlockSpec((1, 1, n_rep, blk, D), q_index),
                pl.BlockSpec((1, 1, blk, D), kv_index),
                pl.BlockSpec((1, 1, blk, D), kv_index),
            ],
            out_specs=pl.BlockSpec((1, blk, n_rep * D), o_index),
            scratch_shapes=[
                pltpu.VMEM((m_rows, NUM_LANES), jnp.float32),   # running max (lane-replicated)
                pltpu.VMEM((m_rows, NUM_LANES), jnp.float32),   # running denom
                pltpu.VMEM((m_rows, D), jnp.float32),           # fp32 output accumulator
            ],
        ),
        compiler_params=pltpu.CompilerParams(
            # B/KVH are parallel (megacore sharding on v7x); the flattened causal axis
            # carries the accumulator and must stay "arbitrary".
            dimension_semantics=("parallel", "parallel", "arbitrary"),
        ),
    )(qi_tab, ki_tab, q, k, v)

    if s_pad != S:
        out = out[:, :S, :]
    return out


# ------------------------------- JAX glue ----------------------------------

def rotate_half(x):
    x1 = x[..., : x.shape[-1] // 2]
    x2 = x[..., x.shape[-1] // 2:]
    return jnp.concatenate((-x2, x1), axis=-1)


def apply_rotary_pos_emb(q, k, cos, sin, position_ids):
    cos = cos[position_ids][:, None, :, :]   # [B, 1, S, D]
    sin = sin[position_ids][:, None, :, :]
    q_embed = q * cos + rotate_half(q) * sin
    k_embed = k * cos + rotate_half(k) * sin
    return q_embed, k_embed


def repeat_kv(x, n_rep):
    # Only used by the pure-JAX reference path; the Pallas kernel handles GQA via its
    # K/V index_map + head blocking and never materializes repeated K/V.
    b, kvh, s, d = x.shape
    if n_rep == 1:
        return x
    x = jnp.broadcast_to(x[:, :, None, :, :], (b, kvh, n_rep, s, d))
    return x.reshape(b, kvh * n_rep, s, d)


def rotary_cos_sin(seq_len, dim, base, dtype=jnp.float32):
    inv_freq = 1.0 / (base ** (jnp.arange(0, dim, 2, dtype=jnp.float32) / dim))
    t = jnp.arange(seq_len, dtype=jnp.float32)
    freqs = jnp.outer(t, inv_freq)
    emb = jnp.concatenate((freqs, freqs), axis=-1)
    return jnp.cos(emb).astype(dtype), jnp.sin(emb).astype(dtype)


def init_params(key, hidden_size, num_heads, num_kv_heads, head_dim, dtype=jnp.float32):
    ks = jax.random.split(key, 7)
    s = 0.02
    return {
        "q_w": (jax.random.normal(ks[0], (num_heads * head_dim, hidden_size)) * s).astype(dtype),
        "q_b": (jax.random.normal(ks[1], (num_heads * head_dim,)) * s).astype(dtype),
        "k_w": (jax.random.normal(ks[2], (num_kv_heads * head_dim, hidden_size)) * s).astype(dtype),
        "k_b": (jax.random.normal(ks[3], (num_kv_heads * head_dim,)) * s).astype(dtype),
        "v_w": (jax.random.normal(ks[4], (num_kv_heads * head_dim, hidden_size)) * s).astype(dtype),
        "v_b": (jax.random.normal(ks[5], (num_kv_heads * head_dim,)) * s).astype(dtype),
        "o_w": (jax.random.normal(ks[6], (hidden_size, num_heads * head_dim)) * s).astype(dtype),
    }


def qwen2_flash_attention2_forward(params, hidden_states, position_ids, *,
                                   num_heads, num_kv_heads, head_dim,
                                   rope_theta=10000.0, use_pallas=True, block_size=256):
    bsz, q_len, _ = hidden_states.shape
    n_rep = num_heads // num_kv_heads

    # projections (nn.Linear: y = x W^T + b)
    q = hidden_states @ params["q_w"].T + params["q_b"]
    k = hidden_states @ params["k_w"].T + params["k_b"]
    v = hidden_states @ params["v_w"].T + params["v_b"]

    q = q.reshape(bsz, q_len, num_heads, head_dim).transpose(0, 2, 1, 3)       # [B,H,S,D]
    k = k.reshape(bsz, q_len, num_kv_heads, head_dim).transpose(0, 2, 1, 3)    # [B,KVH,S,D]
    v = v.reshape(bsz, q_len, num_kv_heads, head_dim).transpose(0, 2, 1, 3)

    # Rotary table built for the static kv_seq_len (jit-friendly; no host sync).
    # TODO(synk): position offsets beyond q_len (KV-cache decode) not implemented.
    kv_seq_len = q_len
    cos, sin = rotary_cos_sin(kv_seq_len, head_dim, rope_theta, hidden_states.dtype)
    q, k = apply_rotary_pos_emb(q, k, cos, sin, position_ids)

    scale = 1.0 / math.sqrt(head_dim)

    if use_pallas:
        # GQA K/V passed un-repeated; kernel returns [B, S, H*D] directly.
        attn = flash_attention_pallas(q, k, v, scale, block_size=block_size)
        attn = attn.astype(hidden_states.dtype)
    else:
        # pure-JAX eager reference (matches the HF eager attention path, fp32 softmax)
        kr = repeat_kv(k, n_rep)
        vr = repeat_kv(v, n_rep)
        s = jnp.einsum("bhqd,bhkd->bhqk", q, kr,
                       preferred_element_type=jnp.float32) * scale
        row = jnp.arange(q_len)[:, None]
        col = jnp.arange(q_len)[None, :]
        s = jnp.where(col <= row, s, -1e30)
        p = jax.nn.softmax(s, axis=-1).astype(q.dtype)
        attn = jnp.einsum("bhqk,bhkd->bhqd", p, vr)
        attn = attn.transpose(0, 2, 1, 3).reshape(bsz, q_len, num_heads * head_dim)

    return attn @ params["o_w"].T   # o_proj (no bias)


# ---------------------------------- main ------------------------------------

if __name__ == "__main__":
    # Small-but-realistic config: head_dim=128 (real Qwen2 head size), GQA 4q/2kv,
    # S=512 with block 256 so the kernel exercises head blocking, the flattened causal
    # grid (init / off-diagonal / diagonal steps) and multiple Q/KV tiles.
    B, S = 2, 512
    num_heads, num_kv_heads, head_dim = 4, 2, 128
    hidden_size = num_heads * head_dim  # 512
    dtype = jnp.bfloat16                # bf16 model, as in a real Qwen2 deployment

    key = jax.random.PRNGKey(0)
    k_param, k_x = jax.random.split(key)
    params = init_params(k_param, hidden_size, num_heads, num_kv_heads, head_dim, dtype=dtype)

    hidden_states = jax.random.normal(k_x, (B, S, hidden_size), dtype=jnp.float32).astype(dtype)
    position_ids = jnp.broadcast_to(jnp.arange(S, dtype=jnp.int32)[None, :], (B, S))

    fwd = partial(qwen2_flash_attention2_forward,
                  num_heads=num_heads, num_kv_heads=num_kv_heads,
                  head_dim=head_dim, rope_theta=10000.0, block_size=256)

    out = jax.jit(partial(fwd, use_pallas=True))(params, hidden_states, position_ids)
    out = jax.block_until_ready(out)

    ref = jax.jit(partial(fwd, use_pallas=False))(params, hidden_states, position_ids)
    ref = jax.block_until_ready(ref)

    assert out.shape == (B, S, hidden_size)
    max_err = float(jnp.max(jnp.abs(out.astype(jnp.float32) - ref.astype(jnp.float32))))
    # bf16 model: tolerance sized for bf16 rounding of independent reduction orders.
    assert max_err < 3e-2, f"Pallas kernel mismatch vs reference: max abs err {max_err}"

    print("KERNEL_OK")
</pallas_src>

<mosaic_0001>
module attributes {stable_mosaic.version = 11 : i64} {
  func.func @_flash_attn_kernel(%arg0: i32, %arg1: i32, %arg2: i32, %arg3: memref<3xi32, #tpu.memory_space<smem>>, %arg4: memref<3xi32, #tpu.memory_space<smem>>, %arg5: memref<1x1x2x256x128xbf16, #tpu.memory_space<vmem>>, %arg6: memref<1x1x256x128xbf16, #tpu.memory_space<vmem>>, %arg7: memref<1x1x256x128xbf16, #tpu.memory_space<vmem>>, %arg8: memref<1x256x256xbf16, #tpu.memory_space<vmem>>, %arg9: memref<512x128xf32, #tpu.memory_space<vmem>>, %arg10: memref<512x128xf32, #tpu.memory_space<vmem>>, %arg11: memref<512x128xf32, #tpu.memory_space<vmem>>) attributes {dimension_semantics = [#tpu.dimension_semantics<parallel>, #tpu.dimension_semantics<parallel>, #tpu.dimension_semantics<arbitrary>], iteration_bounds = array<i64: 2, 2, 3>, scalar_prefetch = 2 : i64, scratch_operands = 3 : i64, tpu.core_type = #tpu.core_type<tc>, window_params = [{transform_indices = @transform_0, window_bounds = array<i64: 1, 1, 2, 256, 128>}, {transform_indices = @transform_1, window_bounds = array<i64: 1, 1, 256, 128>}, {transform_indices = @transform_2, window_bounds = array<i64: 1, 1, 256, 128>}, {transform_indices = @transform_3, window_bounds = array<i64: 1, 256, 256>}]} {
    %0 = arith.index_cast %arg2 : i32 to index
    %1 = memref.load %arg3[%0] : memref<3xi32, #tpu.memory_space<smem>>
    %2 = arith.index_cast %arg2 : i32 to index
    %3 = memref.load %arg4[%2] : memref<3xi32, #tpu.memory_space<smem>>
    %c0_i32 = arith.constant 0 : i32
    %4 = arith.cmpi eq, %3, %c0_i32 : i32
    %5 = arith.extui %4 : i1 to i32
    %c0_i32_0 = arith.constant 0 : i32
    %6 = arith.cmpi ne, %5, %c0_i32_0 : i32
    scf.if %6 {
      %cst = arith.constant 0xFF800000 : f32
      %13 = vector.broadcast %cst : f32 to vector<512x128xf32>
      %c0 = arith.constant 0 : index
      %c0_3 = arith.constant 0 : index
      %14 = vector.load %arg9[%c0, %c0_3] : memref<512x128xf32, #tpu.memory_space<vmem>>, vector<512x128xf32>
      tpu.vector_store %arg9[%c0, %c0_3], %13 {strides = array<i32>} : memref<512x128xf32, #tpu.memory_space<vmem>>, vector<512x128xf32>,
      %cst_4 = arith.constant 0.000000e+00 : f32
      %15 = vector.broadcast %cst_4 : f32 to vector<512x128xf32>
      %c0_5 = arith.constant 0 : index
      %c0_6 = arith.constant 0 : index
      %16 = vector.load %arg10[%c0_5, %c0_6] : memref<512x128xf32, #tpu.memory_space<vmem>>, vector<512x128xf32>
      tpu.vector_store %arg10[%c0_5, %c0_6], %15 {strides = array<i32>} : memref<512x128xf32, #tpu.memory_space<vmem>>, vector<512x128xf32>,
      %cst_7 = arith.constant 0.000000e+00 : f32
      %17 = vector.broadcast %cst_7 : f32 to vector<512x128xf32>
      %c0_8 = arith.constant 0 : index
      %c0_9 = arith.constant 0 : index
      %18 = vector.load %arg11[%c0_8, %c0_9] : memref<512x128xf32, #tpu.memory_space<vmem>>, vector<512x128xf32>
      tpu.vector_store %arg11[%c0_8, %c0_9], %17 {strides = array<i32>} : memref<512x128xf32, #tpu.memory_space<vmem>>, vector<512x128xf32>,
    } else {
    }
    %7 = arith.cmpi slt, %3, %1 : i32
    %8 = arith.extui %7 : i1 to i32
    %c0_i32_1 = arith.constant 0 : i32
    %9 = arith.cmpi ne, %8, %c0_i32_1 : i32
    scf.if %9 {
      %c0 = arith.constant 0 : index
      %c0_3 = arith.constant 0 : index
      %c0_4 = arith.constant 0 : index
      %c0_5 = arith.constant 0 : index
      %c0_6 = arith.constant 0 : index
      %13 = vector.load %arg5[%c0, %c0_3, %c0_4, %c0_5, %c0_6] : memref<1x1x2x256x128xbf16, #tpu.memory_space<vmem>>, vector<1x1x2x256x128xbf16>
      %14 = vector.shape_cast %13 : vector<1x1x2x256x128xbf16> to vector<2x256x128xbf16>
      %15 = vector.shape_cast %14 : vector<2x256x128xbf16> to vector<512x128xbf16>
      %c0_7 = arith.constant 0 : index
      %c0_8 = arith.constant 0 : index
      %c0_9 = arith.constant 0 : index
      %c0_10 = arith.constant 0 : index
      %16 = vector.load %arg6[%c0_7, %c0_8, %c0_9, %c0_10] : memref<1x1x256x128xbf16, #tpu.memory_space<vmem>>, vector<1x1x256x128xbf16>
      %17 = vector.shape_cast %16 : vector<1x1x256x128xbf16> to vector<256x128xbf16>
      %c0_11 = arith.constant 0 : index
      %c0_12 = arith.constant 0 : index
      %c0_13 = arith.constant 0 : index
      %c0_14 = arith.constant 0 : index
      %18 = vector.load %arg7[%c0_11, %c0_12, %c0_13, %c0_14] : memref<1x1x256x128xbf16, #tpu.memory_space<vmem>>, vector<1x1x256x128xbf16>
      %19 = vector.shape_cast %18 : vector<1x1x256x128xbf16> to vector<256x128xbf16>
      %cst = arith.constant dense<0.000000e+00> : vector<512x256xf32>
      %20 = tpu.matmul %15, %17, %cst {dimension_numbers = #tpu.dot_dimension_numbers<[1], [1], [0], [0], [0, 0, 1, 0], [], []>} : vector<512x128xbf16>, vector<256x128xbf16>, vector<512x256xf32> -> vector<512x256xf32>
      %c0_15 = arith.constant 0 : index
      %c0_16 = arith.constant 0 : index
      %21 = vector.load %arg9[%c0_15, %c0_16] : memref<512x128xf32, #tpu.memory_space<vmem>>, vector<512x128xf32>
      %c0_17 = arith.constant 0 : index
      %c0_18 = arith.constant 0 : index
      %22 = vector.load %arg10[%c0_17, %c0_18] : memref<512x128xf32, #tpu.memory_space<vmem>>, vector<512x128xf32>
      %cst_19 = arith.constant dense<0xFF800000> : vector<512xf32>
      %23 = vector.multi_reduction <maximumf>, %20, %cst_19 [1] : vector<512x256xf32> to vector<512xf32>
      %24 = vector.shape_cast %23 : vector<512xf32> to vector<512x1xf32>
      %25 = vector.broadcast %24 : vector<512x1xf32> to vector<512x128xf32>
      %26 = arith.maximumf %21, %25 : vector<512x128xf32>
      %27 = arith.subf %21, %26 : vector<512x128xf32>
      %28 = math.exp %27 : vector<512x128xf32>
      %29 = vector.extract_strided_slice %26 {offsets = [0, 0], sizes = [512, 1], strides = [1, 1]} : vector<512x128xf32> to vector<512x1xf32>
      %30 = vector.broadcast %29 : vector<512x1xf32> to vector<512x256xf32>
      %31 = arith.subf %20, %30 : vector<512x256xf32>
      %32 = math.exp %31 : vector<512x256xf32>
      %33 = arith.mulf %28, %22 : vector<512x128xf32>
      %cst_20 = arith.constant dense<0.000000e+00> : vector<512xf32>
      %34 = vector.multi_reduction <add>, %32, %cst_20 [1] : vector<512x256xf32> to vector<512xf32>
      %35 = vector.shape_cast %34 : vector<512xf32> to vector<512x1xf32>
      %36 = vector.broadcast %35 : vector<512x1xf32> to vector<512x128xf32>
      %37 = arith.addf %33, %36 : vector<512x128xf32>
      %c0_21 = arith.constant 0 : index
      %c0_22 = arith.constant 0 : index
      %38 = vector.load %arg10[%c0_21, %c0_22] : memref<512x128xf32, #tpu.memory_space<vmem>>, vector<512x128xf32>
      tpu.vector_store %arg10[%c0_21, %c0_22], %37 {strides = array<i32>} : memref<512x128xf32, #tpu.memory_space<vmem>>, vector<512x128xf32>,
      %c0_23 = arith.constant 0 : index
      %c0_24 = arith.constant 0 : index
      %39 = vector.load %arg9[%c0_23, %c0_24] : memref<512x128xf32, #tpu.memory_space<vmem>>, vector<512x128xf32>
      tpu.vector_store %arg9[%c0_23, %c0_24], %26 {strides = array<i32>} : memref<512x128xf32, #tpu.memory_space<vmem>>, vector<512x128xf32>,
      %40 = arith.truncf %32 : vector<512x256xf32> to vector<512x256xbf16>
      %cst_25 = arith.constant dense<0.000000e+00> : vector<512x128xf32>
      %41 = tpu.matmul %40, %19, %cst_25 {dimension_numbers = #tpu.dot_dimension_numbers<[1], [0], [0], [1], [0, 0, 1, 1], [], []>} : vector<512x256xbf16>, vector<256x128xbf16>, vector<512x128xf32> -> vector<512x128xf32>
      %c0_26 = arith.constant 0 : index
      %c0_27 = arith.constant 0 : index
      %42 = vector.load %arg11[%c0_26, %c0_27] : memref<512x128xf32, #tpu.memory_space<vmem>>, vector<512x128xf32>
      %43 = arith.mulf %28, %42 : vector<512x128xf32>
      %44 = arith.addf %43, %41 : vector<512x128xf32>
      %c0_28 = arith.constant 0 : index
      %c0_29 = arith.constant 0 : index
      %45 = vector.load %arg11[%c0_28, %c0_29] : memref<512x128xf32, #tpu.memory_space<vmem>>, vector<512x128xf32>
      tpu.vector_store %arg11[%c0_28, %c0_29], %44 {strides = array<i32>} : memref<512x128xf32, #tpu.memory_space<vmem>>, vector<512x128xf32>,
    } else {
    }
    %10 = arith.cmpi eq, %3, %1 : i32
    %11 = arith.extui %10 : i1 to i32
    %c0_i32_2 = arith.constant 0 : i32
    %12 = arith.cmpi ne, %11, %c0_i32_2 : i32
    scf.if %12 {
      %c0 = arith.constant 0 : index
      %c0_3 = arith.constant 0 : index
      %c0_4 = arith.constant 0 : index
      %c0_5 = arith.constant 0 : index
      %c0_6 = arith.constant 0 : index
      %13 = vector.load %arg5[%c0, %c0_3, %c0_4, %c0_5, %c0_6] : memref<1x1x2x256x128xbf16, #tpu.memory_space<vmem>>, vector<1x1x2x256x128xbf16>
      %14 = vector.shape_cast %13 : vector<1x1x2x256x128xbf16> to vector<2x256x128xbf16>
      %15 = vector.shape_cast %14 : vector<2x256x128xbf16> to vector<512x128xbf16>
      %c0_7 = arith.constant 0 : index
      %c0_8 = arith.constant 0 : index
      %c0_9 = arith.constant 0 : index
      %c0_10 = arith.constant 0 : index
      %16 = vector.load %arg6[%c0_7, %c0_8, %c0_9, %c0_10] : memref<1x1x256x128xbf16, #tpu.memory_space<vmem>>, vector<1x1x256x128xbf16>
      %17 = vector.shape_cast %16 : vector<1x1x256x128xbf16> to vector<256x128xbf16>
      %c0_11 = arith.constant 0 : index
      %c0_12 = arith.constant 0 : index
      %c0_13 = arith.constant 0 : index
      %c0_14 = arith.constant 0 : index
      %18 = vector.load %arg7[%c0_11, %c0_12, %c0_13, %c0_14] : memref<1x1x256x128xbf16, #tpu.memory_space<vmem>>, vector<1x1x256x128xbf16>
      %19 = vector.shape_cast %18 : vector<1x1x256x128xbf16> to vector<256x128xbf16>
      %cst = arith.constant dense<0.000000e+00> : vector<512x256xf32>
      %20 = tpu.matmul %15, %17, %cst {dimension_numbers = #tpu.dot_dimension_numbers<[1], [1], [0], [0], [0, 0, 1, 0], [], []>} : vector<512x128xbf16>, vector<256x128xbf16>, vector<512x256xf32> -> vector<512x256xf32>
      %21 = tpu.iota {dimensions = array<i32: 0>} : vector<256x256xi32>
      %22 = tpu.iota {dimensions = array<i32: 1>} : vector<256x256xi32>
      %23 = arith.cmpi sle, %22, %21 : vector<256x256xi32>
      %cst_15 = arith.constant 0.000000e+00 : f32
      %cst_16 = arith.constant -1.000000e+30 : f32
      %24 = vector.broadcast %cst_15 : f32 to vector<256x256xf32>
      %25 = vector.broadcast %cst_16 : f32 to vector<256x256xf32>
      %26 = arith.select %23, %24, %25 : vector<256x256xi1>, vector<256x256xf32>
      %27 = tpu.concatenate %26, %26 in 0 : vector<256x256xf32>, vector<256x256xf32> -> vector<512x256xf32>
      %28 = arith.addf %20, %27 : vector<512x256xf32>
      %c0_17 = arith.constant 0 : index
      %c0_18 = arith.constant 0 : index
      %29 = vector.load %arg9[%c0_17, %c0_18] : memref<512x128xf32, #tpu.memory_space<vmem>>, vector<512x128xf32>
      %c0_19 = arith.constant 0 : index
      %c0_20 = arith.constant 0 : index
      %30 = vector.load %arg10[%c0_19, %c0_20] : memref<512x128xf32, #tpu.memory_space<vmem>>, vector<512x128xf32>
      %cst_21 = arith.constant dense<0xFF800000> : vector<512xf32>
      %31 = vector.multi_reduction <maximumf>, %28, %cst_21 [1] : vector<512x256xf32> to vector<512xf32>
      %32 = vector.shape_cast %31 : vector<512xf32> to vector<512x1xf32>
      %33 = vector.broadcast %32 : vector<512x1xf32> to vector<512x128xf32>
      %34 = arith.maximumf %29, %33 : vector<512x128xf32>
      %35 = arith.subf %29, %34 : vector<512x128xf32>
      %36 = math.exp %35 : vector<512x128xf32>
      %37 = vector.extract_strided_slice %34 {offsets = [0, 0], sizes = [512, 1], strides = [1, 1]} : vector<512x128xf32> to vector<512x1xf32>
      %38 = vector.broadcast %37 : vector<512x1xf32> to vector<512x256xf32>
      %39 = arith.subf %28, %38 : vector<512x256xf32>
      %40 = math.exp %39 : vector<512x256xf32>
      %41 = arith.mulf %36, %30 : vector<512x128xf32>
      %cst_22 = arith.constant dense<0.000000e+00> : vector<512xf32>
      %42 = vector.multi_reduction <add>, %40, %cst_22 [1] : vector<512x256xf32> to vector<512xf32>
      %43 = vector.shape_cast %42 : vector<512xf32> to vector<512x1xf32>
      %44 = vector.broadcast %43 : vector<512x1xf32> to vector<512x128xf32>
      %45 = arith.addf %41, %44 : vector<512x128xf32>
      %c0_23 = arith.constant 0 : index
      %c0_24 = arith.constant 0 : index
      %46 = vector.load %arg10[%c0_23, %c0_24] : memref<512x128xf32, #tpu.memory_space<vmem>>, vector<512x128xf32>
      tpu.vector_store %arg10[%c0_23, %c0_24], %45 {strides = array<i32>} : memref<512x128xf32, #tpu.memory_space<vmem>>, vector<512x128xf32>,
      %c0_25 = arith.constant 0 : index
      %c0_26 = arith.constant 0 : index
      %47 = vector.load %arg9[%c0_25, %c0_26] : memref<512x128xf32, #tpu.memory_space<vmem>>, vector<512x128xf32>
      tpu.vector_store %arg9[%c0_25, %c0_26], %34 {strides = array<i32>} : memref<512x128xf32, #tpu.memory_space<vmem>>, vector<512x128xf32>,
      %48 = arith.truncf %40 : vector<512x256xf32> to vector<512x256xbf16>
      %cst_27 = arith.constant dense<0.000000e+00> : vector<512x128xf32>
      %49 = tpu.matmul %48, %19, %cst_27 {dimension_numbers = #tpu.dot_dimension_numbers<[1], [0], [0], [1], [0, 0, 1, 1], [], []>} : vector<512x256xbf16>, vector<256x128xbf16>, vector<512x128xf32> -> vector<512x128xf32>
      %c0_28 = arith.constant 0 : index
      %c0_29 = arith.constant 0 : index
      %50 = vector.load %arg11[%c0_28, %c0_29] : memref<512x128xf32, #tpu.memory_space<vmem>>, vector<512x128xf32>
      %51 = arith.mulf %36, %50 : vector<512x128xf32>
      %52 = arith.addf %51, %49 : vector<512x128xf32>
      %c0_30 = arith.constant 0 : index
      %c0_31 = arith.constant 0 : index
      %53 = vector.load %arg11[%c0_30, %c0_31] : memref<512x128xf32, #tpu.memory_space<vmem>>, vector<512x128xf32>
      tpu.vector_store %arg11[%c0_30, %c0_31], %52 {strides = array<i32>} : memref<512x128xf32, #tpu.memory_space<vmem>>, vector<512x128xf32>,
      %c0_32 = arith.constant 0 : index
      %c0_33 = arith.constant 0 : index
      %54 = vector.load %arg10[%c0_32, %c0_33] : memref<512x128xf32, #tpu.memory_space<vmem>>, vector<512x128xf32>
      %55 = tpu.reciprocal %54 {approx = true} : vector<512x128xf32> -> vector<512x128xf32>
      %56 = arith.mulf %54, %55 : vector<512x128xf32>
      %cst_34 = arith.constant 2.000000e+00 : f32
      %57 = vector.broadcast %cst_34 : f32 to vector<512x128xf32>
      %58 = arith.subf %57, %56 : vector<512x128xf32>
      %59 = arith.mulf %55, %58 : vector<512x128xf32>
      %c0_35 = arith.constant 0 : index
      %c0_36 = arith.constant 0 : index
      %60 = vector.load %arg11[%c0_35, %c0_36] : memref<512x128xf32, #tpu.memory_space<vmem>>, vector<512x128xf32>
      %61 = vector.extract_strided_slice %59 {offsets = [0, 0], sizes = [256, 128], strides = [1, 1]} : vector<512x128xf32> to vector<256x128xf32>
      %62 = vector.extract_strided_slice %60 {offsets = [0, 0], sizes = [256, 128], strides = [1, 1]} : vector<512x128xf32> to vector<256x128xf32>
      %63 = arith.mulf %62, %61 : vector<256x128xf32>
      %64 = arith.truncf %63 : vector<256x128xf32> to vector<256x128xbf16>
      %65 = vector.extract_strided_slice %59 {offsets = [256, 0], sizes = [256, 128], strides = [1, 1]} : vector<512x128xf32> to vector<256x128xf32>
      %66 = vector.extract_strided_slice %60 {offsets = [256, 0], sizes = [256, 128], strides = [1, 1]} : vector<512x128xf32> to vector<256x128xf32>
      %67 = arith.mulf %66, %65 : vector<256x128xf32>
      %68 = arith.truncf %67 : vector<256x128xf32> to vector<256x128xbf16>
      %69 = tpu.concatenate %64, %68 in 1 : vector<256x128xbf16>, vector<256x128xbf16> -> vector<256x256xbf16>
      %c0_37 = arith.constant 0 : index
      %c0_38 = arith.constant 0 : index
      %c0_39 = arith.constant 0 : index
      %70 = vector.load %arg8[%c0_37, %c0_38, %c0_39] : memref<1x256x256xbf16, #tpu.memory_space<vmem>>, vector<1x256x256xbf16>
      %71 = vector.shape_cast %70 : vector<1x256x256xbf16> to vector<256x256xbf16>
      %72 = vector.shape_cast %69 : vector<256x256xbf16> to vector<1x256x256xbf16>
      tpu.vector_store %arg8[%c0_37, %c0_38, %c0_39], %72 {strides = array<i32>} : memref<1x256x256xbf16, #tpu.memory_space<vmem>>, vector<1x256x256xbf16>,
    } else {
    }
    return
  }
  func.func @transform_0(%arg0: i32, %arg1: i32, %arg2: i32, %arg3: memref<3xi32, #tpu.memory_space<smem>>, %arg4: memref<3xi32, #tpu.memory_space<smem>>) -> (i32, i32, i32, i32, i32) {
    %0 = arith.index_cast %arg2 : i32 to index
    %1 = memref.load %arg3[%0] : memref<3xi32, #tpu.memory_space<smem>>
    %c0_i32 = arith.constant 0 : i32
    %c0_i32_0 = arith.constant 0 : i32
    %c0_i32_1 = arith.constant 0 : i32
    return %arg0, %arg1, %c0_i32, %1, %c0_i32_0 : i32, i32, i32, i32, i32
  }
  func.func @transform_1(%arg0: i32, %arg1: i32, %arg2: i32, %arg3: memref<3xi32, #tpu.memory_space<smem>>, %arg4: memref<3xi32, #tpu.memory_space<smem>>) -> (i32, i32, i32, i32) {
    %0 = arith.index_cast %arg2 : i32 to index
    %1 = memref.load %arg4[%0] : memref<3xi32, #tpu.memory_space<smem>>
    %c0_i32 = arith.constant 0 : i32
    %c0_i32_0 = arith.constant 0 : i32
    return %arg0, %arg1, %1, %c0_i32 : i32, i32, i32, i32
  }
  func.func @transform_2(%arg0: i32, %arg1: i32, %arg2: i32, %arg3: memref<3xi32, #tpu.memory_space<smem>>, %arg4: memref<3xi32, #tpu.memory_space<smem>>) -> (i32, i32, i32, i32) {
    %0 = arith.index_cast %arg2 : i32 to index
    %1 = memref.load %arg4[%0] : memref<3xi32, #tpu.memory_space<smem>>
    %c0_i32 = arith.constant 0 : i32
    %c0_i32_0 = arith.constant 0 : i32
    return %arg0, %arg1, %1, %c0_i32 : i32, i32, i32, i32
  }
  func.func @transform_3(%arg0: i32, %arg1: i32, %arg2: i32, %arg3: memref<3xi32, #tpu.memory_space<smem>>, %arg4: memref<3xi32, #tpu.memory_space<smem>>) -> (i32, i32, i32) {
    %0 = arith.index_cast %arg2 : i32 to index
    %1 = memref.load %arg3[%0] : memref<3xi32, #tpu.memory_space<smem>>
    %c0_i32 = arith.constant 0 : i32
    return %arg0, %1, %arg1 : i32, i32, i32
  }
}

</mosaic_0001>

<bundles_post_ra>
// kernel: qwen2_flash_attention2_forward.1
= control target key start
LH: loop header
LB: loop body
LE: loop exit
PB: predicated region body
PF: predicated region fallthrough
CT: control target
= control target key end

     0   :  { %s10437_s24 = smov [#allocation6]   ;;  %s10438_s25 = smov [#allocation7]   ;;  %s15613_s0 = inlined_call_operand.vmem [shape: s32[3], index: 0, kind: input, shape index: {}]   ;;  %s15614_s2 = inlined_call_operand.vmem [shape: bf16[2,2,2,512,128], index: 2, kind: input, shape index: {}]   ;;  %s15615_s3 = inlined_call_operand.vmem [shape: bf16[2,2,512,128], index: 3, kind: input, shape index: {}]   ;;  %s15616_s4 = inlined_call_operand.vmem [shape: bf16[2,2,512,128], index: 4, kind: input, shape index: {}]   ;;  %s15617_s5 = inlined_call_operand.vmem [shape: bf16[2,512,512], index: 5, kind: output, shape index: {}]   ;;  %s15618_s1 = inlined_call_operand.vmem [shape: s32[3], index: 1, kind: input, shape index: {}]  }
   0x1   :  { %16040 = sst [smem:[#allocation271_spill]] %s15614_s2  ;;  %s11_s20 = sshll.u32 %s15613_s0, 4  ;;  %s12_s20 = int_to_ptr.vmem [resolvable:$true] %s11_s20 }
   0x2   :  { %16041 = sst [smem:[#allocation272_spill]] %s15616_s4  ;;  %s16_s23 = sshll.u32 %s15618_s1, 4  ;;  %s17_s23 = int_to_ptr.vmem [resolvable:$true] %s16_s23 }
   0x3   :  { %16042 = sst [smem:[#allocation273_spill]] %s15617_s5 }
   0x4   :  { %14 = dma.vmem_to_smem %s12_s20, 16, %s10437_s24, [#allocation5] }
   0x5   :  { %19 = dma.vmem_to_smem %s17_s23, 16, %s10438_s25, [#allocation5] }
   0x6   :  { %10391 = dma.done.wait [#allocation5], 32 }
   0x7   :  { %10392 = vsyncadd [#allocation5], 4294967264 }
   0x8   :  { %22 = sfence }
   0x9   :  { %s10480_s26 = smov 0   ;;  %s10482_s27 = smov 0  }
   0xa   :  { %s10484_s28 = smov 0   ;;  %s10486_s0 = smov 0  }
   0xb   :  { %s10488_s29 = smov 0   ;;  %s10490_s1 = smov 0  }
   0xc   :  { %s10492_s30 = smov 0   ;;  %s10494_s6 = smov 0  }
   0xd   :  { %s10496_s7 = smov 0   ;;  %s10498_s8 = smov 0  }
   0xe   :  { %s10500_s9 = smov 0  }
   0xf LB: > { %16043 = sst [smem:[#allocation11_spill]] %s10407_s0  ;;  %s40_s10 = sadd.s32 1, %s10423_s6  ;;  %s10435_s9 = sphi %s10500_s9, %s28_s9   ;;  %s10431_s8 = sphi %s10498_s8, %s17086_s8   ;;  %s10427_s7 = sphi %s10496_s7, %s17085_s7   ;;  %s10423_s6 = sphi %s10494_s6, %s17084_s6   ;;  %s10419_s30 = sphi %s10492_s30, %s17083_s30   ;;  %s10415_s1 = sphi %s10490_s1, %s17082_s1   ;;  %s10411_s29 = sphi %s10488_s29, %s17081_s29   ;;  %s10407_s0 = sphi %s10486_s0, %s17080_s0   ;;  %s10403_s28 = sphi %s10484_s28, %s17079_s28   ;;  %s10399_s27 = sphi %s10482_s27, %s17088_s27   ;;  %s10395_s26 = sphi %s10480_s26, %s17087_s26  }
  0x10   : > { %16044 = sst [smem:[#allocation12_spill]] %s10423_s6  ;;  %p41_p0 = scmp.ge.s32.totalorder %s40_s10, 3 }
  0x11   : > { %16045 = sst [smem:[#allocation13_spill]] %s10427_s7  ;;  %s43_s11 = sadd.s32 1, %s10427_s7 }
  0x12   : > { %16046 = sst [smem:[#allocation14_spill]] %s10431_s8  ;;  %s17090_s10 = smov (%p41_p0, %s40_s10), 0 }
  0x13   : > { %s51_s12 = sld [smem:[#allocation6 + %s10423_s6]]  ;;  %s17092_s11 = smov (!%p41_p0, %s43_s11), %s10427_s7 }
  0x14   : > { %16047 = sst [smem:[#allocation15_spill]] %s17090_s10  ;;  %s47_s13 = sadd.s32 1, %s10431_s8 }
  0x15   : > { %s52_s14 = sld [smem:[#allocation6 + %s17090_s10]]  ;;  %p45_p1 = scmp.ge.s32.totalorder %s17092_s11, 2 }
  0x16   : > { %p67_p2 = scmp.ne.s32.totalorder %s10407_s0, %s10403_s28  ;;  %s8514_s15 = sadd.s32 4294967295, %s10435_s9  }
  0x17   : > { %p68_p3 = scmp.eq.s32.totalorder %s10435_s9, 0  ;;  %s17094_s11 = smov (%p45_p1, %s17092_s11), 0 }
  0x18   : > { %16048 = sst [smem:[#allocation16_spill]] %s17094_s11  ;;  %s17096_s13 = smov (!%p45_p1, %s47_s13), %s10431_s8 }
  0x19   : > { %p10550_p4 = por %p68_p3, %p67_p2  ;;  %s147_s17 = sld [smem:[#allocation6 + %s10423_s6]] }
  0x1a   : > { %p49_p5 = scmp.ge.s32.totalorder %s17096_s13, 2  ;;  %s54_s18 = ssub.s32 %s10427_s7, %s17094_s11 }
  0x1b   : > { %s56_s19 = ssub.s32 %s51_s12, %s52_s14  ;;  %s148_s20 = sld [smem:[#allocation6 + %s17090_s10]] }
  0x1c   : > { %s17098_s13 = smov (%p49_p5, %s17096_s13), 0  ;;  %p166_p6 = scmp.ne.s32.totalorder %s10399_s27, %s10395_s26 }
  0x1d   : > { %16050 = sst [smem:[#allocation17_spill]] %s17098_s13  ;;  %p167_p7 = scmp.eq.s32.totalorder %s8514_s15, 11 }
  0x1e   : > { %s53_s21 = ssub.s32 %s10431_s8, %s17098_s13  ;;  %s60_s25 = sadd.s32 1, %s10407_s0 }
  0x1f   : > { %s55_s22 = sor.u32 %s54_s18, %s53_s21  ;;  %p10564_p8 = por %p167_p7, %p166_p6 }
  0x20   : > { %s57_s24 = sor.u32 %s56_s19, %s55_s22  ;;  %s156_s14 = sadd.s32 1, %s10399_s27 }
  0x21   : > { %p58_p9 = scmp.eq.s32.totalorder %s57_s24, 0  ;;  %s150_s5 = ssub.s32 %s147_s17, %s148_s20 }
  0x22   : > { %s151_s11 = sor.u32 %s150_s5, %s53_s21  ;;  %p8517_p11 = scmp.ge.s32.totalorder %s10435_s9, 12 }
  0x23   : > { %s10570_s4 = scalar_select %p58_p9, %s10407_s0, %s60_s25  }
  0x24   : > { %s153_s12 = sor.u32 %s151_s11, %s54_s18  ;;  %189 = sbr.rel (%p8517_p11) target bundleno = 85 (0x55), region = 16 }
  0x25   : > { %16052 = sst [smem:[#allocation18_spill]] %s10570_s4  ;;  %p154_p10 = scmp.eq.s32.totalorder %s153_s12, 0 }
  0x27   : > { %s10574_s10 = scalar_select %p154_p10, %s10399_s27, %s156_s14  }
  0x29   : > { %192 = sbr.rel (!%p10550_p4) target bundleno = 85 (0x55), region = 20  ;;  %s197_s15 = sld [smem:[#allocation6 + %s10423_s6]] (%p10550_p4) }
  0x2a   : > { %s194_s17 = sand.u32 (%p10550_p4), 1, %s10407_s0   ;;  %s8520_s5 = sshll.u32 (%p10550_p4), %s10427_s7, 7 }
  0x2b   : > { %s8521_s19 = sshll.u32 (%p10550_p4), %s10431_s8, 8  ;;  %s8518_s20 = sshll.u32 (%p10550_p4), %s194_s17, 8 }
  0x2c   : > { %s16053_s2 = sld [smem:[#allocation271_spill]] (%p10550_p4)  ;;  %s10591_s16 = scalar_lea.vmem (%p10550_p4), [#allocation8], %s8518_s20 }
  0x2f   : > { %s8519_s11 = sshll.u32 %s197_s15, 5 }
  0x30   : > { %s200_s18 = sadd.s32 %s8520_s5, %s8519_s11 }
  0x31   : > { %s202_s21 = sadd.s32 %s8521_s19, %s200_s18 }
  0x32   : > { %s8522_s22 = sshll.u32 %s202_s21, 2 }
  0x33   : > { %s10586_s12 = scalar_lea.vmem %s16053_s2, %s8522_s22 }
  0x34   : > { %v221_v0 = vld [vmem:[%s10586_s12] sm:$0xff]   ;;  %v225_v1 = vld [vmem:[%s10586_s12 + $0x8] sm:$0xff]   ;;  %v229_v2 = vld [vmem:[%s10586_s12 + $0x10] sm:$0xff]  }
  0x35   : > { %222 = vst [vmem:[%s10591_s16] sm:$0xff] %v221_v0   ;;  %v233_v3 = vld [vmem:[%s10586_s12 + $0x18] sm:$0xff]   ;;  %v237_v4 = vld [vmem:[%s10586_s12 + $0x20] sm:$0xff]   ;;  %v241_v5 = vld [vmem:[%s10586_s12 + $0x28] sm:$0xff]  }
  0x36   : > { %226 = vst [vmem:[%s10591_s16 + $0x8] sm:$0xff] %v225_v1   ;;  %v245_v6 = vld [vmem:[%s10586_s12 + $0x30] sm:$0xff]   ;;  %v249_v7 = vld [vmem:[%s10586_s12 + $0x38] sm:$0xff]   ;;  %v253_v8 = vld [vmem:[%s10586_s12 + $0x40] sm:$0xff]  }
  0x37   : > { %230 = vst [vmem:[%s10591_s16 + $0x10] sm:$0xff] %v229_v2   ;;  %v257_v9 = vld [vmem:[%s10586_s12 + $0x48] sm:$0xff]   ;;  %v261_v10 = vld [vmem:[%s10586_s12 + $0x50] sm:$0xff]   ;;  %v265_v11 = vld [vmem:[%s10586_s12 + $0x58] sm:$0xff]  }
  0x38   : > { %234 = vst [vmem:[%s10591_s16 + $0x18] sm:$0xff] %v233_v3   ;;  %v269_v12 = vld [vmem:[%s10586_s12 + $0x60] sm:$0xff]   ;;  %v273_v13 = vld [vmem:[%s10586_s12 + $0x68] sm:$0xff]   ;;  %v277_v14 = vld [vmem:[%s10586_s12 + $0x70] sm:$0xff]  }
  0x39   : > { %238 = vst [vmem:[%s10591_s16 + $0x20] sm:$0xff] %v237_v4   ;;  %v281_v15 = vld [vmem:[%s10586_s12 + $0x78] sm:$0xff]   ;;  %v285_v16 = vld [vmem:[%s10586_s12 + $0x100] sm:$0xff]   ;;  %v289_v17 = vld [vmem:[%s10586_s12 + $0x108] sm:$0xff]  }
  0x3a   : > { %242 = vst [vmem:[%s10591_s16 + $0x28] sm:$0xff] %v241_v5   ;;  %v293_v18 = vld [vmem:[%s10586_s12 + $0x110] sm:$0xff]   ;;  %v297_v19 = vld [vmem:[%s10586_s12 + $0x118] sm:$0xff]   ;;  %v301_v20 = vld [vmem:[%s10586_s12 + $0x120] sm:$0xff]  }
  0x3b   : > { %246 = vst [vmem:[%s10591_s16 + $0x30] sm:$0xff] %v245_v6   ;;  %v305_v21 = vld [vmem:[%s10586_s12 + $0x128] sm:$0xff]   ;;  %v309_v22 = vld [vmem:[%s10586_s12 + $0x130] sm:$0xff]   ;;  %v313_v23 = vld [vmem:[%s10586_s12 + $0x138] sm:$0xff]  }
  0x3c   : > { %250 = vst [vmem:[%s10591_s16 + $0x38] sm:$0xff] %v249_v7   ;;  %v317_v24 = vld [vmem:[%s10586_s12 + $0x140] sm:$0xff]   ;;  %v321_v25 = vld [vmem:[%s10586_s12 + $0x148] sm:$0xff]   ;;  %v325_v26 = vld [vmem:[%s10586_s12 + $0x150] sm:$0xff]  }
  0x3d   : > { %254 = vst [vmem:[%s10591_s16 + $0x40] sm:$0xff] %v253_v8   ;;  %v329_v27 = vld [vmem:[%s10586_s12 + $0x158] sm:$0xff]   ;;  %v333_v28 = vld [vmem:[%s10586_s12 + $0x160] sm:$0xff]   ;;  %v337_v29 = vld [vmem:[%s10586_s12 + $0x168] sm:$0xff]  }
  0x3e   : > { %258 = vst [vmem:[%s10591_s16 + $0x48] sm:$0xff] %v257_v9   ;;  %v341_v30 = vld [vmem:[%s10586_s12 + $0x170] sm:$0xff]   ;;  %v345_v31 = vld [vmem:[%s10586_s12 + $0x178] sm:$0xff]  }
  0x3f   : > { %262 = vst [vmem:[%s10591_s16 + $0x50] sm:$0xff] %v261_v10  }
  0x40   : > { %266 = vst [vmem:[%s10591_s16 + $0x58] sm:$0xff] %v265_v11  }
  0x41   : > { %270 = vst [vmem:[%s10591_s16 + $0x60] sm:$0xff] %v269_v12  }
  0x42   : > { %274 = vst [vmem:[%s10591_s16 + $0x68] sm:$0xff] %v273_v13  }
  0x43   : > { %278 = vst [vmem:[%s10591_s16 + $0x70] sm:$0xff] %v277_v14  }
  0x44   : > { %282 = vst [vmem:[%s10591_s16 + $0x78] sm:$0xff] %v281_v15  }
  0x45   : > { %286 = vst [vmem:[%s10591_s16 + $0x80] sm:$0xff] %v285_v16  }
  0x46   : > { %290 = vst [vmem:[%s10591_s16 + $0x88] sm:$0xff] %v289_v17  }
  0x47   : > { %294 = vst [vmem:[%s10591_s16 + $0x90] sm:$0xff] %v293_v18  }
  0x48   : > { %298 = vst [vmem:[%s10591_s16 + $0x98] sm:$0xff] %v297_v19  }
  0x49   : > { %302 = vst [vmem:[%s10591_s16 + $0xa0] sm:$0xff] %v301_v20  }
  0x4a   : > { %306 = vst [vmem:[%s10591_s16 + $0xa8] sm:$0xff] %v305_v21  }
  0x4b   : > { %310 = vst [vmem:[%s10591_s16 + $0xb0] sm:$0xff] %v309_v22  }
  0x4c   : > { %314 = vst [vmem:[%s10591_s16 + $0xb8] sm:$0xff] %v313_v23  }
  0x4d   : > { %318 = vst [vmem:[%s10591_s16 + $0xc0] sm:$0xff] %v317_v24  }
  0x4e   : > { %322 = vst [vmem:[%s10591_s16 + $0xc8] sm:$0xff] %v321_v25  }
  0x4f   : > { %326 = vst [vmem:[%s10591_s16 + $0xd0] sm:$0xff] %v325_v26  }
  0x50   : > { %330 = vst [vmem:[%s10591_s16 + $0xd8] sm:$0xff] %v329_v27  }
  0x51   : > { %334 = vst [vmem:[%s10591_s16 + $0xe0] sm:$0xff] %v333_v28  }
  0x52   : > { %338 = vst [vmem:[%s10591_s16 + $0xe8] sm:$0xff] %v337_v29  }
  0x53   : > { %342 = vst [vmem:[%s10591_s16 + $0xf0] sm:$0xff] %v341_v30  }
  0x54   : > { %346 = vst [vmem:[%s10591_s16 + $0xf8] sm:$0xff] %v345_v31  }
  0x55 PF: > { %p8523_p12 = scmp.ge.s32.totalorder %s10435_s9, 1  ;;  %p537_p13 = scmp.lt.s32.totalorder %s10435_s9, 13 }
  0x57   : > { %p538_p0 = pnand %p8523_p12, %p537_p13 }
  0x58   : > { %s544_s14 = sand.u32 (!%p538_p0), 1, %s10403_s28   ;;  %s591_s15 = sand.u32 (!%p538_p0), 1, %s10395_s26  }
  0x59   : > { %541 = sbr.rel (%p538_p0) target bundleno = 3631 (0xe2f), region = 69  ;;  %s8524_s17 = sshll.u32 (!%p538_p0), %s544_s14, 8 }
  0x5a   : > { %s8525_s5 = sshll.u32 (!%p538_p0), %s591_s15, 8  ;;  %s596_s19 = sld [smem:[#allocation7 + %s10411_s29]] (!%p538_p0) }
  0x5b   : > { %p598_p1 = scmp.lt.s32.totalorder (!%p538_p0), %s10419_s30, 1  ;;  %p600_p2 = scmp.lt.s32.totalorder (!%p538_p0), %s10415_s1, 1 }
  0x5c   : > { %s612_s20 = sld [smem:[#allocation7 + %s10411_s29]] (!%p538_p0) }
  0x5d   : > { %s10665_s21 = sld [smem:[#allocation6 + %s10411_s29]] (!%p538_p0) }
  0x5e   : > { %s599_s11 = scalar_select %p598_p1, %s10419_s30, 1 }
  0x5f   : > { %s601_s18 = scalar_select %p600_p2, %s10415_s1, 1 }
  0x60   : > { %s10668_s22 = sld [smem:[#allocation7 + %s10411_s29]]  ;;  %s8526_s24 = sshll.u32 %s596_s19, 5 }
  0x61   : > { %s8528_s25 = sshll.u32 %s599_s11, 7  ;;  %p602_p3 = scmp.lt.s32.totalorder %s8526_s24, 63 }
  0x62   : > { %s8530_s12 = sshll.u32 %s612_s20, 5  ;;  %s8527_s16 = sshll.u32 %s601_s18, 6 }
  0x63   : > { %p618_p4 = scmp.lt.s32.totalorder %s8530_s12, 63  ;;  %s17100_s24 = smov (!%p602_p3, %s8526_s24), 63 }
  0x64   : > { %s605_s26 = sadd.s32 %s8527_s16, %s17100_s24  ;;  %s16054_s11 = sld [smem:[#allocation272_spill]] }
  0x65   : > { %s17102_s12 = smov (!%p618_p4, %s8530_s12), 63  ;;  %s607_s28 = sadd.s32 %s8528_s25, %s605_s26 }
  0x66   : > { %s621_s14 = sadd.s32 %s8527_s16, %s17102_s12  ;;  %s8529_s15 = sshll.u32 %s607_s28, 2 }
  0x67   : > { %s623_s2 = sadd.s32 %s8528_s25, %s621_s14  ;;  %s10673_s7 = scalar_lea.vmem %s15615_s3, %s8529_s15 }
  0x68   : > { %s8533_s6 = sshll.u32 %s623_s2, 2  ;;  %s10680_s20 = scalar_lea.vmem [#allocation8], %s8524_s17 }
  0x69   : > { %s10682_s18 = scalar_lea.vmem [#allocation9], %s8525_s5  ;;  %p8534_p5 = scmp.ne.s32.totalorder %s10668_s22, 0 }
  0x6a   : > { %s10678_s0 = scalar_lea.vmem %s16054_s11, %s8533_s6 }
  0x6b   : > { %636 = sbr.rel (%p8534_p5) target bundleno = 305 (0x131), region = 77 }
  0x70   : > { %v10439_v32 = vmov -inf   ;;  %v10440_v33 = vmov 0.0  }
  0x71   : > { %637 = vst [vmem:[#allocation2 + $0xb0] sm:$0xff] %v10439_v32 }
  0x72   : > { %638 = vst [vmem:[#allocation2 + $0x1b0] sm:$0xff] %v10439_v32 }
  0x73   : > { %639 = vst [vmem:[#allocation2 + $0xd8] sm:$0xff] %v10439_v32 }
  0x74   : > { %640 = vst [vmem:[#allocation2 + $0x18] sm:$0xff] %v10439_v32 }
  0x75   : > { %641 = vst [vmem:[#allocation2 + $0x50] sm:$0xff] %v10439_v32 }
  0x76   : > { %642 = vst [vmem:[#allocation2 + $0x168] sm:$0xff] %v10439_v32 }
  0x77   : > { %643 = vst [vmem:[#allocation2 + $0x130] sm:$0xff] %v10439_v32 }
  0x78   : > { %644 = vst [vmem:[#allocation2 + $0x48] sm:$0xff] %v10439_v32 }
  0x79   : > { %645 = vst [vmem:[#allocation2 + $0x180] sm:$0xff] %v10439_v32 }
  0x7a   : > { %646 = vst [vmem:[#allocation2 + $0x110] sm:$0xff] %v10439_v32 }
  0x7b   : > { %647 = vst [vmem:[#allocation2 + $0x118] sm:$0xff] %v10439_v32 }
  0x7c   : > { %648 = vst [vmem:[#allocation2 + $0x98] sm:$0xff] %v10439_v32 }
  0x7d   : > { %649 = vst [vmem:[#allocation2 + $0x120] sm:$0xff] %v10439_v32 }
  0x7e   : > { %650 = vst [vmem:[#allocation2 + $0x150] sm:$0xff] %v10439_v32 }
  0x7f   : > { %651 = vst [vmem:[#allocation2 + $0x108] sm:$0xff] %v10439_v32 }
  0x80   : > { %652 = vst [vmem:[#allocation2 + $0x60] sm:$0xff] %v10439_v32 }
  0x81   : > { %653 = vst [vmem:[#allocation2 + $0xe0] sm:$0xff] %v10439_v32 }
  0x82   : > { %654 = vst [vmem:[#allocation2 + $0x188] sm:$0xff] %v10439_v32 }
  0x83   : > { %655 = vst [vmem:[#allocation2 + $0x138] sm:$0xff] %v10439_v32 }
  0x84   : > { %656 = vst [vmem:[#allocation2 + $0x140] sm:$0xff] %v10439_v32 }
  0x85   : > { %657 = vst [vmem:[#allocation2 + $0x80] sm:$0xff] %v10439_v32 }
  0x86   : > { %658 = vst [vmem:[#allocation2 + $0x1a8] sm:$0xff] %v10439_v32 }
  0x87   : > { %659 = vst [vmem:[#allocation2 + $0x1b8] sm:$0xff] %v10439_v32 }
  0x88   : > { %660 = vst [vmem:[#allocation2 + $0x28] sm:$0xff] %v10439_v32 }
  0x89   : > { %661 = vst [vmem:[#allocation2 + $0x1e8] sm:$0xff] %v10439_v32 }
  0x8a   : > { %662 = vst [vmem:[#allocation2 + $0xf8] sm:$0xff] %v10439_v32 }
  0x8b   : > { %663 = vst [vmem:[#allocation2 + $0x160] sm:$0xff] %v10439_v32 }
  0x8c   : > { %664 = vst [vmem:[#allocation2 + $0x30] sm:$0xff] %v10439_v32 }
  0x8d   : > { %665 = vst [vmem:[#allocation2 + $0x1e0] sm:$0xff] %v10439_v32 }
  0x8e   : > { %666 = vst [vmem:[#allocation2] sm:$0xff] %v10439_v32 }
  0x8f   : > { %667 = vst [vmem:[#allocation2 + $0xf0] sm:$0xff] %v10439_v32 }
  0x90   : > { %668 = vst [vmem:[#allocation2 + $0x8] sm:$0xff] %v10439_v32 }
  0x91   : > { %669 = vst [vmem:[#allocation2 + $0x148] sm:$0xff] %v10439_v32 }
  0x92   : > { %670 = vst [vmem:[#allocation2 + $0x1d0] sm:$0xff] %v10439_v32 }
  0x93   : > { %671 = vst [vmem:[#allocation2 + $0x100] sm:$0xff] %v10439_v32 }
  0x94   : > { %672 = vst [vmem:[#allocation2 + $0xc8] sm:$0xff] %v10439_v32 }
  0x95   : > { %673 = vst [vmem:[#allocation2 + $0x40] sm:$0xff] %v10439_v32 }
  0x96   : > { %674 = vst [vmem:[#allocation2 + $0x1f8] sm:$0xff] %v10439_v32 }
  0x97   : > { %675 = vst [vmem:[#allocation2 + $0x20] sm:$0xff] %v10439_v32 }
  0x98   : > { %676 = vst [vmem:[#allocation2 + $0x128] sm:$0xff] %v10439_v32 }
  0x99   : > { %677 = vst [vmem:[#allocation2 + $0x1a0] sm:$0xff] %v10439_v32 }
  0x9a   : > { %678 = vst [vmem:[#allocation2 + $0x1f0] sm:$0xff] %v10439_v32 }
  0x9b   : > { %679 = vst [vmem:[#allocation2 + $0xe8] sm:$0xff] %v10439_v32 }
  0x9c   : > { %680 = vst [vmem:[#allocation2 + $0x78] sm:$0xff] %v10439_v32 }
  0x9d   : > { %681 = vst [vmem:[#allocation2 + $0x70] sm:$0xff] %v10439_v32 }
  0x9e   : > { %682 = vst [vmem:[#allocation2 + $0x90] sm:$0xff] %v10439_v32 }
  0x9f   : > { %683 = vst [vmem:[#allocation2 + $0x1d8] sm:$0xff] %v10439_v32 }
  0xa0   : > { %684 = vst [vmem:[#allocation2 + $0xd0] sm:$0xff] %v10439_v32 }
  0xa1   : > { %685 = vst [vmem:[#allocation2 + $0xb8] sm:$0xff] %v10439_v32 }
  0xa2   : > { %686 = vst [vmem:[#allocation2 + $0x88] sm:$0xff] %v10439_v32 }
  0xa3   : > { %687 = vst [vmem:[#allocation2 + $0xa8] sm:$0xff] %v10439_v32 }
  0xa4   : > { %688 = vst [vmem:[#allocation2 + $0x1c8] sm:$0xff] %v10439_v32 }
  0xa5   : > { %689 = vst [vmem:[#allocation2 + $0x170] sm:$0xff] %v10439_v32 }
  0xa6   : > { %690 = vst [vmem:[#allocation2 + $0x178] sm:$0xff] %v10439_v32 }
  0xa7   : > { %691 = vst [vmem:[#allocation2 + $0x68] sm:$0xff] %v10439_v32 }
  0xa8   : > { %692 = vst [vmem:[#allocation2 + $0x190] sm:$0xff] %v10439_v32 }
  0xa9   : > { %693 = vst [vmem:[#allocation2 + $0x198] sm:$0xff] %v10439_v32 }
  0xaa   : > { %694 = vst [vmem:[#allocation2 + $0x38] sm:$0xff] %v10439_v32 }
  0xab   : > { %695 = vst [vmem:[#allocation2 + $0xc0] sm:$0xff] %v10439_v32 }
  0xac   : > { %696 = vst [vmem:[#allocation2 + $0x1c0] sm:$0xff] %v10439_v32 }
  0xad   : > { %697 = vst [vmem:[#allocation2 + $0x158] sm:$0xff] %v10439_v32 }
  0xae   : > { %698 = vst [vmem:[#allocation2 + $0x10] sm:$0xff] %v10439_v32 }
  0xaf   : > { %699 = vst [vmem:[#allocation2 + $0x58] sm:$0xff] %v10439_v32 }
  0xb0   : > { %700 = vst [vmem:[#allocation2 + $0xa0] sm:$0xff] %v10439_v32 }
  0xb1   : > { %701 = vst [vmem:[#allocation3 + $0x68] sm:$0xff] %v10440_v33 }
  0xb2   : > { %702 = vst [vmem:[#allocation3 + $0x150] sm:$0xff] %v10440_v33 }
  0xb3   : > { %703 = vst [vmem:[#allocation3 + $0x70] sm:$0xff] %v10440_v33 }
  0xb4   : > { %704 = vst [vmem:[#allocation3 + $0x160] sm:$0xff] %v10440_v33 }
  0xb5   : > { %705 = vst [vmem:[#allocation3 + $0xd0] sm:$0xff] %v10440_v33 }
  0xb6   : > { %706 = vst [vmem:[#allocation3 + $0xd8] sm:$0xff] %v10440_v33 }
  0xb7   : > { %707 = vst [vmem:[#allocation3 + $0x1e0] sm:$0xff] %v10440_v33 }
  0xb8   : > { %708 = vst [vmem:[#allocation3 + $0x30] sm:$0xff] %v10440_v33 }
  0xb9   : > { %709 = vst [vmem:[#allocation3 + $0x148] sm:$0xff] %v10440_v33 }
  0xba   : > { %710 = vst [vmem:[#allocation3 + $0x50] sm:$0xff] %v10440_v33 }
  0xbb   : > { %711 = vst [vmem:[#allocation3 + $0x1f0] sm:$0xff] %v10440_v33 }
  0xbc   : > { %712 = vst [vmem:[#allocation3 + $0x130] sm:$0xff] %v10440_v33 }
  0xbd   : > { %713 = vst [vmem:[#allocation3 + $0x190] sm:$0xff] %v10440_v33 }
  0xbe   : > { %714 = vst [vmem:[#allocation3 + $0x8] sm:$0xff] %v10440_v33 }
  0xbf   : > { %715 = vst [vmem:[#allocation3 + $0x88] sm:$0xff] %v10440_v33 }
  0xc0   : > { %716 = vst [vmem:[#allocation3 + $0x38] sm:$0xff] %v10440_v33 }
  0xc1   : > { %717 = vst [vmem:[#allocation3 + $0xe0] sm:$0xff] %v10440_v33 }
  0xc2   : > { %718 = vst [vmem:[#allocation3 + $0x10] sm:$0xff] %v10440_v33 }
  0xc3   : > { %719 = vst [vmem:[#allocation3 + $0x1a8] sm:$0xff] %v10440_v33 }
  0xc4   : > { %720 = vst [vmem:[#allocation3 + $0xa0] sm:$0xff] %v10440_v33 }
  0xc5   : > { %721 = vst [vmem:[#allocation3 + $0x1c0] sm:$0xff] %v10440_v33 }
  0xc6   : > { %722 = vst [vmem:[#allocation3 + $0x78] sm:$0xff] %v10440_v33 }
  0xc7   : > { %723 = vst [vmem:[#allocation3 + $0x108] sm:$0xff] %v10440_v33 }
  0xc8   : > { %724 = vst [vmem:[#allocation3 + $0x80] sm:$0xff] %v10440_v33 }
  0xc9   : > { %725 = vst [vmem:[#allocation3 + $0x58] sm:$0xff] %v10440_v33 }
  0xca   : > { %726 = vst [vmem:[#allocation3 + $0x48] sm:$0xff] %v10440_v33 }
  0xcb   : > { %727 = vst [vmem:[#allocation3 + $0x40] sm:$0xff] %v10440_v33 }
  0xcc   : > { %728 = vst [vmem:[#allocation3 + $0x1a0] sm:$0xff] %v10440_v33 }
  0xcd   : > { %729 = vst [vmem:[#allocation3 + $0x198] sm:$0xff] %v10440_v33 }
  0xce   : > { %730 = vst [vmem:[#allocation3 + $0xe8] sm:$0xff] %v10440_v33 }
  0xcf   : > { %731 = vst [vmem:[#allocation3 + $0x168] sm:$0xff] %v10440_v33 }
  0xd0   : > { %732 = vst [vmem:[#allocation3 + $0x158] sm:$0xff] %v10440_v33 }
  0xd1   : > { %733 = vst [vmem:[#allocation3 + $0x1d8] sm:$0xff] %v10440_v33 }
  0xd2   : > { %734 = vst [vmem:[#allocation3 + $0x28] sm:$0xff] %v10440_v33 }
  0xd3   : > { %735 = vst [vmem:[#allocation3] sm:$0xff] %v10440_v33 }
  0xd4   : > { %736 = vst [vmem:[#allocation3 + $0x1c8] sm:$0xff] %v10440_v33 }
  0xd5   : > { %737 = vst [vmem:[#allocation3 + $0x1e8] sm:$0xff] %v10440_v33 }
  0xd6   : > { %738 = vst [vmem:[#allocation3 + $0x140] sm:$0xff] %v10440_v33 }
  0xd7   : > { %739 = vst [vmem:[#allocation3 + $0x60] sm:$0xff] %v10440_v33 }
  0xd8   : > { %740 = vst [vmem:[#allocation3 + $0x98] sm:$0xff] %v10440_v33 }
  0xd9   : > { %741 = vst [vmem:[#allocation3 + $0x1b8] sm:$0xff] %v10440_v33 }
  0xda   : > { %742 = vst [vmem:[#allocation3 + $0x100] sm:$0xff] %v10440_v33 }
  0xdb   : > { %743 = vst [vmem:[#allocation3 + $0xc8] sm:$0xff] %v10440_v33 }
  0xdc   : > { %744 = vst [vmem:[#allocation3 + $0xf8] sm:$0xff] %v10440_v33 }
  0xdd   : > { %745 = vst [vmem:[#allocation3 + $0x178] sm:$0xff] %v10440_v33 }
  0xde   : > { %746 = vst [vmem:[#allocation3 + $0x180] sm:$0xff] %v10440_v33 }
  0xdf   : > { %747 = vst [vmem:[#allocation3 + $0xb0] sm:$0xff] %v10440_v33 }
  0xe0   : > { %748 = vst [vmem:[#allocation3 + $0x110] sm:$0xff] %v10440_v33 }
  0xe1   : > { %749 = vst [vmem:[#allocation3 + $0x20] sm:$0xff] %v10440_v33 }
  0xe2   : > { %750 = vst [vmem:[#allocation3 + $0xb8] sm:$0xff] %v10440_v33 }
  0xe3   : > { %751 = vst [vmem:[#allocation3 + $0x120] sm:$0xff] %v10440_v33 }
  0xe4   : > { %752 = vst [vmem:[#allocation3 + $0x90] sm:$0xff] %v10440_v33 }
  0xe5   : > { %753 = vst [vmem:[#allocation3 + $0xa8] sm:$0xff] %v10440_v33 }
  0xe6   : > { %754 = vst [vmem:[#allocation3 + $0xc0] sm:$0xff] %v10440_v33 }
  0xe7   : > { %755 = vst [vmem:[#allocation3 + $0x138] sm:$0xff] %v10440_v33 }
  0xe8   : > { %756 = vst [vmem:[#allocation3 + $0x188] sm:$0xff] %v10440_v33 }
  0xe9   : > { %757 = vst [vmem:[#allocation3 + $0x1b0] sm:$0xff] %v10440_v33 }
  0xea   : > { %758 = vst [vmem:[#allocation3 + $0x18] sm:$0xff] %v10440_v33 }
  0xeb   : > { %759 = vst [vmem:[#allocation3 + $0xf0] sm:$0xff] %v10440_v33 }
  0xec   : > { %760 = vst [vmem:[#allocation3 + $0x128] sm:$0xff] %v10440_v33 }
  0xed   : > { %761 = vst [vmem:[#allocation3 + $0x1f8] sm:$0xff] %v10440_v33 }
  0xee   : > { %762 = vst [vmem:[#allocation3 + $0x170] sm:$0xff] %v10440_v33 }
  0xef   : > { %763 = vst [vmem:[#allocation3 + $0x1d0] sm:$0xff] %v10440_v33 }
  0xf0   : > { %764 = vst [vmem:[#allocation3 + $0x118] sm:$0xff] %v10440_v33 }
  0xf1   : > { %765 = vst [vmem:[#allocation4 + $0xc0] sm:$0xff] %v10440_v33 }
  0xf2   : > { %766 = vst [vmem:[#allocation4 + $0x138] sm:$0xff] %v10440_v33 }
  0xf3   : > { %767 = vst [vmem:[#allocation4] sm:$0xff] %v10440_v33 }
  0xf4   : > { %768 = vst [vmem:[#allocation4 + $0xc8] sm:$0xff] %v10440_v33 }
  0xf5   : > { %769 = vst [vmem:[#allocation4 + $0x1d0] sm:$0xff] %v10440_v33 }
  0xf6   : > { %770 = vst [vmem:[#allocation4 + $0x160] sm:$0xff] %v10440_v33 }
  0xf7   : > { %771 = vst [vmem:[#allocation4 + $0x1f0] sm:$0xff] %v10440_v33 }
  0xf8   : > { %772 = vst [vmem:[#allocation4 + $0xe8] sm:$0xff] %v10440_v33 }
  0xf9   : > { %773 = vst [vmem:[#allocation4 + $0x100] sm:$0xff] %v10440_v33 }
  0xfa   : > { %774 = vst [vmem:[#allocation4 + $0xd0] sm:$0xff] %v10440_v33 }
  0xfb   : > { %775 = vst [vmem:[#allocation4 + $0x70] sm:$0xff] %v10440_v33 }
  0xfc   : > { %776 = vst [vmem:[#allocation4 + $0x168] sm:$0xff] %v10440_v33 }
  0xfd   : > { %777 = vst [vmem:[#allocation4 + $0x158] sm:$0xff] %v10440_v33 }
  0xfe   : > { %778 = vst [vmem:[#allocation4 + $0x190] sm:$0xff] %v10440_v33 }
  0xff   : > { %779 = vst [vmem:[#allocation4 + $0x88] sm:$0xff] %v10440_v33 }
 0x100   : > { %780 = vst [vmem:[#allocation4 + $0x60] sm:$0xff] %v10440_v33 }
 0x101   : > { %781 = vst [vmem:[#allocation4 + $0x68] sm:$0xff] %v10440_v33 }
 0x102   : > { %782 = vst [vmem:[#allocation4 + $0xd8] sm:$0xff] %v10440_v33 }
 0x103   : > { %783 = vst [vmem:[#allocation4 + $0xf0] sm:$0xff] %v10440_v33 }
 0x104   : > { %784 = vst [vmem:[#allocation4 + $0x80] sm:$0xff] %v10440_v33 }
 0x105   : > { %785 = vst [vmem:[#allocation4 + $0x78] sm:$0xff] %v10440_v33 }
 0x106   : > { %786 = vst [vmem:[#allocation4 + $0x180] sm:$0xff] %v10440_v33 }
 0x107   : > { %787 = vst [vmem:[#allocation4 + $0x18] sm:$0xff] %v10440_v33 }
 0x108   : > { %788 = vst [vmem:[#allocation4 + $0x148] sm:$0xff] %v10440_v33 }
 0x109   : > { %789 = vst [vmem:[#allocation4 + $0x1c8] sm:$0xff] %v10440_v33 }
 0x10a   : > { %790 = vst [vmem:[#allocation4 + $0x188] sm:$0xff] %v10440_v33 }
 0x10b   : > { %791 = vst [vmem:[#allocation4 + $0x150] sm:$0xff] %v10440_v33 }
 0x10c   : > { %792 = vst [vmem:[#allocation4 + $0xa8] sm:$0xff] %v10440_v33 }
 0x10d   : > { %793 = vst [vmem:[#allocation4 + $0x108] sm:$0xff] %v10440_v33 }
 0x10e   : > { %794 = vst [vmem:[#allocation4 + $0x50] sm:$0xff] %v10440_v33 }
 0x10f   : > { %795 = vst [vmem:[#allocation4 + $0xb8] sm:$0xff] %v10440_v33 }
 0x110   : > { %796 = vst [vmem:[#allocation4 + $0x28] sm:$0xff] %v10440_v33 }
 0x111   : > { %797 = vst [vmem:[#allocation4 + $0x38] sm:$0xff] %v10440_v33 }
 0x112   : > { %798 = vst [vmem:[#allocation4 + $0x40] sm:$0xff] %v10440_v33 }
 0x113   : > { %799 = vst [vmem:[#allocation4 + $0x98] sm:$0xff] %v10440_v33 }
 0x114   : > { %800 = vst [vmem:[#allocation4 + $0x90] sm:$0xff] %v10440_v33 }
 0x115   : > { %801 = vst [vmem:[#allocation4 + $0x30] sm:$0xff] %v10440_v33 }
 0x116   : > { %802 = vst [vmem:[#allocation4 + $0x140] sm:$0xff] %v10440_v33 }
 0x117   : > { %803 = vst [vmem:[#allocation4 + $0x1d8] sm:$0xff] %v10440_v33 }
 0x118   : > { %804 = vst [vmem:[#allocation4 + $0x1e8] sm:$0xff] %v10440_v33 }
 0x119   : > { %805 = vst [vmem:[#allocation4 + $0x1a8] sm:$0xff] %v10440_v33 }
 0x11a   : > { %806 = vst [vmem:[#allocation4 + $0x1e0] sm:$0xff] %v10440_v33 }
 0x11b   : > { %807 = vst [vmem:[#allocation4 + $0x1b0] sm:$0xff] %v10440_v33 }
 0x11c   : > { %808 = vst [vmem:[#allocation4 + $0x1b8] sm:$0xff] %v10440_v33 }
 0x11d   : > { %809 = vst [vmem:[#allocation4 + $0x110] sm:$0xff] %v10440_v33 }
 0x11e   : > { %810 = vst [vmem:[#allocation4 + $0xa0] sm:$0xff] %v10440_v33 }
 0x11f   : > { %811 = vst [vmem:[#allocation4 + $0x118] sm:$0xff] %v10440_v33 }
 0x120   : > { %812 = vst [vmem:[#allocation4 + $0x198] sm:$0xff] %v10440_v33 }
 0x121   : > { %813 = vst [vmem:[#allocation4 + $0x178] sm:$0xff] %v10440_v33 }
 0x122   : > { %814 = vst [vmem:[#allocation4 + $0x58] sm:$0xff] %v10440_v33 }
 0x123   : > { %815 = vst [vmem:[#allocation4 + $0x8] sm:$0xff] %v10440_v33 }
 0x124   : > { %816 = vst [vmem:[#allocation4 + $0x1c0] sm:$0xff] %v10440_v33 }
 0x125   : > { %817 = vst [vmem:[#allocation4 + $0x1f8] sm:$0xff] %v10440_v33 }
 0x126   : > { %818 = vst [vmem:[#allocation4 + $0x130] sm:$0xff] %v10440_v33 }
 0x127   : > { %819 = vst [vmem:[#allocation4 + $0x120] sm:$0xff] %v10440_v33 }
 0x128   : > { %820 = vst [vmem:[#allocation4 + $0x10] sm:$0xff] %v10440_v33 }
 0x129   : > { %821 = vst [vmem:[#allocation4 + $0x170] sm:$0xff] %v10440_v33 }
 0x12a   : > { %822 = vst [vmem:[#allocation4 + $0x20] sm:$0xff] %v10440_v33 }
 0x12b   : > { %823 = vst [vmem:[#allocation4 + $0xf8] sm:$0xff] %v10440_v33 }
 0x12c   : > { %824 = vst [vmem:[#allocation4 + $0xe0] sm:$0xff] %v10440_v33 }
 0x12d   : > { %825 = vst [vmem:[#allocation4 + $0x1a0] sm:$0xff] %v10440_v33 }
 0x12e   : > { %826 = vst [vmem:[#allocation4 + $0xb0] sm:$0xff] %v10440_v33 }
 0x12f   : > { %827 = vst [vmem:[#allocation4 + $0x48] sm:$0xff] %v10440_v33 }
 0x130   : > { %828 = vst [vmem:[#allocation4 + $0x128] sm:$0xff] %v10440_v33 }
 0x131 PF: > { %p8535_p6 = scmp.ge.s32.totalorder %s10668_s22, %s10665_s21 }
 0x133   : > { %832 = sbr.rel (%p8535_p6) target bundleno = 1920 (0x780), region = 81 }
 0x138   : > { %v9096_v34 = vld [vmem:[%s10673_s7 + $0x38] sm:$0xff]  ;;  %v9095_v36 = vld [vmem:[%s10673_s7 + $0x30] sm:$0xff]  ;;  %v9094_v38 = vld [vmem:[%s10673_s7 + $0x28] sm:$0xff] }
 0x139   : > { %v9104_v35 = vld [vmem:[%s10673_s7 + $0x78] sm:$0xff]  ;;  %1249 = vmatpush.bf16.xpose.msra.mxu0 %v9096_v34  ;;  %v9103_v37 = vld [vmem:[%s10673_s7 + $0x70] sm:$0xff]  ;;  %v9102_v39 = vld [vmem:[%s10673_s7 + $0x68] sm:$0xff] }
 0x13a   : > { %1418 = vmatpush.bf16.xpose.msra.mxu1 %v9104_v35  ;;  %v9093_v40 = vld [vmem:[%s10673_s7 + $0x20] sm:$0xff]  ;;  %v9092_v42 = vld [vmem:[%s10673_s7 + $0x18] sm:$0xff]  ;;  %v9091_v44 = vld [vmem:[%s10673_s7 + $0x10] sm:$0xff] }
 0x13b   : > { %v9101_v41 = vld [vmem:[%s10673_s7 + $0x60] sm:$0xff]  ;;  %v9100_v43 = vld [vmem:[%s10673_s7 + $0x58] sm:$0xff]  ;;  %v9099_v45 = vld [vmem:[%s10673_s7 + $0x50] sm:$0xff] }
 0x13c   : > { %v9090_v46 = vld [vmem:[%s10673_s7 + $0x8] sm:$0xff]  ;;  %v9089_v48 = vld [vmem:[%s10673_s7] sm:$0xff]  ;;  %v9059_v52 = vld [vmem:[%s10680_s20 + $0x10] sm:$0xff] }
 0x13d   : > { %v9098_v47 = vld [vmem:[%s10673_s7 + $0x48] sm:$0xff]  ;;  %v9097_v49 = vld [vmem:[%s10673_s7 + $0x40] sm:$0xff]  ;;  %v9060_v53 = vld [vmem:[%s10680_s20 + $0x18] sm:$0xff] }
 0x13e   : > { %v9057_v50 = vld [vmem:[%s10680_s20] sm:$0xff]  ;;  %v9058_v51 = vld [vmem:[%s10680_s20 + $0x8] sm:$0xff]  ;;  %v9063_v56 = vld [vmem:[%s10680_s20 + $0x30] sm:$0xff] }
 0x13f   : > { %v9061_v54 = vld [vmem:[%s10680_s20 + $0x20] sm:$0xff]  ;;  %v9062_v55 = vld [vmem:[%s10680_s20 + $0x28] sm:$0xff]  ;;  %v9064_v57 = vld [vmem:[%s10680_s20 + $0x38] sm:$0xff] }
 0x140   : > { %v9065_v58 = vld [vmem:[%s10680_s20 + $0x40] sm:$0xff]  ;;  %v9066_v1 = vld [vmem:[%s10680_s20 + $0x48] sm:$0xff]  ;;  %v9067_v8 = vld [vmem:[%s10680_s20 + $0x50] sm:$0xff] }
 0x141   : > { %1250 = vmatpush.bf16.xpose.msra.mxu0 %v9095_v36  ;;  %v9068_v21 = vld [vmem:[%s10680_s20 + $0x58] sm:$0xff]  ;;  %v9069_v28 = vld [vmem:[%s10680_s20 + $0x60] sm:$0xff]  ;;  %v9070_v35 = vld [vmem:[%s10680_s20 + $0x68] sm:$0xff] }
 0x142   : > { %1419 = vmatpush.bf16.xpose.msra.mxu1 %v9103_v37 }
 0x149   : > { %1251 = vmatpush.bf16.xpose.msra.mxu0 %v9094_v38 }
 0x14a   : > { %1420 = vmatpush.bf16.xpose.msra.mxu1 %v9102_v39 }
 0x151   : > { %1252 = vmatpush.bf16.xpose.msra.mxu0 %v9093_v40 }
 0x152   : > { %1421 = vmatpush.bf16.xpose.msra.mxu1 %v9101_v41 }
 0x159   : > { %1253 = vmatpush.bf16.xpose.msra.mxu0 %v9092_v42  ;;  %v10441_v42 = vmov 0  }
 0x15a   : > { %1422 = vmatpush.bf16.xpose.msra.mxu1 %v9100_v43  ;;  %9281 = vset.pattern.permute.xlu2 %v10441_v42  ;;  %v9071_v43 = vld [vmem:[%s10680_s20 + $0x70] sm:$0xff] }
 0x15b   : > { %9282 = vset.pattern.permute.xlu0 %v10441_v42  ;;  %9283 = vset.pattern.permute.xlu1 %v10441_v42 }
 0x161   : > { %1254 = vmatpush.bf16.xpose.msra.mxu0 %v9091_v44 }
 0x162   : > { %1423 = vmatpush.bf16.xpose.msra.mxu1 %v9099_v45 }
 0x169   : > { %1255 = vmatpush.bf16.xpose.msra.mxu0 %v9090_v46 }
 0x16a   : > { %1424 = vmatpush.bf16.xpose.msra.mxu1 %v9098_v47  ;;  %v11000_v47 = vld [vmem:[#allocation2 + $0xb0] sm:$0xff] }
 0x171   : > { %1256 = vmatpush.bf16.xpose.msra.mxu0 %v9089_v48 }
 0x172   : > { %1425 = vmatpush.bf16.xpose.msra.mxu1 %v9097_v49 }
 0x178   : > { %1257 = vmatmul.bf16.vlgmr.msra.gmra.mxu0 %v9057_v50 }
 0x179   : > { %1426 = vmatmul.bf16.vlgmr.msra.gmra.mxu1 %v9057_v50 }
 0x188   : > { %1262 = vmatmul.bf16.gmra.mxu0 %v9058_v51 }
 0x189   : > { %1431 = vmatmul.bf16.gmra.mxu1 %v9058_v51 }
 0x198   : > { %1267 = vmatmul.bf16.gmra.mxu0 %v9059_v52 }
 0x199   : > { %1436 = vmatmul.bf16.gmra.mxu1 %v9059_v52 }
 0x1a8   : > { %1272 = vmatmul.bf16.gmra.mxu0 %v9060_v53 }
 0x1a9   : > { %1441 = vmatmul.bf16.gmra.mxu1 %v9060_v53 }
 0x1b8   : > { %1277 = vmatmul.bf16.gmra.mxu0 %v9061_v54 }
 0x1b9   : > { %1446 = vmatmul.bf16.gmra.mxu1 %v9061_v54  ;;  %v11014_v54 = vld [vmem:[#allocation2 + $0x1b0] sm:$0xff] }
 0x1c8   : > { %1282 = vmatmul.bf16.gmra.mxu0 %v9062_v55 }
 0x1c9   : > { %1451 = vmatmul.bf16.gmra.mxu1 %v9062_v55 }
 0x1d8   : > { %1287 = vmatmul.bf16.gmra.mxu0 %v9063_v56 }
 0x1d9   : > { %1456 = vmatmul.bf16.gmra.mxu1 %v9063_v56 }
 0x1e8   : > { %1292 = vmatmul.bf16.gmra.mxu0 %v9064_v57 }
 0x1e9   : > { %1461 = vmatmul.bf16.gmra.mxu1 %v9064_v57 }
 0x1f5   : > { %v10904_v59 = vpop.f32.mrf.mxu0 }
 0x1f6   : > { %v10906_v60 = vpop.f32.mrf.mxu1 }
 0x1f7   : > { %v1715_v61 = vmax.f32 %v10904_v59, %v10906_v60 }
 0x1f8   : > { %1297 = vmatmul.bf16.gmra.mxu0 %v9065_v58 }
 0x1f9   : > { %1466 = vmatmul.bf16.gmra.mxu1 %v9065_v58  ;;  %1716 = vmax.xlane.f32.xlu0 %v1715_v61 }
 0x1fd   : > { %v10910_v62 = vpop.f32.mrf.mxu0 }
 0x1fe   : > { %v10912_v63 = vpop.f32.mrf.mxu1 }
 0x1ff   : > { %v1718_v0 = vmax.f32 %v10910_v62, %v10912_v63 }
 0x201   : > { %1719 = vmax.xlane.f32.xlu0 %v1718_v0  ;;  %v9073_v0 = vld [vmem:[%s10680_s20 + $0x80] sm:$0xff] }
 0x205   : > { %v10917_v2 = vpop.f32.mrf.mxu0 }
 0x206   : > { %v10919_v3 = vpop.f32.mrf.mxu1 }
 0x207   : > { %v1721_v4 = vmax.f32 %v10917_v2, %v10919_v3 }
 0x208   : > { %1302 = vmatmul.bf16.gmra.mxu0 %v9066_v1 }
 0x209   : > { %1722 = vmax.xlane.f32.xlu1 %v1721_v4  ;;  %1471 = vmatmul.bf16.gmra.mxu1 %v9066_v1  ;;  %v11028_v1 = vld [vmem:[#allocation2 + $0xd8] sm:$0xff] }
 0x20d   : > { %v10923_v5 = vpop.f32.mrf.mxu0 }
 0x20e   : > { %v10925_v6 = vpop.f32.mrf.mxu1 }
 0x20f   : > { %v1724_v7 = vmax.f32 %v10923_v5, %v10925_v6 }
 0x211   : > { %1725 = vmax.xlane.f32.xlu1 %v1724_v7 }
 0x215   : > { %v10930_v9 = vpop.f32.mrf.mxu0 }
 0x216   : > { %v10932_v10 = vpop.f32.mrf.mxu1 }
 0x217   : > { %v1727_v11 = vmax.f32 %v10930_v9, %v10932_v10 }
 0x218   : > { %1307 = vmatmul.bf16.gmra.mxu0 %v9067_v8 }
 0x219   : > { %1728 = vmax.xlane.f32.xlu2 %v1727_v11  ;;  %1476 = vmatmul.bf16.gmra.mxu1 %v9067_v8  ;;  %v11037_v11 = vld [vmem:[#allocation2 + $0x18] sm:$0xff] }
 0x21d   : > { %v10936_v12 = vpop.f32.mrf.mxu0 }
 0x21e   : > { %v10938_v13 = vpop.f32.mrf.mxu1 }
 0x21f   : > { %v1730_v14 = vmax.f32 %v10936_v12, %v10938_v13 }
 0x221   : > { %1731 = vmax.xlane.f32.xlu2 %v1730_v14 }
 0x225   : > { %v10942_v15 = vpop.f32.mrf.mxu0 }
 0x226   : > { %v10944_v16 = vpop.f32.mrf.mxu1 }
 0x227   : > { %v1733_v17 = vmax.f32 %v10942_v15, %v10944_v16 }
 0x228   : > { %1312 = vmatmul.bf16.gmra.mxu0 %v9068_v21 }
 0x229   : > { %1734 = vmax.xlane.f32.xlu0 %v1733_v17  ;;  %1481 = vmatmul.bf16.gmra.mxu1 %v9068_v21 }
 0x22d   : > { %v10948_v18 = vpop.f32.mrf.mxu0 }
 0x22e   : > { %v10950_v19 = vpop.f32.mrf.mxu1 }
 0x22f   : > { %v1736_v20 = vmax.f32 %v10948_v18, %v10950_v19 }
 0x231   : > { %1737 = vmax.xlane.f32.xlu1 %v1736_v20 }
 0x235   : > { %v10955_v22 = vpop.f32.mrf.mxu0 }
 0x236   : > { %v10957_v23 = vpop.f32.mrf.mxu1 }
 0x237   : > { %v1739_v24 = vmax.f32 %v10955_v22, %v10957_v23 }
 0x238   : > { %1317 = vmatmul.bf16.gmra.mxu0 %v9069_v28 }
 0x239   : > { %1740 = vmax.xlane.f32.xlu2 %v1739_v24  ;;  %1486 = vmatmul.bf16.gmra.mxu1 %v9069_v28 }
 0x23d   : > { %v10961_v25 = vpop.f32.mrf.mxu0 }
 0x23e   : > { %v10963_v26 = vpop.f32.mrf.mxu1 }
 0x23f   : > { %v1742_v27 = vmax.f32 %v10961_v25, %v10963_v26 }
 0x241   : > { %1743 = vmax.xlane.f32.xlu0 %v1742_v27  ;;  %v11050_v27 = vld [vmem:[#allocation2 + $0x50] sm:$0xff] }
 0x242   : > { %16068 = vst [vmem:[#allocation32_spill] sm:$0xff] %v11050_v27 }
 0x245   : > { %v10968_v29 = vpop.f32.mrf.mxu0 }
 0x246   : > { %v10970_v30 = vpop.f32.mrf.mxu1 }
 0x247   : > { %v1745_v31 = vmax.f32 %v10968_v29, %v10970_v30 }
 0x248   : > { %1322 = vmatmul.bf16.gmra.mxu0 %v9070_v35 }
 0x249   : > { %1746 = vmax.xlane.f32.xlu1 %v1745_v31  ;;  %1491 = vmatmul.bf16.gmra.mxu1 %v9070_v35 }
 0x24d   : > { %v10974_v32 = vpop.f32.mrf.mxu0 }
 0x24e   : > { %v10976_v33 = vpop.f32.mrf.mxu1 }
 0x24f   : > { %v1748_v34 = vmax.f32 %v10974_v32, %v10976_v33 }
 0x251   : > { %1749 = vmax.xlane.f32.xlu2 %v1748_v34 }
 0x255   : > { %v10981_v36 = vpop.f32.mrf.mxu0 }
 0x256   : > { %16055 = vst [vmem:[#allocation19_spill] sm:$0xff] %v10981_v36  ;;  %v10983_v37 = vpop.f32.mrf.mxu1 }
 0x257   : > { %16056 = vst [vmem:[#allocation20_spill] sm:$0xff] %v10983_v37  ;;  %v1751_v38 = vmax.f32 %v10981_v36, %v10983_v37  ;;  %v9074_v37 = vld [vmem:[%s10680_s20 + $0x88] sm:$0xff]  ;;  %v9105_v36 = vld [vmem:[%s10678_s0] sm:$0xff] }
 0x258   : > { %1327 = vmatmul.bf16.gmra.mxu0 %v9071_v43 }
 0x259   : > { %1752 = vmax.xlane.f32.xlu0 %v1751_v38  ;;  %1496 = vmatmul.bf16.gmra.mxu1 %v9071_v43  ;;  %v11061_v38 = vld [vmem:[#allocation2 + $0x168] sm:$0xff] }
 0x25a   : > { %16071 = vst [vmem:[#allocation35_spill] sm:$0xff] %v11061_v38 }
 0x25d   : > { %v10987_v39 = vpop.f32.mrf.mxu0 }
 0x25e   : > { %16057 = vst [vmem:[#allocation21_spill] sm:$0xff] %v10987_v39  ;;  %v10989_v40 = vpop.f32.mrf.mxu1 }
 0x25f   : > { %16058 = vst [vmem:[#allocation22_spill] sm:$0xff] %v10989_v40  ;;  %v1754_v41 = vmax.f32 %v10987_v39, %v10989_v40 }
 0x261   : > { %1755 = vmax.xlane.f32.xlu1 %v1754_v41 }
 0x265   : > { %v10994_v44 = vpop.f32.mrf.mxu0 }
 0x266   : > { %16059 = vst [vmem:[#allocation23_spill] sm:$0xff] %v10994_v44  ;;  %v10996_v45 = vpop.f32.mrf.mxu1 }
 0x267   : > { %16060 = vst [vmem:[#allocation24_spill] sm:$0xff] %v10996_v45  ;;  %v1757_v46 = vmax.f32 %v10994_v44, %v10996_v45 }
 0x269   : > { %1758 = vmax.xlane.f32.xlu2 %v1757_v46 }
 0x26c   : > { %v1717_v48 = vpop.xlane.xlu0 %1716 }
 0x26d   : > { %v11003_v49 = vmax.f32 %v11000_v47, %v1717_v48  ;;  %v11005_v50 = vpop.f32.mrf.mxu0  ;;  %v11071_v48 = vld [vmem:[#allocation2 + $0x130] sm:$0xff] }
 0x26e   : > { %16061 = vst [vmem:[#allocation25_spill] sm:$0xff] %v11005_v50  ;;  %v11007_v51 = vpop.f32.mrf.mxu1 }
 0x26f   : > { %16062 = vst [vmem:[#allocation26_spill] sm:$0xff] %v11007_v51  ;;  %v1760_v52 = vmax.f32 %v11005_v50, %v11007_v51 }
 0x270   : > { %3251 = vst [vmem:[#allocation2 + $0xb0] sm:$0xff] %v11003_v49 }
 0x271   : > { %1761 = vmax.xlane.f32.xlu0 %v1760_v52  ;;  %16074 = vst [vmem:[#allocation38_spill] sm:$0xff] %v11071_v48 }
 0x274   : > { %v1720_v55 = vpop.xlane.xlu0 %1719 }
 0x275   : > { %v11017_v56 = vmax.f32 %v11014_v54, %v1720_v55  ;;  %v11019_v57 = vpop.f32.mrf.mxu0  ;;  %v9072_v55 = vld [vmem:[%s10680_s20 + $0x78] sm:$0xff] }
 0x276   : > { %16063 = vst [vmem:[#allocation27_spill] sm:$0xff] %v11019_v57  ;;  %v11021_v58 = vpop.f32.mrf.mxu1  ;;  %1332 = vmatmul.bf16.gmra.mxu0 %v9072_v55  ;;  %1501 = vmatmul.bf16.gmra.mxu1 %v9072_v55 }
 0x277   : > { %16064 = vst [vmem:[#allocation28_spill] sm:$0xff] %v11021_v58  ;;  %v1763_v61 = vmax.f32 %v11019_v57, %v11021_v58 }
 0x278   : > { %3252 = vst [vmem:[#allocation2 + $0x1b0] sm:$0xff] %v11017_v56 }
 0x279   : > { %1764 = vmax.xlane.f32.xlu1 %v1763_v61 }
 0x27c   : > { %v1723_v4 = vpop.xlane.xlu1 %1722 }
 0x27d   : > { %v11031_v7 = vmax.f32 %v11028_v1, %v1723_v4  ;;  %v11046_v21 = vpop.f32.mrf.mxu0 }
 0x27e   : > { %16066 = vst [vmem:[#allocation30_spill] sm:$0xff] %v11046_v21  ;;  %v11048_v24 = vpop.f32.mrf.mxu1 }
 0x27f   : > { %3253 = vst [vmem:[#allocation2 + $0xd8] sm:$0xff] %v11031_v7  ;;  %v1766_v55 = vmax.f32 %v11046_v21, %v11048_v24  ;;  %v9117_v21 = vld [vmem:[%s10678_s0 + $0x60] sm:$0xff] }
 0x280   : > { %16067 = vst [vmem:[#allocation31_spill] sm:$0xff] %v11048_v24  ;;  %v9109_v24 = vld [vmem:[%s10678_s0 + $0x20] sm:$0xff] }
 0x281   : > { %2165 = vperm.xlu2 %9281, %v11003_v49  }
 0x284   : > { %v1726_v14 = vpop.xlane.xlu1 %1725 }
 0x285   : > { %v11040_v17 = vmax.f32 %v11037_v11, %v1726_v14  ;;  %2170 = vperm.xlu0 %9282, %v11017_v56   ;;  %v11058_v35 = vpop.f32.mrf.mxu0 }
 0x286   : > { %16070 = vst [vmem:[#allocation34_spill] sm:$0xff] %v11058_v35  ;;  %v11063_v41 = vpop.f32.mrf.mxu1  ;;  %1337 = vmatmul.bf16.gmra.mxu0 %v9073_v0  ;;  %1506 = vmatmul.bf16.gmra.mxu1 %v9073_v0 }
 0x287   : > { %16065 = vst [vmem:[#allocation29_spill] sm:$0xff] %v11040_v17  ;;  %v1769_v58 = vmax.f32 %v11058_v35, %v11063_v41 }
 0x288   : > { %3254 = vst [vmem:[#allocation2 + $0x18] sm:$0xff] %v11040_v17 }
 0x289   : > { %16072 = vst [vmem:[#allocation36_spill] sm:$0xff] %v11063_v41 }
 0x28c   : > { %v1729_v28 = vpop.xlane.xlu2 %1728 }
 0x28d   : > { %v11053_v31 = vmax.f32 %v11050_v27, %v1729_v28  ;;  %v11073_v52 = vpop.f32.mrf.mxu0  ;;  %v11098_v28 = vld [vmem:[#allocation2 + $0x180] sm:$0xff] }
 0x28e   : > { %16075 = vst [vmem:[#allocation39_spill] sm:$0xff] %v11073_v52  ;;  %v11076_v4 = vpop.f32.mrf.mxu1 }
 0x28f   : > { %16069 = vst [vmem:[#allocation33_spill] sm:$0xff] %v11053_v31  ;;  %v1772_v51 = vmax.f32 %v11073_v52, %v11076_v4  ;;  %v9111_v52 = vld [vmem:[%s10678_s0 + $0x30] sm:$0xff] }
 0x290   : > { %3255 = vst [vmem:[#allocation2 + $0x50] sm:$0xff] %v11053_v31 }
 0x291   : > { %16076 = vst [vmem:[#allocation40_spill] sm:$0xff] %v11076_v4  ;;  %v9120_v4 = vld [vmem:[%s10678_s0 + $0x78] sm:$0xff] }
 0x292   : > { %2175 = vperm.xlu1 %9283, %v11031_v7   ;;  %16080 = vst [vmem:[#allocation44_spill] sm:$0xff] %v11098_v28  ;;  %3644 = vmatpush.bf16.msra.mxu3 %v9120_v4  ;;  %v9110_v4 = vld [vmem:[%s10678_s0 + $0x28] sm:$0xff] }
 0x294   : > { %v1732_v42 = vpop.xlane.xlu2 %1731 }
 0x295   : > { %v11066_v43 = vmax.f32 %v11061_v38, %v1732_v42  ;;  %v11084_v42 = vld [vmem:[#allocation2 + $0x48] sm:$0xff]  ;;  %v11091_v8 = vpop.f32.mrf.mxu0 }
 0x296   : > { %16078 = vst [vmem:[#allocation42_spill] sm:$0xff] %v11084_v42  ;;  %v11089_v20 = vpop.f32.mrf.mxu1  ;;  %1342 = vmatmul.bf16.gmra.mxu0 %v9074_v37  ;;  %1511 = vmatmul.bf16.gmra.mxu1 %v9074_v37 }
 0x297   : > { %16073 = vst [vmem:[#allocation37_spill] sm:$0xff] %v11066_v43 }
 0x298   : > { %3256 = vst [vmem:[#allocation2 + $0x168] sm:$0xff] %v11066_v43 }
 0x29c   : > { %v1735_v61 = vpop.xlane.xlu0 %1734 }
 0x29d   : > { %v11079_v14 = vmax.f32 %v11071_v48, %v1735_v61  ;;  %v11109_v57 = vpop.f32.mrf.mxu0  ;;  %v11192_v48 = vld [vmem:[#allocation2 + $0x60] sm:$0xff] }
 0x29e   : > { %v11107_v61 = vpop.f32.mrf.mxu1  ;;  %16082 = vst [vmem:[#allocation46_spill] sm:$0xff] %v11109_v57 }
 0x29f   : > { %16077 = vst [vmem:[#allocation41_spill] sm:$0xff] %v11079_v14  ;;  %v1778_v45 = vmax.f32 %v11109_v57, %v11107_v61 }
 0x2a0   : > { %3257 = vst [vmem:[#allocation2 + $0x130] sm:$0xff] %v11079_v14 }
 0x2a1   : > { %16081 = vst [vmem:[#allocation45_spill] sm:$0xff] %v11107_v61 }
 0x2a2   : > { %16092 = vst [vmem:[#allocation56_spill] sm:$0xff] %v11192_v48 }
 0x2a4   : > { %v1738_v46 = vpop.xlane.xlu1 %1737 }
 0x2a5   : > { %v11087_v34 = vmax.f32 %v11084_v42, %v1738_v46 }
 0x2a6   : > { %v11130_v57 = vpop.f32.mrf.mxu1 }
 0x2a7   : > { %16079 = vst [vmem:[#allocation43_spill] sm:$0xff] %v11087_v34 }
 0x2a8   : > { %3258 = vst [vmem:[#allocation2 + $0x48] sm:$0xff] %v11087_v34 }
 0x2aa   : > { %1767 = vmax.xlane.f32.xlu2 %v1766_v55  ;;  %v11111_v55 = vld [vmem:[#allocation2 + $0x110] sm:$0xff] }
 0x2ab   : > { %16083 = vst [vmem:[#allocation47_spill] sm:$0xff] %v11111_v55 }
 0x2ac   : > { %v1741_v53 = vpop.xlane.xlu2 %1740 }
 0x2ad   : > { %v11102_v46 = vmax.f32 %v11098_v28, %v1741_v53  ;;  %v9119_v28 = vld [vmem:[%s10678_s0 + $0x70] sm:$0xff] }
 0x2ae   : > { %3645 = vmatpush.bf16.msra.mxu3 %v9119_v28  ;;  %v9108_v28 = vld [vmem:[%s10678_s0 + $0x18] sm:$0xff] }
 0x2af   : > { %3259 = vst [vmem:[#allocation2 + $0x180] sm:$0xff] %v11102_v46  ;;  %1770 = vmax.xlane.f32.xlu0 %v1769_v58  ;;  %v11121_v58 = vld [vmem:[#allocation2 + $0x118] sm:$0xff] }
 0x2b0   : > { %16085 = vst [vmem:[#allocation49_spill] sm:$0xff] %v11121_v58 }
 0x2b4   : > { %v1744_v44 = vpop.xlane.xlu0 %1743 }
 0x2b5   : > { %v11116_v53 = vmax.f32 %v11111_v55, %v1744_v44  ;;  %v11128_v44 = vpop.f32.mrf.mxu0 }
 0x2b7   : > { %16084 = vst [vmem:[#allocation48_spill] sm:$0xff] %v11116_v53  ;;  %1779 = vmax.xlane.f32.xlu0 %v1778_v45  ;;  %v11134_v45 = vld [vmem:[#allocation2 + $0x98] sm:$0xff] }
 0x2b8   : > { %3260 = vst [vmem:[#allocation2 + $0x110] sm:$0xff] %v11116_v53 }
 0x2b9   : > { %16086 = vst [vmem:[#allocation50_spill] sm:$0xff] %v11134_v45 }
 0x2bc   : > { %v1747_v50 = vpop.xlane.xlu1 %1746  ;;  %1773 = vmax.xlane.f32.xlu1 %v1772_v51  ;;  %v9112_v51 = vld [vmem:[%s10678_s0 + $0x38] sm:$0xff] }
 0x2bd   : > { %v11126_v61 = vmax.f32 %v11121_v58, %v1747_v50  ;;  %v11142_v50 = vpop.f32.mrf.mxu0  ;;  %3475 = vmatpush.bf16.msra.mxu2 %v9112_v51  ;;  %v11144_v58 = vpop.f32.mrf.mxu1  ;;  %v9118_v51 = vld [vmem:[%s10678_s0 + $0x68] sm:$0xff] }
 0x2be   : > { %16087 = vst [vmem:[#allocation51_spill] sm:$0xff] %v11144_v58  ;;  %3646 = vmatpush.bf16.msra.mxu3 %v9118_v51  ;;  %v9107_v51 = vld [vmem:[%s10678_s0 + $0x10] sm:$0xff] }
 0x2bf   : > { %3261 = vst [vmem:[#allocation2 + $0x118] sm:$0xff] %v11126_v61 }
 0x2c1   : > { %3476 = vmatpush.bf16.msra.mxu2 %v9111_v52  ;;  %v11162_v52 = vld [vmem:[#allocation2 + $0x150] sm:$0xff] }
 0x2c2   : > { %2180 = vperm.xlu2 %9281, %v11040_v17   ;;  %16089 = vst [vmem:[#allocation53_spill] sm:$0xff] %v11162_v52  ;;  %3647 = vmatpush.bf16.msra.mxu3 %v9117_v21 }
 0x2c4   : > { %v1750_v0 = vpop.xlane.xlu2 %1749 }
 0x2c5   : > { %v11137_v55 = vmax.f32 %v11134_v45, %v1750_v0  ;;  %v11149_v0 = vld [vmem:[#allocation2 + $0x120] sm:$0xff]  ;;  %3477 = vmatpush.bf16.msra.mxu2 %v9110_v4  ;;  %v11158_v35 = vpop.f32.mrf.mxu0 }
 0x2c6   : > { %16088 = vst [vmem:[#allocation52_spill] sm:$0xff] %v11149_v0 }
 0x2c7   : > { %3262 = vst [vmem:[#allocation2 + $0x98] sm:$0xff] %v11137_v55 }
 0x2c9   : > { %3478 = vmatpush.bf16.msra.mxu2 %v9109_v24  ;;  %v11176_v24 = vld [vmem:[#allocation2 + $0x108] sm:$0xff] }
 0x2ca   : > { %2185 = vperm.xlu2 %9281, %v11053_v31   ;;  %16091 = vst [vmem:[#allocation55_spill] sm:$0xff] %v11176_v24 }
 0x2cb   : > { %2200 = vperm.xlu0 %9282, %v11087_v34   ;;  %v11164_v34 = vpop.f32.mrf.mxu1 }
 0x2cc   : > { %v1753_v45 = vpop.xlane.xlu0 %1752  ;;  %16090 = vst [vmem:[#allocation54_spill] sm:$0xff] %v11164_v34 }
 0x2cd   : > { %v11153_v41 = vmax.f32 %v11149_v0, %v1753_v45  ;;  %v9116_v0 = vld [vmem:[%s10678_s0 + $0x58] sm:$0xff]  ;;  %3479 = vmatpush.bf16.msra.mxu2 %v9108_v28  ;;  %v11178_v42 = vpop.f32.mrf.mxu0  ;;  %v9106_v28 = vld [vmem:[%s10678_s0 + $0x8] sm:$0xff] }
 0x2ce   : > { %3648 = vmatpush.bf16.msra.mxu3 %v9116_v0  ;;  %v9114_v0 = vld [vmem:[%s10678_s0 + $0x48] sm:$0xff] }
 0x2cf   : > { %3263 = vst [vmem:[#allocation2 + $0x120] sm:$0xff] %v11153_v41 }
 0x2d1   : > { %3480 = vmatpush.bf16.msra.mxu2 %v9107_v51  ;;  %v9113_v51 = vld [vmem:[%s10678_s0 + $0x40] sm:$0xff] }
 0x2d3   : > { %2210 = vperm.xlu0 %9282, %v11116_v53   ;;  %v9115_v53 = vld [vmem:[%s10678_s0 + $0x50] sm:$0xff] }
 0x2d4   : > { %v1756_v45 = vpop.xlane.xlu1 %1755  ;;  %3649 = vmatpush.bf16.msra.mxu3 %v9115_v53 }
 0x2d5   : > { %v11170_v4 = vmax.f32 %v11162_v52, %v1756_v45  ;;  %2190 = vperm.xlu1 %9283, %v11066_v43   ;;  %v11180_v45 = vpop.f32.mrf.mxu1  ;;  %3481 = vmatpush.bf16.msra.mxu2 %v9106_v28  ;;  %v11199_v38 = vpop.f32.mrf.mxu0 }
 0x2d6   : > { %16093 = vst [vmem:[#allocation57_spill] sm:$0xff] %v11199_v38 }
 0x2d7   : > { %3264 = vst [vmem:[#allocation2 + $0x150] sm:$0xff] %v11170_v4 }
 0x2d8   : > { %3650 = vmatpush.bf16.msra.mxu3 %v9114_v0 }
 0x2d9   : > { %3482 = vmatpush.bf16.msra.mxu2 %v9105_v36  ;;  %v11204_v36 = vld [vmem:[#allocation2 + $0xe0] sm:$0xff] }
 0x2da   : > { %16095 = vst [vmem:[#allocation59_spill] sm:$0xff] %v11204_v36 }
 0x2dc   : > { %v1759_v21 = vpop.xlane.xlu2 %1758  ;;  %3651 = vmatpush.bf16.msra.mxu3 %v9113_v51 }
 0x2dd   : > { %v11183_v52 = vmax.f32 %v11176_v24, %v1759_v21  ;;  %2195 = vperm.xlu1 %9283, %v11079_v14   ;;  %v11201_v28 = vpop.f32.mrf.mxu1 }
 0x2de   : > { %16094 = vst [vmem:[#allocation58_spill] sm:$0xff] %v11201_v28 }
 0x2df   : > { %3265 = vst [vmem:[#allocation2 + $0x108] sm:$0xff] %v11183_v52 }
 0x2e4   : > { %v2166_v53 = vpop.permute.xlu2 %2165  ;;  %v1762_v43 = vpop.xlane.xlu0 %1761 }
 0x2e5   : > { %v2483_v21 = vsub.f32 %v10904_v59, %v2166_v53  ;;  %v2484_v24 = vsub.f32 %v10906_v60, %v2166_v53  ;;  %v11197_v14 = vmax.f32 %v11192_v48, %v1762_v43  ;;  %v11212_v53 = vpop.f32.mrf.mxu0 }
 0x2e6   : > { %16096 = vst [vmem:[#allocation60_spill] sm:$0xff] %v11212_v53 }
 0x2e7   : > { %v2611_v37 = vmul.f32 1.442695, %v2483_v21  ;;  %v2613_v0 = vmul.f32 1.442695, %v2484_v24  ;;  %3266 = vst [vmem:[#allocation2 + $0x60] sm:$0xff] %v11197_v14  ;;  %v11214_v24 = vpop.f32.mrf.mxu1 }
 0x2e8   : > { %16097 = vst [vmem:[#allocation61_spill] sm:$0xff] %v11214_v24 }
 0x2e9   : > { %9284 = vpow2.f32 %v2611_v37  ;;  %v1775_v37 = vmax.f32 %v11091_v8, %v11089_v20 }
 0x2ea   : > { %9286 = vpow2.f32 %v2613_v0  ;;  %v9075_v0 = vld [vmem:[%s10680_s20 + $0x90] sm:$0xff] }
 0x2eb   : > { %1347 = vmatmul.bf16.gmra.mxu0 %v9075_v0  ;;  %1516 = vmatmul.bf16.gmra.mxu1 %v9075_v0 }
 0x2ec   : > { %v1765_v51 = vpop.xlane.xlu1 %1764 }
 0x2ed   : > { %v11207_v59 = vmax.f32 %v11204_v36, %v1765_v51  ;;  %v1784_v36 = vmax.f32 %v11142_v50, %v11144_v58  ;;  %v11225_v27 = vpop.f32.mrf.mxu0 }
 0x2ef   : > { %v9285_v60 = vpop.eup %9284  ;;  %3267 = vst [vmem:[#allocation2 + $0xe0] sm:$0xff] %v11207_v59  ;;  %v11227_v17 = vpop.f32.mrf.mxu1 }
 0x2f0   : > { %v9287_v21 = vpop.eup %9286 }
 0x2f1   : > { %v11219_v48 = vadd.f32 %v9287_v21, %v9285_v60 }
 0x2f3   : > { %16098 = vst [vmem:[#allocation62_spill] sm:$0xff] %v11219_v48  ;;  %1776 = vmax.xlane.f32.xlu2 %v1775_v37  ;;  %v1787_v37 = vmax.f32 %v11158_v35, %v11164_v34 }
 0x2f5   : > { %v11233_v48 = vpop.f32.mrf.mxu0 }
 0x2f7   : > { %v2171_v51 = vpop.permute.xlu0 %2170  ;;  %v11235_v58 = vpop.f32.mrf.mxu1 }
 0x2f8   : > { %v2485_v31 = vsub.f32 %v10910_v62, %v2171_v51  ;;  %v2486_v43 = vsub.f32 %v10912_v63, %v2171_v51  ;;  %v1793_v62 = vmax.f32 %v11199_v38, %v11201_v28 }
 0x2fa   : > { %v2615_v40 = vmul.f32 1.442695, %v2485_v31  ;;  %v2617_v39 = vmul.f32 1.442695, %v2486_v43 }
 0x2fb   : > { %1785 = vmax.xlane.f32.xlu2 %v1784_v36 }
 0x2fc   : > { %9288 = vpow2.f32 %v2615_v40  ;;  %v1781_v40 = vmax.f32 %v11128_v44, %v11130_v57 }
 0x2fd   : > { %9290 = vpow2.f32 %v2617_v39  ;;  %1788 = vmax.xlane.f32.xlu0 %v1787_v37 }
 0x302   : > { %v9289_v63 = vpop.eup %9288 }
 0x303   : > { %v9291_v0 = vpop.eup %9290  ;;  %1794 = vmax.xlane.f32.xlu2 %v1793_v62  ;;  %v3315_v51 = vpack.c.bf16 %v9289_v63, %v9285_v60  ;;  %v1802_v60 = vmax.f32 %v11233_v48, %v11235_v58 }
 0x304   : > { %v2176_v31 = vpop.permute.xlu1 %2175  ;;  %v3316_v43 = vpack.c.bf16 %v9291_v0, %v9287_v21  ;;  %v11237_v36 = vadd.f32 %v9291_v0, %v9289_v63 }
 0x305   : > { %v2487_v34 = vsub.f32 %v10917_v2, %v2176_v31  ;;  %v2488_v39 = vsub.f32 %v10919_v3, %v2176_v31  ;;  %3483 = vmatmul.bf16.vlgmr.msra.gmra.mxu2 %v3315_v51  ;;  %v11248_v3 = vld [vmem:[#allocation2 + $0x188] sm:$0xff] }
 0x306   : > { %16099 = vst [vmem:[#allocation63_spill] sm:$0xff] %v11237_v36  ;;  %3652 = vmatmul.bf16.vlgmr.msra.gmra.mxu3 %v3316_v43  ;;  %v11271_v36 = vld [vmem:[#allocation2 + $0x140] sm:$0xff] }
 0x307   : > { %v2619_v37 = vmul.f32 1.442695, %v2487_v34  ;;  %v2621_v62 = vmul.f32 1.442695, %v2488_v39  ;;  %1782 = vmax.xlane.f32.xlu1 %v1781_v40  ;;  %v11255_v34 = vld [vmem:[#allocation2 + $0x138] sm:$0xff] }
 0x309   : > { %9292 = vpow2.f32 %v2619_v37 }
 0x30a   : > { %9294 = vpow2.f32 %v2621_v62 }
 0x30b   : > { %1803 = vmax.xlane.f32.xlu2 %v1802_v60 }
 0x30f   : > { %v9293_v21 = vpop.eup %9292 }
 0x310   : > { %v9295_v63 = vpop.eup %9294 }
 0x311   : > { %2220 = vperm.xlu0 %9282, %v11137_v55   ;;  %v11246_v2 = vadd.f32 %v9295_v63, %v9293_v21 }
 0x313   : > { %16100 = vst [vmem:[#allocation64_spill] sm:$0xff] %v11246_v2 }
 0x31d   : > { %v1768_v0 = vpop.xlane.xlu2 %1767 }
 0x31e   : > { %v11251_v51 = vmax.f32 %v11248_v3, %v1768_v0  ;;  %v9076_v0 = vld [vmem:[%s10680_s20 + $0x98] sm:$0xff] }
 0x31f   : > { %1352 = vmatmul.bf16.gmra.mxu0 %v9076_v0  ;;  %1521 = vmatmul.bf16.gmra.mxu1 %v9076_v0  ;;  %v11279_v0 = vpop.f32.mrf.mxu0 }
 0x320   : > { %3268 = vst [vmem:[#allocation2 + $0x188] sm:$0xff] %v11251_v51  ;;  %2205 = vperm.xlu1 %9283, %v11102_v46   ;;  %v11265_v46 = vld [vmem:[#allocation2 + $0x1a8] sm:$0xff] }
 0x321   : > { %16101 = vst [vmem:[#allocation65_spill] sm:$0xff] %v11265_v46 }
 0x322   : > { %v1771_v31 = vpop.xlane.xlu0 %1770 }
 0x323   : > { %v11258_v43 = vmax.f32 %v11255_v34, %v1771_v31  ;;  %2245 = vperm.xlu2 %9281, %v11207_v59  }
 0x325   : > { %3269 = vst [vmem:[#allocation2 + $0x138] sm:$0xff] %v11258_v43  ;;  %v2181_v55 = vpop.permute.xlu2 %2180 }
 0x326   : > { %v2489_v39 = vsub.f32 %v10923_v5, %v2181_v55  ;;  %v2490_v40 = vsub.f32 %v10925_v6, %v2181_v55 }
 0x328   : > { %v2623_v37 = vmul.f32 1.442695, %v2489_v39  ;;  %v2625_v62 = vmul.f32 1.442695, %v2490_v40  ;;  %2215 = vperm.xlu1 %9283, %v11126_v61  }
 0x32a   : > { %9296 = vpow2.f32 %v2623_v37  ;;  %v1780_v60 = vpop.xlane.xlu0 %1779 }
 0x32b   : > { %9298 = vpow2.f32 %v2625_v62  ;;  %v11269_v31 = vmax.f32 %v11265_v46, %v1780_v60  ;;  %v11281_v46 = vpop.f32.mrf.mxu1 }
 0x32d   : > { %v2186_v2 = vpop.permute.xlu2 %2185  ;;  %3272 = vst [vmem:[#allocation2 + $0x1a8] sm:$0xff] %v11269_v31 }
 0x32e   : > { %v2491_v5 = vsub.f32 %v10930_v9, %v2186_v2  ;;  %v2492_v6 = vsub.f32 %v10932_v10, %v2186_v2  ;;  %v9077_v2 = vld [vmem:[%s10680_s20 + $0xa0] sm:$0xff] }
 0x32f   : > { %v1774_v61 = vpop.xlane.xlu1 %1773  ;;  %1357 = vmatmul.bf16.gmra.mxu0 %v9077_v2  ;;  %1526 = vmatmul.bf16.gmra.mxu1 %v9077_v2 }
 0x330   : > { %v9297_v55 = vpop.eup %9296  ;;  %v2627_v39 = vmul.f32 1.442695, %v2491_v5  ;;  %v2629_v40 = vmul.f32 1.442695, %v2492_v6  ;;  %v11277_v37 = vmax.f32 %v11271_v36, %v1774_v61  ;;  %v1796_v6 = vmax.f32 %v11212_v53, %v11214_v24  ;;  %v11291_v61 = vpop.f32.mrf.mxu0 }
 0x331   : > { %v9299_v62 = vpop.eup %9298  ;;  %v3317_v60 = vpack.c.bf16 %v9297_v55, %v9293_v21 }
 0x332   : > { %9300 = vpow2.f32 %v2627_v39  ;;  %3270 = vst [vmem:[#allocation2 + $0x140] sm:$0xff] %v11277_v37  ;;  %v3318_v9 = vpack.c.bf16 %v9299_v62, %v9295_v63  ;;  %v11284_v28 = vadd.f32 %v9299_v62, %v9297_v55 }
 0x333   : > { %9302 = vpow2.f32 %v2629_v40  ;;  %3488 = vmatmul.bf16.gmra.mxu2 %v3317_v60  ;;  %v11293_v39 = vpop.f32.mrf.mxu1 }
 0x334   : > { %16102 = vst [vmem:[#allocation66_spill] sm:$0xff] %v11284_v28  ;;  %3657 = vmatmul.bf16.gmra.mxu3 %v3318_v9 }
 0x338   : > { %v9301_v10 = vpop.eup %9300  ;;  %v11297_v9 = vpop.f32.mrf.mxu0 }
 0x339   : > { %v9303_v5 = vpop.eup %9302  ;;  %16104 = vst [vmem:[#allocation68_spill] sm:$0xff] %v11297_v9 }
 0x33a   : > { %v11289_v21 = vadd.f32 %v9303_v5, %v9301_v10 }
 0x33b   : > { %1797 = vmax.xlane.f32.xlu0 %v1796_v6  ;;  %v11299_v28 = vpop.f32.mrf.mxu1 }
 0x33c   : > { %16103 = vst [vmem:[#allocation67_spill] sm:$0xff] %v11289_v21  ;;  %v1811_v2 = vmax.f32 %v11297_v9, %v11299_v28 }
 0x33d   : > { %v2201_v63 = vpop.permute.xlu0 %2200  ;;  %16105 = vst [vmem:[#allocation69_spill] sm:$0xff] %v11299_v28 }
 0x33e   : > { %v2497_v55 = vsub.f32 %v10948_v18, %v2201_v63  ;;  %v2498_v40 = vsub.f32 %v10950_v19, %v2201_v63 }
 0x340   : > { %v2639_v62 = vmul.f32 1.442695, %v2497_v55  ;;  %v2641_v60 = vmul.f32 1.442695, %v2498_v40 }
 0x342   : > { %9304 = vpow2.f32 %v2639_v62 }
 0x343   : > { %9306 = vpow2.f32 %v2641_v60 }
 0x347   : > { %v2191_v6 = vpop.permute.xlu1 %2190 }
 0x348   : > { %v9305_v21 = vpop.eup %9304  ;;  %v2493_v38 = vsub.f32 %v10936_v12, %v2191_v6  ;;  %v2494_v24 = vsub.f32 %v10938_v13, %v2191_v6  ;;  %v1790_v13 = vmax.f32 %v11178_v42, %v11180_v45 }
 0x349   : > { %v9307_v18 = vpop.eup %9306 }
 0x34a   : > { %v2631_v53 = vmul.f32 1.442695, %v2493_v38  ;;  %v2633_v19 = vmul.f32 1.442695, %v2494_v24  ;;  %v11305_v63 = vadd.f32 %v9307_v18, %v9305_v21 }
 0x34c   : > { %16106 = vst [vmem:[#allocation70_spill] sm:$0xff] %v11305_v63  ;;  %9308 = vpow2.f32 %v2631_v53  ;;  %1812 = vmax.xlane.f32.xlu2 %v1811_v2 }
 0x34d   : > { %9310 = vpow2.f32 %v2633_v19 }
 0x34f   : > { %v2196_v55 = vpop.permute.xlu1 %2195  ;;  %2230 = vperm.xlu0 %9282, %v11170_v4  }
 0x350   : > { %v2495_v40 = vsub.f32 %v10942_v15, %v2196_v55  ;;  %v2496_v12 = vsub.f32 %v10944_v16, %v2196_v55 }
 0x352   : > { %v9309_v62 = vpop.eup %9308  ;;  %v2635_v60 = vmul.f32 1.442695, %v2495_v40  ;;  %v2637_v6 = vmul.f32 1.442695, %v2496_v12  ;;  %1791 = vmax.xlane.f32.xlu1 %v1790_v13  ;;  %v11317_v40 = vld [vmem:[#allocation2 + $0x80] sm:$0xff]  ;;  %v11322_v12 = vpop.permute.xlu0 %2210  ;;  %v16121_v13 = vsub.f32 %v11000_v47, %v11003_v49  ;;  %v9078_v49 = vld [vmem:[%s10680_s20 + $0xa8] sm:$0xff] }
 0x353   : > { %v9311_v38 = vpop.eup %9310  ;;  %v3319_v24 = vpack.c.bf16 %v9309_v62, %v9301_v10  ;;  %16109 = vst [vmem:[#allocation73_spill] sm:$0xff] %v11317_v40  ;;  %1362 = vmatmul.bf16.gmra.mxu0 %v9078_v49  ;;  %1531 = vmatmul.bf16.gmra.mxu1 %v9078_v49 }
 0x354   : > { %9312 = vpow2.f32 %v2635_v60  ;;  %v3320_v53 = vpack.c.bf16 %v9311_v38, %v9303_v5  ;;  %v11312_v2 = vadd.f32 %v9311_v38, %v9309_v62  ;;  %v11333_v62 = vpop.f32.mrf.mxu0  ;;  %v11335_v60 = vpop.f32.mrf.mxu1 }
 0x355   : > { %9314 = vpow2.f32 %v2637_v6  ;;  %3493 = vmatmul.bf16.gmra.mxu2 %v3319_v24  ;;  %16113 = vst [vmem:[#allocation77_spill] sm:$0xff] %v11333_v62 }
 0x356   : > { %16107 = vst [vmem:[#allocation71_spill] sm:$0xff] %v11312_v2  ;;  %3662 = vmatmul.bf16.gmra.mxu3 %v3320_v53  ;;  %v11347_v53 = vld [vmem:[#allocation2 + $0x160] sm:$0xff] }
 0x357   : > { %2240 = vperm.xlu0 %9282, %v11197_v14   ;;  %v11329_v14 = vld [vmem:[#allocation2 + $0x28] sm:$0xff]  ;;  %16114 = vst [vmem:[#allocation78_spill] sm:$0xff] %v11335_v60 }
 0x358   : > { %16111 = vst [vmem:[#allocation75_spill] sm:$0xff] %v11329_v14 }
 0x359   : > { %16116 = vst [vmem:[#allocation80_spill] sm:$0xff] %v11347_v53 }
 0x35a   : > { %v9313_v15 = vpop.eup %9312 }
 0x35b   : > { %v9315_v16 = vpop.eup %9314  ;;  %v3321_v19 = vpack.c.bf16 %v9305_v21, %v9313_v15 }
 0x35c   : > { %v11315_v4 = vadd.f32 %v9315_v16, %v9313_v15  ;;  %v3322_v55 = vpack.c.bf16 %v9307_v18, %v9315_v16  ;;  %v11331_v18 = vld [vmem:[#allocation2 + $0x1e8] sm:$0xff] }
 0x35d   : > { %16112 = vst [vmem:[#allocation76_spill] sm:$0xff] %v11331_v18 }
 0x35e   : > { %16108 = vst [vmem:[#allocation72_spill] sm:$0xff] %v11315_v4 }
 0x365   : > { %3498 = vmatmul.bf16.gmra.mxu2 %v3321_v19  ;;  %v11352_v19 = vpop.f32.mrf.mxu0 }
 0x366   : > { %3667 = vmatmul.bf16.gmra.mxu3 %v3322_v55  ;;  %v1777_v10 = vpop.xlane.xlu2 %1776  ;;  %v11354_v55 = vpop.f32.mrf.mxu1 }
 0x367   : > { %v11320_v5 = vmax.f32 %v11317_v40, %v1777_v10  ;;  %16117 = vst [vmem:[#allocation81_spill] sm:$0xff] %v11354_v55  ;;  %v11356_v10 = vld [vmem:[#allocation2 + $0x1b8] sm:$0xff] }
 0x368   : > { %16118 = vst [vmem:[#allocation82_spill] sm:$0xff] %v11356_v10 }
 0x369   : > { %16110 = vst [vmem:[#allocation74_spill] sm:$0xff] %v11320_v5  ;;  %2265 = vperm.xlu2 %9281, %v11320_v5  }
 0x36a   : > { %3271 = vst [vmem:[#allocation2 + $0x80] sm:$0xff] %v11320_v5 }
 0x36b   : > { %2225 = vperm.xlu1 %9283, %v11153_v41   ;;  %v11362_v41 = vld [vmem:[#allocation2] sm:$0xff] }
 0x36c   : > { %16120 = vst [vmem:[#allocation84_spill] sm:$0xff] %v11362_v41 }
 0x36e   : > { %v1786_v21 = vpop.xlane.xlu2 %1785  ;;  %v11378_v47 = vpop.f32.mrf.mxu1 }
 0x36f   : > { %v11338_v6 = vmax.f32 %v11329_v14, %v1786_v21 }
 0x370   : > { %v1789_v38 = vpop.xlane.xlu0 %1788 }
 0x371   : > { %3274 = vst [vmem:[#allocation2 + $0x28] sm:$0xff] %v11338_v6  ;;  %v11342_v24 = vmax.f32 %v11331_v18, %v1789_v38 }
 0x373   : > { %16115 = vst [vmem:[#allocation79_spill] sm:$0xff] %v11342_v24 }
 0x374   : > { %3275 = vst [vmem:[#allocation2 + $0x1e8] sm:$0xff] %v11342_v24 }
 0x376   : > { %v1795_v15 = vpop.xlane.xlu2 %1794  ;;  %v11391_v49 = vpop.f32.mrf.mxu1 }
 0x377   : > { %v11350_v16 = vmax.f32 %v11347_v53, %v1795_v15  ;;  %v2035_v15 = vmul.f32 1.442695, %v16121_v13  ;;  %v1805_v53 = vmax.f32 %v11279_v0, %v11281_v46  ;;  %v16122_v13 = vsub.f32 %v11014_v54, %v11017_v56  ;;  %16125 = vst [vmem:[#allocation87_spill] sm:$0xff] %v11391_v49 }
 0x379   : > { %3277 = vst [vmem:[#allocation2 + $0x160] sm:$0xff] %v11350_v16  ;;  %9316 = vpow2.f32 %v2035_v15  ;;  %v2037_v63 = vmul.f32 1.442695, %v16122_v13 }
 0x37a   : > { %v1783_v21 = vpop.xlane.xlu1 %1782 }
 0x37b   : > { %v11360_v38 = vmax.f32 %v11356_v10, %v1783_v21  ;;  %v11376_v21 = vpop.f32.mrf.mxu0  ;;  %9318 = vpow2.f32 %v2037_v63  ;;  %v2502_v63 = vsub.f32 %v10963_v26, %v11322_v12 }
 0x37d   : > { %16119 = vst [vmem:[#allocation83_spill] sm:$0xff] %v11360_v38 }
 0x37e   : > { %3273 = vst [vmem:[#allocation2 + $0x1b8] sm:$0xff] %v11360_v38  ;;  %v1804_v4 = vpop.xlane.xlu2 %1803 }
 0x37f   : > { %v11371_v2 = vmax.f32 %v11362_v41, %v1804_v4  ;;  %v11386_v28 = vpop.eup %9316 }
 0x380   : > { %16123 = vst [vmem:[#allocation85_spill] sm:$0xff] %v11386_v28 }
 0x381   : > { %3280 = vst [vmem:[#allocation2] sm:$0xff] %v11371_v2  ;;  %1806 = vmax.xlane.f32.xlu0 %v1805_v53  ;;  %v3813_v53 = vld [vmem:[#allocation4 + $0xc0] sm:$0xff]  ;;  %v11393_v13 = vpop.eup %9318 }
 0x382   : > { %v3877_v54 = vmul.f32 %v11386_v28, %v3813_v53  ;;  %16126 = vst [vmem:[#allocation88_spill] sm:$0xff] %v11393_v13  ;;  %v2649_v53 = vmul.f32 1.442695, %v2502_v63 }
 0x383   : > { %v2221_v18 = vpop.permute.xlu0 %2220  ;;  %v11389_v56 = vpop.f32.mrf.mxu0 }
 0x384   : > { %v2505_v4 = vsub.f32 %v10974_v32, %v2221_v18  ;;  %v2506_v41 = vsub.f32 %v10976_v33, %v2221_v18  ;;  %16124 = vst [vmem:[#allocation86_spill] sm:$0xff] %v11389_v56  ;;  %v2501_v33 = vsub.f32 %v10961_v25, %v11322_v12  ;;  %v1799_v12 = vmax.f32 %v11225_v27, %v11227_v17 }
 0x386   : > { %v2655_v15 = vmul.f32 1.442695, %v2505_v4  ;;  %v2657_v14 = vmul.f32 1.442695, %v2506_v41  ;;  %v3814_v41 = vld [vmem:[#allocation4 + $0x138] sm:$0xff] }
 0x387   : > { %v3878_v28 = vmul.f32 %v11393_v13, %v3814_v41  ;;  %v9081_v13 = vld [vmem:[%s10680_s20 + $0xc0] sm:$0xff] }
 0x388   : > { %9320 = vpow2.f32 %v2655_v15  ;;  %v3484_v9 = vpop.f32.mrf.mxu2  ;;  %v2647_v15 = vmul.f32 1.442695, %v2501_v33 }
 0x389   : > { %9322 = vpow2.f32 %v2657_v14  ;;  %v3653_v10 = vpop.f32.mrf.mxu3 }
 0x38a   : > { %v3654_v5 = vadd.f32 %v3653_v10, %v3484_v9  ;;  %v1823_v9 = vmax.f32 %v11389_v56, %v11391_v49  ;;  %9324 = vpow2.f32 %v2647_v15 }
 0x38b   : > { %9326 = vpow2.f32 %v2649_v53 }
 0x38c   : > { %v3941_v32 = vadd.f32 %v3877_v54, %v3654_v5 }
 0x38e   : > { %v9321_v18 = vpop.eup %9320  ;;  %4005 = vst [vmem:[#allocation4 + $0xc0] sm:$0xff] %v3941_v32 }
 0x38f   : > { %v9323_v14 = vpop.eup %9322 }
 0x390   : > { %v3486_v10 = vpop.f32.mrf.mxu2  ;;  %v11401_v4 = vadd.f32 %v9323_v14, %v9321_v18  ;;  %v11409_v63 = vpop.eup %9324 }
 0x391   : > { %v3655_v5 = vpop.f32.mrf.mxu3  ;;  %16128 = vst [vmem:[#allocation90_spill] sm:$0xff] %v11409_v63 }
 0x392   : > { %16127 = vst [vmem:[#allocation89_spill] sm:$0xff] %v11401_v4  ;;  %v3656_v54 = vadd.f32 %v3655_v5, %v3486_v10  ;;  %v2206_v25 = vpop.permute.xlu1 %2205  ;;  %1824 = vmax.xlane.f32.xlu2 %v1823_v9  ;;  %v11413_v9 = vpop.eup %9326 }
 0x393   : > { %v2499_v40 = vsub.f32 %v10955_v22, %v2206_v25  ;;  %v2500_v26 = vsub.f32 %v10957_v23, %v2206_v25  ;;  %16129 = vst [vmem:[#allocation91_spill] sm:$0xff] %v11413_v9 }
 0x394   : > { %v3942_v32 = vadd.f32 %v3878_v28, %v3656_v54  ;;  %v9079_v28 = vld [vmem:[%s10680_s20 + $0xb0] sm:$0xff] }
 0x395   : > { %v2643_v49 = vmul.f32 1.442695, %v2499_v40  ;;  %v2645_v4 = vmul.f32 1.442695, %v2500_v26  ;;  %1800 = vmax.xlane.f32.xlu1 %v1799_v12  ;;  %2250 = vperm.xlu0 %9282, %v11251_v51   ;;  %v11428_v54 = vld [vmem:[#allocation2 + $0x30] sm:$0xff] }
 0x396   : > { %4006 = vst [vmem:[#allocation4 + $0x138] sm:$0xff] %v3942_v32  ;;  %1367 = vmatmul.bf16.gmra.mxu0 %v9079_v28  ;;  %1536 = vmatmul.bf16.gmra.mxu1 %v9079_v28 }
 0x397   : > { %9328 = vpow2.f32 %v2643_v49  ;;  %16133 = vst [vmem:[#allocation94_spill] sm:$0xff] %v11428_v54 }
 0x398   : > { %9330 = vpow2.f32 %v2645_v4 }
 0x39a   : > { %v2216_v33 = vpop.permute.xlu1 %2215 }
 0x39b   : > { %v2503_v22 = vsub.f32 %v10968_v29, %v2216_v33  ;;  %v2504_v23 = vsub.f32 %v10970_v30, %v2216_v33 }
 0x39d   : > { %v9329_v41 = vpop.eup %9328  ;;  %v2651_v40 = vmul.f32 1.442695, %v2503_v22  ;;  %v2653_v10 = vmul.f32 1.442695, %v2504_v23  ;;  %2255 = vperm.xlu0 %9282, %v11258_v43   ;;  %v16132_v43 = vsub.f32 %v11028_v1, %v11031_v7  ;;  %v16134_v1 = vld [vmem:[#allocation29_spill] sm:$0xff]  ;;  %v11441_v22 = vpop.f32.mrf.mxu0 }
 0x39e   : > { %v9331_v51 = vpop.eup %9330  ;;  %v3323_v15 = vpack.c.bf16 %v11409_v63, %v9329_v41  ;;  %v16135_v7 = vsub.f32 %v11037_v11, %v16134_v1  ;;  %16137 = vst [vmem:[#allocation95_spill] sm:$0xff] %v11441_v22  ;;  %v3816_v11 = vld [vmem:[#allocation4 + $0xc8] sm:$0xff] }
 0x39f   : > { %9332 = vpow2.f32 %v2651_v40  ;;  %v3324_v49 = vpack.c.bf16 %v11413_v9, %v9331_v51  ;;  %v11419_v4 = vadd.f32 %v9331_v51, %v9329_v41  ;;  %v2039_v53 = vmul.f32 1.442695, %v16132_v43 }
 0x3a0   : > { %9334 = vpow2.f32 %v2653_v10  ;;  %3503 = vmatmul.bf16.gmra.mxu2 %v3323_v15  ;;  %v2041_v32 = vmul.f32 1.442695, %v16135_v7  ;;  %v11450_v15 = vld [vmem:[#allocation2 + $0x148] sm:$0xff] }
 0x3a1   : > { %16130 = vst [vmem:[#allocation92_spill] sm:$0xff] %v11419_v4  ;;  %3672 = vmatmul.bf16.gmra.mxu3 %v3324_v49  ;;  %9336 = vpow2.f32 %v2039_v53  ;;  %v16159_v4 = vld [vmem:[#allocation38_spill] sm:$0xff] }
 0x3a2   : > { %9338 = vpow2.f32 %v2041_v32  ;;  %16140 = vst [vmem:[#allocation98_spill] sm:$0xff] %v11450_v15  ;;  %v16141_v32 = vld [vmem:[#allocation21_spill] sm:$0xff] }
 0x3a5   : > { %v9333_v29 = vpop.eup %9332  ;;  %2260 = vperm.xlu0 %9282, %v11277_v37   ;;  %v11452_v49 = vpop.f32.mrf.mxu0 }
 0x3a6   : > { %v9335_v30 = vpop.eup %9334  ;;  %v3325_v26 = vpack.c.bf16 %v9321_v18, %v9333_v29  ;;  %v11443_v18 = vpop.f32.mrf.mxu1 }
 0x3a7   : > { %v11422_v5 = vadd.f32 %v9335_v30, %v9333_v29  ;;  %v3326_v37 = vpack.c.bf16 %v9323_v14, %v9335_v30  ;;  %v11439_v33 = vpop.eup %9336  ;;  %16138 = vst [vmem:[#allocation96_spill] sm:$0xff] %v11443_v18  ;;  %v11445_v14 = vpop.permute.xlu2 %2245 }
 0x3a8   : > { %16136 = vst [vmem:[#allocation29_spill] sm:$0xff] %v11439_v33  ;;  %v11448_v51 = vpop.eup %9338 }
 0x3a9   : > { %16131 = vst [vmem:[#allocation93_spill] sm:$0xff] %v11422_v5  ;;  %v3817_v5 = vld [vmem:[#allocation4 + $0x1d0] sm:$0xff] }
 0x3aa   : > { %2275 = vperm.xlu2 %9281, %v11360_v38   ;;  %16139 = vst [vmem:[#allocation97_spill] sm:$0xff] %v11448_v51 }
 0x3ae   : > { %v1798_v25 = vpop.xlane.xlu0 %1797  ;;  %2235 = vperm.xlu1 %9283, %v11183_v52   ;;  %v3815_v52 = vld [vmem:[#allocation4] sm:$0xff]  ;;  %v11454_v30 = vpop.f32.mrf.mxu1 }
 0x3af   : > { %v11432_v12 = vmax.f32 %v11428_v54, %v1798_v25  ;;  %v3879_v40 = vmul.f32 %v11439_v33, %v3815_v52 }
 0x3b0   : > { %3508 = vmatmul.bf16.gmra.mxu2 %v3325_v26  ;;  %v3880_v26 = vmul.f32 %v11448_v51, %v3816_v11  ;;  %v1808_v51 = vmax.f32 %v11291_v61, %v11293_v39 }
 0x3b1   : > { %3278 = vst [vmem:[#allocation2 + $0x30] sm:$0xff] %v11432_v12  ;;  %3677 = vmatmul.bf16.gmra.mxu3 %v3326_v37 }
 0x3b2   : > { %2285 = vperm.xlu2 %9281, %v11342_v24   ;;  %v16163_v24 = vld [vmem:[#allocation20_spill] sm:$0xff] }
 0x3b6   : > { %v3489_v23 = vpop.f32.mrf.mxu2 }
 0x3b7   : > { %v3658_v28 = vpop.f32.mrf.mxu3 }
 0x3b8   : > { %v3659_v41 = vadd.f32 %v3658_v28, %v3489_v23  ;;  %v16142_v23 = vld [vmem:[#allocation22_spill] sm:$0xff] }
 0x3ba   : > { %v3943_v10 = vadd.f32 %v3879_v40, %v3659_v41  ;;  %v11463_v41 = vld [vmem:[#allocation2 + $0xf8] sm:$0xff] }
 0x3bb   : > { %16143 = vst [vmem:[#allocation21_spill] sm:$0xff] %v11463_v41 }
 0x3bc   : > { %4007 = vst [vmem:[#allocation4] sm:$0xff] %v3943_v10 }
 0x3be   : > { %v3491_v29 = vpop.f32.mrf.mxu2 }
 0x3bf   : > { %v3660_v43 = vpop.f32.mrf.mxu3  ;;  %v1813_v53 = vpop.xlane.xlu2 %1812 }
 0x3c0   : > { %v3661_v25 = vadd.f32 %v3660_v43, %v3491_v29  ;;  %v11458_v37 = vmax.f32 %v11450_v15, %v1813_v53  ;;  %v11471_v53 = vpop.f32.mrf.mxu0  ;;  %v16160_v15 = vld [vmem:[#allocation41_spill] sm:$0xff] }
 0x3c1   : > { %v2231_v1 = vpop.permute.xlu0 %2230  ;;  %16145 = vst [vmem:[#allocation99_spill] sm:$0xff] %v11471_v53  ;;  %v16161_v56 = vsub.f32 %v16159_v4, %v16160_v15 }
 0x3c2   : > { %v3944_v7 = vadd.f32 %v3880_v26, %v3661_v25  ;;  %3283 = vst [vmem:[#allocation2 + $0x148] sm:$0xff] %v11458_v37  ;;  %v2509_v52 = vsub.f32 %v16141_v32, %v2231_v1  ;;  %v2510_v28 = vsub.f32 %v16142_v23, %v2231_v1  ;;  %v11473_v25 = vpop.f32.mrf.mxu1  ;;  %v16147_v1 = vld [vmem:[#allocation32_spill] sm:$0xff]  ;;  %v1817_v23 = vmax.f32 %v11352_v19, %v11354_v55 }
 0x3c3   : > { %16146 = vst [vmem:[#allocation100_spill] sm:$0xff] %v11473_v25  ;;  %v2047_v54 = vmul.f32 1.442695, %v16161_v56 }
 0x3c4   : > { %4008 = vst [vmem:[#allocation4 + $0xc8] sm:$0xff] %v3944_v7  ;;  %v2663_v40 = vmul.f32 1.442695, %v2509_v52  ;;  %v2665_v10 = vmul.f32 1.442695, %v2510_v28  ;;  %v16148_v7 = vld [vmem:[#allocation33_spill] sm:$0xff] }
 0x3c5   : > { %v1792_v29 = vpop.xlane.xlu1 %1791  ;;  %v16149_v32 = vsub.f32 %v16147_v1, %v16148_v7  ;;  %v16153_v1 = vld [vmem:[#allocation35_spill] sm:$0xff]  ;;  %v16154_v7 = vld [vmem:[#allocation37_spill] sm:$0xff] }
 0x3c6   : > { %v11466_v11 = vmax.f32 %v11463_v41, %v1792_v29  ;;  %9340 = vpow2.f32 %v2663_v40  ;;  %v9080_v40 = vld [vmem:[%s10680_s20 + $0xb8] sm:$0xff] }
 0x3c7   : > { %9342 = vpow2.f32 %v2665_v10  ;;  %v2043_v52 = vmul.f32 1.442695, %v16149_v32  ;;  %1372 = vmatmul.bf16.gmra.mxu0 %v9080_v40  ;;  %1541 = vmatmul.bf16.gmra.mxu1 %v9080_v40  ;;  %v16155_v32 = vsub.f32 %v16153_v1, %v16154_v7 }
 0x3c8   : > { %16144 = vst [vmem:[#allocation22_spill] sm:$0xff] %v11466_v11  ;;  %v11491_v43 = vpop.f32.mrf.mxu0 }
 0x3c9   : > { %3276 = vst [vmem:[#allocation2 + $0xf8] sm:$0xff] %v11466_v11  ;;  %9344 = vpow2.f32 %v2043_v52  ;;  %v2045_v33 = vmul.f32 1.442695, %v16155_v32  ;;  %v1832_v52 = vmax.f32 %v11471_v53, %v11473_v25  ;;  %v16192_v53 = vld [vmem:[#allocation49_spill] sm:$0xff] }
 0x3ca   : > { %v11489_v29 = vpop.f32.mrf.mxu1  ;;  %16152 = vst [vmem:[#allocation101_spill] sm:$0xff] %v11491_v43 }
 0x3cb   : > { %16151 = vst [vmem:[#allocation33_spill] sm:$0xff] %v11489_v29  ;;  %9346 = vpow2.f32 %v2045_v33  ;;  %v16162_v33 = vld [vmem:[#allocation19_spill] sm:$0xff] }
 0x3cc   : > { %v11475_v26 = vpop.eup %9340  ;;  %9348 = vpow2.f32 %v2047_v54 }
 0x3cd   : > { %v11482_v28 = vpop.eup %9342 }
 0x3ce   : > { %v11487_v10 = vadd.f32 %v11482_v28, %v11475_v26 }
 0x3cf   : > { %1818 = vmax.xlane.f32.xlu0 %v1817_v23  ;;  %v11498_v23 = vpop.eup %9344 }
 0x3d0   : > { %16150 = vst [vmem:[#allocation32_spill] sm:$0xff] %v11487_v10  ;;  %v3881_v63 = vmul.f32 %v11498_v23, %v3817_v5  ;;  %v11505_v32 = vpop.f32.mrf.mxu0 }
 0x3d1   : > { %16156 = vst [vmem:[#allocation35_spill] sm:$0xff] %v11498_v23  ;;  %v11515_v5 = vpop.eup %9346 }
 0x3d2   : > { %v11503_v7 = vpop.f32.mrf.mxu1  ;;  %16158 = vst [vmem:[#allocation102_spill] sm:$0xff] %v11505_v32  ;;  %v11526_v54 = vpop.eup %9348 }
 0x3d3   : > { %16157 = vst [vmem:[#allocation37_spill] sm:$0xff] %v11503_v7 }
 0x3d4   : > { %16164 = vst [vmem:[#allocation38_spill] sm:$0xff] %v11515_v5 }
 0x3d5   : > { %16168 = vst [vmem:[#allocation41_spill] sm:$0xff] %v11526_v54 }
 0x3d7   : > { %1377 = vmatmul.bf16.gmra.mxu0 %v9081_v13  ;;  %1546 = vmatmul.bf16.gmra.mxu1 %v9081_v13  ;;  %v3819_v13 = vld [vmem:[#allocation4 + $0x1f0] sm:$0xff] }
 0x3d8   : > { %v3494_v9 = vpop.f32.mrf.mxu2  ;;  %1809 = vmax.xlane.f32.xlu1 %v1808_v51 }
 0x3d9   : > { %v3663_v40 = vpop.f32.mrf.mxu3 }
 0x3da   : > { %v3664_v10 = vadd.f32 %v3663_v40, %v3494_v9  ;;  %v1814_v9 = vmax.f32 %v11333_v62, %v11335_v60 }
 0x3db   : > { %1833 = vmax.xlane.f32.xlu2 %v1832_v52 }
 0x3dc   : > { %v3945_v1 = vadd.f32 %v3881_v63, %v3664_v10  ;;  %v3818_v63 = vld [vmem:[#allocation4 + $0x160] sm:$0xff]  ;;  %v1838_v10 = vmax.f32 %v11505_v32, %v11503_v7  ;;  %v11585_v32 = vpop.f32.mrf.mxu1 }
 0x3dd   : > { %v2226_v51 = vpop.permute.xlu1 %2225 }
 0x3de   : > { %4009 = vst [vmem:[#allocation4 + $0x1d0] sm:$0xff] %v3945_v1  ;;  %v2507_v41 = vsub.f32 %v16162_v33, %v2226_v51  ;;  %v2508_v25 = vsub.f32 %v16163_v24, %v2226_v51  ;;  %v3882_v24 = vmul.f32 %v11515_v5, %v3818_v63  ;;  %v16165_v1 = vld [vmem:[#allocation42_spill] sm:$0xff]  ;;  %v16166_v51 = vld [vmem:[#allocation43_spill] sm:$0xff] }
 0x3df   : > { %v16167_v33 = vsub.f32 %v16165_v1, %v16166_v51  ;;  %v3820_v51 = vld [vmem:[#allocation4 + $0xe8] sm:$0xff]  ;;  %v9668_v5 = vld [vmem:[#allocation2 + $0x180] sm:$0xff] }
 0x3e0   : > { %v2659_v40 = vmul.f32 1.442695, %v2507_v41  ;;  %v2661_v52 = vmul.f32 1.442695, %v2508_v25  ;;  %v3496_v23 = vpop.f32.mrf.mxu2  ;;  %1815 = vmax.xlane.f32.xlu1 %v1814_v9  ;;  %v1820_v25 = vmax.f32 %v11376_v21, %v11378_v47 }
 0x3e1   : > { %v3665_v56 = vpop.f32.mrf.mxu3  ;;  %v2049_v41 = vmul.f32 1.442695, %v16167_v33 }
 0x3e2   : > { %9350 = vpow2.f32 %v2659_v40  ;;  %v3666_v4 = vadd.f32 %v3665_v56, %v3496_v23 }
 0x3e3   : > { %9352 = vpow2.f32 %v2661_v52  ;;  %2270 = vperm.xlu0 %9282, %v11269_v31   ;;  %1839 = vmax.xlane.f32.xlu2 %v1838_v10  ;;  %v3883_v52 = vmul.f32 %v11526_v54, %v3819_v13 }
 0x3e4   : > { %v3946_v15 = vadd.f32 %v3882_v24, %v3666_v4  ;;  %9354 = vpow2.f32 %v2049_v41  ;;  %v11533_v24 = vpop.permute.xlu0 %2240 }
 0x3e6   : > { %4010 = vst [vmem:[#allocation4 + $0x160] sm:$0xff] %v3946_v15 }
 0x3e8   : > { %v9351_v9 = vpop.eup %9350  ;;  %v3499_v23 = vpop.f32.mrf.mxu2  ;;  %1821 = vmax.xlane.f32.xlu1 %v1820_v25 }
 0x3e9   : > { %v9353_v63 = vpop.eup %9352  ;;  %v3668_v40 = vpop.f32.mrf.mxu3  ;;  %v3327_v31 = vpack.c.bf16 %v11475_v26, %v9351_v9 }
 0x3ea   : > { %v3669_v10 = vadd.f32 %v3668_v40, %v3499_v23  ;;  %v3328_v56 = vpack.c.bf16 %v11482_v28, %v9353_v63  ;;  %v11531_v4 = vadd.f32 %v9353_v63, %v9351_v9  ;;  %v11535_v1 = vpop.eup %9354  ;;  %v11538_v23 = vld [vmem:[#allocation2 + $0xf0] sm:$0xff]  ;;  %v11545_v63 = vpop.permute.xlu2 %2265  ;;  %v11548_v40 = vld [vmem:[#allocation2 + $0x40] sm:$0xff] }
 0x3eb   : > { %3513 = vmatmul.bf16.gmra.mxu2 %v3327_v31  ;;  %16170 = vst [vmem:[#allocation20_spill] sm:$0xff] %v11535_v1  ;;  %v3884_v26 = vmul.f32 %v11535_v1, %v3820_v51  ;;  %v16178_v1 = vld [vmem:[#allocation36_spill] sm:$0xff] }
 0x3ec   : > { %16169 = vst [vmem:[#allocation19_spill] sm:$0xff] %v11531_v4  ;;  %v3947_v15 = vadd.f32 %v3883_v52, %v3669_v10  ;;  %3682 = vmatmul.bf16.gmra.mxu3 %v3328_v56  ;;  %v11553_v52 = vld [vmem:[#allocation2 + $0x1e0] sm:$0xff]  ;;  %v16179_v4 = vld [vmem:[#allocation44_spill] sm:$0xff] }
 0x3ed   : > { %16171 = vst [vmem:[#allocation42_spill] sm:$0xff] %v11538_v23 }
 0x3ee   : > { %4011 = vst [vmem:[#allocation4 + $0x1f0] sm:$0xff] %v3947_v15  ;;  %v16174_v15 = vld [vmem:[#allocation30_spill] sm:$0xff] }
 0x3ef   : > { %16172 = vst [vmem:[#allocation43_spill] sm:$0xff] %v11548_v40 }
 0x3f0   : > { %v3501_v33 = vpop.f32.mrf.mxu2  ;;  %16173 = vst [vmem:[#allocation103_spill] sm:$0xff] %v11553_v52 }
 0x3f1   : > { %v3670_v41 = vpop.f32.mrf.mxu3 }
 0x3f2   : > { %v3671_v25 = vadd.f32 %v3670_v41, %v3501_v33  ;;  %v16175_v33 = vld [vmem:[#allocation31_spill] sm:$0xff] }
 0x3f4   : > { %v3948_v13 = vadd.f32 %v3884_v26, %v3671_v25  ;;  %v1807_v28 = vpop.xlane.xlu0 %1806 }
 0x3f5   : > { %v11541_v9 = vmax.f32 %v11538_v23, %v1807_v28 }
 0x3f6   : > { %4012 = vst [vmem:[#allocation4 + $0xe8] sm:$0xff] %v3948_v13 }
 0x3f7   : > { %3281 = vst [vmem:[#allocation2 + $0xf0] sm:$0xff] %v11541_v9 }
 0x3fb   : > { %2300 = vperm.xlu2 %9281, %v11432_v12  }
 0x401   : > { %2290 = vperm.xlu1 %9283, %v11466_v11  }
 0x405   : > { %v1825_v31 = vpop.xlane.xlu2 %1824 }
 0x406   : > { %v11551_v10 = vmax.f32 %v11548_v40, %v1825_v31  ;;  %v1826_v31 = vmax.f32 %v11441_v22, %v11443_v18  ;;  %v1979_v40 = vsub.f32 %v16179_v4, %v9668_v5  ;;  %v16190_v22 = vld [vmem:[#allocation23_spill] sm:$0xff] }
 0x407   : > { %v2251_v56 = vpop.permute.xlu0 %2250 }
 0x408   : > { %3287 = vst [vmem:[#allocation2 + $0x40] sm:$0xff] %v11551_v10  ;;  %v2517_v51 = vsub.f32 %v16174_v15, %v2251_v56  ;;  %v2518_v12 = vsub.f32 %v16175_v33, %v2251_v56  ;;  %v1801_v41 = vpop.xlane.xlu1 %1800  ;;  %v9082_v56 = vld [vmem:[%s10680_s20 + $0xc8] sm:$0xff]  ;;  %v16177_v33 = vld [vmem:[#allocation34_spill] sm:$0xff] }
 0x409   : > { %v11559_v25 = vmax.f32 %v11553_v52, %v1801_v41  ;;  %1382 = vmatmul.bf16.gmra.mxu0 %v9082_v56  ;;  %1551 = vmatmul.bf16.gmra.mxu1 %v9082_v56 }
 0x40a   : > { %v2679_v26 = vmul.f32 1.442695, %v2517_v51  ;;  %v2681_v13 = vmul.f32 1.442695, %v2518_v12 }
 0x40b   : > { %16176 = vst [vmem:[#allocation30_spill] sm:$0xff] %v11559_v25  ;;  %2305 = vperm.xlu2 %9281, %v11559_v25  }
 0x40c   : > { %3279 = vst [vmem:[#allocation2 + $0x1e0] sm:$0xff] %v11559_v25  ;;  %9356 = vpow2.f32 %v2679_v26  ;;  %v9083_v25 = vld [vmem:[%s10680_s20 + $0xd0] sm:$0xff] }
 0x40d   : > { %1827 = vmax.xlane.f32.xlu0 %v1826_v31  ;;  %9358 = vpow2.f32 %v2681_v13  ;;  %v2051_v13 = vmul.f32 1.442695, %v1979_v40 }
 0x40f   : > { %v2256_v15 = vpop.permute.xlu0 %2255 }
 0x410   : > { %v2519_v41 = vsub.f32 %v16177_v33, %v2256_v15  ;;  %v2520_v51 = vsub.f32 %v16178_v1, %v2256_v15  ;;  %v16181_v1 = vld [vmem:[#allocation39_spill] sm:$0xff]  ;;  %v16182_v15 = vld [vmem:[#allocation40_spill] sm:$0xff] }
 0x412   : > { %v2683_v12 = vmul.f32 1.442695, %v2519_v41  ;;  %v2685_v28 = vmul.f32 1.442695, %v2520_v51  ;;  %v11570_v54 = vpop.eup %9356  ;;  %v11581_v41 = vpop.f32.mrf.mxu0 }
 0x413   : > { %v11573_v7 = vpop.eup %9358 }
 0x414   : > { %9360 = vpow2.f32 %v2683_v12  ;;  %v11577_v26 = vadd.f32 %v11573_v7, %v11570_v54  ;;  %v16183_v12 = vld [vmem:[#allocation25_spill] sm:$0xff] }
 0x415   : > { %9362 = vpow2.f32 %v2685_v28  ;;  %v2513_v40 = vsub.f32 %v16183_v12, %v11533_v24 }
 0x416   : > { %16180 = vst [vmem:[#allocation31_spill] sm:$0xff] %v11577_v26  ;;  %9364 = vpow2.f32 %v2051_v13  ;;  %v16184_v26 = vld [vmem:[#allocation26_spill] sm:$0xff] }
 0x417   : > { %v2261_v31 = vpop.permute.xlu0 %2260  ;;  %v2514_v23 = vsub.f32 %v16184_v26, %v11533_v24  ;;  %v2671_v52 = vmul.f32 1.442695, %v2513_v40  ;;  %v16191_v26 = vld [vmem:[#allocation24_spill] sm:$0xff] }
 0x418   : > { %v2521_v56 = vsub.f32 %v16181_v1, %v2261_v31  ;;  %v2522_v33 = vsub.f32 %v16182_v15, %v2261_v31  ;;  %v16186_v1 = vld [vmem:[#allocation47_spill] sm:$0xff] }
 0x419   : > { %v2673_v18 = vmul.f32 1.442695, %v2514_v23  ;;  %1387 = vmatmul.bf16.gmra.mxu0 %v9083_v25  ;;  %1556 = vmatmul.bf16.gmra.mxu1 %v9083_v25  ;;  %v9669_v25 = vld [vmem:[#allocation2 + $0x118] sm:$0xff] }
 0x41a   : > { %v11583_v51 = vpop.eup %9360  ;;  %v2687_v5 = vmul.f32 1.442695, %v2521_v56  ;;  %v2689_v4 = vmul.f32 1.442695, %v2522_v33  ;;  %v16187_v56 = vld [vmem:[#allocation48_spill] sm:$0xff]  ;;  %v1981_v11 = vsub.f32 %v16192_v53, %v9669_v25  ;;  %v1835_v53 = vmax.f32 %v11491_v43, %v11489_v29 }
 0x41b   : > { %v11587_v28 = vpop.eup %9362  ;;  %v16188_v15 = vsub.f32 %v16186_v1, %v16187_v56 }
 0x41c   : > { %9366 = vpow2.f32 %v2687_v5  ;;  %v11595_v31 = vadd.f32 %v11587_v28, %v11583_v51  ;;  %v11601_v12 = vpop.eup %9364 }
 0x41d   : > { %9368 = vpow2.f32 %v2689_v4  ;;  %v2053_v33 = vmul.f32 1.442695, %v16188_v15  ;;  %16189 = vst [vmem:[#allocation36_spill] sm:$0xff] %v11601_v12  ;;  %v3821_v4 = vld [vmem:[#allocation4 + $0x100] sm:$0xff]  ;;  %v11610_v15 = vpop.f32.mrf.mxu0 }
 0x41e   : > { %16185 = vst [vmem:[#allocation34_spill] sm:$0xff] %v11595_v31 }
 0x41f   : > { %9370 = vpow2.f32 %v2053_v33 }
 0x420   : > { %v2236_v13 = vpop.permute.xlu1 %2235  ;;  %9372 = vpow2.f32 %v2671_v52  ;;  %v3885_v52 = vmul.f32 %v11601_v12, %v3821_v4  ;;  %v16200_v12 = vld [vmem:[#allocation27_spill] sm:$0xff] }
 0x421   : > { %v2511_v24 = vsub.f32 %v16190_v22, %v2236_v13  ;;  %v2512_v5 = vsub.f32 %v16191_v26, %v2236_v13  ;;  %2280 = vperm.xlu0 %9282, %v11338_v6   ;;  %9374 = vpow2.f32 %v2673_v18  ;;  %v11613_v13 = vpop.f32.mrf.mxu1  ;;  %v3822_v18 = vld [vmem:[#allocation4 + $0xd0] sm:$0xff]  ;;  %v2515_v29 = vsub.f32 %v16200_v12, %v11445_v14 }
 0x422   : > { %v11606_v31 = vpop.eup %9366 }
 0x423   : > { %v11608_v1 = vpop.eup %9368  ;;  %v2667_v40 = vmul.f32 1.442695, %v2511_v24  ;;  %v2669_v23 = vmul.f32 1.442695, %v2512_v5  ;;  %v3504_v56 = vpop.f32.mrf.mxu2  ;;  %v2055_v5 = vmul.f32 1.442695, %v1981_v11 }
 0x424   : > { %v3673_v22 = vpop.f32.mrf.mxu3  ;;  %v11617_v6 = vadd.f32 %v11608_v1, %v11606_v31 }
 0x425   : > { %9376 = vpow2.f32 %v2667_v40  ;;  %v3674_v33 = vadd.f32 %v3673_v22, %v3504_v56  ;;  %v11620_v26 = vpop.eup %9370  ;;  %v11628_v40 = vpop.f32.mrf.mxu0  ;;  %v16198_v56 = vld [vmem:[#allocation50_spill] sm:$0xff] }
 0x426   : > { %16193 = vst [vmem:[#allocation44_spill] sm:$0xff] %v11617_v6  ;;  %9378 = vpow2.f32 %v2669_v23  ;;  %v11622_v38 = vpop.eup %9372  ;;  %v9670_v23 = vld [vmem:[#allocation2 + $0x98] sm:$0xff] }
 0x427   : > { %v3949_v24 = vadd.f32 %v3885_v52, %v3674_v33  ;;  %16194 = vst [vmem:[#allocation39_spill] sm:$0xff] %v11620_v26  ;;  %v11626_v25 = vpop.eup %9374  ;;  %9380 = vpow2.f32 %v2055_v5  ;;  %v1982_v22 = vsub.f32 %v16198_v56, %v9670_v23  ;;  %v3886_v33 = vmul.f32 %v11620_v26, %v3822_v18  ;;  %v16202_v5 = vld [vmem:[#allocation28_spill] sm:$0xff] }
 0x428   : > { %16195 = vst [vmem:[#allocation40_spill] sm:$0xff] %v11622_v38  ;;  %v2516_v55 = vsub.f32 %v16202_v5, %v11445_v14  ;;  %v2675_v26 = vmul.f32 1.442695, %v2515_v29  ;;  %v11655_v5 = vpop.permute.xlu2 %2275 }
 0x429   : > { %4013 = vst [vmem:[#allocation4 + $0x100] sm:$0xff] %v3949_v24  ;;  %v11633_v24 = vpop.f32.mrf.mxu1  ;;  %v2057_v56 = vmul.f32 1.442695, %v1982_v22 }
 0x42a   : > { %16196 = vst [vmem:[#allocation25_spill] sm:$0xff] %v11626_v25  ;;  %v1847_v18 = vmax.f32 %v11628_v40, %v11633_v24  ;;  %v2677_v12 = vmul.f32 1.442695, %v2516_v55 }
 0x42b   : > { %v9377_v60 = vpop.eup %9376  ;;  %v3506_v6 = vpop.f32.mrf.mxu2  ;;  %1836 = vmax.xlane.f32.xlu1 %v1835_v53  ;;  %16197 = vst [vmem:[#allocation26_spill] sm:$0xff] %v11628_v40  ;;  %9382 = vpow2.f32 %v2057_v56 }
 0x42c   : > { %v9379_v4 = vpop.eup %9378  ;;  %v3675_v11 = vpop.f32.mrf.mxu3  ;;  %v3329_v52 = vpack.c.bf16 %v11622_v38, %v9377_v60  ;;  %16199 = vst [vmem:[#allocation47_spill] sm:$0xff] %v11633_v24  ;;  %9384 = vpow2.f32 %v2675_v26 }
 0x42d   : > { %v3676_v43 = vadd.f32 %v3675_v11, %v3506_v6  ;;  %v3330_v53 = vpack.c.bf16 %v11626_v25, %v9379_v4  ;;  %v11638_v62 = vadd.f32 %v9379_v4, %v9377_v60  ;;  %v11644_v38 = vpop.eup %9380  ;;  %v3823_v6 = vld [vmem:[#allocation4 + $0x70] sm:$0xff]  ;;  %v1844_v60 = vmax.f32 %v11610_v15, %v11613_v13 }
 0x42e   : > { %3518 = vmatmul.bf16.gmra.mxu2 %v3329_v52  ;;  %16203 = vst [vmem:[#allocation23_spill] sm:$0xff] %v11644_v38  ;;  %v3887_v11 = vmul.f32 %v11644_v38, %v3823_v6  ;;  %9386 = vpow2.f32 %v2677_v12 }
 0x42f   : > { %16201 = vst [vmem:[#allocation48_spill] sm:$0xff] %v11638_v62  ;;  %v3950_v23 = vadd.f32 %v3886_v33, %v3676_v43  ;;  %3687 = vmatmul.bf16.gmra.mxu3 %v3330_v53  ;;  %v3824_v33 = vld [vmem:[#allocation4 + $0x168] sm:$0xff] }
 0x431   : > { %4014 = vst [vmem:[#allocation4 + $0xd0] sm:$0xff] %v3950_v23  ;;  %v11649_v29 = vpop.eup %9382 }
 0x432   : > { %16204 = vst [vmem:[#allocation24_spill] sm:$0xff] %v11649_v29  ;;  %v11651_v55 = vpop.eup %9384  ;;  %v3888_v56 = vmul.f32 %v11649_v29, %v3824_v33  ;;  %v3333_v33 = vpack.c.bf16 %v11606_v31, %v11583_v51  ;;  %v11693_v51 = vld [vmem:[#allocation2 + $0x1d0] sm:$0xff] }
 0x433   : > { %v3509_v4 = vpop.f32.mrf.mxu2  ;;  %1848 = vmax.xlane.f32.xlu1 %v1847_v18  ;;  %16205 = vst [vmem:[#allocation49_spill] sm:$0xff] %v11651_v55  ;;  %v3331_v26 = vpack.c.bf16 %v11570_v54, %v11651_v55  ;;  %v11670_v54 = vld [vmem:[#allocation2 + $0x8] sm:$0xff]  ;;  %v9085_v55 = vld [vmem:[%s10680_s20 + $0xe0] sm:$0xff] }
 0x434   : > { %v3678_v14 = vpop.f32.mrf.mxu3  ;;  %1845 = vmax.xlane.f32.xlu2 %v1844_v60  ;;  %v11653_v53 = vpop.eup %9386  ;;  %v11662_v60 = vld [vmem:[#allocation2 + $0x100] sm:$0xff] }
 0x435   : > { %v3679_v43 = vadd.f32 %v3678_v14, %v3509_v4  ;;  %16206 = vst [vmem:[#allocation50_spill] sm:$0xff] %v11653_v53  ;;  %v3332_v12 = vpack.c.bf16 %v11573_v7, %v11653_v53 }
 0x437   : > { %v3951_v22 = vadd.f32 %v3887_v11, %v3679_v43  ;;  %v11668_v43 = vpop.permute.xlu2 %2285  ;;  %v1829_v11 = vmax.f32 %v11452_v49, %v11454_v30 }
 0x439   : > { %4015 = vst [vmem:[#allocation4 + $0x70] sm:$0xff] %v3951_v22 }
 0x43b   : > { %v3511_v52 = vpop.f32.mrf.mxu2 }
 0x43c   : > { %v3680_v23 = vpop.f32.mrf.mxu3 }
 0x43d   : > { %v3681_v18 = vadd.f32 %v3680_v23, %v3511_v52  ;;  %v11680_v52 = vld [vmem:[#allocation2 + $0x128] sm:$0xff]  ;;  %v3334_v23 = vpack.c.bf16 %v11608_v1, %v11587_v28  ;;  %v2524_v28 = vsub.f32 %v11089_v20, %v11545_v63 }
 0x43e   : > { %3523 = vmatmul.bf16.gmra.mxu2 %v3331_v26  ;;  %16207 = vst [vmem:[#allocation27_spill] sm:$0xff] %v11680_v52 }
 0x43f   : > { %v3952_v6 = vadd.f32 %v3888_v56, %v3681_v18  ;;  %3692 = vmatmul.bf16.gmra.mxu3 %v3332_v12  ;;  %v11701_v12 = vld [vmem:[#allocation2 + $0x1f0] sm:$0xff] }
 0x440   : > { %16208 = vst [vmem:[#allocation28_spill] sm:$0xff] %v11701_v12 }
 0x441   : > { %4016 = vst [vmem:[#allocation4 + $0x168] sm:$0xff] %v3952_v6 }
 0x442   : > { %v1819_v4 = vpop.xlane.xlu0 %1818 }
 0x443   : > { %v11665_v14 = vmax.f32 %v11662_v60, %v1819_v4 }
 0x445   : > { %3285 = vst [vmem:[#allocation2 + $0x100] sm:$0xff] %v11665_v14 }
 0x44b   : > { %v1810_v7 = vpop.xlane.xlu1 %1809  ;;  %1830 = vmax.xlane.f32.xlu0 %v1829_v11  ;;  %v2693_v11 = vmul.f32 1.442695, %v2524_v28  ;;  %v11713_v28 = vld [vmem:[#allocation2 + $0xc8] sm:$0xff] }
 0x44c   : > { %v11675_v22 = vmax.f32 %v11670_v54, %v1810_v7  ;;  %2310 = vperm.xlu2 %9281, %v11371_v2   ;;  %v2523_v2 = vsub.f32 %v11091_v8, %v11545_v63  ;;  %v16209_v7 = vld [vmem:[#allocation46_spill] sm:$0xff] }
 0x44e   : > { %3282 = vst [vmem:[#allocation2 + $0x8] sm:$0xff] %v11675_v22  ;;  %3528 = vmatmul.bf16.gmra.mxu2 %v3333_v33  ;;  %v1834_v18 = vpop.xlane.xlu2 %1833  ;;  %v2691_v6 = vmul.f32 1.442695, %v2523_v2 }
 0x44f   : > { %3697 = vmatmul.bf16.gmra.mxu3 %v3334_v23  ;;  %v11688_v56 = vmax.f32 %v11680_v52, %v1834_v18  ;;  %v16210_v23 = vld [vmem:[#allocation45_spill] sm:$0xff] }
 0x450   : > { %9388 = vpow2.f32 %v2691_v6 }
 0x451   : > { %3290 = vst [vmem:[#allocation2 + $0x128] sm:$0xff] %v11688_v56  ;;  %9390 = vpow2.f32 %v2693_v11 }
 0x453   : > { %v1816_v31 = vpop.xlane.xlu1 %1815 }
 0x454   : > { %v11698_v1 = vmax.f32 %v11693_v51, %v1816_v31  ;;  %2315 = vperm.xlu2 %9281, %v11541_v9  }
 0x455   : > { %v2271_v4 = vpop.permute.xlu0 %2270 }
 0x456   : > { %3284 = vst [vmem:[#allocation2 + $0x1d0] sm:$0xff] %v11698_v1  ;;  %v2525_v33 = vsub.f32 %v16209_v7, %v2271_v4  ;;  %v2526_v20 = vsub.f32 %v16210_v23, %v2271_v4  ;;  %v1840_v63 = vpop.xlane.xlu2 %1839  ;;  %2330 = vperm.xlu1 %9283, %v11698_v1   ;;  %v11719_v7 = vpop.f32.mrf.mxu0  ;;  %v9084_v23 = vld [vmem:[%s10680_s20 + $0xd8] sm:$0xff] }
 0x457   : > { %v11710_v9 = vmax.f32 %v11701_v12, %v1840_v63  ;;  %v11722_v63 = vpop.f32.mrf.mxu1  ;;  %1392 = vmatmul.bf16.gmra.mxu0 %v9084_v23  ;;  %1561 = vmatmul.bf16.gmra.mxu1 %v9084_v23  ;;  %v11727_v11 = vpop.eup %9388 }
 0x458   : > { %v2695_v18 = vmul.f32 1.442695, %v2525_v33  ;;  %v2697_v2 = vmul.f32 1.442695, %v2526_v20  ;;  %16211 = vst [vmem:[#allocation46_spill] sm:$0xff] %v11727_v11  ;;  %v9671_v33 = vld [vmem:[#allocation2 + $0x120] sm:$0xff] }
 0x459   : > { %3292 = vst [vmem:[#allocation2 + $0x1f0] sm:$0xff] %v11710_v9  ;;  %v16212_v20 = vld [vmem:[#allocation52_spill] sm:$0xff] }
 0x45a   : > { %9392 = vpow2.f32 %v2695_v18  ;;  %v1983_v18 = vsub.f32 %v16212_v20, %v9671_v33  ;;  %v9672_v33 = vld [vmem:[#allocation2 + $0x150] sm:$0xff] }
 0x45b   : > { %v1822_v31 = vpop.xlane.xlu1 %1821  ;;  %9394 = vpow2.f32 %v2697_v2  ;;  %v11731_v2 = vpop.eup %9390 }
 0x45c   : > { %v11716_v4 = vmax.f32 %v11713_v28, %v1822_v31  ;;  %2320 = vperm.xlu2 %9281, %v11675_v22   ;;  %16213 = vst [vmem:[#allocation45_spill] sm:$0xff] %v11731_v2  ;;  %v2059_v38 = vmul.f32 1.442695, %v1983_v18 }
 0x45e   : > { %3286 = vst [vmem:[#allocation2 + $0xc8] sm:$0xff] %v11716_v4  ;;  %v11737_v23 = vpop.f32.mrf.mxu0  ;;  %9396 = vpow2.f32 %v2059_v38 }
 0x45f   : > { %2295 = vperm.xlu0 %9282, %v11350_v16   ;;  %v11739_v53 = vpop.f32.mrf.mxu1  ;;  %v16216_v16 = vld [vmem:[#allocation53_spill] sm:$0xff] }
 0x460   : > { %v9393_v31 = vpop.eup %9392  ;;  %16215 = vst [vmem:[#allocation104_spill] sm:$0xff] %v11739_v53  ;;  %v1984_v20 = vsub.f32 %v16216_v16, %v9672_v33 }
 0x461   : > { %v9395_v8 = vpop.eup %9394  ;;  %v3335_v26 = vpack.c.bf16 %v9393_v31, %v11727_v11  ;;  %v3825_v11 = vld [vmem:[#allocation4 + $0x158] sm:$0xff] }
 0x462   : > { %v3336_v6 = vpack.c.bf16 %v9395_v8, %v11731_v2  ;;  %v11735_v29 = vadd.f32 %v9395_v8, %v9393_v31  ;;  %v2061_v62 = vmul.f32 1.442695, %v1984_v20 }
 0x463   : > { %3533 = vmatmul.bf16.gmra.mxu2 %v3335_v26 }
 0x464   : > { %16214 = vst [vmem:[#allocation52_spill] sm:$0xff] %v11735_v29  ;;  %3702 = vmatmul.bf16.gmra.mxu3 %v3336_v6  ;;  %v11743_v25 = vpop.eup %9396  ;;  %9398 = vpow2.f32 %v2061_v62  ;;  %v3826_v29 = vld [vmem:[#allocation4 + $0x190] sm:$0xff] }
 0x465   : > { %16217 = vst [vmem:[#allocation53_spill] sm:$0xff] %v11743_v25  ;;  %v3889_v38 = vmul.f32 %v11743_v25, %v3825_v11 }
 0x466   : > { %v11745_v12 = vpop.f32.mrf.mxu0 }
 0x467   : > { %1397 = vmatmul.bf16.gmra.mxu0 %v9085_v55  ;;  %1566 = vmatmul.bf16.gmra.mxu1 %v9085_v55  ;;  %v11747_v8 = vpop.f32.mrf.mxu1 }
 0x46a   : > { %v11752_v20 = vpop.eup %9398 }
 0x46b   : > { %16218 = vst [vmem:[#allocation105_spill] sm:$0xff] %v11752_v20 }
 0x46e   : > { %v3514_v18 = vpop.f32.mrf.mxu2  ;;  %v11755_v11 = vpop.f32.mrf.mxu0 }
 0x46f   : > { %v3683_v26 = vpop.f32.mrf.mxu3  ;;  %16219 = vst [vmem:[#allocation106_spill] sm:$0xff] %v11755_v11 }
 0x470   : > { %v3684_v6 = vadd.f32 %v3683_v26, %v3514_v18  ;;  %v3890_v18 = vmul.f32 %v11752_v20, %v3826_v29  ;;  %v11757_v26 = vpop.f32.mrf.mxu1  ;;  %v11787_v20 = vpop.permute.xlu2 %2300 }
 0x471   : > { %16220 = vst [vmem:[#allocation107_spill] sm:$0xff] %v11757_v26 }
 0x472   : > { %v3953_v31 = vadd.f32 %v3889_v38, %v3684_v6 }
 0x473   : > { %v2291_v2 = vpop.permute.xlu1 %2290 }
 0x474   : > { %4017 = vst [vmem:[#allocation4 + $0x158] sm:$0xff] %v3953_v31  ;;  %v2533_v33 = vsub.f32 %v11178_v42, %v2291_v2  ;;  %v2534_v16 = vsub.f32 %v11180_v45, %v2291_v2  ;;  %v1859_v42 = vmax.f32 %v11755_v11, %v11757_v26  ;;  %v11763_v2 = vld [vmem:[#allocation2 + $0x1f8] sm:$0xff]  ;;  %v1841_v31 = vmax.f32 %v11581_v41, %v11585_v32 }
 0x476   : > { %v2711_v52 = vmul.f32 1.442695, %v2533_v33  ;;  %v2713_v24 = vmul.f32 1.442695, %v2534_v16  ;;  %v3516_v55 = vpop.f32.mrf.mxu2  ;;  %v2527_v33 = vsub.f32 %v11128_v44, %v11655_v5  ;;  %v2528_v16 = vsub.f32 %v11130_v57, %v11655_v5  ;;  %v11792_v44 = vld [vmem:[#allocation2 + $0x1a0] sm:$0xff] }
 0x477   : > { %v3685_v62 = vpop.f32.mrf.mxu3  ;;  %16224 = vst [vmem:[#allocation109_spill] sm:$0xff] %v11792_v44 }
 0x478   : > { %9400 = vpow2.f32 %v2711_v52  ;;  %v3686_v40 = vadd.f32 %v3685_v62, %v3516_v55  ;;  %v1850_v55 = vmax.f32 %v11719_v7, %v11722_v63  ;;  %v2699_v62 = vmul.f32 1.442695, %v2527_v33 }
 0x479   : > { %9402 = vpow2.f32 %v2713_v24 }
 0x47a   : > { %v3954_v6 = vadd.f32 %v3890_v18, %v3686_v40  ;;  %v1853_v40 = vmax.f32 %v11737_v23, %v11739_v53  ;;  %v2701_v18 = vmul.f32 1.442695, %v2528_v16  ;;  %9404 = vpow2.f32 %v2699_v62 }
 0x47c   : > { %4018 = vst [vmem:[#allocation4 + $0x190] sm:$0xff] %v3954_v6  ;;  %9406 = vpow2.f32 %v2701_v18 }
 0x47e   : > { %v11761_v45 = vpop.eup %9400 }
 0x47f   : > { %v11765_v38 = vpop.eup %9402 }
 0x480   : > { %v1828_v52 = vpop.xlane.xlu0 %1827  ;;  %1860 = vmax.xlane.f32.xlu1 %v1859_v42  ;;  %v11769_v24 = vadd.f32 %v11765_v38, %v11761_v45  ;;  %v11790_v57 = vpop.eup %9404 }
 0x481   : > { %v11772_v29 = vmax.f32 %v11763_v2, %v1828_v52  ;;  %v16222_v52 = vld [vmem:[#allocation51_spill] sm:$0xff] }
 0x482   : > { %16221 = vst [vmem:[#allocation108_spill] sm:$0xff] %v11769_v24  ;;  %v11794_v5 = vpop.eup %9406  ;;  %v16228_v24 = vld [vmem:[#allocation55_spill] sm:$0xff] }
 0x483   : > { %3288 = vst [vmem:[#allocation2 + $0x1f8] sm:$0xff] %v11772_v29 }
 0x484   : > { %16223 = vst [vmem:[#allocation51_spill] sm:$0xff] %v11790_v57 }
 0x485   : > { %1854 = vmax.xlane.f32.xlu2 %v1853_v40  ;;  %16225 = vst [vmem:[#allocation110_spill] sm:$0xff] %v11794_v5 }
 0x489   : > { %1842 = vmax.xlane.f32.xlu0 %v1841_v31 }
 0x491   : > { %1851 = vmax.xlane.f32.xlu0 %v1850_v55  ;;  %v11797_v55 = vpop.permute.xlu2 %2305 }
 0x493   : > { %v2281_v6 = vpop.permute.xlu0 %2280 }
 0x494   : > { %v2529_v42 = vsub.f32 %v11142_v50, %v2281_v6  ;;  %v2530_v40 = vsub.f32 %v16222_v52, %v2281_v6  ;;  %v11806_v6 = vpop.f32.mrf.mxu1  ;;  %v16227_v52 = vld [vmem:[#allocation54_spill] sm:$0xff] }
 0x496   : > { %v2703_v31 = vmul.f32 1.442695, %v2529_v42  ;;  %v2705_v25 = vmul.f32 1.442695, %v2530_v40  ;;  %v2532_v40 = vsub.f32 %v16227_v52, %v11668_v43 }
 0x498   : > { %9408 = vpow2.f32 %v2703_v31  ;;  %v11813_v31 = vpop.f32.mrf.mxu0 }
 0x499   : > { %9410 = vpow2.f32 %v2705_v25  ;;  %2335 = vperm.xlu1 %9283, %v11665_v14   ;;  %v2531_v14 = vsub.f32 %v11158_v35, %v11668_v43 }
 0x49b   : > { %v2707_v35 = vmul.f32 1.442695, %v2531_v14  ;;  %v16231_v14 = vld [vmem:[#allocation56_spill] sm:$0xff] }
 0x49d   : > { %2340 = vperm.xlu2 %9281, %v11716_v4   ;;  %9412 = vpow2.f32 %v2707_v35 }
 0x49e   : > { %v9409_v50 = vpop.eup %9408  ;;  %v1837_v33 = vpop.xlane.xlu1 %1836 }
 0x49f   : > { %v9411_v16 = vpop.eup %9410  ;;  %v11800_v62 = vmax.f32 %v11792_v44, %v1837_v33  ;;  %v3337_v25 = vpack.c.bf16 %v9409_v50, %v11790_v57  ;;  %v9673_v33 = vld [vmem:[#allocation2 + $0x108] sm:$0xff]  ;;  %v2709_v44 = vmul.f32 1.442695, %v2532_v40 }
 0x4a0   : > { %v3338_v18 = vpack.c.bf16 %v9411_v16, %v11794_v5  ;;  %v11808_v42 = vadd.f32 %v9411_v16, %v9409_v50  ;;  %v1985_v57 = vsub.f32 %v16228_v24, %v9673_v33  ;;  %v11817_v5 = vld [vmem:[#allocation2 + $0x78] sm:$0xff]  ;;  %v11819_v16 = vld [vmem:[#allocation2 + $0x70] sm:$0xff]  ;;  %v9086_v24 = vld [vmem:[%s10680_s20 + $0xe8] sm:$0xff]  ;;  %v11833_v40 = vpop.f32.mrf.mxu0 }
 0x4a1   : > { %3291 = vst [vmem:[#allocation2 + $0x1a0] sm:$0xff] %v11800_v62  ;;  %3538 = vmatmul.bf16.gmra.mxu2 %v3337_v25  ;;  %9414 = vpow2.f32 %v2709_v44  ;;  %1402 = vmatmul.bf16.gmra.mxu0 %v9086_v24 }
 0x4a2   : > { %16226 = vst [vmem:[#allocation111_spill] sm:$0xff] %v11808_v42  ;;  %3707 = vmatmul.bf16.gmra.mxu3 %v3338_v18  ;;  %v2063_v50 = vmul.f32 1.442695, %v1985_v57  ;;  %v11831_v57 = vpop.f32.mrf.mxu1  ;;  %1571 = vmatmul.bf16.gmra.mxu1 %v9086_v24 }
 0x4a3   : > { %16229 = vst [vmem:[#allocation54_spill] sm:$0xff] %v11817_v5  ;;  %v11835_v33 = vpop.eup %9412 }
 0x4a4   : > { %16230 = vst [vmem:[#allocation55_spill] sm:$0xff] %v11819_v16  ;;  %9416 = vpow2.f32 %v2063_v50  ;;  %v3339_v50 = vpack.c.bf16 %v11761_v45, %v11835_v33 }
 0x4a5   : > { %2325 = vperm.xlu0 %9282, %v11458_v37   ;;  %v9674_v37 = vld [vmem:[#allocation2 + $0x60] sm:$0xff]  ;;  %16232 = vst [vmem:[#allocation56_spill] sm:$0xff] %v11831_v57 }
 0x4a6   : > { %v1849_v43 = vpop.xlane.xlu1 %1848  ;;  %v1986_v18 = vsub.f32 %v16231_v14, %v9674_v37  ;;  %16233 = vst [vmem:[#allocation112_spill] sm:$0xff] %v11833_v40 }
 0x4a7   : > { %v1846_v52 = vpop.xlane.xlu2 %1845  ;;  %v11822_v25 = vmax.f32 %v11819_v16, %v1849_v43  ;;  %16234 = vst [vmem:[#allocation113_spill] sm:$0xff] %v11835_v33  ;;  %v11837_v43 = vpop.eup %9414  ;;  %v3827_v16 = vld [vmem:[#allocation4 + $0x88] sm:$0xff] }
 0x4a8   : > { %v11825_v42 = vmax.f32 %v11817_v5, %v1846_v52  ;;  %v2065_v35 = vmul.f32 1.442695, %v1986_v18  ;;  %16235 = vst [vmem:[#allocation114_spill] sm:$0xff] %v11837_v43  ;;  %v3340_v5 = vpack.c.bf16 %v11765_v38, %v11837_v43 }
 0x4a9   : > { %3295 = vst [vmem:[#allocation2 + $0x70] sm:$0xff] %v11822_v25 }
 0x4aa   : > { %3294 = vst [vmem:[#allocation2 + $0x78] sm:$0xff] %v11825_v42  ;;  %v11841_v52 = vpop.eup %9416  ;;  %9418 = vpow2.f32 %v2065_v35  ;;  %v11848_v33 = vpop.f32.mrf.mxu1 }
 0x4ab   : > { %16236 = vst [vmem:[#allocation115_spill] sm:$0xff] %v11841_v52  ;;  %v3891_v45 = vmul.f32 %v11841_v52, %v3827_v16  ;;  %v3828_v16 = vld [vmem:[#allocation4 + $0x60] sm:$0xff] }
 0x4ac   : > { %16237 = vst [vmem:[#allocation116_spill] sm:$0xff] %v11848_v33 }
 0x4af   : > { %v2311_v44 = vpop.permute.xlu2 %2310 }
 0x4b0   : > { %v2541_v37 = vsub.f32 %v11233_v48, %v2311_v44  ;;  %v2542_v14 = vsub.f32 %v11235_v58, %v2311_v44  ;;  %v11850_v58 = vpop.f32.mrf.mxu0  ;;  %v16239_v44 = vld [vmem:[#allocation59_spill] sm:$0xff] }
 0x4b1   : > { %v3519_v24 = vpop.f32.mrf.mxu2  ;;  %3543 = vmatmul.bf16.gmra.mxu2 %v3339_v50  ;;  %16238 = vst [vmem:[#allocation117_spill] sm:$0xff] %v11850_v58  ;;  %v16240_v38 = vsub.f32 %v16239_v44, %v11207_v59  ;;  %v11855_v50 = vpop.eup %9418 }
 0x4b2   : > { %v2727_v18 = vmul.f32 1.442695, %v2541_v37  ;;  %v2729_v26 = vmul.f32 1.442695, %v2542_v14  ;;  %v3688_v11 = vpop.f32.mrf.mxu3  ;;  %3712 = vmatmul.bf16.gmra.mxu3 %v3340_v5  ;;  %16241 = vst [vmem:[#allocation59_spill] sm:$0xff] %v11855_v50  ;;  %v3892_v44 = vmul.f32 %v11855_v50, %v3828_v16 }
 0x4b3   : > { %v3689_v53 = vadd.f32 %v3688_v11, %v3519_v24  ;;  %v2067_v43 = vmul.f32 1.442695, %v16240_v38 }
 0x4b4   : > { %9420 = vpow2.f32 %v2727_v18 }
 0x4b5   : > { %9422 = vpow2.f32 %v2729_v26  ;;  %v3955_v48 = vadd.f32 %v3891_v45, %v3689_v53  ;;  %v9675_v53 = vld [vmem:[#allocation2 + $0x188] sm:$0xff] }
 0x4b6   : > { %9424 = vpow2.f32 %v2067_v43  ;;  %v1988_v26 = vsub.f32 %v11248_v3, %v9675_v53 }
 0x4b7   : > { %4019 = vst [vmem:[#allocation4 + $0x88] sm:$0xff] %v3955_v48  ;;  %v2316_v35 = vpop.permute.xlu2 %2315 }
 0x4b8   : > { %v2543_v5 = vsub.f32 %v11279_v0, %v2316_v35  ;;  %v2544_v11 = vsub.f32 %v11281_v46, %v2316_v35  ;;  %v11865_v0 = vld [vmem:[#allocation2 + $0x20] sm:$0xff]  ;;  %v2069_v38 = vmul.f32 1.442695, %v1988_v26  ;;  %v11871_v35 = vpop.f32.mrf.mxu1 }
 0x4b9   : > { %v3521_v37 = vpop.f32.mrf.mxu2 }
 0x4ba   : > { %v11859_v14 = vpop.eup %9420  ;;  %v2731_v24 = vmul.f32 1.442695, %v2543_v5  ;;  %v2733_v18 = vmul.f32 1.442695, %v2544_v11  ;;  %v3690_v59 = vpop.f32.mrf.mxu3 }
 0x4bb   : > { %v11862_v45 = vpop.eup %9422  ;;  %v3691_v48 = vadd.f32 %v3690_v59, %v3521_v37  ;;  %v11873_v5 = vpop.f32.mrf.mxu0  ;;  %v3829_v59 = vld [vmem:[#allocation4 + $0x68] sm:$0xff] }
 0x4bc   : > { %9426 = vpow2.f32 %v2731_v24  ;;  %v11869_v46 = vadd.f32 %v11862_v45, %v11859_v14  ;;  %v11878_v37 = vpop.eup %9424 }
 0x4bd   : > { %9428 = vpow2.f32 %v2733_v18  ;;  %v3956_v43 = vadd.f32 %v3892_v44, %v3691_v48  ;;  %16243 = vst [vmem:[#allocation119_spill] sm:$0xff] %v11878_v37  ;;  %v1868_v48 = vmax.f32 %v11850_v58, %v11848_v33  ;;  %v3893_v26 = vmul.f32 %v11878_v37, %v3829_v59  ;;  %v16249_v37 = vld [vmem:[#allocation61_spill] sm:$0xff] }
 0x4be   : > { %16242 = vst [vmem:[#allocation118_spill] sm:$0xff] %v11869_v46  ;;  %v1831_v3 = vpop.xlane.xlu0 %1830  ;;  %9430 = vpow2.f32 %v2069_v38  ;;  %v1865_v46 = vmax.f32 %v11833_v40, %v11831_v57 }
 0x4bf   : > { %4020 = vst [vmem:[#allocation4 + $0x60] sm:$0xff] %v3956_v43  ;;  %v11876_v11 = vmax.f32 %v11865_v0, %v1831_v3  ;;  %v2321_v16 = vpop.permute.xlu2 %2320  ;;  %v9676_v43 = vld [vmem:[#allocation2 + $0x138] sm:$0xff] }
 0x4c0   : > { %v2545_v53 = vsub.f32 %v11291_v61, %v2321_v16  ;;  %v2546_v24 = vsub.f32 %v11293_v39, %v2321_v16  ;;  %v1989_v3 = vsub.f32 %v11255_v34, %v9676_v43 }
 0x4c1   : > { %3289 = vst [vmem:[#allocation2 + $0x20] sm:$0xff] %v11876_v11  ;;  %v3524_v18 = vpop.f32.mrf.mxu2 }
 0x4c2   : > { %v11887_v44 = vpop.eup %9426  ;;  %v2735_v52 = vmul.f32 1.442695, %v2545_v53  ;;  %v2737_v61 = vmul.f32 1.442695, %v2546_v24  ;;  %v3693_v50 = vpop.f32.mrf.mxu3  ;;  %v2071_v58 = vmul.f32 1.442695, %v1989_v3 }
 0x4c3   : > { %v11890_v39 = vpop.eup %9428  ;;  %v3694_v16 = vadd.f32 %v3693_v50, %v3524_v18  ;;  %1869 = vmax.xlane.f32.xlu1 %v1868_v48  ;;  %v11901_v53 = vpop.f32.mrf.mxu1  ;;  %v3830_v50 = vld [vmem:[#allocation4 + $0xd8] sm:$0xff]  ;;  %v9677_v18 = vld [vmem:[#allocation2 + $0x140] sm:$0xff] }
 0x4c4   : > { %9432 = vpow2.f32 %v2735_v52  ;;  %v11897_v33 = vadd.f32 %v11890_v39, %v11887_v44  ;;  %v11899_v34 = vpop.eup %9430  ;;  %16246 = vst [vmem:[#allocation122_spill] sm:$0xff] %v11901_v53  ;;  %v11903_v24 = vpop.f32.mrf.mxu0  ;;  %v1990_v48 = vsub.f32 %v11271_v36, %v9677_v18 }
 0x4c5   : > { %v3957_v38 = vadd.f32 %v3893_v26, %v3694_v16  ;;  %9434 = vpow2.f32 %v2737_v61  ;;  %16245 = vst [vmem:[#allocation121_spill] sm:$0xff] %v11899_v34  ;;  %v3894_v3 = vmul.f32 %v11899_v34, %v3830_v50  ;;  %v16248_v61 = vld [vmem:[#allocation60_spill] sm:$0xff] }
 0x4c6   : > { %16244 = vst [vmem:[#allocation120_spill] sm:$0xff] %v11897_v33  ;;  %1866 = vmax.xlane.f32.xlu2 %v1865_v46  ;;  %9436 = vpow2.f32 %v2071_v58  ;;  %v2537_v16 = vsub.f32 %v16248_v61, %v11787_v20  ;;  %v2538_v33 = vsub.f32 %v16249_v37, %v11787_v20  ;;  %v1856_v58 = vmax.f32 %v11745_v12, %v11747_v8  ;;  %v16252_v37 = vld [vmem:[#allocation57_spill] sm:$0xff] }
 0x4c7   : > { %4021 = vst [vmem:[#allocation4 + $0x68] sm:$0xff] %v3957_v38  ;;  %v1874_v38 = vmax.f32 %v11903_v24, %v11901_v53  ;;  %v2073_v50 = vmul.f32 1.442695, %v1990_v48 }
 0x4c8   : > { %16247 = vst [vmem:[#allocation123_spill] sm:$0xff] %v11903_v24  ;;  %v2719_v18 = vmul.f32 1.442695, %v2537_v16  ;;  %v2721_v61 = vmul.f32 1.442695, %v2538_v33  ;;  %v1862_v16 = vmax.f32 %v11813_v31, %v11806_v6 }
 0x4c9   : > { %v3526_v52 = vpop.f32.mrf.mxu2  ;;  %9438 = vpow2.f32 %v2073_v50 }
 0x4ca   : > { %v11905_v59 = vpop.eup %9432  ;;  %v3695_v43 = vpop.f32.mrf.mxu3  ;;  %9440 = vpow2.f32 %v2719_v18 }
 0x4cb   : > { %v3696_v26 = vadd.f32 %v3695_v43, %v3526_v52  ;;  %v11909_v46 = vpop.eup %9434  ;;  %v3831_v43 = vld [vmem:[#allocation4 + $0xf0] sm:$0xff]  ;;  %9442 = vpow2.f32 %v2721_v61  ;;  %v16258_v61 = vld [vmem:[#allocation74_spill] sm:$0xff] }
 0x4cc   : > { %v11921_v36 = vadd.f32 %v11909_v46, %v11905_v59  ;;  %v11923_v52 = vpop.eup %9436 }
 0x4cd   : > { %v3958_v57 = vadd.f32 %v3894_v3, %v3696_v26  ;;  %16251 = vst [vmem:[#allocation61_spill] sm:$0xff] %v11923_v52  ;;  %v16253_v3 = vld [vmem:[#allocation58_spill] sm:$0xff] }
 0x4ce   : > { %16250 = vst [vmem:[#allocation60_spill] sm:$0xff] %v11921_v36  ;;  %1875 = vmax.xlane.f32.xlu2 %v1874_v38  ;;  %v3895_v36 = vmul.f32 %v11923_v52, %v3831_v43 }
 0x4cf   : > { %4022 = vst [vmem:[#allocation4 + $0xd8] sm:$0xff] %v3958_v57  ;;  %1857 = vmax.xlane.f32.xlu0 %v1856_v58  ;;  %v11930_v33 = vpop.eup %9438  ;;  %v3832_v58 = vld [vmem:[#allocation4 + $0x80] sm:$0xff] }
 0x4d0   : > { %16254 = vst [vmem:[#allocation57_spill] sm:$0xff] %v11930_v33 }
 0x4d1   : > { %v3529_v34 = vpop.f32.mrf.mxu2  ;;  %v2296_v40 = vpop.permute.xlu0 %2295 }
 0x4d2   : > { %v3698_v20 = vpop.f32.mrf.mxu3  ;;  %v2535_v26 = vsub.f32 %v16252_v37, %v2296_v40  ;;  %v2536_v53 = vsub.f32 %v16253_v3, %v2296_v40  ;;  %v11932_v40 = vpop.eup %9440 }
 0x4d3   : > { %v3699_v24 = vadd.f32 %v3698_v20, %v3529_v34  ;;  %16255 = vst [vmem:[#allocation58_spill] sm:$0xff] %v11932_v40  ;;  %v11934_v43 = vpop.eup %9442 }
 0x4d4   : > { %v2715_v48 = vmul.f32 1.442695, %v2535_v26  ;;  %v2717_v57 = vmul.f32 1.442695, %v2536_v53  ;;  %16256 = vst [vmem:[#allocation124_spill] sm:$0xff] %v11934_v43  ;;  %v3896_v53 = vmul.f32 %v11930_v33, %v3832_v58  ;;  %v2540_v58 = vsub.f32 %v11227_v17, %v11797_v55 }
 0x4d5   : > { %v3959_v38 = vadd.f32 %v3895_v36, %v3699_v24  ;;  %v16257_v36 = vld [vmem:[#allocation73_spill] sm:$0xff]  ;;  %v1871_v33 = vmax.f32 %v11873_v5, %v11871_v35 }
 0x4d6   : > { %9444 = vpow2.f32 %v2715_v48  ;;  %v16259_v20 = vsub.f32 %v16257_v36, %v16258_v61 }
 0x4d7   : > { %4023 = vst [vmem:[#allocation4 + $0xf0] sm:$0xff] %v3959_v38  ;;  %9446 = vpow2.f32 %v2717_v57  ;;  %1863 = vmax.xlane.f32.xlu0 %v1862_v16  ;;  %v2539_v57 = vsub.f32 %v11225_v27, %v11797_v55  ;;  %v9087_v27 = vld [vmem:[%s10680_s20 + $0xf0] sm:$0xff] }
 0x4d8   : > { %v2075_v37 = vmul.f32 1.442695, %v16259_v20  ;;  %1407 = vmatmul.bf16.gmra.mxu0 %v9087_v27  ;;  %1576 = vmatmul.bf16.gmra.mxu1 %v9087_v27 }
 0x4d9   : > { %v3531_v50 = vpop.f32.mrf.mxu2 }
 0x4da   : > { %v3700_v34 = vpop.f32.mrf.mxu3  ;;  %9448 = vpow2.f32 %v2075_v37 }
 0x4db   : > { %v3701_v18 = vadd.f32 %v3700_v34, %v3531_v50  ;;  %v9678_v50 = vld [vmem:[#allocation2 + $0x1a8] sm:$0xff]  ;;  %v16261_v34 = vld [vmem:[#allocation65_spill] sm:$0xff] }
 0x4dc   : > { %v9445_v24 = vpop.eup %9444  ;;  %2350 = vperm.xlu1 %9283, %v11772_v29   ;;  %v1992_v29 = vsub.f32 %v16261_v34, %v9678_v50 }
 0x4dd   : > { %v9447_v26 = vpop.eup %9446  ;;  %v3960_v3 = vadd.f32 %v3896_v53, %v3701_v18  ;;  %v3341_v48 = vpack.c.bf16 %v11932_v40, %v9445_v24  ;;  %v2723_v18 = vmul.f32 1.442695, %v2539_v57  ;;  %v2725_v53 = vmul.f32 1.442695, %v2540_v58  ;;  %v3834_v58 = vld [vmem:[#allocation4 + $0x180] sm:$0xff] }
 0x4de   : > { %v3342_v38 = vpack.c.bf16 %v11934_v43, %v9447_v26  ;;  %v11945_v16 = vadd.f32 %v9447_v26, %v9445_v24  ;;  %v2077_v36 = vmul.f32 1.442695, %v1992_v29  ;;  %v3833_v24 = vld [vmem:[#allocation4 + $0x78] sm:$0xff]  ;;  %v11956_v26 = vpop.permute.xlu1 %2330  ;;  %v9680_v40 = vld [vmem:[#allocation2 + $0x160] sm:$0xff] }
 0x4df   : > { %4024 = vst [vmem:[#allocation4 + $0x80] sm:$0xff] %v3960_v3  ;;  %3548 = vmatmul.bf16.gmra.mxu2 %v3341_v48  ;;  %9450 = vpow2.f32 %v2723_v18 }
 0x4e0   : > { %16260 = vst [vmem:[#allocation73_spill] sm:$0xff] %v11945_v16  ;;  %3717 = vmatmul.bf16.gmra.mxu3 %v3342_v38  ;;  %v11952_v61 = vpop.eup %9448  ;;  %9452 = vpow2.f32 %v2725_v53  ;;  %v11971_v53 = vld [vmem:[#allocation2 + $0xb8] sm:$0xff] }
 0x4e1   : > { %16262 = vst [vmem:[#allocation74_spill] sm:$0xff] %v11952_v61  ;;  %9454 = vpow2.f32 %v2077_v36  ;;  %v3897_v37 = vmul.f32 %v11952_v61, %v3833_v24  ;;  %v9088_v36 = vld [vmem:[%s10680_s20 + $0xf8] sm:$0xff] }
 0x4e2   : > { %16266 = vst [vmem:[#allocation127_spill] sm:$0xff] %v11971_v53 }
 0x4e4   : > { %2355 = vperm.xlu1 %9283, %v11876_v11  }
 0x4e5   : > { %v11959_v48 = vpop.eup %9450 }
 0x4e6   : > { %2360 = vperm.xlu2 %9281, %v11688_v56   ;;  %v3534_v17 = vpop.f32.mrf.mxu2  ;;  %16263 = vst [vmem:[#allocation65_spill] sm:$0xff] %v11959_v48  ;;  %v11961_v57 = vpop.eup %9452  ;;  %v3343_v56 = vpack.c.bf16 %v11859_v14, %v11959_v48 }
 0x4e7   : > { %v3703_v55 = vpop.f32.mrf.mxu3  ;;  %16264 = vst [vmem:[#allocation125_spill] sm:$0xff] %v11961_v57  ;;  %v11965_v38 = vpop.eup %9454  ;;  %v3344_v50 = vpack.c.bf16 %v11862_v45, %v11961_v57 }
 0x4e8   : > { %v3704_v20 = vadd.f32 %v3703_v55, %v3534_v17  ;;  %16265 = vst [vmem:[#allocation126_spill] sm:$0xff] %v11965_v38  ;;  %v3898_v18 = vmul.f32 %v11965_v38, %v3834_v58  ;;  %1412 = vmatmul.bf16.gmra.mxu0 %v9088_v36  ;;  %1581 = vmatmul.bf16.gmra.mxu1 %v9088_v36  ;;  %v11983_v55 = vld [vmem:[#allocation2 + $0xe8] sm:$0xff]  ;;  %v11993_v58 = vpop.f32.mrf.mxu0 }
 0x4ea   : > { %v3961_v3 = vadd.f32 %v3897_v37, %v3704_v20 }
 0x4eb   : > { %2345 = vperm.xlu0 %9282, %v11551_v10  }
 0x4ec   : > { %4025 = vst [vmem:[#allocation4 + $0x78] sm:$0xff] %v3961_v3  ;;  %v3345_v3 = vpack.c.bf16 %v11905_v59, %v11887_v44  ;;  %v12002_v44 = vld [vmem:[#allocation2 + $0x90] sm:$0xff] }
 0x4ee   : > { %2365 = vperm.xlu2 %9281, %v11800_v62   ;;  %v3536_v34 = vpop.f32.mrf.mxu2  ;;  %v11977_v62 = vld [vmem:[#allocation2 + $0x1d8] sm:$0xff] }
 0x4ef   : > { %3553 = vmatmul.bf16.gmra.mxu2 %v3343_v56  ;;  %v3705_v10 = vpop.f32.mrf.mxu3  ;;  %16267 = vst [vmem:[#allocation128_spill] sm:$0xff] %v11977_v62  ;;  %v11991_v56 = vpop.f32.mrf.mxu1 }
 0x4f0   : > { %3722 = vmatmul.bf16.gmra.mxu3 %v3344_v50  ;;  %v3706_v29 = vadd.f32 %v3705_v10, %v3536_v34  ;;  %v3346_v50 = vpack.c.bf16 %v11909_v46, %v11890_v39 }
 0x4f2   : > { %v3962_v27 = vadd.f32 %v3898_v18, %v3706_v29 }
 0x4f3   : > { %v1861_v14 = vpop.xlane.xlu1 %1860 }
 0x4f4   : > { %v11975_v24 = vmax.f32 %v11971_v53, %v1861_v14  ;;  %4026 = vst [vmem:[#allocation4 + $0x180] sm:$0xff] %v3962_v27  ;;  %v12010_v14 = vpop.f32.mrf.mxu0  ;;  %v16277_v53 = vld [vmem:[#allocation68_spill] sm:$0xff] }
 0x4f6   : > { %3299 = vst [vmem:[#allocation2 + $0xb8] sm:$0xff] %v11975_v24 }
 0x4f7   : > { %v12008_v46 = vpop.f32.mrf.mxu1 }
 0x4f8   : > { %v1855_v45 = vpop.xlane.xlu2 %1854 }
 0x4f9   : > { %v11981_v17 = vmax.f32 %v11977_v62, %v1855_v45 }
 0x4fb   : > { %3297 = vst [vmem:[#allocation2 + $0x1d8] sm:$0xff] %v11981_v17 }
 0x4fc   : > { %v1843_v20 = vpop.xlane.xlu0 %1842  ;;  %v12026_v34 = vpop.f32.mrf.mxu0 }
 0x4fd   : > { %v11987_v37 = vmax.f32 %v11983_v55, %v1843_v20 }
 0x4ff   : > { %3293 = vst [vmem:[#allocation2 + $0xe8] sm:$0xff] %v11987_v37  ;;  %3558 = vmatmul.bf16.gmra.mxu2 %v3345_v3  ;;  %v16268_v3 = vld [vmem:[#allocation81_spill] sm:$0xff] }
 0x500   : > { %3727 = vmatmul.bf16.gmra.mxu3 %v3346_v50  ;;  %v2341_v10 = vpop.permute.xlu2 %2340 }
 0x501   : > { %v2553_v29 = vsub.f32 %v11376_v21, %v2341_v10  ;;  %v2554_v18 = vsub.f32 %v11378_v47, %v2341_v10  ;;  %v1877_v10 = vmax.f32 %v11993_v58, %v11991_v56 }
 0x503   : > { %v2751_v59 = vmul.f32 1.442695, %v2553_v29  ;;  %v2753_v36 = vmul.f32 1.442695, %v2554_v18 }
 0x504   : > { %v1852_v27 = vpop.xlane.xlu0 %1851 }
 0x505   : > { %9456 = vpow2.f32 %v2751_v59  ;;  %v12005_v39 = vmax.f32 %v12002_v44, %v1852_v27 }
 0x506   : > { %9458 = vpow2.f32 %v2753_v36  ;;  %v16270_v36 = vld [vmem:[#allocation77_spill] sm:$0xff] }
 0x507   : > { %3296 = vst [vmem:[#allocation2 + $0x90] sm:$0xff] %v12005_v39  ;;  %v2549_v27 = vsub.f32 %v16270_v36, %v11956_v26 }
 0x508   : > { %16271 = vst [vmem:[#allocation77_spill] sm:$0xff] %v12026_v34 }
 0x509   : > { %v2743_v36 = vmul.f32 1.442695, %v2549_v27  ;;  %v9679_v27 = vld [vmem:[#allocation2 + $0x28] sm:$0xff] }
 0x50b   : > { %v12012_v45 = vpop.eup %9456  ;;  %v2336_v21 = vpop.permute.xlu1 %2335 }
 0x50c   : > { %v12014_v47 = vpop.eup %9458  ;;  %v2551_v20 = vsub.f32 %v11352_v19, %v2336_v21  ;;  %v2552_v50 = vsub.f32 %v16268_v3, %v2336_v21  ;;  %v12028_v19 = vpop.f32.mrf.mxu1  ;;  %v16273_v21 = vld [vmem:[#allocation78_spill] sm:$0xff] }
 0x50d   : > { %v12022_v29 = vadd.f32 %v12014_v47, %v12012_v45  ;;  %16272 = vst [vmem:[#allocation129_spill] sm:$0xff] %v12028_v19  ;;  %v2550_v3 = vsub.f32 %v16273_v21, %v11956_v26  ;;  %v16278_v26 = vld [vmem:[#allocation69_spill] sm:$0xff] }
 0x50e   : > { %v2747_v18 = vmul.f32 1.442695, %v2551_v20  ;;  %v2749_v59 = vmul.f32 1.442695, %v2552_v50  ;;  %1878 = vmax.xlane.f32.xlu1 %v1877_v10  ;;  %v1883_v20 = vmax.f32 %v12026_v34, %v12028_v19  ;;  %v16274_v50 = vld [vmem:[#allocation82_spill] sm:$0xff]  ;;  %v16275_v10 = vld [vmem:[#allocation83_spill] sm:$0xff] }
 0x50f   : > { %16269 = vst [vmem:[#allocation81_spill] sm:$0xff] %v12022_v29  ;;  %v2745_v52 = vmul.f32 1.442695, %v2550_v3  ;;  %v3840_v19 = vld [vmem:[#allocation4 + $0xa8] sm:$0xff] }
 0x510   : > { %9460 = vpow2.f32 %v2747_v18  ;;  %v16276_v18 = vsub.f32 %v16274_v50, %v16275_v10  ;;  %v16280_v50 = vld [vmem:[#allocation75_spill] sm:$0xff] }
 0x511   : > { %9462 = vpow2.f32 %v2749_v59  ;;  %v1994_v3 = vsub.f32 %v16280_v50, %v9679_v27  ;;  %v16285_v50 = vld [vmem:[#allocation76_spill] sm:$0xff] }
 0x512   : > { %v2079_v59 = vmul.f32 1.442695, %v16276_v18 }
 0x513   : > { %v2081_v10 = vmul.f32 1.442695, %v1994_v3  ;;  %v16286_v3 = vld [vmem:[#allocation79_spill] sm:$0xff] }
 0x514   : > { %9464 = vpow2.f32 %v2079_v59  ;;  %v3835_v59 = vld [vmem:[#allocation4 + $0x18] sm:$0xff] }
 0x515   : > { %1872 = vmax.xlane.f32.xlu0 %v1871_v33  ;;  %9466 = vpow2.f32 %v2743_v36  ;;  %v1880_v33 = vmax.f32 %v12010_v14, %v12008_v46 }
 0x516   : > { %v9461_v61 = vpop.eup %9460  ;;  %9468 = vpow2.f32 %v2745_v52 }
 0x517   : > { %v9463_v38 = vpop.eup %9462  ;;  %v2326_v29 = vpop.permute.xlu0 %2325  ;;  %1884 = vmax.xlane.f32.xlu2 %v1883_v20 }
 0x518   : > { %v2547_v57 = vsub.f32 %v16277_v53, %v2326_v29  ;;  %v2548_v21 = vsub.f32 %v16278_v26, %v2326_v29  ;;  %v12041_v48 = vadd.f32 %v9463_v38, %v9461_v61 }
 0x51a   : > { %16279 = vst [vmem:[#allocation78_spill] sm:$0xff] %v12041_v48  ;;  %v2739_v62 = vmul.f32 1.442695, %v2547_v57  ;;  %v2741_v16 = vmul.f32 1.442695, %v2548_v21  ;;  %v12046_v20 = vpop.eup %9464  ;;  %v16287_v48 = vsub.f32 %v16285_v50, %v16286_v3  ;;  %v3350_v50 = vpack.c.bf16 %v12014_v47, %v9463_v38  ;;  %v12073_v3 = vld [vmem:[#allocation2 + $0x1c8] sm:$0xff] }
 0x51b   : > { %16281 = vst [vmem:[#allocation82_spill] sm:$0xff] %v12046_v20  ;;  %v12048_v53 = vpop.eup %9466 }
 0x51c   : > { %9470 = vpow2.f32 %v2739_v62  ;;  %16282 = vst [vmem:[#allocation83_spill] sm:$0xff] %v12048_v53  ;;  %v12050_v29 = vpop.eup %9468  ;;  %v2083_v43 = vmul.f32 1.442695, %v16287_v48 }
 0x51d   : > { %9472 = vpow2.f32 %v2741_v16  ;;  %1881 = vmax.xlane.f32.xlu0 %v1880_v33  ;;  %16283 = vst [vmem:[#allocation68_spill] sm:$0xff] %v12050_v29  ;;  %v3899_v33 = vmul.f32 %v12046_v20, %v3835_v59 }
 0x51e   : > { %9474 = vpow2.f32 %v2081_v10  ;;  %16293 = vst [vmem:[#allocation79_spill] sm:$0xff] %v12073_v3 }
 0x51f   : > { %9476 = vpow2.f32 %v2083_v43 }
 0x522   : > { %v9471_v18 = vpop.eup %9470 }
 0x523   : > { %v9473_v57 = vpop.eup %9472  ;;  %v3347_v52 = vpack.c.bf16 %v12048_v53, %v9471_v18 }
 0x524   : > { %v3539_v36 = vpop.f32.mrf.mxu2  ;;  %v3348_v62 = vpack.c.bf16 %v12050_v29, %v9473_v57  ;;  %v12054_v26 = vadd.f32 %v9473_v57, %v9471_v18  ;;  %v12061_v53 = vpop.eup %9474  ;;  %v3836_v29 = vld [vmem:[#allocation4 + $0x148] sm:$0xff] }
 0x525   : > { %v3708_v16 = vpop.f32.mrf.mxu3  ;;  %3563 = vmatmul.bf16.gmra.mxu2 %v3347_v52  ;;  %16288 = vst [vmem:[#allocation75_spill] sm:$0xff] %v12061_v53  ;;  %v3900_v52 = vmul.f32 %v12061_v53, %v3836_v29  ;;  %v12069_v48 = vpop.eup %9476 }
 0x526   : > { %16284 = vst [vmem:[#allocation69_spill] sm:$0xff] %v12054_v26  ;;  %v3709_v21 = vadd.f32 %v3708_v16, %v3539_v36  ;;  %3732 = vmatmul.bf16.gmra.mxu3 %v3348_v62  ;;  %v16289_v36 = vld [vmem:[#allocation21_spill] sm:$0xff]  ;;  %v16290_v62 = vld [vmem:[#allocation22_spill] sm:$0xff]  ;;  %v16308_v26 = vld [vmem:[#allocation96_spill] sm:$0xff] }
 0x527   : > { %2375 = vperm.xlu1 %9283, %v11987_v37   ;;  %v16291_v16 = vsub.f32 %v16289_v36, %v16290_v62  ;;  %16292 = vst [vmem:[#allocation76_spill] sm:$0xff] %v12069_v48  ;;  %v3838_v36 = vld [vmem:[#allocation4 + $0x188] sm:$0xff] }
 0x528   : > { %v3963_v27 = vadd.f32 %v3899_v33, %v3709_v21  ;;  %v3837_v33 = vld [vmem:[#allocation4 + $0x1c8] sm:$0xff] }
 0x529   : > { %v2085_v21 = vmul.f32 1.442695, %v16291_v16 }
 0x52a   : > { %4027 = vst [vmem:[#allocation4 + $0x18] sm:$0xff] %v3963_v27  ;;  %v3349_v27 = vpack.c.bf16 %v12012_v45, %v9461_v61  ;;  %v12083_v61 = vpop.f32.mrf.mxu0 }
 0x52b   : > { %9478 = vpow2.f32 %v2085_v21  ;;  %16296 = vst [vmem:[#allocation130_spill] sm:$0xff] %v12083_v61 }
 0x52c   : > { %v3541_v18 = vpop.f32.mrf.mxu2 }
 0x52d   : > { %v3710_v10 = vpop.f32.mrf.mxu3 }
 0x52e   : > { %v3711_v57 = vadd.f32 %v3710_v10, %v3541_v18  ;;  %v3901_v18 = vmul.f32 %v12069_v48, %v3837_v33 }
 0x52f   : > { %2380 = vperm.xlu2 %9281, %v11825_v42  }
 0x530   : > { %v3964_v59 = vadd.f32 %v3900_v52, %v3711_v57  ;;  %v12081_v52 = vld [vmem:[#allocation2 + $0xa8] sm:$0xff] }
 0x531   : > { %2370 = vperm.xlu0 %9282, %v11710_v9   ;;  %v12076_v9 = vpop.f32.mrf.mxu1  ;;  %16295 = vst [vmem:[#allocation22_spill] sm:$0xff] %v12081_v52 }
 0x532   : > { %4028 = vst [vmem:[#allocation4 + $0x148] sm:$0xff] %v3964_v59  ;;  %v12089_v59 = vpop.eup %9478 }
 0x533   : > { %16294 = vst [vmem:[#allocation21_spill] sm:$0xff] %v12076_v9  ;;  %v3902_v33 = vmul.f32 %v12089_v59, %v3838_v36 }
 0x534   : > { %v3544_v43 = vpop.f32.mrf.mxu2  ;;  %16297 = vst [vmem:[#allocation131_spill] sm:$0xff] %v12089_v59 }
 0x535   : > { %v3713_v42 = vpop.f32.mrf.mxu3  ;;  %3568 = vmatmul.bf16.gmra.mxu2 %v3349_v27  ;;  %v12093_v27 = vld [vmem:[#allocation2 + $0x178] sm:$0xff] }
 0x536   : > { %v3714_v29 = vadd.f32 %v3713_v42, %v3544_v43  ;;  %3737 = vmatmul.bf16.gmra.mxu3 %v3350_v50  ;;  %v1870_v10 = vpop.xlane.xlu1 %1869  ;;  %16298 = vst [vmem:[#allocation132_spill] sm:$0xff] %v12093_v27  ;;  %v12097_v42 = vld [vmem:[#allocation2 + $0xd0] sm:$0xff] }
 0x537   : > { %v12079_v57 = vmax.f32 %v12073_v3, %v1870_v10  ;;  %16300 = vst [vmem:[#allocation134_spill] sm:$0xff] %v12097_v42 }
 0x538   : > { %v3965_v38 = vadd.f32 %v3901_v18, %v3714_v29  ;;  %v12099_v29 = vpop.f32.mrf.mxu0 }
 0x539   : > { %3302 = vst [vmem:[#allocation2 + $0x1c8] sm:$0xff] %v12079_v57  ;;  %v1867_v45 = vpop.xlane.xlu2 %1866  ;;  %v12095_v43 = vpop.f32.mrf.mxu1 }
 0x53a   : > { %4029 = vst [vmem:[#allocation4 + $0x1c8] sm:$0xff] %v3965_v38  ;;  %v12087_v47 = vmax.f32 %v12081_v52, %v1867_v45  ;;  %v16307_v52 = vld [vmem:[#allocation95_spill] sm:$0xff] }
 0x53b   : > { %16299 = vst [vmem:[#allocation133_spill] sm:$0xff] %v12095_v43 }
 0x53c   : > { %3301 = vst [vmem:[#allocation2 + $0xa8] sm:$0xff] %v12087_v47  ;;  %v3546_v62 = vpop.f32.mrf.mxu2 }
 0x53d   : > { %v3715_v16 = vpop.f32.mrf.mxu3  ;;  %16301 = vst [vmem:[#allocation135_spill] sm:$0xff] %v12099_v29 }
 0x53e   : > { %v3716_v21 = vadd.f32 %v3715_v16, %v3546_v62  ;;  %v12111_v62 = vld [vmem:[#allocation2 + $0x88] sm:$0xff] }
 0x53f   : > { %16302 = vst [vmem:[#allocation136_spill] sm:$0xff] %v12111_v62 }
 0x540   : > { %v3966_v50 = vadd.f32 %v3902_v33, %v3716_v21  ;;  %v16304_v33 = vld [vmem:[#allocation99_spill] sm:$0xff]  ;;  %v12117_v53 = vpop.f32.mrf.mxu0 }
 0x541   : > { %v1876_v18 = vpop.xlane.xlu2 %1875  ;;  %v12113_v21 = vpop.f32.mrf.mxu1  ;;  %16306 = vst [vmem:[#allocation99_spill] sm:$0xff] %v12117_v53 }
 0x542   : > { %4030 = vst [vmem:[#allocation4 + $0x188] sm:$0xff] %v3966_v50  ;;  %v12102_v10 = vmax.f32 %v12093_v27, %v1876_v18  ;;  %v1858_v38 = vpop.xlane.xlu0 %1857  ;;  %v16305_v18 = vld [vmem:[#allocation100_spill] sm:$0xff]  ;;  %v1892_v36 = vmax.f32 %v12117_v53, %v12113_v21 }
 0x543   : > { %v12105_v45 = vmax.f32 %v12097_v42, %v1858_v38  ;;  %16303 = vst [vmem:[#allocation137_spill] sm:$0xff] %v12113_v21 }
 0x544   : > { %3304 = vst [vmem:[#allocation2 + $0x178] sm:$0xff] %v12102_v10 }
 0x545   : > { %3298 = vst [vmem:[#allocation2 + $0xd0] sm:$0xff] %v12105_v45 }
 0x549   : > { %v2361_v16 = vpop.permute.xlu2 %2360 }
 0x54a   : > { %v2561_v50 = vsub.f32 %v16304_v33, %v2361_v16  ;;  %v2562_v59 = vsub.f32 %v16305_v18, %v2361_v16  ;;  %v1864_v20 = vpop.xlane.xlu0 %1863 }
 0x54b   : > { %v12120_v38 = vmax.f32 %v12111_v62, %v1864_v20  ;;  %v16309_v20 = vld [vmem:[#allocation80_spill] sm:$0xff] }
 0x54c   : > { %v2767_v27 = vmul.f32 1.442695, %v2561_v50  ;;  %v2769_v48 = vmul.f32 1.442695, %v2562_v59  ;;  %v1997_v62 = vsub.f32 %v16309_v20, %v9680_v40  ;;  %v1889_v50 = vmax.f32 %v12099_v29, %v12095_v43 }
 0x54d   : > { %3300 = vst [vmem:[#allocation2 + $0x88] sm:$0xff] %v12120_v38  ;;  %v1886_v20 = vmax.f32 %v12083_v61, %v12076_v9 }
 0x54e   : > { %9480 = vpow2.f32 %v2767_v27  ;;  %v2351_v3 = vpop.permute.xlu1 %2350 }
 0x54f   : > { %9482 = vpow2.f32 %v2769_v48  ;;  %v2557_v33 = vsub.f32 %v16307_v52, %v2351_v3  ;;  %v2558_v16 = vsub.f32 %v16308_v26, %v2351_v3  ;;  %v2087_v48 = vmul.f32 1.442695, %v1997_v62 }
 0x551   : > { %v2759_v18 = vmul.f32 1.442695, %v2557_v33  ;;  %v2761_v42 = vmul.f32 1.442695, %v2558_v16  ;;  %1893 = vmax.xlane.f32.xlu1 %v1892_v36  ;;  %v9681_v36 = vld [vmem:[#allocation2 + $0x30] sm:$0xff]  ;;  %v16311_v33 = vld [vmem:[#allocation94_spill] sm:$0xff] }
 0x553   : > { %9484 = vpow2.f32 %v2759_v18 }
 0x554   : > { %v12128_v59 = vpop.eup %9480  ;;  %9486 = vpow2.f32 %v2761_v42  ;;  %v1998_v42 = vsub.f32 %v16311_v33, %v9681_v36  ;;  %v3839_v33 = vld [vmem:[#allocation4 + $0x150] sm:$0xff] }
 0x555   : > { %v12132_v27 = vpop.eup %9482  ;;  %9488 = vpow2.f32 %v2087_v48 }
 0x556   : > { %v2356_v21 = vpop.permute.xlu1 %2355  ;;  %v12136_v26 = vadd.f32 %v12132_v27, %v12128_v59 }
 0x557   : > { %v2559_v3 = vsub.f32 %v11452_v49, %v2356_v21  ;;  %v2560_v52 = vsub.f32 %v11454_v30, %v2356_v21  ;;  %v2089_v49 = vmul.f32 1.442695, %v1998_v42  ;;  %v16313_v30 = vld [vmem:[#allocation86_spill] sm:$0xff] }
 0x558   : > { %16310 = vst [vmem:[#allocation100_spill] sm:$0xff] %v12136_v26  ;;  %1890 = vmax.xlane.f32.xlu2 %v1889_v50  ;;  %v16314_v50 = vld [vmem:[#allocation87_spill] sm:$0xff] }
 0x559   : > { %v9485_v40 = vpop.eup %9484  ;;  %v2763_v16 = vmul.f32 1.442695, %v2559_v3  ;;  %v2765_v18 = vmul.f32 1.442695, %v2560_v52 }
 0x55a   : > { %v9487_v62 = vpop.eup %9486 }
 0x55b   : > { %9490 = vpow2.f32 %v2763_v16  ;;  %1887 = vmax.xlane.f32.xlu0 %v1886_v20  ;;  %v12143_v53 = vadd.f32 %v9487_v62, %v9485_v40  ;;  %v12147_v26 = vpop.eup %9488 }
 0x55c   : > { %9492 = vpow2.f32 %v2765_v18  ;;  %16315 = vst [vmem:[#allocation96_spill] sm:$0xff] %v12147_v26  ;;  %v3903_v18 = vmul.f32 %v12147_v26, %v3839_v33  ;;  %v16320_v33 = vld [vmem:[#allocation84_spill] sm:$0xff] }
 0x55d   : > { %16312 = vst [vmem:[#allocation95_spill] sm:$0xff] %v12143_v53  ;;  %v2346_v43 = vpop.permute.xlu0 %2345  ;;  %9494 = vpow2.f32 %v2089_v49 }
 0x55e   : > { %v2555_v21 = vsub.f32 %v16313_v30, %v2346_v43  ;;  %v2556_v29 = vsub.f32 %v16314_v50, %v2346_v43  ;;  %v16317_v43 = vld [vmem:[#allocation103_spill] sm:$0xff]  ;;  %v16318_v50 = vld [vmem:[#allocation30_spill] sm:$0xff] }
 0x560   : > { %v2755_v3 = vmul.f32 1.442695, %v2555_v21  ;;  %v2757_v52 = vmul.f32 1.442695, %v2556_v29  ;;  %v16319_v21 = vsub.f32 %v16317_v43, %v16318_v50 }
 0x561   : > { %v9491_v36 = vpop.eup %9490 }
 0x562   : > { %v9493_v9 = vpop.eup %9492  ;;  %9496 = vpow2.f32 %v2755_v3  ;;  %v3549_v48 = vpop.f32.mrf.mxu2  ;;  %v2091_v29 = vmul.f32 1.442695, %v16319_v21  ;;  %v9683_v21 = vld [vmem:[#allocation2 + $0xf0] sm:$0xff] }
 0x563   : > { %9498 = vpow2.f32 %v2757_v52  ;;  %v3718_v16 = vpop.f32.mrf.mxu3  ;;  %v12149_v20 = vadd.f32 %v9493_v9, %v9491_v36  ;;  %v12152_v53 = vpop.eup %9494 }
 0x564   : > { %v3719_v42 = vadd.f32 %v3718_v16, %v3549_v48  ;;  %v9682_v48 = vld [vmem:[#allocation2] sm:$0xff]  ;;  %9500 = vpow2.f32 %v2091_v29  ;;  %v3904_v43 = vmul.f32 %v12152_v53, %v3840_v19  ;;  %v16322_v29 = vld [vmem:[#allocation42_spill] sm:$0xff] }
 0x565   : > { %16316 = vst [vmem:[#allocation80_spill] sm:$0xff] %v12149_v20  ;;  %v2000_v16 = vsub.f32 %v16320_v33, %v9682_v48  ;;  %v12168_v33 = vpop.f32.mrf.mxu0 }
 0x566   : > { %v3967_v30 = vadd.f32 %v3903_v18, %v3719_v42 }
 0x567   : > { %v2093_v50 = vmul.f32 1.442695, %v2000_v16  ;;  %v3353_v16 = vpack.c.bf16 %v12128_v59, %v9491_v36  ;;  %v12184_v36 = vpop.permute.xlu2 %2365 }
 0x568   : > { %v9497_v61 = vpop.eup %9496  ;;  %4031 = vst [vmem:[#allocation4 + $0x150] sm:$0xff] %v3967_v30 }
 0x569   : > { %v9499_v49 = vpop.eup %9498  ;;  %v3351_v3 = vpack.c.bf16 %v9485_v40, %v9497_v61  ;;  %9502 = vpow2.f32 %v2093_v50 }
 0x56a   : > { %v3551_v34 = vpop.f32.mrf.mxu2  ;;  %2400 = vperm.xlu1 %9283, %v12105_v45   ;;  %v3352_v52 = vpack.c.bf16 %v9487_v62, %v9499_v49  ;;  %v12158_v20 = vadd.f32 %v9499_v49, %v9497_v61  ;;  %v12164_v40 = vpop.eup %9500  ;;  %v3841_v61 = vld [vmem:[#allocation4 + $0x108] sm:$0xff]  ;;  %v2001_v49 = vsub.f32 %v16322_v29, %v9683_v21  ;;  %v16324_v21 = vsub.f32 %v11670_v54, %v11675_v22 }
 0x56b   : > { %v3720_v42 = vpop.f32.mrf.mxu3  ;;  %3573 = vmatmul.bf16.gmra.mxu2 %v3351_v3  ;;  %16321 = vst [vmem:[#allocation94_spill] sm:$0xff] %v12164_v40  ;;  %v3905_v19 = vmul.f32 %v12164_v40, %v3841_v61 }
 0x56c   : > { %v3721_v18 = vadd.f32 %v3720_v42, %v3551_v34  ;;  %3742 = vmatmul.bf16.gmra.mxu3 %v3352_v52  ;;  %v2095_v48 = vmul.f32 1.442695, %v2001_v49  ;;  %v12173_v42 = vpop.f32.mrf.mxu1  ;;  %v2097_v29 = vmul.f32 1.442695, %v16324_v21  ;;  %v12180_v49 = vld [vmem:[#allocation2 + $0x68] sm:$0xff] }
 0x56d   : > { %16325 = vst [vmem:[#allocation87_spill] sm:$0xff] %v12180_v49 }
 0x56e   : > { %v3968_v30 = vadd.f32 %v3904_v43, %v3721_v18  ;;  %v3354_v43 = vpack.c.bf16 %v12132_v27, %v9493_v9  ;;  %9504 = vpow2.f32 %v2095_v48  ;;  %v3843_v27 = vld [vmem:[#allocation4 + $0xb8] sm:$0xff] }
 0x56f   : > { %2385 = vperm.xlu0 %9282, %v11822_v25   ;;  %v12170_v25 = vpop.eup %9502  ;;  %9506 = vpow2.f32 %v2097_v29 }
 0x570   : > { %4032 = vst [vmem:[#allocation4 + $0xa8] sm:$0xff] %v3968_v30  ;;  %2390 = vperm.xlu2 %9281, %v12005_v39   ;;  %v3842_v39 = vld [vmem:[#allocation4 + $0x50] sm:$0xff] }
 0x571   : > { %16323 = vst [vmem:[#allocation86_spill] sm:$0xff] %v12170_v25  ;;  %v3906_v61 = vmul.f32 %v12170_v25, %v3842_v39  ;;  %v9684_v25 = vld [vmem:[#allocation2 + $0x148] sm:$0xff] }
 0x572   : > { %v3554_v62 = vpop.f32.mrf.mxu2 }
 0x573   : > { %v3723_v3 = vpop.f32.mrf.mxu3 }
 0x574   : > { %v3724_v34 = vadd.f32 %v3723_v3, %v3554_v62  ;;  %v12182_v59 = vpop.eup %9504  ;;  %v12191_v48 = vpop.f32.mrf.mxu1 }
 0x575   : > { %16326 = vst [vmem:[#allocation103_spill] sm:$0xff] %v12182_v59  ;;  %v3907_v22 = vmul.f32 %v12182_v59, %v3843_v27 }
 0x576   : > { %v3969_v52 = vadd.f32 %v3905_v19, %v3724_v34  ;;  %v12189_v19 = vpop.f32.mrf.mxu0 }
 0x578   : > { %4033 = vst [vmem:[#allocation4 + $0x108] sm:$0xff] %v3969_v52 }
 0x57a   : > { %v3556_v18 = vpop.f32.mrf.mxu2 }
 0x57b   : > { %v3725_v30 = vpop.f32.mrf.mxu3  ;;  %3578 = vmatmul.bf16.gmra.mxu2 %v3353_v16  ;;  %v12195_v16 = vld [vmem:[#allocation2 + $0x170] sm:$0xff] }
 0x57c   : > { %v3726_v50 = vadd.f32 %v3725_v30, %v3556_v18  ;;  %3747 = vmatmul.bf16.gmra.mxu3 %v3354_v43  ;;  %v12197_v43 = vld [vmem:[#allocation2 + $0x198] sm:$0xff]  ;;  %v12199_v30 = vpop.eup %9506 }
 0x57d   : > { %16327 = vst [vmem:[#allocation30_spill] sm:$0xff] %v12197_v43 }
 0x57e   : > { %v3970_v62 = vadd.f32 %v3906_v61, %v3726_v50  ;;  %16328 = vst [vmem:[#allocation84_spill] sm:$0xff] %v12199_v30  ;;  %v3844_v61 = vld [vmem:[#allocation4 + $0x28] sm:$0xff] }
 0x580   : > { %4034 = vst [vmem:[#allocation4 + $0x50] sm:$0xff] %v3970_v62 }
 0x581   : > { %v1879_v9 = vpop.xlane.xlu1 %1878 }
 0x582   : > { %v12187_v3 = vmax.f32 %v12180_v49, %v1879_v9  ;;  %v3559_v34 = vpop.f32.mrf.mxu2 }
 0x583   : > { %v3728_v52 = vpop.f32.mrf.mxu3 }
 0x584   : > { %3305 = vst [vmem:[#allocation2 + $0x68] sm:$0xff] %v12187_v3  ;;  %v3729_v54 = vadd.f32 %v3728_v52, %v3559_v34  ;;  %v3908_v52 = vmul.f32 %v12199_v30, %v3844_v61 }
 0x586   : > { %v3971_v39 = vadd.f32 %v3907_v22, %v3729_v54  ;;  %v12212_v54 = vpop.f32.mrf.mxu0  ;;  %v12214_v22 = vpop.f32.mrf.mxu1 }
 0x587   : > { %v1901_v40 = vmax.f32 %v12212_v54, %v12214_v22 }
 0x588   : > { %4035 = vst [vmem:[#allocation4 + $0xb8] sm:$0xff] %v3971_v39  ;;  %v1873_v18 = vpop.xlane.xlu0 %1872 }
 0x589   : > { %v12202_v50 = vmax.f32 %v12195_v16, %v1873_v18  ;;  %v12216_v18 = vld [vmem:[#allocation2 + $0x190] sm:$0xff] }
 0x58a   : > { %v3561_v62 = vpop.f32.mrf.mxu2  ;;  %v1885_v21 = vpop.xlane.xlu2 %1884  ;;  %16329 = vst [vmem:[#allocation42_spill] sm:$0xff] %v12216_v18 }
 0x58b   : > { %3303 = vst [vmem:[#allocation2 + $0x170] sm:$0xff] %v12202_v50  ;;  %v3730_v9 = vpop.f32.mrf.mxu3  ;;  %v12208_v27 = vmax.f32 %v12197_v43, %v1885_v21 }
 0x58c   : > { %v3731_v34 = vadd.f32 %v3730_v9, %v3561_v62 }
 0x58d   : > { %3307 = vst [vmem:[#allocation2 + $0x198] sm:$0xff] %v12208_v27 }
 0x58e   : > { %v3972_v39 = vadd.f32 %v3908_v52, %v3731_v34  ;;  %v1895_v52 = vmax.f32 %v12168_v33, %v12173_v42 }
 0x590   : > { %4036 = vst [vmem:[#allocation4 + $0x28] sm:$0xff] %v3972_v39  ;;  %v1882_v29 = vpop.xlane.xlu0 %1881  ;;  %v1898_v39 = vmax.f32 %v12189_v19, %v12191_v48 }
 0x591   : > { %v12221_v21 = vmax.f32 %v12216_v18, %v1882_v29  ;;  %v16330_v29 = vld [vmem:[#allocation98_spill] sm:$0xff]  ;;  %v16331_v18 = vld [vmem:[#allocation101_spill] sm:$0xff] }
 0x592   : > { %v2381_v62 = vpop.permute.xlu2 %2380  ;;  %v2003_v43 = vsub.f32 %v16330_v29, %v9684_v25  ;;  %v2563_v49 = vsub.f32 %v16331_v18, %v12184_v36  ;;  %v16332_v25 = vld [vmem:[#allocation33_spill] sm:$0xff]  ;;  %v16334_v29 = vld [vmem:[#allocation102_spill] sm:$0xff] }
 0x593   : > { %3306 = vst [vmem:[#allocation2 + $0x190] sm:$0xff] %v12221_v21  ;;  %v2569_v61 = vsub.f32 %v11610_v15, %v2381_v62  ;;  %v2570_v9 = vsub.f32 %v11613_v13, %v2381_v62 }
 0x594   : > { %1902 = vmax.xlane.f32.xlu1 %v1901_v40 }
 0x595   : > { %v2783_v30 = vmul.f32 1.442695, %v2569_v61  ;;  %v2785_v34 = vmul.f32 1.442695, %v2570_v9  ;;  %v2099_v61 = vmul.f32 1.442695, %v2003_v43 }
 0x596   : > { %v2771_v43 = vmul.f32 1.442695, %v2563_v49 }
 0x597   : > { %9508 = vpow2.f32 %v2783_v30 }
 0x598   : > { %9510 = vpow2.f32 %v2785_v34  ;;  %v2564_v34 = vsub.f32 %v16332_v25, %v12184_v36 }
 0x599   : > { %v2376_v26 = vpop.permute.xlu1 %2375  ;;  %1896 = vmax.xlane.f32.xlu0 %v1895_v52  ;;  %1899 = vmax.xlane.f32.xlu2 %v1898_v39 }
 0x59a   : > { %v2567_v15 = vsub.f32 %v11581_v41, %v2376_v26  ;;  %v2568_v13 = vsub.f32 %v11585_v32, %v2376_v26  ;;  %v16333_v32 = vsub.f32 %v11693_v51, %v11698_v1  ;;  %v2773_v52 = vmul.f32 1.442695, %v2564_v34  ;;  %v3845_v1 = vld [vmem:[#allocation4 + $0x38] sm:$0xff]  ;;  %v9685_v34 = vld [vmem:[#allocation2 + $0x100] sm:$0xff] }
 0x59c   : > { %v2779_v40 = vmul.f32 1.442695, %v2567_v15  ;;  %v2781_v62 = vmul.f32 1.442695, %v2568_v13  ;;  %v2101_v26 = vmul.f32 1.442695, %v16333_v32  ;;  %v2005_v32 = vsub.f32 %v11662_v60, %v9685_v34 }
 0x59d   : > { %v12233_v9 = vpop.eup %9508  ;;  %v16335_v13 = vld [vmem:[#allocation37_spill] sm:$0xff] }
 0x59e   : > { %9512 = vpow2.f32 %v2779_v40  ;;  %v12237_v30 = vpop.eup %9510  ;;  %v2103_v59 = vmul.f32 1.442695, %v2005_v32 }
 0x59f   : > { %9514 = vpow2.f32 %v2781_v62  ;;  %v12243_v41 = vadd.f32 %v12237_v30, %v12233_v9 }
 0x5a0   : > { %9516 = vpow2.f32 %v2099_v61 }
 0x5a1   : > { %9518 = vpow2.f32 %v2101_v26 }
 0x5a2   : > { %9520 = vpow2.f32 %v2771_v43 }
 0x5a3   : > { %v2371_v39 = vpop.permute.xlu0 %2370  ;;  %9522 = vpow2.f32 %v2773_v52 }
 0x5a4   : > { %v12248_v18 = vpop.eup %9512  ;;  %v2565_v15 = vsub.f32 %v16334_v29, %v2371_v39  ;;  %v2566_v40 = vsub.f32 %v16335_v13, %v2371_v39 }
 0x5a5   : > { %v12252_v36 = vpop.eup %9514 }
 0x5a6   : > { %v2775_v62 = vmul.f32 1.442695, %v2565_v15  ;;  %v2777_v25 = vmul.f32 1.442695, %v2566_v40  ;;  %v12256_v61 = vadd.f32 %v12252_v36, %v12248_v18  ;;  %v12258_v51 = vpop.eup %9516 }
 0x5a7   : > { %16336 = vst [vmem:[#allocation98_spill] sm:$0xff] %v12258_v51  ;;  %v3909_v26 = vmul.f32 %v12258_v51, %v3845_v1  ;;  %v12262_v43 = vpop.eup %9518 }
 0x5a8   : > { %9524 = vpow2.f32 %v2775_v62  ;;  %v3564_v49 = vpop.f32.mrf.mxu2  ;;  %v12264_v15 = vpop.eup %9520  ;;  %v3846_v62 = vld [vmem:[#allocation4 + $0x40] sm:$0xff] }
 0x5a9   : > { %9526 = vpow2.f32 %v2777_v25  ;;  %v3733_v39 = vpop.f32.mrf.mxu3  ;;  %v12266_v40 = vpop.eup %9522 }
 0x5aa   : > { %v3734_v29 = vadd.f32 %v3733_v39, %v3564_v49  ;;  %9528 = vpow2.f32 %v2103_v59 }
 0x5ac   : > { %v3973_v13 = vadd.f32 %v3909_v26, %v3734_v29  ;;  %v16337_v29 = vsub.f32 %v11713_v28, %v11716_v4  ;;  %v3848_v4 = vld [vmem:[#allocation4 + $0x90] sm:$0xff] }
 0x5ad   : > { %2395 = vperm.xlu0 %9282, %v11981_v17   ;;  %2405 = vperm.xlu1 %9283, %v11975_v24   ;;  %v3910_v17 = vmul.f32 %v12262_v43, %v3846_v62 }
 0x5ae   : > { %v9525_v52 = vpop.eup %9524  ;;  %4037 = vst [vmem:[#allocation4 + $0x38] sm:$0xff] %v3973_v13  ;;  %v2105_v26 = vmul.f32 1.442695, %v16337_v29 }
 0x5af   : > { %v9527_v60 = vpop.eup %9526  ;;  %v3355_v25 = vpack.c.bf16 %v9525_v52, %v12264_v15 }
 0x5b0   : > { %v3566_v49 = vpop.f32.mrf.mxu2  ;;  %v3356_v1 = vpack.c.bf16 %v9527_v60, %v12266_v40  ;;  %v12272_v34 = vadd.f32 %v9527_v60, %v9525_v52  ;;  %v12280_v13 = vpop.eup %9528  ;;  %v3847_v52 = vld [vmem:[#allocation4 + $0x98] sm:$0xff]  ;;  %9530 = vpow2.f32 %v2105_v26 }
 0x5b1   : > { %v3735_v39 = vpop.f32.mrf.mxu3  ;;  %3583 = vmatmul.bf16.gmra.mxu2 %v3355_v25  ;;  %2410 = vperm.xlu2 %9281, %v12120_v38   ;;  %16338 = vst [vmem:[#allocation101_spill] sm:$0xff] %v12280_v13  ;;  %v3911_v62 = vmul.f32 %v12280_v13, %v3847_v52 }
 0x5b2   : > { %v3736_v32 = vadd.f32 %v3735_v39, %v3566_v49  ;;  %3752 = vmatmul.bf16.gmra.mxu3 %v3356_v1  ;;  %v3357_v49 = vpack.c.bf16 %v12233_v9, %v12248_v18  ;;  %v3358_v39 = vpack.c.bf16 %v12237_v30, %v12252_v36  ;;  %v12298_v9 = vld [vmem:[#allocation2 + $0xc0] sm:$0xff]  ;;  %v12303_v36 = vld [vmem:[#allocation2 + $0x38] sm:$0xff] }
 0x5b3   : > { %16341 = vst [vmem:[#allocation37_spill] sm:$0xff] %v12298_v9 }
 0x5b4   : > { %v3974_v24 = vadd.f32 %v3910_v17, %v3736_v32 }
 0x5b5   : > { %2425 = vperm.xlu1 %9283, %v12202_v50  }
 0x5b6   : > { %4038 = vst [vmem:[#allocation4 + $0x40] sm:$0xff] %v3974_v24  ;;  %v12285_v28 = vpop.eup %9530  ;;  %v12292_v24 = vld [vmem:[#allocation2 + $0x1c0] sm:$0xff] }
 0x5b7   : > { %16339 = vst [vmem:[#allocation33_spill] sm:$0xff] %v12285_v28  ;;  %v3912_v17 = vmul.f32 %v12285_v28, %v3848_v4  ;;  %v3849_v28 = vld [vmem:[#allocation4 + $0x30] sm:$0xff] }
 0x5b8   : > { %v3569_v59 = vpop.f32.mrf.mxu2  ;;  %16340 = vst [vmem:[#allocation102_spill] sm:$0xff] %v12292_v24 }
 0x5b9   : > { %v3738_v60 = vpop.f32.mrf.mxu3  ;;  %2420 = vperm.xlu2 %9281, %v12079_v57  }
 0x5ba   : > { %v3739_v38 = vadd.f32 %v3738_v60, %v3569_v59 }
 0x5bc   : > { %v3975_v25 = vadd.f32 %v3911_v62, %v3739_v38 }
 0x5bd   : > { %2430 = vperm.xlu1 %9283, %v12102_v10  }
 0x5be   : > { %4039 = vst [vmem:[#allocation4 + $0x98] sm:$0xff] %v3975_v25 }
 0x5c0   : > { %v3571_v1 = vpop.f32.mrf.mxu2 }
 0x5c1   : > { %v3740_v32 = vpop.f32.mrf.mxu3  ;;  %3588 = vmatmul.bf16.gmra.mxu2 %v3357_v49 }
 0x5c2   : > { %v3741_v57 = vadd.f32 %v3740_v32, %v3571_v1  ;;  %3757 = vmatmul.bf16.gmra.mxu3 %v3358_v39  ;;  %v16344_v39 = vld [vmem:[#allocation63_spill] sm:$0xff] }
 0x5c3   : > { %v9686_v32 = vld [vmem:[#allocation2 + $0x40] sm:$0xff] }
 0x5c4   : > { %v3976_v10 = vadd.f32 %v3912_v17, %v3741_v57  ;;  %v1894_v29 = vpop.xlane.xlu1 %1893  ;;  %v16345_v57 = vld [vmem:[#allocation43_spill] sm:$0xff] }
 0x5c5   : > { %v12295_v26 = vmax.f32 %v12292_v24, %v1894_v29  ;;  %v2007_v17 = vsub.f32 %v16345_v57, %v9686_v32  ;;  %v12320_v29 = vpop.f32.mrf.mxu1  ;;  %v9687_v57 = vld [vmem:[#allocation2 + $0x1f8] sm:$0xff] }
 0x5c6   : > { %4040 = vst [vmem:[#allocation4 + $0x90] sm:$0xff] %v3976_v10  ;;  %v12318_v10 = vpop.f32.mrf.mxu0  ;;  %v2008_v38 = vsub.f32 %v11763_v2, %v9687_v57  ;;  %v16348_v24 = vld [vmem:[#allocation62_spill] sm:$0xff] }
 0x5c7   : > { %3310 = vst [vmem:[#allocation2 + $0x1c0] sm:$0xff] %v12295_v26 }
 0x5cb   : > { %v1891_v18 = vpop.xlane.xlu2 %1890 }
 0x5cc   : > { %v12301_v30 = vmax.f32 %v12298_v9, %v1891_v18  ;;  %v2109_v9 = vmul.f32 1.442695, %v2008_v38  ;;  %v16349_v38 = vsub.f32 %v11865_v0, %v11876_v11 }
 0x5ce   : > { %16342 = vst [vmem:[#allocation138_spill] sm:$0xff] %v12301_v30  ;;  %v1888_v59 = vpop.xlane.xlu0 %1887 }
 0x5cf   : > { %3309 = vst [vmem:[#allocation2 + $0xc0] sm:$0xff] %v12301_v30  ;;  %v12309_v60 = vmax.f32 %v12303_v36, %v1888_v59 }
 0x5d1   : > { %16343 = vst [vmem:[#allocation139_spill] sm:$0xff] %v12309_v60 }
 0x5d2   : > { %3308 = vst [vmem:[#allocation2 + $0x38] sm:$0xff] %v12309_v60 }
 0x5d3   : > { %v2391_v62 = vpop.permute.xlu2 %2390 }
 0x5d4   : > { %v2573_v25 = vsub.f32 %v11719_v7, %v2391_v62  ;;  %v2574_v4 = vsub.f32 %v11722_v63, %v2391_v62  ;;  %v1904_v7 = vmax.f32 %v12318_v10, %v12320_v29  ;;  %v2107_v63 = vmul.f32 1.442695, %v2007_v17 }
 0x5d6   : > { %v2791_v49 = vmul.f32 1.442695, %v2573_v25  ;;  %v2793_v1 = vmul.f32 1.442695, %v2574_v4  ;;  %v16346_v25 = vld [vmem:[#allocation26_spill] sm:$0xff] }
 0x5d7   : > { %2935 = vadd.xlane.f32.xlu0 %v16344_v39 }
 0x5d8   : > { %9532 = vpow2.f32 %v2791_v49  ;;  %v16347_v49 = vld [vmem:[#allocation47_spill] sm:$0xff] }
 0x5d9   : > { %9534 = vpow2.f32 %v2793_v1 }
 0x5da   : > { %9536 = vpow2.f32 %v2107_v63 }
 0x5de   : > { %v9533_v18 = vpop.eup %9532 }
 0x5df   : > { %v9535_v59 = vpop.eup %9534 }
 0x5e0   : > { %v12324_v52 = vadd.f32 %v9535_v59, %v9533_v18  ;;  %v12330_v13 = vpop.eup %9536 }
 0x5e1   : > { %v2386_v62 = vpop.permute.xlu0 %2385 }
 0x5e2   : > { %v2571_v4 = vsub.f32 %v16346_v25, %v2386_v62  ;;  %v2572_v1 = vsub.f32 %v16347_v49, %v2386_v62  ;;  %1905 = vmax.xlane.f32.xlu2 %v1904_v7 }
 0x5e4   : > { %v2787_v39 = vmul.f32 1.442695, %v2571_v4  ;;  %v2789_v32 = vmul.f32 1.442695, %v2572_v1  ;;  %v3913_v1 = vmul.f32 %v12330_v13, %v3849_v28 }
 0x5e6   : > { %9538 = vpow2.f32 %v2787_v39 }
 0x5e7   : > { %9540 = vpow2.f32 %v2789_v32  ;;  %2932 = vadd.xlane.f32.xlu1 %v16348_v24  ;;  %v9688_v32 = vld [vmem:[#allocation2 + $0x128] sm:$0xff] }
 0x5e8   : > { %9542 = vpow2.f32 %v2109_v9  ;;  %v16351_v9 = vld [vmem:[#allocation27_spill] sm:$0xff] }
 0x5e9   : > { %v2010_v57 = vsub.f32 %v16351_v9, %v9688_v32 }
 0x5eb   : > { %2415 = vperm.xlu0 %9282, %v12087_v47   ;;  %v2111_v47 = vmul.f32 1.442695, %v16349_v38  ;;  %v2113_v0 = vmul.f32 1.442695, %v2010_v57  ;;  %v3852_v38 = vld [vmem:[#allocation4 + $0x1e8] sm:$0xff] }
 0x5ec   : > { %v9539_v17 = vpop.eup %9538 }
 0x5ed   : > { %v9541_v25 = vpop.eup %9540  ;;  %v3359_v62 = vpack.c.bf16 %v9533_v18, %v9539_v17  ;;  %9544 = vpow2.f32 %v2111_v47  ;;  %v12353_v47 = vld [vmem:[#allocation2 + $0x58] sm:$0xff] }
 0x5ee   : > { %v3574_v7 = vpop.f32.mrf.mxu2  ;;  %v3360_v4 = vpack.c.bf16 %v9535_v59, %v9541_v25  ;;  %v12333_v49 = vadd.f32 %v9541_v25, %v9539_v17  ;;  %v12340_v18 = vpop.eup %9542  ;;  %v3850_v59 = vld [vmem:[#allocation4 + $0x140] sm:$0xff]  ;;  %9546 = vpow2.f32 %v2113_v0  ;;  %16353 = vst [vmem:[#allocation26_spill] sm:$0xff] %v12353_v47 }
 0x5ef   : > { %v3743_v63 = vpop.f32.mrf.mxu3  ;;  %3593 = vmatmul.bf16.gmra.mxu2 %v3359_v62  ;;  %16350 = vst [vmem:[#allocation63_spill] sm:$0xff] %v12340_v18  ;;  %v3914_v28 = vmul.f32 %v12340_v18, %v3850_v59  ;;  %v16373_v18 = vld [vmem:[#allocation71_spill] sm:$0xff] }
 0x5f0   : > { %v3744_v2 = vadd.f32 %v3743_v63, %v3574_v7  ;;  %3762 = vmatmul.bf16.gmra.mxu3 %v3360_v4  ;;  %v2401_v4 = vpop.permute.xlu1 %2400 }
 0x5f2   : > { %v3977_v24 = vadd.f32 %v3913_v1, %v3744_v2 }
 0x5f3   : > { %2440 = vperm.xlu0 %9282, %v12221_v21   ;;  %v12346_v11 = vpop.eup %9544  ;;  %v3851_v21 = vld [vmem:[#allocation4 + $0x1d8] sm:$0xff] }
 0x5f4   : > { %4041 = vst [vmem:[#allocation4 + $0x30] sm:$0xff] %v3977_v24  ;;  %v3915_v1 = vmul.f32 %v12346_v11, %v3851_v21 }
 0x5f5   : > { %16352 = vst [vmem:[#allocation43_spill] sm:$0xff] %v12346_v11 }
 0x5f6   : > { %v3576_v39 = vpop.f32.mrf.mxu2 }
 0x5f7   : > { %v3745_v17 = vpop.f32.mrf.mxu3 }
 0x5f8   : > { %v3746_v25 = vadd.f32 %v3745_v17, %v3576_v39 }
 0x5fa   : > { %v3978_v62 = vadd.f32 %v3914_v28, %v3746_v25  ;;  %2435 = vperm.xlu2 %9281, %v12187_v3   ;;  %v12351_v3 = vpop.eup %9546  ;;  %v12361_v28 = vld [vmem:[#allocation2 + $0x10] sm:$0xff] }
 0x5fb   : > { %2450 = vperm.xlu0 %9282, %v12309_v60   ;;  %v3916_v57 = vmul.f32 %v12351_v3, %v3852_v38  ;;  %16356 = vst [vmem:[#allocation27_spill] sm:$0xff] %v12361_v28 }
 0x5fc   : > { %4042 = vst [vmem:[#allocation4 + $0x140] sm:$0xff] %v3978_v62 }
 0x5fe   : > { %v3579_v7 = vpop.f32.mrf.mxu2 }
 0x5ff   : > { %v3748_v63 = vpop.f32.mrf.mxu3 }
 0x600   : > { %v3749_v2 = vadd.f32 %v3748_v63, %v3579_v7  ;;  %2445 = vperm.xlu1 %9283, %v12208_v27   ;;  %v12359_v27 = vld [vmem:[#allocation2 + $0x158] sm:$0xff] }
 0x601   : > { %16355 = vst [vmem:[#allocation62_spill] sm:$0xff] %v12359_v27 }
 0x602   : > { %v3979_v24 = vadd.f32 %v3915_v1, %v3749_v2  ;;  %2455 = vperm.xlu2 %9281, %v12301_v30  }
 0x604   : > { %4043 = vst [vmem:[#allocation4 + $0x1d8] sm:$0xff] %v3979_v24 }
 0x606   : > { %v3581_v59 = vpop.f32.mrf.mxu2 }
 0x607   : > { %v3750_v39 = vpop.f32.mrf.mxu3  ;;  %v1903_v32 = vpop.xlane.xlu1 %1902 }
 0x608   : > { %v3751_v9 = vadd.f32 %v3750_v39, %v3581_v59  ;;  %v12357_v17 = vmax.f32 %v12353_v47, %v1903_v32  ;;  %v16359_v47 = vld [vmem:[#allocation104_spill] sm:$0xff] }
 0x60a   : > { %16354 = vst [vmem:[#allocation47_spill] sm:$0xff] %v12357_v17  ;;  %v3980_v25 = vadd.f32 %v3916_v57, %v3751_v9  ;;  %v2577_v9 = vsub.f32 %v11745_v12, %v2401_v4  ;;  %v2578_v57 = vsub.f32 %v11747_v8, %v2401_v4 }
 0x60b   : > { %3313 = vst [vmem:[#allocation2 + $0x58] sm:$0xff] %v12357_v17 }
 0x60c   : > { %4044 = vst [vmem:[#allocation4 + $0x1e8] sm:$0xff] %v3980_v25  ;;  %v1897_v0 = vpop.xlane.xlu0 %1896  ;;  %v1900_v21 = vpop.xlane.xlu2 %1899  ;;  %v2799_v25 = vmul.f32 1.442695, %v2577_v9  ;;  %v9689_v9 = vld [vmem:[#allocation2 + $0x1a0] sm:$0xff] }
 0x60d   : > { %v12367_v7 = vmax.f32 %v12359_v27, %v1897_v0  ;;  %v12370_v63 = vmax.f32 %v12361_v28, %v1900_v21  ;;  %v2801_v21 = vmul.f32 1.442695, %v2578_v57  ;;  %v16362_v57 = vld [vmem:[#allocation109_spill] sm:$0xff] }
 0x60f   : > { %16357 = vst [vmem:[#allocation140_spill] sm:$0xff] %v12367_v7  ;;  %2470 = vperm.xlu2 %9281, %v12370_v63  }
 0x610   : > { %16358 = vst [vmem:[#allocation141_spill] sm:$0xff] %v12370_v63 }
 0x611   : > { %3311 = vst [vmem:[#allocation2 + $0x158] sm:$0xff] %v12367_v7 }
 0x612   : > { %3312 = vst [vmem:[#allocation2 + $0x10] sm:$0xff] %v12370_v63  ;;  %v2011_v63 = vsub.f32 %v16362_v57, %v9689_v9 }
 0x614   : > { %v2411_v24 = vpop.permute.xlu2 %2410 }
 0x615   : > { %v2581_v38 = vsub.f32 %v11813_v31, %v2411_v24  ;;  %v2582_v59 = vsub.f32 %v11806_v6, %v2411_v24  ;;  %v16360_v24 = vld [vmem:[#allocation106_spill] sm:$0xff] }
 0x617   : > { %v2807_v39 = vmul.f32 1.442695, %v2581_v38  ;;  %v2809_v32 = vmul.f32 1.442695, %v2582_v59  ;;  %v16361_v59 = vld [vmem:[#allocation107_spill] sm:$0xff] }
 0x619   : > { %9548 = vpow2.f32 %v2807_v39 }
 0x61a   : > { %9550 = vpow2.f32 %v2809_v32 }
 0x61b   : > { %9552 = vpow2.f32 %v2799_v25 }
 0x61c   : > { %9554 = vpow2.f32 %v2801_v21 }
 0x61f   : > { %v12383_v0 = vpop.eup %9548  ;;  %v2396_v62 = vpop.permute.xlu0 %2395 }
 0x620   : > { %v2406_v1 = vpop.permute.xlu1 %2405  ;;  %v12385_v2 = vpop.eup %9550  ;;  %v2575_v31 = vsub.f32 %v11737_v23, %v2396_v62  ;;  %v2576_v6 = vsub.f32 %v16359_v47, %v2396_v62  ;;  %v16363_v23 = vld [vmem:[#allocation92_spill] sm:$0xff]  ;;  %v2115_v47 = vmul.f32 1.442695, %v2011_v63 }
 0x621   : > { %v2579_v38 = vsub.f32 %v16360_v24, %v2406_v1  ;;  %v2580_v39 = vsub.f32 %v16361_v59, %v2406_v1  ;;  %v12393_v12 = vadd.f32 %v12385_v2, %v12383_v0  ;;  %v12397_v1 = vpop.eup %9552  ;;  %v16364_v59 = vld [vmem:[#allocation66_spill] sm:$0xff] }
 0x622   : > { %v2795_v8 = vmul.f32 1.442695, %v2575_v31  ;;  %v2797_v4 = vmul.f32 1.442695, %v2576_v6  ;;  %v12401_v6 = vpop.eup %9554 }
 0x623   : > { %v2803_v32 = vmul.f32 1.442695, %v2579_v38  ;;  %v2805_v28 = vmul.f32 1.442695, %v2580_v39 }
 0x624   : > { %9556 = vpow2.f32 %v2795_v8  ;;  %v9690_v8 = vld [vmem:[#allocation2 + $0x1f0] sm:$0xff] }
 0x625   : > { %9558 = vpow2.f32 %v2797_v4  ;;  %2956 = vadd.xlane.f32.xlu0 %v16363_v23  ;;  %v16365_v4 = vld [vmem:[#allocation28_spill] sm:$0xff] }
 0x626   : > { %9560 = vpow2.f32 %v2803_v32  ;;  %v2012_v32 = vsub.f32 %v16365_v4, %v9690_v8 }
 0x627   : > { %9562 = vpow2.f32 %v2805_v28 }
 0x628   : > { %v2426_v62 = vpop.permute.xlu1 %2425  ;;  %9564 = vpow2.f32 %v2115_v47  ;;  %v2117_v23 = vmul.f32 1.442695, %v2012_v32 }
 0x629   : > { %v2587_v25 = vsub.f32 %v11873_v5, %v2426_v62  ;;  %v2588_v31 = vsub.f32 %v11871_v35, %v2426_v62 }
 0x62a   : > { %v9557_v24 = vpop.eup %9556  ;;  %2941 = vadd.xlane.f32.xlu1 %v16364_v59  ;;  %v16367_v59 = vld [vmem:[#allocation122_spill] sm:$0xff] }
 0x62b   : > { %v2819_v38 = vmul.f32 1.442695, %v2587_v25  ;;  %v2821_v21 = vmul.f32 1.442695, %v2588_v31  ;;  %v9559_v39 = vpop.eup %9558  ;;  %v3361_v28 = vpack.c.bf16 %v12397_v1, %v9557_v24  ;;  %v16366_v25 = vld [vmem:[#allocation123_spill] sm:$0xff] }
 0x62c   : > { %v9561_v63 = vpop.eup %9560  ;;  %v3362_v5 = vpack.c.bf16 %v12401_v6, %v9559_v39  ;;  %v12407_v9 = vadd.f32 %v9559_v39, %v9557_v24  ;;  %v16369_v24 = vld [vmem:[#allocation67_spill] sm:$0xff] }
 0x62d   : > { %9566 = vpow2.f32 %v2819_v38  ;;  %v9563_v35 = vpop.eup %9562  ;;  %3598 = vmatmul.bf16.gmra.mxu2 %v3361_v28 }
 0x62e   : > { %9568 = vpow2.f32 %v2821_v21  ;;  %3767 = vmatmul.bf16.gmra.mxu3 %v3362_v5  ;;  %v12409_v57 = vadd.f32 %v9563_v35, %v9561_v63  ;;  %v12413_v8 = vpop.eup %9564  ;;  %v3853_v21 = vld [vmem:[#allocation4 + $0x1a8] sm:$0xff] }
 0x62f   : > { %16368 = vst [vmem:[#allocation104_spill] sm:$0xff] %v12413_v8  ;;  %9570 = vpow2.f32 %v2117_v23  ;;  %v16372_v23 = vsub.f32 %v11983_v55, %v11987_v37  ;;  %v9691_v55 = vld [vmem:[#allocation2 + $0x78] sm:$0xff] }
 0x630   : > { %v2431_v62 = vpop.permute.xlu1 %2430  ;;  %v16374_v37 = vld [vmem:[#allocation54_spill] sm:$0xff] }
 0x631   : > { %v2589_v31 = vsub.f32 %v16366_v25, %v2431_v62  ;;  %v2590_v47 = vsub.f32 %v16367_v59, %v2431_v62  ;;  %v3917_v25 = vmul.f32 %v12413_v8, %v3853_v21  ;;  %v3363_v21 = vpack.c.bf16 %v12383_v0, %v9561_v63  ;;  %v3855_v63 = vld [vmem:[#allocation4 + $0x1b0] sm:$0xff] }
 0x632   : > { %2944 = vadd.xlane.f32.xlu1 %v16369_v24  ;;  %v2119_v24 = vmul.f32 1.442695, %v16372_v23 }
 0x633   : > { %v12415_v4 = vpop.eup %9566  ;;  %v2823_v38 = vmul.f32 1.442695, %v2589_v31  ;;  %v2825_v27 = vmul.f32 1.442695, %v2590_v47  ;;  %v16370_v31 = vld [vmem:[#allocation64_spill] sm:$0xff] }
 0x634   : > { %v12418_v39 = vpop.eup %9568  ;;  %v3584_v28 = vpop.f32.mrf.mxu2 }
 0x635   : > { %9572 = vpow2.f32 %v2823_v38  ;;  %v12422_v32 = vadd.f32 %v12418_v39, %v12415_v4  ;;  %v3753_v5 = vpop.f32.mrf.mxu3  ;;  %v12426_v47 = vpop.eup %9570 }
 0x636   : > { %9574 = vpow2.f32 %v2825_v27  ;;  %v3754_v62 = vadd.f32 %v3753_v5, %v3584_v28  ;;  %16371 = vst [vmem:[#allocation106_spill] sm:$0xff] %v12426_v47  ;;  %v3854_v28 = vld [vmem:[#allocation4 + $0x1e0] sm:$0xff] }
 0x637   : > { %9576 = vpow2.f32 %v2119_v24 }
 0x638   : > { %v3981_v59 = vadd.f32 %v3917_v25, %v3754_v62  ;;  %2938 = vadd.xlane.f32.xlu2 %v16370_v31  ;;  %v3364_v62 = vpack.c.bf16 %v12385_v2, %v9563_v35  ;;  %v16375_v2 = vld [vmem:[#allocation72_spill] sm:$0xff] }
 0x639   : > { %2460 = vperm.xlu0 %9282, %v12295_v26   ;;  %v2014_v26 = vsub.f32 %v16374_v37, %v9691_v55 }
 0x63a   : > { %4045 = vst [vmem:[#allocation4 + $0x1a8] sm:$0xff] %v3981_v59  ;;  %2947 = vadd.xlane.f32.xlu1 %v16373_v18  ;;  %v3918_v18 = vmul.f32 %v12426_v47, %v3854_v28  ;;  %v16377_v28 = vld [vmem:[#allocation88_spill] sm:$0xff] }
 0x63b   : > { %v12432_v38 = vpop.eup %9572  ;;  %v2121_v8 = vmul.f32 1.442695, %v2014_v26 }
 0x63c   : > { %v12435_v27 = vpop.eup %9574  ;;  %v3586_v5 = vpop.f32.mrf.mxu2 }
 0x63d   : > { %v12441_v25 = vadd.f32 %v12435_v27, %v12432_v38  ;;  %v3755_v31 = vpop.f32.mrf.mxu3  ;;  %3603 = vmatmul.bf16.gmra.mxu2 %v3363_v21  ;;  %v12447_v0 = vpop.eup %9576  ;;  %9578 = vpow2.f32 %v2121_v8 }
 0x63e   : > { %v3756_v59 = vadd.f32 %v3755_v31, %v3586_v5  ;;  %3772 = vmatmul.bf16.gmra.mxu3 %v3364_v62  ;;  %16376 = vst [vmem:[#allocation107_spill] sm:$0xff] %v12447_v0  ;;  %v3919_v21 = vmul.f32 %v12447_v0, %v3855_v63  ;;  %v1652_v5 = vld [vmem:[#allocation3 + $0x150] sm:$0xff]  ;;  %v16378_v31 = vld [vmem:[#allocation70_spill] sm:$0xff]  ;;  %v2421_v8 = vpop.permute.xlu2 %2420 }
 0x63f   : > { %v2868_v62 = vmul.f32 %v16377_v28, %v1652_v5  ;;  %v12458_v5 = vld [vmem:[#allocation2 + $0xa0] sm:$0xff] }
 0x640   : > { %v3982_v23 = vadd.f32 %v3918_v18, %v3756_v59  ;;  %16382 = vst [vmem:[#allocation92_spill] sm:$0xff] %v12458_v5 }
 0x641   : > { %2465 = vperm.xlu0 %9282, %v12367_v7  }
 0x642   : > { %4046 = vst [vmem:[#allocation4 + $0x1e0] sm:$0xff] %v3982_v23  ;;  %2950 = vadd.xlane.f32.xlu1 %v16375_v2  ;;  %v3856_v23 = vld [vmem:[#allocation4 + $0x1b8] sm:$0xff] }
 0x643   : > { %v12453_v59 = vpop.eup %9578 }
 0x644   : > { %v3589_v35 = vpop.f32.mrf.mxu2  ;;  %16379 = vst [vmem:[#allocation109_spill] sm:$0xff] %v12453_v59  ;;  %v3920_v63 = vmul.f32 %v12453_v59, %v3856_v23  ;;  %v16385_v23 = vld [vmem:[#allocation116_spill] sm:$0xff] }
 0x645   : > { %v3758_v55 = vpop.f32.mrf.mxu3  ;;  %v16388_v59 = vld [vmem:[#allocation112_spill] sm:$0xff] }
 0x646   : > { %v3759_v24 = vadd.f32 %v3758_v55, %v3589_v35 }
 0x648   : > { %v3983_v37 = vadd.f32 %v3919_v21, %v3759_v24  ;;  %v16380_v21 = vld [vmem:[#allocation90_spill] sm:$0xff] }
 0x649   : > { %2475 = vperm.xlu0 %9282, %v12357_v17   ;;  %v16381_v17 = vld [vmem:[#allocation91_spill] sm:$0xff] }
 0x64a   : > { %4047 = vst [vmem:[#allocation4 + $0x1b0] sm:$0xff] %v3983_v37  ;;  %v2936_v26 = vpop.xlane.xlu0 %2935  ;;  %2953 = vadd.xlane.f32.xlu1 %v16378_v31  ;;  %v2958_v7 = vadd.f32 %v16381_v17, %v16380_v21  ;;  %v2586_v17 = vsub.f32 %v16385_v23, %v2421_v8  ;;  %v16391_v23 = vld [vmem:[#allocation25_spill] sm:$0xff] }
 0x64b   : > { %v3124_v18 = vadd.f32 %v2936_v26, %v2868_v62  ;;  %v1651_v62 = vld [vmem:[#allocation3 + $0x68] sm:$0xff]  ;;  %v16384_v26 = vld [vmem:[#allocation117_spill] sm:$0xff] }
 0x64c   : > { %v3591_v2 = vpop.f32.mrf.mxu2  ;;  %v2585_v31 = vsub.f32 %v16384_v26, %v2421_v8  ;;  %v2817_v21 = vmul.f32 1.442695, %v2586_v17  ;;  %v16390_v8 = vld [vmem:[#allocation40_spill] sm:$0xff]  ;;  %v16392_v17 = vld [vmem:[#allocation55_spill] sm:$0xff] }
 0x64d   : > { %3188 = vst [vmem:[#allocation3 + $0x150] sm:$0xff] %v3124_v18  ;;  %v3760_v35 = vpop.f32.mrf.mxu3  ;;  %v16389_v18 = vld [vmem:[#allocation56_spill] sm:$0xff] }
 0x64e   : > { %v3761_v55 = vadd.f32 %v3760_v35, %v3591_v2  ;;  %v16386_v2 = vld [vmem:[#allocation85_spill] sm:$0xff]  ;;  %v16387_v35 = vld [vmem:[#allocation19_spill] sm:$0xff] }
 0x650   : > { %v3984_v24 = vadd.f32 %v3920_v63, %v3761_v55 }
 0x652   : > { %4048 = vst [vmem:[#allocation4 + $0x1b8] sm:$0xff] %v3984_v24  ;;  %2959 = vadd.xlane.f32.xlu1 %v2958_v7  ;;  %v2867_v7 = vmul.f32 %v16386_v2, %v1651_v62  ;;  %v2815_v24 = vmul.f32 1.442695, %v2585_v31  ;;  %v2976_v62 = vadd.f32 %v16391_v23, %v16390_v8  ;;  %v9692_v31 = vld [vmem:[#allocation2 + $0x70] sm:$0xff]  ;;  %v16393_v23 = vld [vmem:[#allocation34_spill] sm:$0xff] }
 0x654   : > { %9580 = vpow2.f32 %v2815_v24 }
 0x655   : > { %v1906_v37 = vpop.xlane.xlu2 %1905  ;;  %9582 = vpow2.f32 %v2817_v21 }
 0x656   : > { %v12461_v28 = vmax.f32 %v12458_v5, %v1906_v37 }
 0x658   : > { %16383 = vst [vmem:[#allocation66_spill] sm:$0xff] %v12461_v28  ;;  %2480 = vperm.xlu2 %9281, %v12461_v28  }
 0x659   : > { %3314 = vst [vmem:[#allocation2 + $0xa0] sm:$0xff] %v12461_v28 }
 0x65a   : > { %2968 = vadd.xlane.f32.xlu1 %v16387_v35  ;;  %v2933_v55 = vpop.xlane.xlu1 %2932 }
 0x65b   : > { %v3123_v63 = vadd.f32 %v2933_v55, %v2867_v7  ;;  %v2015_v55 = vsub.f32 %v16392_v17, %v9692_v31 }
 0x65d   : > { %3187 = vst [vmem:[#allocation3 + $0x68] sm:$0xff] %v3123_v63  ;;  %v2416_v37 = vpop.permute.xlu0 %2415  ;;  %v2436_v26 = vpop.permute.xlu2 %2435 }
 0x65e   : > { %v2583_v47 = vsub.f32 %v16388_v59, %v2416_v37  ;;  %v2584_v5 = vsub.f32 %v16389_v18, %v2416_v37  ;;  %v2591_v30 = vsub.f32 %v11993_v58, %v2436_v26  ;;  %v2592_v28 = vsub.f32 %v11991_v56, %v2436_v26  ;;  %v12480_v18 = vpop.eup %9580 }
 0x65f   : > { %v2123_v59 = vmul.f32 1.442695, %v2015_v55 }
 0x660   : > { %v2811_v2 = vmul.f32 1.442695, %v2583_v47  ;;  %v2813_v35 = vmul.f32 1.442695, %v2584_v5  ;;  %v2827_v7 = vmul.f32 1.442695, %v2591_v30  ;;  %v12484_v5 = vpop.eup %9582 }
 0x661   : > { %v2829_v63 = vmul.f32 1.442695, %v2592_v28 }
 0x662   : > { %9584 = vpow2.f32 %v2811_v2  ;;  %2977 = vadd.xlane.f32.xlu1 %v2976_v62 }
 0x663   : > { %9586 = vpow2.f32 %v2813_v35 }
 0x664   : > { %9588 = vpow2.f32 %v2827_v7 }
 0x665   : > { %9590 = vpow2.f32 %v2829_v63  ;;  %v2441_v58 = vpop.permute.xlu0 %2440  ;;  %v12478_v56 = vpop.permute.xlu2 %2455 }
 0x666   : > { %v2593_v47 = vsub.f32 %v12010_v14, %v2441_v58  ;;  %v2594_v30 = vsub.f32 %v12008_v46, %v2441_v58  ;;  %9592 = vpow2.f32 %v2123_v59  ;;  %v9693_v46 = vld [vmem:[#allocation2 + $0x90] sm:$0xff] }
 0x667   : > { %v2016_v35 = vsub.f32 %v12002_v44, %v9693_v46  ;;  %v3857_v44 = vld [vmem:[#allocation4 + $0x110] sm:$0xff] }
 0x668   : > { %v9585_v24 = vpop.eup %9584  ;;  %v2831_v21 = vmul.f32 1.442695, %v2593_v47  ;;  %v2833_v28 = vmul.f32 1.442695, %v2594_v30  ;;  %v16396_v46 = vld [vmem:[#allocation129_spill] sm:$0xff] }
 0x669   : > { %v9587_v37 = vpop.eup %9586  ;;  %v3365_v26 = vpack.c.bf16 %v12480_v18, %v9585_v24  ;;  %v2125_v59 = vmul.f32 1.442695, %v2016_v35 }
 0x66a   : > { %v12487_v8 = vpop.eup %9588  ;;  %9594 = vpow2.f32 %v2831_v21  ;;  %2986 = vadd.xlane.f32.xlu1 %v16393_v23  ;;  %v3366_v62 = vpack.c.bf16 %v12484_v5, %v9587_v37  ;;  %v12491_v2 = vadd.f32 %v9587_v37, %v9585_v24 }
 0x66b   : > { %v12493_v14 = vpop.eup %9590  ;;  %9596 = vpow2.f32 %v2833_v28  ;;  %3608 = vmatmul.bf16.gmra.mxu2 %v3365_v26  ;;  %v16394_v28 = vld [vmem:[#allocation52_spill] sm:$0xff] }
 0x66c   : > { %3777 = vmatmul.bf16.gmra.mxu3 %v3366_v62  ;;  %v12498_v7 = vadd.f32 %v12493_v14, %v12487_v8  ;;  %v12502_v63 = vpop.eup %9592  ;;  %9598 = vpow2.f32 %v2125_v59  ;;  %v16395_v62 = vld [vmem:[#allocation77_spill] sm:$0xff]  ;;  %v16399_v59 = vld [vmem:[#allocation114_spill] sm:$0xff] }
 0x66d   : > { %v2471_v31 = vpop.permute.xlu2 %2470 }
 0x66e   : > { %v2605_v17 = vsub.f32 %v12189_v19, %v2471_v31  ;;  %v2606_v55 = vsub.f32 %v12191_v48, %v2471_v31  ;;  %v16397_v31 = vld [vmem:[#allocation89_spill] sm:$0xff] }
 0x670   : > { %v9595_v58 = vpop.eup %9594  ;;  %v2855_v47 = vmul.f32 1.442695, %v2605_v17  ;;  %v2857_v24 = vmul.f32 1.442695, %v2606_v55  ;;  %v3921_v17 = vmul.f32 %v12502_v63, %v3857_v44 }
 0x671   : > { %v9597_v30 = vpop.eup %9596 }
 0x672   : > { %v3594_v21 = vpop.f32.mrf.mxu2  ;;  %2995 = vadd.xlane.f32.xlu1 %v16394_v28  ;;  %v2446_v37 = vpop.permute.xlu1 %2445  ;;  %v12505_v26 = vadd.f32 %v9597_v30, %v9595_v58  ;;  %9600 = vpow2.f32 %v2855_v47  ;;  %v16398_v28 = vld [vmem:[#allocation113_spill] sm:$0xff] }
 0x673   : > { %v3763_v23 = vpop.f32.mrf.mxu3  ;;  %v2595_v19 = vsub.f32 %v16395_v62, %v2446_v37  ;;  %v2596_v48 = vsub.f32 %v16396_v46, %v2446_v37  ;;  %2965 = vadd.xlane.f32.xlu0 %v16397_v31  ;;  %9602 = vpow2.f32 %v2857_v24  ;;  %v3003_v0 = vadd.f32 %v16399_v59, %v16398_v28  ;;  %v12513_v60 = vpop.eup %9598  ;;  %v3858_v62 = vld [vmem:[#allocation4 + $0xa0] sm:$0xff]  ;;  %v16405_v28 = vld [vmem:[#allocation32_spill] sm:$0xff]  ;;  %v16406_v59 = vld [vmem:[#allocation46_spill] sm:$0xff] }
 0x674   : > { %v3764_v35 = vadd.f32 %v3763_v23, %v3594_v21  ;;  %v3367_v37 = vpack.c.bf16 %v12432_v38, %v12415_v4  ;;  %v3368_v24 = vpack.c.bf16 %v12435_v27, %v12418_v39  ;;  %v16401_v39 = vld [vmem:[#allocation58_spill] sm:$0xff]  ;;  %v16402_v27 = vld [vmem:[#allocation124_spill] sm:$0xff] }
 0x675   : > { %v2835_v55 = vmul.f32 1.442695, %v2595_v19  ;;  %v2837_v11 = vmul.f32 1.442695, %v2596_v48  ;;  %v3922_v19 = vmul.f32 %v12513_v60, %v3858_v62  ;;  %v3012_v31 = vadd.f32 %v16402_v27, %v16401_v39  ;;  %v16407_v62 = vld [vmem:[#allocation45_spill] sm:$0xff] }
 0x676   : > { %v3985_v51 = vadd.f32 %v3921_v17, %v3764_v35  ;;  %v16403_v35 = vld [vmem:[#allocation93_spill] sm:$0xff]  ;;  %v16404_v17 = vld [vmem:[#allocation31_spill] sm:$0xff] }
 0x677   : > { %9604 = vpow2.f32 %v2835_v55  ;;  %v2451_v55 = vpop.permute.xlu0 %2450 }
 0x678   : > { %4049 = vst [vmem:[#allocation4 + $0x110] sm:$0xff] %v3985_v51  ;;  %9606 = vpow2.f32 %v2837_v11  ;;  %v12517_v47 = vpop.eup %9600  ;;  %v16400_v11 = vld [vmem:[#allocation48_spill] sm:$0xff] }
 0x679   : > { %v12521_v44 = vpop.eup %9602 }
 0x67a   : > { %v3596_v21 = vpop.f32.mrf.mxu2  ;;  %3004 = vadd.xlane.f32.xlu1 %v3003_v0  ;;  %v12527_v4 = vadd.f32 %v12521_v44, %v12517_v47 }
 0x67b   : > { %v3765_v51 = vpop.f32.mrf.mxu3  ;;  %2974 = vadd.xlane.f32.xlu0 %v16400_v11  ;;  %3613 = vmatmul.bf16.gmra.mxu2 %v3367_v37  ;;  %v2991_v37 = vadd.f32 %v16407_v62, %v16406_v59  ;;  %v16409_v11 = vld [vmem:[#allocation120_spill] sm:$0xff] }
 0x67c   : > { %v3766_v23 = vadd.f32 %v3765_v51, %v3596_v21  ;;  %3782 = vmatmul.bf16.gmra.mxu3 %v3368_v24  ;;  %v3369_v21 = vpack.c.bf16 %v9595_v58, %v12487_v8  ;;  %v16408_v24 = vld [vmem:[#allocation130_spill] sm:$0xff]  ;;  %v16414_v59 = vld [vmem:[#allocation68_spill] sm:$0xff]  ;;  %v16415_v8 = vld [vmem:[#allocation111_spill] sm:$0xff] }
 0x67d   : > { %v9605_v38 = vpop.eup %9604  ;;  %v2597_v51 = vsub.f32 %v16408_v24, %v2451_v55  ;;  %v16416_v58 = vld [vmem:[#allocation36_spill] sm:$0xff] }
 0x67e   : > { %v9607_v46 = vpop.eup %9606  ;;  %v3986_v0 = vadd.f32 %v3922_v19, %v3766_v23  ;;  %v3370_v23 = vpack.c.bf16 %v9597_v30, %v12493_v14  ;;  %v16410_v19 = vld [vmem:[#allocation21_spill] sm:$0xff]  ;;  %v1659_v14 = vld [vmem:[#allocation3 + $0x148] sm:$0xff] }
 0x67f   : > { %v12529_v48 = vadd.f32 %v9607_v46, %v9605_v38  ;;  %v2839_v39 = vmul.f32 1.442695, %v2597_v51  ;;  %v2875_v30 = vmul.f32 %v16416_v58, %v1659_v14  ;;  %v16417_v51 = vld [vmem:[#allocation44_spill] sm:$0xff]  ;;  %v16425_v58 = vld [vmem:[#allocation35_spill] sm:$0xff] }
 0x680   : > { %4050 = vst [vmem:[#allocation4 + $0xa0] sm:$0xff] %v3986_v0  ;;  %v2598_v0 = vsub.f32 %v16410_v19, %v2451_v55  ;;  %v16423_v14 = vld [vmem:[#allocation100_spill] sm:$0xff] }
 0x681   : > { %2962 = vadd.xlane.f32.xlu2 %v16403_v35  ;;  %v16412_v35 = vld [vmem:[#allocation50_spill] sm:$0xff]  ;;  %9608 = vpow2.f32 %v2839_v39  ;;  %v16419_v39 = vld [vmem:[#allocation97_spill] sm:$0xff] }
 0x682   : > { %3013 = vadd.xlane.f32.xlu1 %v3012_v31  ;;  %v2841_v27 = vmul.f32 1.442695, %v2598_v0  ;;  %v16411_v31 = vld [vmem:[#allocation49_spill] sm:$0xff] }
 0x683   : > { %2983 = vadd.xlane.f32.xlu0 %v16404_v17  ;;  %v2979_v17 = vadd.f32 %v16412_v35, %v16411_v31  ;;  %v16418_v0 = vld [vmem:[#allocation73_spill] sm:$0xff] }
 0x684   : > { %9610 = vpow2.f32 %v2841_v27 }
 0x687   : > { %v12549_v55 = vpop.eup %9608 }
 0x689   : > { %2971 = vadd.xlane.f32.xlu2 %v16405_v28  ;;  %v16413_v28 = vld [vmem:[#allocation83_spill] sm:$0xff] }
 0x68a   : > { %3022 = vadd.xlane.f32.xlu1 %v16409_v11  ;;  %v3030_v62 = vadd.f32 %v16414_v59, %v16413_v28  ;;  %v3371_v11 = vpack.c.bf16 %v12549_v55, %v9605_v38  ;;  %v16421_v28 = vld [vmem:[#allocation110_spill] sm:$0xff]  ;;  %v16422_v38 = vld [vmem:[#allocation128_spill] sm:$0xff] }
 0x68b   : > { %2992 = vadd.xlane.f32.xlu0 %v2991_v37  ;;  %3618 = vmatmul.bf16.gmra.mxu2 %v3369_v21  ;;  %v12551_v21 = vpop.eup %9610 }
 0x68c   : > { %3787 = vmatmul.bf16.gmra.mxu3 %v3370_v23  ;;  %v1654_v23 = vld [vmem:[#allocation3 + $0x160] sm:$0xff]  ;;  %v3372_v19 = vpack.c.bf16 %v12551_v21, %v9607_v46  ;;  %v16424_v46 = vld [vmem:[#allocation118_spill] sm:$0xff] }
 0x68d   : > { %v2870_v27 = vmul.f32 %v16419_v39, %v1654_v23  ;;  %v1653_v39 = vld [vmem:[#allocation3 + $0x70] sm:$0xff] }
 0x691   : > { %2980 = vadd.xlane.f32.xlu2 %v2979_v17  ;;  %v16420_v17 = vld [vmem:[#allocation51_spill] sm:$0xff] }
 0x692   : > { %3031 = vadd.xlane.f32.xlu1 %v3030_v62  ;;  %v2997_v59 = vadd.f32 %v16421_v28, %v16420_v17  ;;  %v9694_v62 = vld [vmem:[#allocation2 + $0x1d8] sm:$0xff]  ;;  %v16430_v17 = vld [vmem:[#allocation108_spill] sm:$0xff] }
 0x693   : > { %3001 = vadd.xlane.f32.xlu0 %v16415_v8  ;;  %v2017_v8 = vsub.f32 %v16422_v38, %v9694_v62  ;;  %v1656_v28 = vld [vmem:[#allocation3 + $0xd8] sm:$0xff]  ;;  %v16431_v62 = vld [vmem:[#allocation29_spill] sm:$0xff] }
 0x694   : > { %v2869_v38 = vmul.f32 %v16431_v62, %v1653_v39 }
 0x698   : > { %v2957_v37 = vpop.xlane.xlu0 %2956 }
 0x699   : > { %v3131_v24 = vadd.f32 %v2957_v37, %v2875_v30  ;;  %2989 = vadd.xlane.f32.xlu2 %v16417_v51  ;;  %v2127_v37 = vmul.f32 1.442695, %v2017_v8  ;;  %v16426_v51 = vld [vmem:[#allocation135_spill] sm:$0xff] }
 0x69a   : > { %3040 = vadd.xlane.f32.xlu1 %v12158_v20  ;;  %v1655_v20 = vld [vmem:[#allocation3 + $0xd0] sm:$0xff] }
 0x69b   : > { %3195 = vst [vmem:[#allocation3 + $0x148] sm:$0xff] %v3131_v24  ;;  %3010 = vadd.xlane.f32.xlu0 %v16418_v0  ;;  %3623 = vmatmul.bf16.gmra.mxu2 %v3371_v11  ;;  %v2871_v30 = vmul.f32 %v16425_v58, %v1655_v20  ;;  %v2599_v11 = vsub.f32 %v16426_v51, %v12478_v56  ;;  %9612 = vpow2.f32 %v2127_v37 }
 0x69c   : > { %3792 = vmatmul.bf16.gmra.mxu3 %v3372_v19  ;;  %v16427_v19 = vld [vmem:[#allocation133_spill] sm:$0xff] }
 0x69d   : > { %v2942_v31 = vpop.xlane.xlu1 %2941  ;;  %v2600_v0 = vsub.f32 %v16427_v19, %v12478_v56 }
 0x69e   : > { %v3126_v35 = vadd.f32 %v2942_v31, %v2870_v27  ;;  %v16428_v27 = vld [vmem:[#allocation134_spill] sm:$0xff] }
 0x69f   : > { %v16429_v31 = vsub.f32 %v16428_v27, %v12105_v45  ;;  %v2845_v8 = vmul.f32 1.442695, %v2600_v0  ;;  %v16435_v45 = vld [vmem:[#allocation38_spill] sm:$0xff]  ;;  %v16436_v27 = vld [vmem:[#allocation65_spill] sm:$0xff] }
 0x6a0   : > { %3190 = vst [vmem:[#allocation3 + $0x160] sm:$0xff] %v3126_v35  ;;  %v2872_v51 = vmul.f32 %v16435_v45, %v1656_v28  ;;  %v3859_v0 = vld [vmem:[#allocation4 + $0x118] sm:$0xff] }
 0x6a1   : > { %2998 = vadd.xlane.f32.xlu2 %v2997_v59  ;;  %v2129_v35 = vmul.f32 1.442695, %v16429_v31  ;;  %v2843_v59 = vmul.f32 1.442695, %v2599_v11  ;;  %v12579_v39 = vpop.eup %9612  ;;  %v16437_v31 = vld [vmem:[#allocation125_spill] sm:$0xff] }
 0x6a2   : > { %3049 = vadd.xlane.f32.xlu1 %v16423_v14  ;;  %v16432_v14 = vld [vmem:[#allocation69_spill] sm:$0xff] }
 0x6a3   : > { %3019 = vadd.xlane.f32.xlu0 %v16424_v46  ;;  %v16433_v46 = vld [vmem:[#allocation99_spill] sm:$0xff]  ;;  %9614 = vpow2.f32 %v2129_v35 }
 0x6a4   : > { %9616 = vpow2.f32 %v2843_v59  ;;  %v1657_v59 = vld [vmem:[#allocation3 + $0x1e0] sm:$0xff] }
 0x6a5   : > { %v2945_v24 = vpop.xlane.xlu1 %2944  ;;  %9618 = vpow2.f32 %v2845_v8 }
 0x6a6   : > { %v3127_v23 = vadd.f32 %v2945_v24, %v2871_v30  ;;  %v16434_v30 = vld [vmem:[#allocation137_spill] sm:$0xff] }
 0x6a8   : > { %3191 = vst [vmem:[#allocation3 + $0xd0] sm:$0xff] %v3127_v23 }
 0x6a9   : > { %3007 = vadd.xlane.f32.xlu2 %v16430_v17  ;;  %v3015_v17 = vadd.f32 %v16437_v31, %v16436_v27  ;;  %v12586_v8 = vpop.eup %9614  ;;  %v3860_v31 = vld [vmem:[#allocation4 + $0x198] sm:$0xff] }
 0x6aa   : > { %3058 = vadd.xlane.f32.xlu1 %v12256_v61 }
 0x6ab   : > { %v2461_v20 = vpop.permute.xlu0 %2460  ;;  %3028 = vadd.xlane.f32.xlu0 %v16432_v14  ;;  %v2939_v56 = vpop.xlane.xlu2 %2938 }
 0x6ac   : > { %v2601_v58 = vsub.f32 %v16433_v46, %v2461_v20  ;;  %v2602_v37 = vsub.f32 %v16434_v30, %v2461_v20  ;;  %v3125_v24 = vadd.f32 %v2939_v56, %v2869_v38  ;;  %v9695_v38 = vld [vmem:[#allocation2 + $0xb8] sm:$0xff]  ;;  %v16438_v20 = vld [vmem:[#allocation127_spill] sm:$0xff]  ;;  %v3923_v56 = vmul.f32 %v12579_v39, %v3859_v0  ;;  %v12589_v30 = vpop.eup %9616 }
 0x6ad   : > { %v2948_v23 = vpop.xlane.xlu1 %2947  ;;  %v2019_v28 = vsub.f32 %v16438_v20, %v9695_v38  ;;  %v9696_v20 = vld [vmem:[#allocation2 + $0x88] sm:$0xff] }
 0x6ae   : > { %v2847_v11 = vmul.f32 1.442695, %v2601_v58  ;;  %v2849_v19 = vmul.f32 1.442695, %v2602_v37  ;;  %3189 = vst [vmem:[#allocation3 + $0x70] sm:$0xff] %v3125_v24  ;;  %v3128_v61 = vadd.f32 %v2948_v23, %v2872_v51  ;;  %v16439_v58 = vld [vmem:[#allocation81_spill] sm:$0xff]  ;;  %v12592_v51 = vpop.eup %9618 }
 0x6af   : > { %v16440_v24 = vld [vmem:[#allocation41_spill] sm:$0xff]  ;;  %v2131_v23 = vmul.f32 1.442695, %v2019_v28  ;;  %v16441_v28 = vld [vmem:[#allocation136_spill] sm:$0xff] }
 0x6b0   : > { %9620 = vpow2.f32 %v2847_v11  ;;  %3192 = vst [vmem:[#allocation3 + $0xd8] sm:$0xff] %v3128_v61  ;;  %v3599_v62 = vpop.f32.mrf.mxu2  ;;  %v2873_v45 = vmul.f32 %v16440_v24, %v1657_v59 }
 0x6b1   : > { %9622 = vpow2.f32 %v2849_v19  ;;  %v3768_v35 = vpop.f32.mrf.mxu3  ;;  %3016 = vadd.xlane.f32.xlu2 %v3015_v17 }
 0x6b2   : > { %v3769_v14 = vadd.f32 %v3768_v35, %v3599_v62  ;;  %3067 = vadd.xlane.f32.xlu1 %v12324_v52  ;;  %9624 = vpow2.f32 %v2131_v23  ;;  %v2020_v35 = vsub.f32 %v16441_v28, %v9696_v20 }
 0x6b3   : > { %v2466_v46 = vpop.permute.xlu0 %2465  ;;  %3037 = vadd.xlane.f32.xlu0 %v16439_v58 }
 0x6b4   : > { %v3987_v37 = vadd.f32 %v3923_v56, %v3769_v14  ;;  %v2603_v61 = vsub.f32 %v12168_v33, %v2466_v46  ;;  %v2604_v27 = vsub.f32 %v12173_v42, %v2466_v46  ;;  %v16442_v33 = vld [vmem:[#allocation60_spill] sm:$0xff]  ;;  %v1658_v14 = vld [vmem:[#allocation3 + $0x30] sm:$0xff]  ;;  %v3924_v46 = vmul.f32 %v12586_v8, %v3860_v31 }
 0x6b5   : > { %v2951_v11 = vpop.xlane.xlu1 %2950 }
 0x6b6   : > { %v12594_v19 = vpop.eup %9620  ;;  %4051 = vst [vmem:[#allocation4 + $0x118] sm:$0xff] %v3987_v37  ;;  %v3129_v52 = vadd.f32 %v2951_v11, %v2873_v45  ;;  %v2851_v56 = vmul.f32 1.442695, %v2603_v61  ;;  %v2853_v58 = vmul.f32 1.442695, %v2604_v27  ;;  %v16443_v37 = vld [vmem:[#allocation80_spill] sm:$0xff] }
 0x6b7   : > { %v12597_v0 = vpop.eup %9622  ;;  %v3373_v17 = vpack.c.bf16 %v12594_v19, %v12589_v30  ;;  %v16444_v45 = vld [vmem:[#allocation20_spill] sm:$0xff]  ;;  %v2133_v11 = vmul.f32 1.442695, %v2020_v35  ;;  %v3861_v61 = vld [vmem:[#allocation4 + $0x178] sm:$0xff] }
 0x6b8   : > { %3193 = vst [vmem:[#allocation3 + $0x1e0] sm:$0xff] %v3129_v52  ;;  %v3601_v62 = vpop.f32.mrf.mxu2  ;;  %v3374_v38 = vpack.c.bf16 %v12597_v0, %v12592_v51  ;;  %v2874_v23 = vmul.f32 %v16444_v45, %v1658_v14  ;;  %9626 = vpow2.f32 %v2851_v56  ;;  %v16446_v56 = vld [vmem:[#allocation39_spill] sm:$0xff] }
 0x6b9   : > { %v3770_v59 = vpop.f32.mrf.mxu3  ;;  %3025 = vadd.xlane.f32.xlu2 %v16442_v33  ;;  %3628 = vmatmul.bf16.gmra.mxu2 %v3373_v17  ;;  %v12610_v17 = vpop.eup %9624  ;;  %9628 = vpow2.f32 %v2853_v58 }
 0x6ba   : > { %v3771_v42 = vadd.f32 %v3770_v59, %v3601_v62  ;;  %3797 = vmatmul.bf16.gmra.mxu3 %v3374_v38  ;;  %3076 = vadd.xlane.f32.xlu1 %v12409_v57  ;;  %v3084_v57 = vadd.f32 %v12484_v5, %v12480_v18  ;;  %9630 = vpow2.f32 %v2133_v11  ;;  %v16445_v62 = vld [vmem:[#allocation78_spill] sm:$0xff]  ;;  %v1660_v38 = vld [vmem:[#allocation3 + $0x50] sm:$0xff]  ;;  %v3925_v35 = vmul.f32 %v12610_v17, %v3861_v61  ;;  %v2481_v58 = vpop.permute.xlu2 %2480 }
 0x6bb   : > { %3046 = vadd.xlane.f32.xlu0 %v16443_v37  ;;  %v2476_v59 = vpop.permute.xlu0 %2475  ;;  %v2610_v61 = vsub.f32 %v12320_v29, %v2481_v58 }
 0x6bc   : > { %v3988_v24 = vadd.f32 %v3924_v46, %v3771_v42  ;;  %v2876_v42 = vmul.f32 %v16446_v56, %v1660_v38  ;;  %v2607_v18 = vsub.f32 %v12212_v54, %v2476_v59  ;;  %v2608_v45 = vsub.f32 %v12214_v22, %v2476_v59  ;;  %v1663_v54 = vld [vmem:[#allocation3 + $0x190] sm:$0xff]  ;;  %v1666_v56 = vld [vmem:[#allocation3 + $0x38] sm:$0xff] }
 0x6bd   : > { %v2954_v52 = vpop.xlane.xlu1 %2953  ;;  %v2865_v29 = vmul.f32 1.442695, %v2610_v61  ;;  %v16451_v61 = vld [vmem:[#allocation22_spill] sm:$0xff] }
 0x6be   : > { %4052 = vst [vmem:[#allocation4 + $0x198] sm:$0xff] %v3988_v24  ;;  %v3130_v20 = vadd.f32 %v2954_v52, %v2874_v23  ;;  %v9627_v33 = vpop.eup %9626  ;;  %v3862_v23 = vld [vmem:[#allocation4 + $0x58] sm:$0xff] }
 0x6bf   : > { %v9629_v46 = vpop.eup %9628  ;;  %v3375_v11 = vpack.c.bf16 %v12517_v47, %v9627_v33  ;;  %v2861_v47 = vmul.f32 1.442695, %v2608_v45 }
 0x6c0   : > { %3194 = vst [vmem:[#allocation3 + $0x30] sm:$0xff] %v3130_v20  ;;  %v3604_v31 = vpop.f32.mrf.mxu2  ;;  %v12619_v24 = vpop.eup %9630  ;;  %v3376_v20 = vpack.c.bf16 %v12521_v44, %v9629_v46  ;;  %v16448_v44 = vld [vmem:[#allocation53_spill] sm:$0xff] }
 0x6c1   : > { %v3773_v27 = vpop.f32.mrf.mxu3  ;;  %3034 = vadd.xlane.f32.xlu2 %v16445_v62  ;;  %v3926_v22 = vmul.f32 %v12619_v24, %v3862_v23  ;;  %v3111_v23 = vadd.f32 %v9629_v46, %v9627_v33  ;;  %v1672_v33 = vld [vmem:[#allocation3 + $0x78] sm:$0xff] }
 0x6c2   : > { %v3774_v28 = vadd.f32 %v3773_v27, %v3604_v31  ;;  %3085 = vadd.xlane.f32.xlu1 %v3084_v57  ;;  %v16447_v57 = vld [vmem:[#allocation95_spill] sm:$0xff]  ;;  %v2859_v27 = vmul.f32 1.442695, %v2607_v18 }
 0x6c3   : > { %3055 = vadd.xlane.f32.xlu0 %v12272_v34  ;;  %v2609_v34 = vsub.f32 %v12318_v10, %v2481_v58  ;;  %v16449_v58 = vld [vmem:[#allocation59_spill] sm:$0xff] }
 0x6c4   : > { %v3989_v14 = vadd.f32 %v3925_v35, %v3774_v28  ;;  %v2879_v28 = vmul.f32 %v16448_v44, %v1663_v54  ;;  %9632 = vpow2.f32 %v2859_v27  ;;  %v16452_v54 = vld [vmem:[#allocation126_spill] sm:$0xff]  ;;  %v16454_v44 = vld [vmem:[#allocation79_spill] sm:$0xff] }
 0x6c5   : > { %v2960_v37 = vpop.xlane.xlu1 %2959  ;;  %v2863_v10 = vmul.f32 1.442695, %v2609_v34  ;;  %9634 = vpow2.f32 %v2861_v47  ;;  %v2888_v27 = vmul.f32 %v16452_v54, %v1672_v33 }
 0x6c6   : > { %4053 = vst [vmem:[#allocation4 + $0x178] sm:$0xff] %v3989_v14  ;;  %v3132_v5 = vadd.f32 %v2960_v37, %v2876_v42  ;;  %v3051_v14 = vadd.f32 %v12266_v40, %v12264_v15  ;;  %v2882_v37 = vmul.f32 %v16449_v58, %v1666_v56  ;;  %v16456_v56 = vld [vmem:[#allocation115_spill] sm:$0xff] }
 0x6c7   : > { %9636 = vpow2.f32 %v2863_v10 }
 0x6c8   : > { %3196 = vst [vmem:[#allocation3 + $0x50] sm:$0xff] %v3132_v5  ;;  %v3606_v52 = vpop.f32.mrf.mxu2  ;;  %9638 = vpow2.f32 %v2865_v29 }
 0x6c9   : > { %v3775_v31 = vpop.f32.mrf.mxu3  ;;  %3043 = vadd.xlane.f32.xlu2 %v16447_v57  ;;  %3633 = vmatmul.bf16.gmra.mxu2 %v3375_v11 }
 0x6ca   : > { %v3776_v62 = vadd.f32 %v3775_v31, %v3606_v52  ;;  %3802 = vmatmul.bf16.gmra.mxu3 %v3376_v20  ;;  %3094 = vadd.xlane.f32.xlu1 %v12498_v7  ;;  %v3102_v7 = vadd.f32 %v12551_v21, %v12549_v55  ;;  %v12637_v42 = vpop.eup %9632  ;;  %v9697_v20 = vld [vmem:[#allocation2 + $0xa8] sm:$0xff] }
 0x6cb   : > { %3064 = vadd.xlane.f32.xlu0 %v12333_v49  ;;  %v3072_v49 = vadd.f32 %v12401_v6, %v12397_v1  ;;  %v12640_v18 = vpop.eup %9634  ;;  %v1669_v1 = vld [vmem:[#allocation3 + $0x1a8] sm:$0xff]  ;;  %v16450_v6 = vld [vmem:[#allocation61_spill] sm:$0xff]  ;;  %v2021_v31 = vsub.f32 %v16451_v61, %v9697_v20  ;;  %v16458_v20 = vld [vmem:[#allocation23_spill] sm:$0xff] }
 0x6cc   : > { %v3990_v38 = vadd.f32 %v3926_v22, %v3776_v62  ;;  %v2885_v11 = vmul.f32 %v16450_v6, %v1669_v1  ;;  %v16453_v62 = vld [vmem:[#allocation24_spill] sm:$0xff]  ;;  %v1678_v1 = vld [vmem:[#allocation3 + $0x1a0] sm:$0xff] }
 0x6cd   : > { %v2969_v35 = vpop.xlane.xlu1 %2968  ;;  %v9637_v40 = vpop.eup %9636  ;;  %v2135_v46 = vmul.f32 1.442695, %v2021_v31 }
 0x6ce   : > { %4054 = vst [vmem:[#allocation4 + $0x58] sm:$0xff] %v3990_v38  ;;  %v3135_v59 = vadd.f32 %v2969_v35, %v2879_v28  ;;  %v9639_v45 = vpop.eup %9638  ;;  %v3377_v55 = vpack.c.bf16 %v9637_v40, %v12637_v42  ;;  %v9698_v38 = vld [vmem:[#allocation2 + $0x1c8] sm:$0xff] }
 0x6cf   : > { %v3378_v21 = vpack.c.bf16 %v9639_v45, %v12640_v18  ;;  %v3120_v57 = vadd.f32 %v9639_v45, %v9637_v40  ;;  %v2022_v28 = vsub.f32 %v16454_v44, %v9698_v38  ;;  %9640 = vpow2.f32 %v2135_v46  ;;  %v1665_v35 = vld [vmem:[#allocation3 + $0x88] sm:$0xff]  ;;  %v16459_v46 = vld [vmem:[#allocation121_spill] sm:$0xff] }
 0x6d0   : > { %3199 = vst [vmem:[#allocation3 + $0x190] sm:$0xff] %v3135_v59  ;;  %v2881_v58 = vmul.f32 %v16456_v56, %v1665_v35  ;;  %v1664_v38 = vld [vmem:[#allocation3 + $0x8] sm:$0xff]  ;;  %v3117_v44 = vadd.f32 %v12640_v18, %v12637_v42 }
 0x6d1   : > { %3052 = vadd.xlane.f32.xlu2 %v3051_v14  ;;  %v2137_v59 = vmul.f32 1.442695, %v2022_v28  ;;  %v1681_v28 = vld [vmem:[#allocation3 + $0x168] sm:$0xff] }
 0x6d2   : > { %3103 = vadd.xlane.f32.xlu1 %v3102_v7 }
 0x6d3   : > { %3073 = vadd.xlane.f32.xlu0 %v3072_v49  ;;  %9642 = vpow2.f32 %v2137_v59  ;;  %v16461_v59 = vld [vmem:[#allocation105_spill] sm:$0xff] }
 0x6d5   : > { %v2978_v15 = vpop.xlane.xlu1 %2977  ;;  %v12656_v7 = vpop.eup %9640 }
 0x6d6   : > { %v3138_v5 = vadd.f32 %v2978_v15, %v2882_v37  ;;  %v3863_v37 = vld [vmem:[#allocation4 + $0x8] sm:$0xff] }
 0x6d8   : > { %3202 = vst [vmem:[#allocation3 + $0x38] sm:$0xff] %v3138_v5 }
 0x6d9   : > { %3061 = vadd.xlane.f32.xlu2 %v12243_v41  ;;  %3638 = vmatmul.bf16.gmra.mxu2 %v3377_v55  ;;  %v1662_v41 = vld [vmem:[#allocation3 + $0x130] sm:$0xff]  ;;  %v12668_v33 = vpop.eup %9642 }
 0x6da   : > { %3807 = vmatmul.bf16.gmra.mxu3 %v3378_v21  ;;  %3112 = vadd.xlane.f32.xlu1 %v3111_v23  ;;  %v2878_v22 = vmul.f32 %v16453_v62, %v1662_v41  ;;  %v3927_v21 = vmul.f32 %v12656_v7, %v3863_v37  ;;  %v1661_v23 = vld [vmem:[#allocation3 + $0x1f0] sm:$0xff]  ;;  %v9699_v62 = vld [vmem:[#allocation2 + $0x178] sm:$0xff] }
 0x6db   : > { %3082 = vadd.xlane.f32.xlu0 %v12491_v2  ;;  %v2877_v61 = vmul.f32 %v16458_v20, %v1661_v23 }
 0x6dd   : > { %v2987_v34 = vpop.xlane.xlu1 %2986 }
 0x6de   : > { %v3141_v52 = vadd.f32 %v2987_v34, %v2885_v11  ;;  %v1668_v11 = vld [vmem:[#allocation3 + $0x10] sm:$0xff]  ;;  %v16457_v34 = vsub.f32 %v12195_v16, %v12202_v50  ;;  %v16460_v16 = vld [vmem:[#allocation132_spill] sm:$0xff] }
 0x6df   : > { %v2024_v50 = vsub.f32 %v16460_v16, %v9699_v62 }
 0x6e0   : > { %3205 = vst [vmem:[#allocation3 + $0x1a8] sm:$0xff] %v3141_v52  ;;  %v2139_v52 = vmul.f32 1.442695, %v16457_v34  ;;  %v1667_v34 = vld [vmem:[#allocation3 + $0xe0] sm:$0xff] }
 0x6e1   : > { %3070 = vadd.xlane.f32.xlu2 %v12407_v9  ;;  %v1675_v9 = vld [vmem:[#allocation3 + $0x58] sm:$0xff]  ;;  %v2141_v35 = vmul.f32 1.442695, %v2024_v50  ;;  %v9701_v50 = vld [vmem:[#allocation2 + $0x190] sm:$0xff] }
 0x6e2   : > { %3121 = vadd.xlane.f32.xlu1 %v3120_v57  ;;  %v2894_v57 = vmul.f32 %v12152_v53, %v1678_v1  ;;  %9644 = vpow2.f32 %v2139_v52  ;;  %v3105_v1 = vadd.f32 %v12592_v51, %v12589_v30  ;;  %v1684_v52 = vld [vmem:[#allocation3 + $0x28] sm:$0xff] }
 0x6e3   : > { %3091 = vadd.xlane.f32.xlu0 %v12441_v25  ;;  %v16455_v25 = vld [vmem:[#allocation76_spill] sm:$0xff]  ;;  %9646 = vpow2.f32 %v2141_v35 }
 0x6e4   : > { %v2891_v14 = vmul.f32 %v16455_v25, %v1675_v9  ;;  %v1671_v9 = vld [vmem:[#allocation3 + $0x1c0] sm:$0xff]  ;;  %v2880_v25 = vmul.f32 %v16461_v59, %v1664_v38  ;;  %v16468_v59 = vld [vmem:[#allocation57_spill] sm:$0xff] }
 0x6e5   : > { %v2996_v2 = vpop.xlane.xlu1 %2995 }
 0x6e6   : > { %v3144_v47 = vadd.f32 %v2996_v2, %v2888_v27  ;;  %v2966_v10 = vpop.xlane.xlu0 %2965 }
 0x6e7   : > { %v3134_v29 = vadd.f32 %v2966_v10, %v2878_v22 }
 0x6e8   : > { %3208 = vst [vmem:[#allocation3 + $0x78] sm:$0xff] %v3144_v47 }
 0x6e9   : > { %3198 = vst [vmem:[#allocation3 + $0x130] sm:$0xff] %v3134_v29  ;;  %3079 = vadd.xlane.f32.xlu2 %v12393_v12 }
 0x6eb   : > { %3100 = vadd.xlane.f32.xlu0 %v12529_v48  ;;  %v3108_v48 = vadd.f32 %v12597_v0, %v12594_v19  ;;  %v2884_v19 = vmul.f32 %v16459_v46, %v1668_v11  ;;  %v3864_v0 = vld [vmem:[#allocation4 + $0x1c0] sm:$0xff]  ;;  %v2900_v46 = vmul.f32 %v12262_v43, %v1684_v52 }
 0x6ec   : > { %v3928_v53 = vmul.f32 %v12668_v33, %v3864_v0  ;;  %v16466_v0 = vld [vmem:[#allocation75_spill] sm:$0xff] }
 0x6ed   : > { %v3005_v49 = vpop.xlane.xlu1 %3004 }
 0x6ee   : > { %v3147_v15 = vadd.f32 %v3005_v49, %v2891_v14  ;;  %v2975_v40 = vpop.xlane.xlu0 %2974  ;;  %v3609_v5 = vpop.f32.mrf.mxu2  ;;  %v16462_v49 = vld [vmem:[#allocation103_spill] sm:$0xff] }
 0x6ef   : > { %v3137_v45 = vadd.f32 %v2975_v40, %v2881_v58  ;;  %v3778_v55 = vpop.f32.mrf.mxu3  ;;  %v2897_v56 = vmul.f32 %v16462_v49, %v1681_v28  ;;  %v12678_v58 = vpop.eup %9644  ;;  %v16463_v40 = vld [vmem:[#allocation74_spill] sm:$0xff]  ;;  %v1687_v28 = vld [vmem:[#allocation3 + $0x1e8] sm:$0xff] }
 0x6f0   : > { %3211 = vst [vmem:[#allocation3 + $0x58] sm:$0xff] %v3147_v15  ;;  %v3779_v12 = vadd.f32 %v3778_v55, %v3609_v5  ;;  %v3865_v5 = vld [vmem:[#allocation4 + $0x1f8] sm:$0xff]  ;;  %v9700_v55 = vld [vmem:[#allocation2 + $0x68] sm:$0xff]  ;;  %v2903_v49 = vmul.f32 %v12330_v13, %v1687_v28  ;;  %v16475_v28 = vld [vmem:[#allocation131_spill] sm:$0xff] }
 0x6f1   : > { %3201 = vst [vmem:[#allocation3 + $0x88] sm:$0xff] %v3137_v45  ;;  %3088 = vadd.xlane.f32.xlu2 %v12422_v32  ;;  %v3929_v11 = vmul.f32 %v12678_v58, %v3865_v5  ;;  %v3867_v5 = vld [vmem:[#allocation4 + $0x120] sm:$0xff] }
 0x6f2   : > { %v3991_v6 = vadd.f32 %v3927_v21, %v3779_v12  ;;  %v16464_v12 = vld [vmem:[#allocation87_spill] sm:$0xff] }
 0x6f3   : > { %3109 = vadd.xlane.f32.xlu0 %v3108_v48  ;;  %v2025_v21 = vsub.f32 %v16464_v12, %v9700_v55  ;;  %v16470_v55 = vld [vmem:[#allocation30_spill] sm:$0xff] }
 0x6f4   : > { %4055 = vst [vmem:[#allocation4 + $0x8] sm:$0xff] %v3991_v6  ;;  %v2963_v31 = vpop.xlane.xlu2 %2962 }
 0x6f5   : > { %v3133_v32 = vadd.f32 %v2963_v31, %v2877_v61  ;;  %v3014_v41 = vpop.xlane.xlu1 %3013  ;;  %v1674_v61 = vld [vmem:[#allocation3 + $0x80] sm:$0xff]  ;;  %v2143_v31 = vmul.f32 1.442695, %v2025_v21 }
 0x6f6   : > { %v3150_v54 = vadd.f32 %v3014_v41, %v2894_v57  ;;  %v2984_v27 = vpop.xlane.xlu0 %2983  ;;  %v3611_v2 = vpop.f32.mrf.mxu2  ;;  %v16465_v57 = vld [vmem:[#allocation119_spill] sm:$0xff] }
 0x6f7   : > { %3197 = vst [vmem:[#allocation3 + $0x1f0] sm:$0xff] %v3133_v32  ;;  %v3140_v22 = vadd.f32 %v2984_v27, %v2884_v19  ;;  %v3780_v47 = vpop.f32.mrf.mxu3  ;;  %v2883_v32 = vmul.f32 %v16465_v57, %v1667_v34  ;;  %v12687_v19 = vpop.eup %9646  ;;  %v3866_v27 = vld [vmem:[#allocation4 + $0x130] sm:$0xff]  ;;  %9648 = vpow2.f32 %v2143_v31  ;;  %v1680_v34 = vld [vmem:[#allocation3 + $0xe8] sm:$0xff] }
 0x6f8   : > { %3214 = vst [vmem:[#allocation3 + $0x1a0] sm:$0xff] %v3150_v54  ;;  %v3781_v10 = vadd.f32 %v3780_v47, %v3611_v2  ;;  %v2890_v54 = vmul.f32 %v16466_v0, %v1674_v61  ;;  %v3930_v43 = vmul.f32 %v12687_v19, %v3866_v27  ;;  %v3868_v0 = vld [vmem:[#allocation4 + $0x10] sm:$0xff] }
 0x6f9   : > { %3204 = vst [vmem:[#allocation3 + $0x10] sm:$0xff] %v3140_v22  ;;  %3097 = vadd.xlane.f32.xlu2 %v12505_v26  ;;  %v2887_v26 = vmul.f32 %v16463_v40, %v1671_v9  ;;  %v16467_v22 = vld [vmem:[#allocation42_spill] sm:$0xff]  ;;  %v1677_v9 = vld [vmem:[#allocation3 + $0x40] sm:$0xff]  ;;  %v16469_v40 = vld [vmem:[#allocation96_spill] sm:$0xff] }
 0x6fa   : > { %v3992_v29 = vadd.f32 %v3928_v53, %v3781_v10  ;;  %v2026_v47 = vsub.f32 %v16467_v22, %v9701_v50 }
 0x6fb   : > { %3118 = vadd.xlane.f32.xlu0 %v3117_v44  ;;  %v1670_v44 = vld [vmem:[#allocation3 + $0xa0] sm:$0xff] }
 0x6fc   : > { %4056 = vst [vmem:[#allocation4 + $0x1c0] sm:$0xff] %v3992_v29  ;;  %v2972_v14 = vpop.xlane.xlu2 %2971  ;;  %v2145_v35 = vmul.f32 1.442695, %v2026_v47  ;;  %v1676_v47 = vld [vmem:[#allocation3 + $0x48] sm:$0xff] }
 0x6fd   : > { %v3136_v37 = vadd.f32 %v2972_v14, %v2880_v25  ;;  %v3023_v15 = vpop.xlane.xlu1 %3022  ;;  %v2886_v25 = vmul.f32 %v16468_v59, %v1670_v44 }
 0x6fe   : > { %v3153_v45 = vadd.f32 %v3023_v15, %v2897_v56  ;;  %v2993_v42 = vpop.xlane.xlu0 %2992  ;;  %v3614_v18 = vpop.f32.mrf.mxu2  ;;  %9650 = vpow2.f32 %v2145_v35  ;;  %v16476_v35 = vld [vmem:[#allocation107_spill] sm:$0xff] }
 0x6ff   : > { %3200 = vst [vmem:[#allocation3 + $0x8] sm:$0xff] %v3136_v37  ;;  %v3143_v23 = vadd.f32 %v2993_v42, %v2887_v26  ;;  %v3783_v48 = vpop.f32.mrf.mxu3  ;;  %v12695_v56 = vpop.eup %9648  ;;  %v2893_v26 = vmul.f32 %v16469_v40, %v1677_v9  ;;  %v3869_v40 = vld [vmem:[#allocation4 + $0x170] sm:$0xff] }
 0x700   : > { %3217 = vst [vmem:[#allocation3 + $0x168] sm:$0xff] %v3153_v45  ;;  %v3784_v6 = vadd.f32 %v3783_v48, %v3614_v18  ;;  %v9702_v18 = vld [vmem:[#allocation2 + $0x198] sm:$0xff]  ;;  %v3931_v13 = vmul.f32 %v12695_v56, %v3867_v5 }
 0x701   : > { %3207 = vst [vmem:[#allocation3 + $0x1c0] sm:$0xff] %v3143_v23  ;;  %3106 = vadd.xlane.f32.xlu2 %v3105_v1  ;;  %v2027_v12 = vsub.f32 %v16470_v55, %v9702_v18  ;;  %v1673_v1 = vld [vmem:[#allocation3 + $0x108] sm:$0xff]  ;;  %v1679_v55 = vld [vmem:[#allocation3 + $0x198] sm:$0xff] }
 0x702   : > { %v3993_v20 = vadd.f32 %v3929_v11, %v3784_v6  ;;  %v1690_v6 = vld [vmem:[#allocation3 + $0x98] sm:$0xff] }
 0x703   : > { %v2147_v52 = vmul.f32 1.442695, %v2027_v12  ;;  %v2906_v57 = vmul.f32 %v12351_v3, %v1690_v6  ;;  %v1693_v3 = vld [vmem:[#allocation3 + $0xc8] sm:$0xff]  ;;  %v1696_v12 = vld [vmem:[#allocation3 + $0x180] sm:$0xff] }
 0x704   : > { %4057 = vst [vmem:[#allocation4 + $0x1f8] sm:$0xff] %v3993_v20  ;;  %v2981_v41 = vpop.xlane.xlu2 %2980  ;;  %v16471_v20 = vld [vmem:[#allocation82_spill] sm:$0xff]  ;;  %v2909_v59 = vmul.f32 %v16476_v35, %v1693_v3  ;;  %v2912_v6 = vmul.f32 %v12513_v60, %v1696_v12  ;;  %v1699_v60 = vld [vmem:[#allocation3 + $0x20] sm:$0xff] }
 0x705   : > { %v3139_v30 = vadd.f32 %v2981_v41, %v2883_v32  ;;  %v3032_v51 = vpop.xlane.xlu1 %3031  ;;  %v2889_v61 = vmul.f32 %v16471_v20, %v1673_v1  ;;  %v12702_v32 = vpop.eup %9650  ;;  %9652 = vpow2.f32 %v2147_v52  ;;  %v16479_v20 = vld [vmem:[#allocation33_spill] sm:$0xff]  ;;  %v16483_v35 = vld [vmem:[#allocation138_spill] sm:$0xff] }
 0x706   : > { %v3156_v2 = vadd.f32 %v3032_v51, %v2900_v46  ;;  %v3002_v62 = vpop.xlane.xlu0 %3001  ;;  %v3616_v16 = vpop.f32.mrf.mxu2  ;;  %v3932_v22 = vmul.f32 %v12702_v32, %v3868_v0 }
 0x707   : > { %3203 = vst [vmem:[#allocation3 + $0xe0] sm:$0xff] %v3139_v30  ;;  %v3146_v10 = vadd.f32 %v3002_v62, %v2890_v54  ;;  %v3785_v53 = vpop.f32.mrf.mxu3  ;;  %v16472_v30 = vld [vmem:[#allocation86_spill] sm:$0xff] }
 0x708   : > { %3220 = vst [vmem:[#allocation3 + $0x28] sm:$0xff] %v3156_v2  ;;  %v3786_v38 = vadd.f32 %v3785_v53, %v3616_v16  ;;  %v2896_v51 = vmul.f32 %v16472_v30, %v1680_v34  ;;  %v1683_v53 = vld [vmem:[#allocation3 + $0x1d8] sm:$0xff] }
 0x709   : > { %3210 = vst [vmem:[#allocation3 + $0x80] sm:$0xff] %v3146_v10  ;;  %3115 = vadd.xlane.f32.xlu2 %v12527_v4 }
 0x70a   : > { %v3994_v29 = vadd.f32 %v3930_v43, %v3786_v38  ;;  %v16473_v38 = vld [vmem:[#allocation139_spill] sm:$0xff] }
 0x70b   : > { %v16474_v43 = vsub.f32 %v12303_v36, %v16473_v38 }
 0x70c   : > { %4058 = vst [vmem:[#allocation4 + $0x130] sm:$0xff] %v3994_v29  ;;  %v2990_v14 = vpop.xlane.xlu2 %2989  ;;  %v2892_v29 = vmul.f32 %v16475_v28, %v1676_v47  ;;  %v2915_v47 = vmul.f32 %v12610_v17, %v1699_v60 }
 0x70d   : > { %v3142_v37 = vadd.f32 %v2990_v14, %v2886_v25  ;;  %v3041_v15 = vpop.xlane.xlu1 %3040  ;;  %v2149_v44 = vmul.f32 1.442695, %v16474_v43  ;;  %v12711_v25 = vpop.eup %9652 }
 0x70e   : > { %v3159_v45 = vadd.f32 %v3041_v15, %v2903_v49  ;;  %v3011_v42 = vpop.xlane.xlu0 %3010  ;;  %v3619_v4 = vpop.f32.mrf.mxu2  ;;  %v3933_v18 = vmul.f32 %v12711_v25, %v3869_v40 }
 0x70f   : > { %3206 = vst [vmem:[#allocation3 + $0xa0] sm:$0xff] %v3142_v37  ;;  %v3149_v21 = vadd.f32 %v3011_v42, %v2893_v26  ;;  %v3788_v23 = vpop.f32.mrf.mxu3  ;;  %v16477_v37 = vld [vmem:[#allocation98_spill] sm:$0xff]  ;;  %9654 = vpow2.f32 %v2149_v44 }
 0x710   : > { %3223 = vst [vmem:[#allocation3 + $0x1e8] sm:$0xff] %v3159_v45  ;;  %v3789_v48 = vadd.f32 %v3788_v23, %v3619_v4  ;;  %v2899_v15 = vmul.f32 %v16477_v37, %v1683_v53  ;;  %v1686_v23 = vld [vmem:[#allocation3 + $0x1c8] sm:$0xff]  ;;  %v16481_v53 = vld [vmem:[#allocation43_spill] sm:$0xff] }
 0x711   : > { %3213 = vst [vmem:[#allocation3 + $0x40] sm:$0xff] %v3149_v21  ;;  %v1692_v37 = vld [vmem:[#allocation3 + $0x100] sm:$0xff] }
 0x712   : > { %v3995_v11 = vadd.f32 %v3931_v13, %v3789_v48  ;;  %v16478_v48 = vld [vmem:[#allocation94_spill] sm:$0xff] }
 0x713   : > { %v2895_v13 = vmul.f32 %v16478_v48, %v1679_v55  ;;  %v1688_v48 = vld [vmem:[#allocation3 + $0x140] sm:$0xff] }
 0x714   : > { %4059 = vst [vmem:[#allocation4 + $0x120] sm:$0xff] %v3995_v11  ;;  %v2999_v31 = vpop.xlane.xlu2 %2998 }
 0x715   : > { %v3145_v41 = vadd.f32 %v2999_v31, %v2889_v61  ;;  %v3050_v46 = vpop.xlane.xlu1 %3049  ;;  %v12717_v11 = vpop.eup %9654  ;;  %v2902_v61 = vmul.f32 %v16479_v20, %v1686_v23  ;;  %v3870_v31 = vld [vmem:[#allocation4 + $0x20] sm:$0xff] }
 0x716   : > { %v3162_v54 = vadd.f32 %v3050_v46, %v2906_v57  ;;  %v3020_v27 = vpop.xlane.xlu0 %3019  ;;  %v3621_v2 = vpop.f32.mrf.mxu2 }
 0x717   : > { %3209 = vst [vmem:[#allocation3 + $0x108] sm:$0xff] %v3145_v41  ;;  %v3152_v62 = vadd.f32 %v3020_v27, %v2896_v51  ;;  %v3790_v16 = vpop.f32.mrf.mxu3  ;;  %v1682_v27 = vld [vmem:[#allocation3 + $0x158] sm:$0xff] }
 0x718   : > { %3226 = vst [vmem:[#allocation3 + $0x98] sm:$0xff] %v3162_v54  ;;  %v3791_v50 = vadd.f32 %v3790_v16, %v3621_v2  ;;  %v3934_v54 = vmul.f32 %v12717_v11, %v3870_v31  ;;  %v16480_v16 = vld [vmem:[#allocation84_spill] sm:$0xff] }
 0x719   : > { %3216 = vst [vmem:[#allocation3 + $0xe8] sm:$0xff] %v3152_v62  ;;  %v1689_v62 = vld [vmem:[#allocation3 + $0x60] sm:$0xff] }
 0x71a   : > { %v3996_v10 = vadd.f32 %v3932_v22, %v3791_v50  ;;  %v2898_v50 = vmul.f32 %v16480_v16, %v1682_v27  ;;  %v2905_v38 = vmul.f32 %v16481_v53, %v1689_v62  ;;  %v16490_v62 = vld [vmem:[#allocation140_spill] sm:$0xff] }
 0x71c   : > { %4060 = vst [vmem:[#allocation4 + $0x10] sm:$0xff] %v3996_v10  ;;  %v3008_v9 = vpop.xlane.xlu2 %3007 }
 0x71d   : > { %v3148_v14 = vadd.f32 %v3008_v9, %v2892_v29  ;;  %v3059_v49 = vpop.xlane.xlu1 %3058  ;;  %v1685_v29 = vld [vmem:[#allocation3] sm:$0xff]  ;;  %v16482_v9 = vld [vmem:[#allocation37_spill] sm:$0xff] }
 0x71e   : > { %v3165_v26 = vadd.f32 %v3059_v49, %v2909_v59  ;;  %v3029_v5 = vpop.xlane.xlu0 %3028  ;;  %v3624_v45 = vpop.f32.mrf.mxu2  ;;  %v16484_v59 = vsub.f32 %v16482_v9, %v16483_v35  ;;  %v1702_v49 = vld [vmem:[#allocation3 + $0x90] sm:$0xff] }
 0x71f   : > { %3212 = vst [vmem:[#allocation3 + $0x48] sm:$0xff] %v3148_v14  ;;  %v3155_v36 = vadd.f32 %v3029_v5, %v2899_v15  ;;  %v3793_v42 = vpop.f32.mrf.mxu3  ;;  %v16485_v15 = vld [vmem:[#allocation101_spill] sm:$0xff]  ;;  %v9703_v5 = vld [vmem:[#allocation2 + $0x1c0] sm:$0xff] }
 0x720   : > { %3229 = vst [vmem:[#allocation3 + $0xc8] sm:$0xff] %v3165_v26  ;;  %v3794_v4 = vadd.f32 %v3793_v42, %v3624_v45  ;;  %v2151_v14 = vmul.f32 1.442695, %v16484_v59  ;;  %v2901_v40 = vmul.f32 %v16485_v15, %v1685_v29  ;;  %v2918_v26 = vmul.f32 %v12668_v33, %v1702_v49  ;;  %v16486_v45 = vld [vmem:[#allocation102_spill] sm:$0xff] }
 0x721   : > { %3219 = vst [vmem:[#allocation3 + $0x1d8] sm:$0xff] %v3155_v36  ;;  %v2030_v36 = vsub.f32 %v16486_v45, %v9703_v5  ;;  %v3871_v33 = vld [vmem:[#allocation4 + $0xf8] sm:$0xff] }
 0x722   : > { %v3997_v21 = vadd.f32 %v3933_v18, %v3794_v4  ;;  %9656 = vpow2.f32 %v2151_v14  ;;  %v16487_v18 = vld [vmem:[#allocation106_spill] sm:$0xff] }
 0x723   : > { %v2908_v55 = vmul.f32 %v16487_v18, %v1692_v37  ;;  %v16496_v18 = vld [vmem:[#allocation27_spill] sm:$0xff] }
 0x724   : > { %4061 = vst [vmem:[#allocation4 + $0x170] sm:$0xff] %v3997_v21  ;;  %v3017_v1 = vpop.xlane.xlu2 %3016 }
 0x725   : > { %v3151_v34 = vadd.f32 %v3017_v1, %v2895_v13  ;;  %v3068_v52 = vpop.xlane.xlu1 %3067  ;;  %v2153_v13 = vmul.f32 1.442695, %v2030_v36  ;;  %v1705_v1 = vld [vmem:[#allocation3 + $0x138] sm:$0xff] }
 0x726   : > { %v3168_v57 = vadd.f32 %v3068_v52, %v2912_v6  ;;  %v3038_v41 = vpop.xlane.xlu0 %3037  ;;  %v3626_v46 = vpop.f32.mrf.mxu2  ;;  %v1695_v6 = vld [vmem:[#allocation3 + $0x178] sm:$0xff]  ;;  %v16488_v52 = vld [vmem:[#allocation63_spill] sm:$0xff] }
 0x727   : > { %3215 = vst [vmem:[#allocation3 + $0x198] sm:$0xff] %v3151_v34  ;;  %v3158_v30 = vadd.f32 %v3038_v41, %v2902_v61  ;;  %v3795_v51 = vpop.f32.mrf.mxu3  ;;  %v2904_v20 = vmul.f32 %v16488_v52, %v1688_v48  ;;  %9658 = vpow2.f32 %v2153_v13  ;;  %v3873_v48 = vld [vmem:[#allocation4 + $0x1a0] sm:$0xff]  ;;  %v16499_v13 = vld [vmem:[#allocation109_spill] sm:$0xff] }
 0x728   : > { %3232 = vst [vmem:[#allocation3 + $0x180] sm:$0xff] %v3168_v57  ;;  %v3796_v0 = vadd.f32 %v3795_v51, %v3626_v46  ;;  %v12731_v34 = vpop.eup %9656  ;;  %v2921_v57 = vmul.f32 %v12695_v56, %v1705_v1  ;;  %v2911_v51 = vmul.f32 %v12502_v63, %v1695_v6  ;;  %v1691_v56 = vld [vmem:[#allocation3 + $0x1b8] sm:$0xff]  ;;  %v3872_v63 = vld [vmem:[#allocation4 + $0xe0] sm:$0xff] }
 0x729   : > { %3222 = vst [vmem:[#allocation3 + $0x1c8] sm:$0xff] %v3158_v30 }
 0x72a   : > { %v3998_v2 = vadd.f32 %v3934_v54, %v3796_v0  ;;  %v3935_v54 = vmul.f32 %v12731_v34, %v3871_v33 }
 0x72c   : > { %4062 = vst [vmem:[#allocation4 + $0x20] sm:$0xff] %v3998_v2  ;;  %v3026_v22 = vpop.xlane.xlu2 %3025  ;;  %v16489_v2 = vld [vmem:[#allocation62_spill] sm:$0xff] }
 0x72d   : > { %v3154_v3 = vadd.f32 %v3026_v22, %v2898_v50  ;;  %v3077_v10 = vpop.xlane.xlu1 %3076  ;;  %v16491_v16 = vsub.f32 %v16489_v2, %v16490_v62  ;;  %v12740_v53 = vpop.eup %9658  ;;  %v16500_v2 = vld [vmem:[#allocation26_spill] sm:$0xff]  ;;  %v16501_v62 = vld [vmem:[#allocation47_spill] sm:$0xff] }
 0x72e   : > { %v3171_v43 = vadd.f32 %v3077_v10, %v2915_v47  ;;  %v3047_v44 = vpop.xlane.xlu0 %3046  ;;  %v1698_v10 = vld [vmem:[#allocation3 + $0x110] sm:$0xff]  ;;  %v3936_v37 = vmul.f32 %v12740_v53, %v3872_v63 }
 0x72f   : > { %3218 = vst [vmem:[#allocation3 + $0x158] sm:$0xff] %v3154_v3  ;;  %v3161_v28 = vadd.f32 %v3047_v44, %v2905_v38  ;;  %v2155_v50 = vmul.f32 1.442695, %v16491_v16  ;;  %v1708_v3 = vld [vmem:[#allocation3 + $0x18] sm:$0xff]  ;;  %v16492_v38 = vld [vmem:[#allocation104_spill] sm:$0xff]  ;;  %v2914_v14 = vmul.f32 %v12586_v8, %v1698_v10  ;;  %v16502_v16 = vsub.f32 %v16500_v2, %v16501_v62  ;;  %v1712_v62 = vld [vmem:[#allocation3 + $0x170] sm:$0xff] }
 0x730   : > { %3235 = vst [vmem:[#allocation3 + $0x20] sm:$0xff] %v3171_v43  ;;  %v2907_v43 = vmul.f32 %v16492_v38, %v1691_v56  ;;  %v2924_v29 = vmul.f32 %v12717_v11, %v1708_v3  ;;  %v1711_v8 = vld [vmem:[#allocation3 + $0x1f8] sm:$0xff] }
 0x731   : > { %3225 = vst [vmem:[#allocation3 + $0x60] sm:$0xff] %v3161_v28  ;;  %9660 = vpow2.f32 %v2155_v50  ;;  %v2159_v50 = vmul.f32 1.442695, %v16502_v16 }
 0x734   : > { %v3035_v17 = vpop.xlane.xlu2 %3034 }
 0x735   : > { %v3157_v42 = vadd.f32 %v3035_v17, %v2901_v40  ;;  %v3086_v4 = vpop.xlane.xlu1 %3085  ;;  %v16493_v17 = vld [vmem:[#allocation92_spill] sm:$0xff] }
 0x736   : > { %v3174_v12 = vadd.f32 %v3086_v4, %v2918_v26  ;;  %v3056_v21 = vpop.xlane.xlu0 %3055  ;;  %v16494_v26 = vld [vmem:[#allocation66_spill] sm:$0xff] }
 0x737   : > { %3221 = vst [vmem:[#allocation3] sm:$0xff] %v3157_v42  ;;  %v3164_v23 = vadd.f32 %v3056_v21, %v2908_v55  ;;  %v16495_v5 = vsub.f32 %v16493_v17, %v16494_v26  ;;  %v1694_v4 = vld [vmem:[#allocation3 + $0xf8] sm:$0xff]  ;;  %v9661_v11 = vpop.eup %9660  ;;  %v16497_v55 = vld [vmem:[#allocation141_spill] sm:$0xff]  ;;  %v3875_v17 = vld [vmem:[#allocation4 + $0x48] sm:$0xff] }
 0x738   : > { %3238 = vst [vmem:[#allocation3 + $0x90] sm:$0xff] %v3174_v12  ;;  %v16498_v12 = vsub.f32 %v16496_v18, %v16497_v55  ;;  %v2910_v1 = vmul.f32 %v16499_v13, %v1694_v4  ;;  %v2927_v52 = vmul.f32 %v9661_v11, %v1711_v8  ;;  %v1710_v8 = vld [vmem:[#allocation3 + $0x128] sm:$0xff] }
 0x739   : > { %3228 = vst [vmem:[#allocation3 + $0x100] sm:$0xff] %v3164_v23  ;;  %v2161_v45 = vmul.f32 1.442695, %v16495_v5  ;;  %v1701_v23 = vld [vmem:[#allocation3 + $0x120] sm:$0xff] }
 0x73a   : > { %v2157_v21 = vmul.f32 1.442695, %v16498_v12 }
 0x73b   : > { %9662 = vpow2.f32 %v2161_v45 }
 0x73c   : > { %v3629_v61 = vpop.f32.mrf.mxu2  ;;  %v3044_v31 = vpop.xlane.xlu2 %3043  ;;  %9664 = vpow2.f32 %v2157_v21  ;;  %v1703_v21 = vld [vmem:[#allocation3 + $0xa8] sm:$0xff] }
 0x73d   : > { %v3798_v41 = vpop.f32.mrf.mxu3  ;;  %v3160_v46 = vadd.f32 %v3044_v31, %v2904_v20  ;;  %v3095_v30 = vpop.xlane.xlu1 %3094  ;;  %9666 = vpow2.f32 %v2159_v50 }
 0x73e   : > { %v3799_v0 = vadd.f32 %v3798_v41, %v3629_v61  ;;  %v3177_v27 = vadd.f32 %v3095_v30, %v2921_v57  ;;  %v3065_v60 = vpop.xlane.xlu0 %3064  ;;  %v2917_v57 = vmul.f32 %v12656_v7, %v1701_v23  ;;  %v3874_v7 = vld [vmem:[#allocation4 + $0xb0] sm:$0xff]  ;;  %v3876_v23 = vld [vmem:[#allocation4 + $0x128] sm:$0xff] }
 0x73f   : > { %3224 = vst [vmem:[#allocation3 + $0x140] sm:$0xff] %v3160_v46  ;;  %v3167_v22 = vadd.f32 %v3065_v60, %v2911_v51  ;;  %v3937_v46 = vmul.f32 %v9661_v11, %v3873_v48  ;;  %v2919_v48 = vmul.f32 %v12678_v58, %v1703_v21 }
 0x740   : > { %v3999_v47 = vadd.f32 %v3935_v54, %v3799_v0  ;;  %3241 = vst [vmem:[#allocation3 + $0x138] sm:$0xff] %v3177_v27  ;;  %v1697_v27 = vld [vmem:[#allocation3 + $0xb0] sm:$0xff] }
 0x741   : > { %3231 = vst [vmem:[#allocation3 + $0x178] sm:$0xff] %v3167_v22  ;;  %v9663_v60 = vpop.eup %9662  ;;  %v1714_v22 = vld [vmem:[#allocation3 + $0x118] sm:$0xff]  ;;  %v2913_v3 = vmul.f32 %v12579_v39, %v1697_v27  ;;  %v1707_v39 = vld [vmem:[#allocation3 + $0x1b0] sm:$0xff] }
 0x742   : > { %4063 = vst [vmem:[#allocation4 + $0xf8] sm:$0xff] %v3999_v47  ;;  %v1704_v47 = vld [vmem:[#allocation3 + $0xc0] sm:$0xff]  ;;  %v12757_v56 = vpop.eup %9664  ;;  %v2930_v38 = vmul.f32 %v9663_v60, %v1714_v22  ;;  %v1709_v27 = vld [vmem:[#allocation3 + $0xf0] sm:$0xff] }
 0x743   : > { %v2928_v16 = vmul.f32 %v12757_v56, %v1712_v62 }
 0x744   : > { %v3631_v44 = vpop.f32.mrf.mxu2  ;;  %v3053_v28 = vpop.xlane.xlu2 %3052 }
 0x745   : > { %v3800_v9 = vpop.f32.mrf.mxu3  ;;  %v3163_v35 = vadd.f32 %v3053_v28, %v2907_v43  ;;  %v3104_v59 = vpop.xlane.xlu1 %3103 }
 0x746   : > { %v3801_v49 = vadd.f32 %v3800_v9, %v3631_v44  ;;  %v3180_v15 = vadd.f32 %v3104_v59, %v2924_v29  ;;  %v3074_v40 = vpop.xlane.xlu0 %3073  ;;  %v2920_v29 = vmul.f32 %v12687_v19, %v1704_v47 }
 0x747   : > { %3227 = vst [vmem:[#allocation3 + $0x1b8] sm:$0xff] %v3163_v35  ;;  %v3170_v36 = vadd.f32 %v3074_v40, %v2914_v14  ;;  %v3938_v35 = vmul.f32 %v12757_v56, %v3874_v7  ;;  %v9667_v40 = vpop.eup %9666 }
 0x748   : > { %v4000_v42 = vadd.f32 %v3936_v37, %v3801_v49  ;;  %3244 = vst [vmem:[#allocation3 + $0x18] sm:$0xff] %v3180_v15  ;;  %v1700_v15 = vld [vmem:[#allocation3 + $0xb8] sm:$0xff]  ;;  %v3939_v11 = vmul.f32 %v9667_v40, %v3875_v17 }
 0x749   : > { %3234 = vst [vmem:[#allocation3 + $0x110] sm:$0xff] %v3170_v36  ;;  %v2916_v26 = vmul.f32 %v12619_v24, %v1700_v15 }
 0x74a   : > { %4064 = vst [vmem:[#allocation4 + $0xe0] sm:$0xff] %v4000_v42  ;;  %v2923_v42 = vmul.f32 %v12711_v25, %v1707_v39 }
 0x74c   : > { %v3634_v6 = vpop.f32.mrf.mxu2  ;;  %v3062_v33 = vpop.xlane.xlu2 %3061 }
 0x74d   : > { %v3803_v20 = vpop.f32.mrf.mxu3  ;;  %v3166_v61 = vadd.f32 %v3062_v33, %v2910_v1  ;;  %v3113_v31 = vpop.xlane.xlu1 %3112  ;;  %v2926_v33 = vmul.f32 %v12740_v53, %v1710_v8  ;;  %v2925_v53 = vmul.f32 %v12731_v34, %v1709_v27 }
 0x74e   : > { %v3804_v41 = vadd.f32 %v3803_v20, %v3634_v6  ;;  %v3183_v30 = vadd.f32 %v3113_v31, %v2927_v52  ;;  %v3083_v51 = vpop.xlane.xlu0 %3082  ;;  %v3940_v52 = vmul.f32 %v9663_v60, %v3876_v23 }
 0x74f   : > { %3230 = vst [vmem:[#allocation3 + $0xf8] sm:$0xff] %v3166_v61  ;;  %v3173_v0 = vadd.f32 %v3083_v51, %v2917_v57  ;;  %v1706_v57 = vld [vmem:[#allocation3 + $0x188] sm:$0xff] }
 0x750   : > { %v4001_v54 = vadd.f32 %v3937_v46, %v3804_v41  ;;  %3247 = vst [vmem:[#allocation3 + $0x1f8] sm:$0xff] %v3183_v30  ;;  %v1713_v41 = vld [vmem:[#allocation3 + $0x1d0] sm:$0xff]  ;;  %v2922_v46 = vmul.f32 %v12702_v32, %v1706_v57 }
 0x751   : > { %3237 = vst [vmem:[#allocation3 + $0x120] sm:$0xff] %v3173_v0  ;;  %v2929_v51 = vmul.f32 %v9667_v40, %v1713_v41 }
 0x752   : > { %4065 = vst [vmem:[#allocation4 + $0x1a0] sm:$0xff] %v4001_v54 }
 0x754   : > { %v3636_v10 = vpop.f32.mrf.mxu2  ;;  %v3071_v63 = vpop.xlane.xlu2 %3070 }
 0x755   : > { %v3805_v43 = vpop.f32.mrf.mxu3  ;;  %v3169_v44 = vadd.f32 %v3071_v63, %v2913_v3  ;;  %v3122_v28 = vpop.xlane.xlu1 %3121 }
 0x756   : > { %v3806_v9 = vadd.f32 %v3805_v43, %v3636_v10  ;;  %v3186_v59 = vadd.f32 %v3122_v28, %v2930_v38  ;;  %v3092_v14 = vpop.xlane.xlu0 %3091 }
 0x757   : > { %3233 = vst [vmem:[#allocation3 + $0xb0] sm:$0xff] %v3169_v44  ;;  %v3176_v49 = vadd.f32 %v3092_v14, %v2920_v29 }
 0x758   : > { %v4002_v37 = vadd.f32 %v3938_v35, %v3806_v9  ;;  %3250 = vst [vmem:[#allocation3 + $0x118] sm:$0xff] %v3186_v59 }
 0x759   : > { %3240 = vst [vmem:[#allocation3 + $0xc0] sm:$0xff] %v3176_v49 }
 0x75a   : > { %4066 = vst [vmem:[#allocation4 + $0xb0] sm:$0xff] %v4002_v37 }
 0x75c   : > { %v3639_v5 = vpop.f32.mrf.mxu2  ;;  %v3080_v45 = vpop.xlane.xlu2 %3079 }
 0x75d   : > { %v3808_v19 = vpop.f32.mrf.mxu3  ;;  %v3172_v36 = vadd.f32 %v3080_v45, %v2916_v26 }
 0x75e   : > { %v3809_v4 = vadd.f32 %v3808_v19, %v3639_v5  ;;  %v3101_v18 = vpop.xlane.xlu0 %3100 }
 0x75f   : > { %3236 = vst [vmem:[#allocation3 + $0xb8] sm:$0xff] %v3172_v36  ;;  %v3179_v55 = vadd.f32 %v3101_v18, %v2923_v42 }
 0x760   : > { %v4003_v12 = vadd.f32 %v3939_v11, %v3809_v4 }
 0x761   : > { %3243 = vst [vmem:[#allocation3 + $0x1b0] sm:$0xff] %v3179_v55 }
 0x762   : > { %4067 = vst [vmem:[#allocation4 + $0x48] sm:$0xff] %v4003_v12 }
 0x764   : > { %v3641_v24 = vpop.f32.mrf.mxu2  ;;  %v3089_v13 = vpop.xlane.xlu2 %3088 }
 0x765   : > { %v3810_v1 = vpop.f32.mrf.mxu3  ;;  %v3175_v6 = vadd.f32 %v3089_v13, %v2919_v48 }
 0x766   : > { %v3811_v25 = vadd.f32 %v3810_v1, %v3641_v24  ;;  %v3110_v20 = vpop.xlane.xlu0 %3109 }
 0x767   : > { %3239 = vst [vmem:[#allocation3 + $0xa8] sm:$0xff] %v3175_v6  ;;  %v3182_v61 = vadd.f32 %v3110_v20, %v2926_v33 }
 0x768   : > { %v4004_v31 = vadd.f32 %v3940_v52, %v3811_v25 }
 0x769   : > { %3246 = vst [vmem:[#allocation3 + $0x128] sm:$0xff] %v3182_v61 }
 0x76a   : > { %4068 = vst [vmem:[#allocation4 + $0x128] sm:$0xff] %v4004_v31 }
 0x76c   : > { %v3098_v30 = vpop.xlane.xlu2 %3097 }
 0x76d   : > { %v3178_v58 = vadd.f32 %v3098_v30, %v2922_v46 }
 0x76e   : > { %v3119_v0 = vpop.xlane.xlu0 %3118 }
 0x76f   : > { %3242 = vst [vmem:[#allocation3 + $0x188] sm:$0xff] %v3178_v58  ;;  %v3185_v54 = vadd.f32 %v3119_v0, %v2929_v51 }
 0x771   : > { %3249 = vst [vmem:[#allocation3 + $0x1d0] sm:$0xff] %v3185_v54 }
 0x774   : > { %v3107_v60 = vpop.xlane.xlu2 %3106 }
 0x775   : > { %v3181_v2 = vadd.f32 %v3107_v60, %v2925_v53 }
 0x777   : > { %3245 = vst [vmem:[#allocation3 + $0xf0] sm:$0xff] %v3181_v2 }
 0x77c   : > { %v3116_v50 = vpop.xlane.xlu2 %3115 }
 0x77d   : > { %v3184_v22 = vadd.f32 %v3116_v50, %v2928_v16 }
 0x77f   : > { %3248 = vst [vmem:[#allocation3 + $0x170] sm:$0xff] %v3184_v22 }
 0x780 PF: > { %p8792_p7 = scmp.ne.s32.totalorder %s10668_s22, %s10665_s21 }
 0x782   : > { %4072 = sbr.rel (%p8792_p7) target bundleno = 3588 (0xe04), region = 85 }
 0x787   : > { %v9160_v32 = vld [vmem:[%s10673_s7 + $0x38] sm:$0xff]  ;;  %v9159_v47 = vld [vmem:[%s10673_s7 + $0x30] sm:$0xff]  ;;  %v9158_v7 = vld [vmem:[%s10673_s7 + $0x28] sm:$0xff]  ;;  %v4201_v5 = vlaneseq  ;;  %v15806_v36 = vmov -1e+30  }
 0x788   : > { %v9168_v34 = vld [vmem:[%s10673_s7 + $0x78] sm:$0xff]  ;;  %4653 = vmatpush.bf16.xpose.msra.mxu0 %v9160_v32  ;;  %v9167_v56 = vld [vmem:[%s10673_s7 + $0x70] sm:$0xff]  ;;  %v9166_v3 = vld [vmem:[%s10673_s7 + $0x68] sm:$0xff] }
 0x789   : > { %4822 = vmatpush.bf16.xpose.msra.mxu1 %v9168_v34  ;;  %v9157_v10 = vld [vmem:[%s10673_s7 + $0x20] sm:$0xff]  ;;  %v9156_v38 = vld [vmem:[%s10673_s7 + $0x18] sm:$0xff]  ;;  %v9155_v44 = vld [vmem:[%s10673_s7 + $0x10] sm:$0xff]  ;;  %v12795_v45 = vshrl.u32 %v4201_v5, 7  ;;  %v12797_v19 = vand.u32 127, %v4201_v5 }
 0x78a   : > { %v9165_v63 = vld [vmem:[%s10673_s7 + $0x60] sm:$0xff]  ;;  %v9164_v43 = vld [vmem:[%s10673_s7 + $0x58] sm:$0xff]  ;;  %v9163_v28 = vld [vmem:[%s10673_s7 + $0x50] sm:$0xff] }
 0x78b   : > { %v9154_v29 = vld [vmem:[%s10673_s7 + $0x8] sm:$0xff]  ;;  %v9153_v35 = vld [vmem:[%s10673_s7] sm:$0xff]  ;;  %v9123_v37 = vld [vmem:[%s10680_s20 + $0x10] sm:$0xff]  ;;  %vm4237_vm0 = vcmp.le.s32.totalorder %v12797_v19, %v12795_v45  ;;  %v4203_v4 = vadd.s32 8, %v12795_v45  ;;  %v4204_v48 = vadd.s32 16, %v12795_v45  ;;  %v4205_v52 = vadd.s32 24, %v12795_v45 }
 0x78c   : > { %v9162_v9 = vld [vmem:[%s10673_s7 + $0x48] sm:$0xff]  ;;  %v9161_v59 = vld [vmem:[%s10673_s7 + $0x40] sm:$0xff]  ;;  %v9124_v15 = vld [vmem:[%s10680_s20 + $0x18] sm:$0xff]  ;;  %v12802_v42 = vsel %vm4237_vm0, 0.0, %v15806_v36  ;;  %v4206_v58 = vadd.s32 32, %v12795_v45  ;;  %v4207_v2 = vadd.s32 40, %v12795_v45 }
 0x78d   : > { %v9121_v14 = vld [vmem:[%s10680_s20] sm:$0xff]  ;;  %v9122_v49 = vld [vmem:[%s10680_s20 + $0x8] sm:$0xff]  ;;  %v9127_v17 = vld [vmem:[%s10680_s20 + $0x30] sm:$0xff]  ;;  %vm4239_vm1 = vcmp.le.s32.totalorder %v12797_v19, %v4203_v4  ;;  %vm4241_vm2 = vcmp.le.s32.totalorder %v12797_v19, %v4204_v48  ;;  %vm4243_vm3 = vcmp.le.s32.totalorder %v12797_v19, %v4205_v52  ;;  %v4211_v4 = vadd.s32 72, %v12795_v45 }
 0x78e   : > { %v9125_v39 = vld [vmem:[%s10680_s20 + $0x20] sm:$0xff]  ;;  %v9126_v40 = vld [vmem:[%s10680_s20 + $0x28] sm:$0xff]  ;;  %v9128_v26 = vld [vmem:[%s10680_s20 + $0x38] sm:$0xff]  ;;  %v12815_v23 = vsel %vm4239_vm1, 0.0, %v15806_v36  ;;  %v12827_v25 = vsel %vm4241_vm2, 0.0, %v15806_v36  ;;  %v12840_v30 = vsel %vm4243_vm3, 0.0, %v15806_v36  ;;  %vm4245_vm4 = vcmp.le.s32.totalorder %v12797_v19, %v4206_v58 }
 0x78f   : > { %v9129_v11 = vld [vmem:[%s10680_s20 + $0x40] sm:$0xff]  ;;  %16503 = vst [vmem:[#allocation142_spill] sm:$0xff] %v12815_v23  ;;  %v9130_v20 = vld [vmem:[%s10680_s20 + $0x48] sm:$0xff]  ;;  %v12852_v60 = vsel %vm4245_vm4, 0.0, %v15806_v36  ;;  %vm4247_vm5 = vcmp.le.s32.totalorder %v12797_v19, %v4207_v2  ;;  %vm4255_vm9 = vcmp.le.s32.totalorder %v12797_v19, %v4211_v4 }
 0x790   : > { %4654 = vmatpush.bf16.xpose.msra.mxu0 %v9159_v47  ;;  %16504 = vst [vmem:[#allocation143_spill] sm:$0xff] %v12827_v25  ;;  %v12864_v34 = vsel %vm4247_vm5, 0.0, %v15806_v36  ;;  %v4208_v47 = vadd.s32 48, %v12795_v45 }
 0x791   : > { %4823 = vmatpush.bf16.xpose.msra.mxu1 %v9167_v56  ;;  %16505 = vst [vmem:[#allocation144_spill] sm:$0xff] %v12840_v30  ;;  %v9131_v56 = vld [vmem:[%s10680_s20 + $0x50] sm:$0xff] }
 0x792   : > { %16506 = vst [vmem:[#allocation145_spill] sm:$0xff] %v12864_v34  ;;  %vm4249_vm6 = vcmp.le.s32.totalorder %v12797_v19, %v4208_v47  ;;  %v4214_v47 = vadd.s32 96, %v12795_v45 }
 0x794   : > { %vm4261_vm12 = vcmp.le.s32.totalorder %v12797_v19, %v4214_v47 }
 0x798   : > { %4655 = vmatpush.bf16.xpose.msra.mxu0 %v9158_v7 }
 0x799   : > { %4824 = vmatpush.bf16.xpose.msra.mxu1 %v9166_v3 }
 0x7a0   : > { %4656 = vmatpush.bf16.xpose.msra.mxu0 %v9157_v10 }
 0x7a1   : > { %4825 = vmatpush.bf16.xpose.msra.mxu1 %v9165_v63 }
 0x7a8   : > { %4657 = vmatpush.bf16.xpose.msra.mxu0 %v9156_v38 }
 0x7a9   : > { %4826 = vmatpush.bf16.xpose.msra.mxu1 %v9164_v43  ;;  %v12877_v43 = vsel %vm4249_vm6, 0.0, %v15806_v36 }
 0x7aa   : > { %16507 = vst [vmem:[#allocation146_spill] sm:$0xff] %v12877_v43 }
 0x7b0   : > { %4658 = vmatpush.bf16.xpose.msra.mxu0 %v9155_v44  ;;  %v4209_v44 = vadd.s32 56, %v12795_v45 }
 0x7b1   : > { %4827 = vmatpush.bf16.xpose.msra.mxu1 %v9163_v28 }
 0x7b2   : > { %vm4251_vm7 = vcmp.le.s32.totalorder %v12797_v19, %v4209_v44 }
 0x7b8   : > { %4659 = vmatpush.bf16.xpose.msra.mxu0 %v9154_v29 }
 0x7b9   : > { %4828 = vmatpush.bf16.xpose.msra.mxu1 %v9162_v9 }
 0x7c0   : > { %4660 = vmatpush.bf16.xpose.msra.mxu0 %v9153_v35 }
 0x7c1   : > { %4829 = vmatpush.bf16.xpose.msra.mxu1 %v9161_v59 }
 0x7c7   : > { %4661 = vmatmul.bf16.vlgmr.msra.gmra.mxu0 %v9121_v14 }
 0x7c8   : > { %4830 = vmatmul.bf16.vlgmr.msra.gmra.mxu1 %v9121_v14  ;;  %v12889_v14 = vsel %vm4251_vm7, 0.0, %v15806_v36 }
 0x7c9   : > { %16508 = vst [vmem:[#allocation147_spill] sm:$0xff] %v12889_v14 }
 0x7d7   : > { %4666 = vmatmul.bf16.gmra.mxu0 %v9122_v49 }
 0x7d8   : > { %4835 = vmatmul.bf16.gmra.mxu1 %v9122_v49  ;;  %v4210_v49 = vadd.s32 64, %v12795_v45 }
 0x7da   : > { %vm4253_vm8 = vcmp.le.s32.totalorder %v12797_v19, %v4210_v49  ;;  %v4215_v49 = vadd.s32 104, %v12795_v45 }
 0x7db   : > { %v12902_v5 = vsel %vm4253_vm8, 0.0, %v15806_v36 }
 0x7dc   : > { %16509 = vst [vmem:[#allocation148_spill] sm:$0xff] %v12902_v5  ;;  %vm4263_vm13 = vcmp.le.s32.totalorder %v12797_v19, %v4215_v49  ;;  %v12995_v49 = vld [vmem:[#allocation2 + $0x1b0] sm:$0xff] }
 0x7e7   : > { %4671 = vmatmul.bf16.gmra.mxu0 %v9123_v37 }
 0x7e8   : > { %4840 = vmatmul.bf16.gmra.mxu1 %v9123_v37  ;;  %v9132_v37 = vld [vmem:[%s10680_s20 + $0x58] sm:$0xff] }
 0x7f7   : > { %4676 = vmatmul.bf16.gmra.mxu0 %v9124_v15 }
 0x7f8   : > { %4845 = vmatmul.bf16.gmra.mxu1 %v9124_v15 }
 0x807   : > { %4681 = vmatmul.bf16.gmra.mxu0 %v9125_v39 }
 0x808   : > { %4850 = vmatmul.bf16.gmra.mxu1 %v9125_v39 }
 0x817   : > { %4686 = vmatmul.bf16.gmra.mxu0 %v9126_v40 }
 0x818   : > { %4855 = vmatmul.bf16.gmra.mxu1 %v9126_v40 }
 0x827   : > { %4691 = vmatmul.bf16.gmra.mxu0 %v9127_v17 }
 0x828   : > { %4860 = vmatmul.bf16.gmra.mxu1 %v9127_v17 }
 0x837   : > { %4696 = vmatmul.bf16.gmra.mxu0 %v9128_v26 }
 0x838   : > { %4865 = vmatmul.bf16.gmra.mxu1 %v9128_v26 }
 0x844   : > { %v4662_v18 = vpop.f32.mrf.mxu0 }
 0x845   : > { %v4831_v55 = vpop.f32.mrf.mxu1  ;;  %v12807_v12 = vadd.f32 %v4662_v18, %v12802_v42 }
 0x846   : > { %v12809_v21 = vadd.f32 -1e+30, %v4831_v55 }
 0x847   : > { %4701 = vmatmul.bf16.gmra.mxu0 %v9129_v11 }
 0x848   : > { %v5119_v8 = vmax.f32 %v12807_v12, %v12809_v21  ;;  %4870 = vmatmul.bf16.gmra.mxu1 %v9129_v11 }
 0x84a   : > { %5120 = vmax.xlane.f32.xlu0 %v5119_v8 }
 0x84c   : > { %v4664_v24 = vpop.f32.mrf.mxu0 }
 0x84d   : > { %v4833_v13 = vpop.f32.mrf.mxu1  ;;  %v12819_v1 = vadd.f32 %v4664_v24, %v12815_v23  ;;  %v12914_v24 = vsel %vm4255_vm9, 0.0, %v15806_v36  ;;  %v13071_v23 = vld [vmem:[#allocation2 + $0x130] sm:$0xff] }
 0x84e   : > { %v12821_v6 = vadd.f32 -1e+30, %v4833_v13  ;;  %16510 = vst [vmem:[#allocation149_spill] sm:$0xff] %v12914_v24  ;;  %v4212_v13 = vadd.s32 80, %v12795_v45 }
 0x84f   : > { %16541 = vst [vmem:[#allocation179_spill] sm:$0xff] %v13071_v23 }
 0x850   : > { %v5122_v33 = vmax.f32 %v12819_v1, %v12821_v6  ;;  %vm4257_vm10 = vcmp.le.s32.totalorder %v12797_v19, %v4212_v13 }
 0x851   : > { %v12927_v58 = vsel %vm4257_vm10, 0.0, %v15806_v36 }
 0x852   : > { %5123 = vmax.xlane.f32.xlu0 %v5122_v33  ;;  %v9133_v33 = vld [vmem:[%s10680_s20 + $0x60] sm:$0xff]  ;;  %16513 = vst [vmem:[#allocation152_spill] sm:$0xff] %v12927_v58 }
 0x854   : > { %v4667_v61 = vpop.f32.mrf.mxu0 }
 0x855   : > { %v4836_v31 = vpop.f32.mrf.mxu1  ;;  %v12832_v57 = vadd.f32 %v4667_v61, %v12827_v25 }
 0x856   : > { %v12834_v41 = vadd.f32 -1e+30, %v4836_v31 }
 0x857   : > { %4706 = vmatmul.bf16.gmra.mxu0 %v9130_v20 }
 0x858   : > { %v5125_v46 = vmax.f32 %v12832_v57, %v12834_v41  ;;  %4875 = vmatmul.bf16.gmra.mxu1 %v9130_v20 }
 0x85a   : > { %5126 = vmax.xlane.f32.xlu1 %v5125_v46 }
 0x85c   : > { %v4669_v51 = vpop.f32.mrf.mxu0 }
 0x85d   : > { %v4838_v0 = vpop.f32.mrf.mxu1  ;;  %v12844_v54 = vadd.f32 %v4669_v51, %v12840_v30  ;;  %v4213_v51 = vadd.s32 88, %v12795_v45 }
 0x85e   : > { %v12846_v27 = vadd.f32 -1e+30, %v4838_v0 }
 0x85f   : > { %vm4259_vm11 = vcmp.le.s32.totalorder %v12797_v19, %v4213_v51 }
 0x860   : > { %v5128_v53 = vmax.f32 %v12844_v54, %v12846_v27 }
 0x862   : > { %5129 = vmax.xlane.f32.xlu1 %v5128_v53 }
 0x864   : > { %v4672_v62 = vpop.f32.mrf.mxu0 }
 0x865   : > { %v4841_v16 = vpop.f32.mrf.mxu1  ;;  %v12856_v50 = vadd.f32 %v4672_v62, %v12852_v60 }
 0x866   : > { %v12858_v22 = vadd.f32 -1e+30, %v4841_v16 }
 0x867   : > { %4711 = vmatmul.bf16.gmra.mxu0 %v9131_v56 }
 0x868   : > { %v5131_v32 = vmax.f32 %v12856_v50, %v12858_v22  ;;  %4880 = vmatmul.bf16.gmra.mxu1 %v9131_v56  ;;  %v9134_v56 = vld [vmem:[%s10680_s20 + $0x68] sm:$0xff] }
 0x86a   : > { %5132 = vmax.xlane.f32.xlu2 %v5131_v32  ;;  %v12939_v32 = vsel %vm4259_vm11, 0.0, %v15806_v36 }
 0x86b   : > { %16514 = vst [vmem:[#allocation153_spill] sm:$0xff] %v12939_v32 }
 0x86c   : > { %v4674_v7 = vpop.f32.mrf.mxu0 }
 0x86d   : > { %v4843_v3 = vpop.f32.mrf.mxu1  ;;  %v12869_v10 = vadd.f32 %v4674_v7, %v12864_v34 }
 0x86e   : > { %v12871_v63 = vadd.f32 -1e+30, %v4843_v3 }
 0x870   : > { %v5134_v38 = vmax.f32 %v12869_v10, %v12871_v63 }
 0x872   : > { %5135 = vmax.xlane.f32.xlu2 %v5134_v38 }
 0x874   : > { %v4677_v28 = vpop.f32.mrf.mxu0 }
 0x875   : > { %v4846_v29 = vpop.f32.mrf.mxu1  ;;  %v12881_v9 = vadd.f32 %v4677_v28, %v12877_v43  ;;  %v10443_v28 = vmov 0  }
 0x876   : > { %v12883_v35 = vadd.f32 -1e+30, %v4846_v29  ;;  %9704 = vset.pattern.permute.xlu0 %v10443_v28  ;;  %9705 = vset.pattern.permute.xlu1 %v10443_v28 }
 0x877   : > { %4716 = vmatmul.bf16.gmra.mxu0 %v9132_v37  ;;  %9706 = vset.pattern.permute.xlu2 %v10443_v28 }
 0x878   : > { %v5137_v59 = vmax.f32 %v12881_v9, %v12883_v35  ;;  %4885 = vmatmul.bf16.gmra.mxu1 %v9132_v37 }
 0x87a   : > { %5138 = vmax.xlane.f32.xlu0 %v5137_v59  ;;  %v12952_v59 = vsel %vm4261_vm12, 0.0, %v15806_v36 }
 0x87b   : > { %16517 = vst [vmem:[#allocation156_spill] sm:$0xff] %v12952_v59 }
 0x87c   : > { %v4679_v15 = vpop.f32.mrf.mxu0 }
 0x87d   : > { %v4848_v39 = vpop.f32.mrf.mxu1  ;;  %v12894_v40 = vadd.f32 %v4679_v15, %v12889_v14  ;;  %v13042_v14 = vld [vmem:[#allocation2 + $0x168] sm:$0xff] }
 0x87e   : > { %v12896_v17 = vadd.f32 -1e+30, %v4848_v39  ;;  %16534 = vst [vmem:[#allocation172_spill] sm:$0xff] %v13042_v14 }
 0x880   : > { %v5140_v26 = vmax.f32 %v12894_v40, %v12896_v17 }
 0x882   : > { %5141 = vmax.xlane.f32.xlu1 %v5140_v26 }
 0x884   : > { %v4682_v11 = vpop.f32.mrf.mxu0 }
 0x885   : > { %v4851_v18 = vpop.f32.mrf.mxu1  ;;  %v12906_v55 = vadd.f32 %v4682_v11, %v12902_v5  ;;  %v12964_v11 = vsel %vm4263_vm13, 0.0, %v15806_v36  ;;  %v13160_v5 = vld [vmem:[#allocation2 + $0x120] sm:$0xff] }
 0x886   : > { %v12908_v8 = vadd.f32 -1e+30, %v4851_v18  ;;  %16520 = vst [vmem:[#allocation159_spill] sm:$0xff] %v12964_v11  ;;  %v4216_v18 = vadd.s32 112, %v12795_v45 }
 0x887   : > { %4721 = vmatmul.bf16.gmra.mxu0 %v9133_v33  ;;  %16555 = vst [vmem:[#allocation193_spill] sm:$0xff] %v13160_v5 }
 0x888   : > { %v5143_v48 = vmax.f32 %v12906_v55, %v12908_v8  ;;  %4890 = vmatmul.bf16.gmra.mxu1 %v9133_v33  ;;  %vm4265_vm14 = vcmp.le.s32.totalorder %v12797_v19, %v4216_v18 }
 0x889   : > { %v12977_v51 = vsel %vm4265_vm14, 0.0, %v15806_v36  ;;  %v13024_v36 = vld [vmem:[#allocation2 + $0x50] sm:$0xff] }
 0x88a   : > { %5144 = vmax.xlane.f32.xlu2 %v5143_v48  ;;  %v9135_v48 = vld [vmem:[%s10680_s20 + $0x70] sm:$0xff]  ;;  %16523 = vst [vmem:[#allocation162_spill] sm:$0xff] %v12977_v51 }
 0x88b   : > { %16529 = vst [vmem:[#allocation168_spill] sm:$0xff] %v13024_v36 }
 0x88c   : > { %v4684_v52 = vpop.f32.mrf.mxu0 }
 0x88d   : > { %v4853_v20 = vpop.f32.mrf.mxu1  ;;  %v12919_v61 = vadd.f32 %v4684_v52, %v12914_v24 }
 0x88e   : > { %v12921_v31 = vadd.f32 -1e+30, %v4853_v20 }
 0x88f   : > { %16511 = vst [vmem:[#allocation150_spill] sm:$0xff] %v12919_v61 }
 0x890   : > { %16512 = vst [vmem:[#allocation151_spill] sm:$0xff] %v12921_v31  ;;  %v5146_v46 = vmax.f32 %v12919_v61, %v12921_v31 }
 0x892   : > { %5147 = vmax.xlane.f32.xlu0 %v5146_v46 }
 0x894   : > { %v4687_v0 = vpop.f32.mrf.mxu0 }
 0x895   : > { %v4856_v53 = vpop.f32.mrf.mxu1  ;;  %v12931_v2 = vadd.f32 %v4687_v0, %v12927_v58 }
 0x896   : > { %v12933_v62 = vadd.f32 -1e+30, %v4856_v53 }
 0x897   : > { %4726 = vmatmul.bf16.gmra.mxu0 %v9134_v56 }
 0x898   : > { %v5149_v16 = vmax.f32 %v12931_v2, %v12933_v62  ;;  %4895 = vmatmul.bf16.gmra.mxu1 %v9134_v56 }
 0x89a   : > { %5150 = vmax.xlane.f32.xlu1 %v5149_v16 }
 0x89c   : > { %v4689_v7 = vpop.f32.mrf.mxu0 }
 0x89d   : > { %v4858_v3 = vpop.f32.mrf.mxu1  ;;  %v12944_v38 = vadd.f32 %v4689_v7, %v12939_v32  ;;  %v12986_v7 = vld [vmem:[#allocation2 + $0xb0] sm:$0xff]  ;;  %v16532_v32 = vmov -1e+30  }
 0x89e   : > { %v12946_v44 = vadd.f32 -1e+30, %v4858_v3 }
 0x89f   : > { %16515 = vst [vmem:[#allocation154_spill] sm:$0xff] %v12944_v38 }
 0x8a0   : > { %16516 = vst [vmem:[#allocation155_spill] sm:$0xff] %v12946_v44  ;;  %v5152_v29 = vmax.f32 %v12944_v38, %v12946_v44  ;;  %v9170_v44 = vld [vmem:[%s10678_s0 + $0x8] sm:$0xff]  ;;  %v9177_v38 = vld [vmem:[%s10678_s0 + $0x40] sm:$0xff] }
 0x8a2   : > { %5153 = vmax.xlane.f32.xlu2 %v5152_v29 }
 0x8a4   : > { %v4692_v37 = vpop.f32.mrf.mxu0 }
 0x8a5   : > { %v4861_v15 = vpop.f32.mrf.mxu1  ;;  %v12956_v39 = vadd.f32 %v4692_v37, %v12952_v59 }
 0x8a6   : > { %v12958_v26 = vadd.f32 -1e+30, %v4861_v15 }
 0x8a7   : > { %16518 = vst [vmem:[#allocation157_spill] sm:$0xff] %v12956_v39  ;;  %4731 = vmatmul.bf16.gmra.mxu0 %v9135_v48 }
 0x8a8   : > { %16519 = vst [vmem:[#allocation158_spill] sm:$0xff] %v12958_v26  ;;  %v5155_v4 = vmax.f32 %v12956_v39, %v12958_v26  ;;  %4900 = vmatmul.bf16.gmra.mxu1 %v9135_v48 }
 0x8aa   : > { %5156 = vmax.xlane.f32.xlu0 %v5155_v4 }
 0x8ac   : > { %v4694_v13 = vpop.f32.mrf.mxu0 }
 0x8ad   : > { %v4863_v33 = vpop.f32.mrf.mxu1  ;;  %v12969_v52 = vadd.f32 %v4694_v13, %v12964_v11  ;;  %v13004_v13 = vld [vmem:[#allocation2 + $0xd8] sm:$0xff] }
 0x8ae   : > { %v12971_v20 = vadd.f32 -1e+30, %v4863_v33 }
 0x8af   : > { %16521 = vst [vmem:[#allocation160_spill] sm:$0xff] %v12969_v52 }
 0x8b0   : > { %16522 = vst [vmem:[#allocation161_spill] sm:$0xff] %v12971_v20  ;;  %v5158_v46 = vmax.f32 %v12969_v52, %v12971_v20  ;;  %v9136_v52 = vld [vmem:[%s10680_s20 + $0x78] sm:$0xff] }
 0x8b2   : > { %5159 = vmax.xlane.f32.xlu1 %v5158_v46 }
 0x8b4   : > { %v4697_v0 = vpop.f32.mrf.mxu0 }
 0x8b5   : > { %v4866_v53 = vpop.f32.mrf.mxu1  ;;  %v12980_v16 = vadd.f32 %v4697_v0, %v12977_v51 }
 0x8b6   : > { %v12982_v47 = vadd.f32 -1e+30, %v4866_v53  ;;  %v4217_v53 = vadd.s32 120, %v12795_v45 }
 0x8b7   : > { %16524 = vst [vmem:[#allocation163_spill] sm:$0xff] %v12980_v16  ;;  %4736 = vmatmul.bf16.gmra.mxu0 %v9136_v52 }
 0x8b8   : > { %16525 = vst [vmem:[#allocation164_spill] sm:$0xff] %v12982_v47  ;;  %v5161_v56 = vmax.f32 %v12980_v16, %v12982_v47  ;;  %vm4267_vm15 = vcmp.le.s32.totalorder %v12797_v19, %v4217_v53  ;;  %v13040_v16 = vadd.s32 128, %v12797_v19  ;;  %4905 = vmatmul.bf16.gmra.mxu1 %v9136_v52 }
 0x8b9   : > { %v13037_v24 = vsel %vm4267_vm15, 0.0, %v16532_v32 }
 0x8ba   : > { %5162 = vmax.xlane.f32.xlu2 %v5161_v56  ;;  %16533 = vst [vmem:[#allocation171_spill] sm:$0xff] %v13037_v24 }
 0x8bc   : > { %v4699_v48 = vpop.f32.mrf.mxu0 }
 0x8bd   : > { %v5121_v3 = vpop.xlane.xlu0 %5120  ;;  %v4868_v37 = vpop.f32.mrf.mxu1  ;;  %v13045_v53 = vadd.f32 %v4699_v48, %v13037_v24 }
 0x8be   : > { %v12989_v28 = vmax.f32 %v12986_v7, %v5121_v3  ;;  %v13015_v3 = vld [vmem:[#allocation2 + $0x18] sm:$0xff] }
 0x8bf   : > { %16527 = vst [vmem:[#allocation166_spill] sm:$0xff] %v13015_v3 }
 0x8c0   : > { %6655 = vst [vmem:[#allocation2 + $0xb0] sm:$0xff] %v12989_v28  ;;  %5569 = vperm.xlu0 %9704, %v12989_v28  }
 0x8c1   : > { %16535 = vst [vmem:[#allocation173_spill] sm:$0xff] %v13045_v53 }
 0x8c4   : > { %v13012_v56 = vpop.f32.mrf.mxu0 }
 0x8c5   : > { %v5124_v15 = vpop.xlane.xlu0 %5123  ;;  %v4871_v46 = vpop.f32.mrf.mxu1  ;;  %16526 = vst [vmem:[#allocation165_spill] sm:$0xff] %v13012_v56 }
 0x8c6   : > { %v12998_v4 = vmax.f32 %v12995_v49, %v5124_v15 }
 0x8c8   : > { %6656 = vst [vmem:[#allocation2 + $0x1b0] sm:$0xff] %v12998_v4 }
 0x8cb   : > { %5574 = vperm.xlu1 %9705, %v12998_v4  }
 0x8cc   : > { %v13026_v51 = vpop.f32.mrf.mxu0 }
 0x8cd   : > { %v5127_v33 = vpop.xlane.xlu1 %5126  ;;  %v4873_v29 = vpop.f32.mrf.mxu1  ;;  %16530 = vst [vmem:[#allocation169_spill] sm:$0xff] %v13026_v51 }
 0x8ce   : > { %v13007_v0 = vmax.f32 %v13004_v13, %v5127_v33  ;;  %v4220_v33 = vadd.s32 144, %v12795_v45 }
 0x8d0   : > { %6657 = vst [vmem:[#allocation2 + $0xd8] sm:$0xff] %v13007_v0  ;;  %vm4274_vm0 = vcmp.le.s32.totalorder %v13040_v16, %v4220_v33 }
 0x8d1   : > { %v13057_v19 = vsel %vm4274_vm0, 0.0, %v16532_v32 }
 0x8d2   : > { %5579 = vperm.xlu2 %9706, %v13007_v0   ;;  %16539 = vst [vmem:[#allocation177_spill] sm:$0xff] %v13057_v19 }
 0x8d4   : > { %v13051_v34 = vpop.f32.mrf.mxu0 }
 0x8d5   : > { %v5130_v15 = vpop.xlane.xlu1 %5129  ;;  %v4876_v47 = vpop.f32.mrf.mxu1  ;;  %16537 = vst [vmem:[#allocation175_spill] sm:$0xff] %v13051_v34 }
 0x8d6   : > { %v13018_v18 = vmax.f32 %v13015_v3, %v5130_v15  ;;  %v4218_v15 = vadd.s32 128, %v12795_v45  ;;  %v13066_v33 = vadd.f32 %v4876_v47, %v13057_v19 }
 0x8d8   : > { %16528 = vst [vmem:[#allocation167_spill] sm:$0xff] %v13018_v18  ;;  %vm4270_vm1 = vcmp.le.s32.totalorder %v13040_v16, %v4218_v15  ;;  %v5173_v15 = vmax.f32 %v13051_v34, %v13066_v33 }
 0x8d9   : > { %6658 = vst [vmem:[#allocation2 + $0x18] sm:$0xff] %v13018_v18  ;;  %v13074_v20 = vsel %vm4270_vm1, 0.0, %v16532_v32 }
 0x8da   : > { %16540 = vst [vmem:[#allocation178_spill] sm:$0xff] %v13066_v33  ;;  %v13083_v47 = vadd.f32 %v4871_v46, %v13074_v20  ;;  %v13122_v33 = vld [vmem:[#allocation2 + $0x110] sm:$0xff] }
 0x8db   : > { %16542 = vst [vmem:[#allocation180_spill] sm:$0xff] %v13074_v20 }
 0x8dc   : > { %16544 = vst [vmem:[#allocation182_spill] sm:$0xff] %v13083_v47  ;;  %v5167_v46 = vmax.f32 %v13012_v56, %v13083_v47  ;;  %v13111_v47 = vld [vmem:[#allocation2 + $0x180] sm:$0xff] }
 0x8dd   : > { %v5133_v59 = vpop.xlane.xlu2 %5132  ;;  %v13069_v24 = vpop.f32.mrf.mxu1  ;;  %16549 = vst [vmem:[#allocation187_spill] sm:$0xff] %v13111_v47  ;;  %v9137_v56 = vld [vmem:[%s10680_s20 + $0x80] sm:$0xff] }
 0x8de   : > { %v13030_v11 = vmax.f32 %v13024_v36, %v5133_v59  ;;  %v13047_v59 = vadd.f32 -1e+30, %v4868_v37  ;;  %4741 = vmatmul.bf16.gmra.mxu0 %v9137_v56  ;;  %4910 = vmatmul.bf16.gmra.mxu1 %v9137_v56  ;;  %16551 = vst [vmem:[#allocation189_spill] sm:$0xff] %v13122_v33  ;;  %v9184_v56 = vld [vmem:[%s10678_s0 + $0x78] sm:$0xff]  ;;  %v13175_v36 = vld [vmem:[#allocation2 + $0x150] sm:$0xff] }
 0x8df   : > { %7048 = vmatpush.bf16.msra.mxu3 %v9184_v56  ;;  %v9174_v56 = vld [vmem:[%s10678_s0 + $0x28] sm:$0xff]  ;;  %16556 = vst [vmem:[#allocation194_spill] sm:$0xff] %v13175_v36 }
 0x8e0   : > { %16531 = vst [vmem:[#allocation170_spill] sm:$0xff] %v13030_v11  ;;  %v5164_v37 = vmax.f32 %v13045_v53, %v13047_v59 }
 0x8e1   : > { %6659 = vst [vmem:[#allocation2 + $0x50] sm:$0xff] %v13030_v11 }
 0x8e2   : > { %16536 = vst [vmem:[#allocation174_spill] sm:$0xff] %v13047_v59  ;;  %v13094_v59 = vld [vmem:[#allocation2 + $0x48] sm:$0xff] }
 0x8e3   : > { %16547 = vst [vmem:[#allocation185_spill] sm:$0xff] %v13094_v59 }
 0x8e5   : > { %v5136_v58 = vpop.xlane.xlu2 %5135 }
 0x8e6   : > { %v13054_v30 = vmax.f32 %v13042_v14, %v5136_v58  ;;  %v4219_v58 = vadd.s32 136, %v12795_v45 }
 0x8e8   : > { %16538 = vst [vmem:[#allocation176_spill] sm:$0xff] %v13054_v30  ;;  %vm4272_vm2 = vcmp.le.s32.totalorder %v13040_v16, %v4219_v58  ;;  %v13098_v58 = vpop.f32.mrf.mxu1 }
 0x8e9   : > { %6660 = vst [vmem:[#allocation2 + $0x168] sm:$0xff] %v13054_v30 }
 0x8ea   : > { %5165 = vmax.xlane.f32.xlu0 %v5164_v37  ;;  %v13086_v37 = vpop.f32.mrf.mxu0 }
 0x8eb   : > { %16545 = vst [vmem:[#allocation183_spill] sm:$0xff] %v13086_v37 }
 0x8ed   : > { %v5139_v48 = vpop.xlane.xlu0 %5138 }
 0x8ee   : > { %v13078_v43 = vmax.f32 %v13071_v23, %v5139_v48  ;;  %v13092_v48 = vsel %vm4272_vm2, 0.0, %v16532_v32 }
 0x8ef   : > { %16546 = vst [vmem:[#allocation184_spill] sm:$0xff] %v13092_v48  ;;  %v13101_v20 = vadd.f32 %v4873_v29, %v13092_v48 }
 0x8f0   : > { %16543 = vst [vmem:[#allocation181_spill] sm:$0xff] %v13078_v43  ;;  %v13114_v48 = vpop.f32.mrf.mxu1 }
 0x8f1   : > { %6661 = vst [vmem:[#allocation2 + $0x130] sm:$0xff] %v13078_v43 }
 0x8f2   : > { %5174 = vmax.xlane.f32.xlu0 %v5173_v15  ;;  %16548 = vst [vmem:[#allocation186_spill] sm:$0xff] %v13101_v20  ;;  %v13106_v53 = vpop.f32.mrf.mxu0  ;;  %v5170_v15 = vmax.f32 %v13026_v51, %v13101_v20  ;;  %v9182_v51 = vld [vmem:[%s10678_s0 + $0x68] sm:$0xff] }
 0x8f5   : > { %v5142_v52 = vpop.xlane.xlu1 %5141  ;;  %5168 = vmax.xlane.f32.xlu1 %v5167_v46 }
 0x8f6   : > { %v13104_v19 = vmax.f32 %v13094_v59, %v5142_v52 }
 0x8f8   : > { %6662 = vst [vmem:[#allocation2 + $0x48] sm:$0xff] %v13104_v19  ;;  %v13128_v26 = vpop.f32.mrf.mxu1 }
 0x8fa   : > { %v13120_v52 = vpop.f32.mrf.mxu0 }
 0x8fb   : > { %5171 = vmax.xlane.f32.xlu2 %v5170_v15  ;;  %16550 = vst [vmem:[#allocation188_spill] sm:$0xff] %v13120_v52 }
 0x8fd   : > { %v5145_v29 = vpop.xlane.xlu2 %5144 }
 0x8fe   : > { %v13117_v46 = vmax.f32 %v13111_v47, %v5145_v29  ;;  %v9176_v29 = vld [vmem:[%s10678_s0 + $0x38] sm:$0xff] }
 0x8ff   : > { %v13133_v47 = vld [vmem:[#allocation2 + $0x118] sm:$0xff]  ;;  %6879 = vmatpush.bf16.msra.mxu2 %v9176_v29 }
 0x900   : > { %6663 = vst [vmem:[#allocation2 + $0x180] sm:$0xff] %v13117_v46  ;;  %v13144_v20 = vpop.f32.mrf.mxu1  ;;  %v13147_v29 = vld [vmem:[#allocation2 + $0x98] sm:$0xff] }
 0x901   : > { %16552 = vst [vmem:[#allocation190_spill] sm:$0xff] %v13133_v47 }
 0x902   : > { %v13135_v39 = vpop.f32.mrf.mxu0  ;;  %16554 = vst [vmem:[#allocation192_spill] sm:$0xff] %v13147_v29 }
 0x903   : > { %16553 = vst [vmem:[#allocation191_spill] sm:$0xff] %v13135_v39 }
 0x905   : > { %v5148_v15 = vpop.xlane.xlu0 %5147 }
 0x906   : > { %v13125_v34 = vmax.f32 %v13122_v33, %v5148_v15  ;;  %5599 = vperm.xlu0 %9704, %v13078_v43   ;;  %v9175_v33 = vld [vmem:[%s10678_s0 + $0x30] sm:$0xff] }
 0x907   : > { %v9183_v43 = vld [vmem:[%s10678_s0 + $0x70] sm:$0xff]  ;;  %6880 = vmatpush.bf16.msra.mxu2 %v9175_v33  ;;  %v9181_v33 = vld [vmem:[%s10678_s0 + $0x60] sm:$0xff] }
 0x908   : > { %6664 = vst [vmem:[#allocation2 + $0x110] sm:$0xff] %v13125_v34  ;;  %7049 = vmatpush.bf16.msra.mxu3 %v9183_v43  ;;  %v9173_v43 = vld [vmem:[%s10678_s0 + $0x20] sm:$0xff]  ;;  %v13162_v14 = vpop.f32.mrf.mxu1 }
 0x90b   : > { %6881 = vmatpush.bf16.msra.mxu2 %v9174_v56  ;;  %v9180_v56 = vld [vmem:[%s10678_s0 + $0x58] sm:$0xff] }
 0x90c   : > { %7050 = vmatpush.bf16.msra.mxu3 %v9182_v51  ;;  %v9172_v51 = vld [vmem:[%s10678_s0 + $0x18] sm:$0xff] }
 0x90d   : > { %v5151_v23 = vpop.xlane.xlu1 %5150 }
 0x90e   : > { %5589 = vperm.xlu1 %9705, %v13030_v11   ;;  %v13139_v15 = vmax.f32 %v13133_v47, %v5151_v23  ;;  %v13151_v47 = vpop.f32.mrf.mxu0 }
 0x90f   : > { %6882 = vmatpush.bf16.msra.mxu2 %v9173_v43  ;;  %v9171_v43 = vld [vmem:[%s10678_s0 + $0x10] sm:$0xff] }
 0x910   : > { %6665 = vst [vmem:[#allocation2 + $0x118] sm:$0xff] %v13139_v15  ;;  %7051 = vmatpush.bf16.msra.mxu3 %v9181_v33  ;;  %v9179_v33 = vld [vmem:[%s10678_s0 + $0x50] sm:$0xff] }
 0x913   : > { %5584 = vperm.xlu2 %9706, %v13018_v18   ;;  %6883 = vmatpush.bf16.msra.mxu2 %v9172_v51  ;;  %v9178_v51 = vld [vmem:[%s10678_s0 + $0x48] sm:$0xff] }
 0x914   : > { %7052 = vmatpush.bf16.msra.mxu3 %v9180_v56 }
 0x915   : > { %v5154_v23 = vpop.xlane.xlu2 %5153 }
 0x916   : > { %v13154_v59 = vmax.f32 %v13147_v29, %v5154_v23  ;;  %v13169_v11 = vpop.f32.mrf.mxu0 }
 0x917   : > { %6884 = vmatpush.bf16.msra.mxu2 %v9171_v43  ;;  %v4221_v43 = vadd.s32 152, %v12795_v45 }
 0x918   : > { %6666 = vst [vmem:[#allocation2 + $0x98] sm:$0xff] %v13154_v59  ;;  %7053 = vmatpush.bf16.msra.mxu3 %v9179_v33 }
 0x919   : > { %vm4276_vm4 = vcmp.le.s32.totalorder %v13040_v16, %v4221_v43 }
 0x91b   : > { %5594 = vperm.xlu2 %9706, %v13054_v30   ;;  %v4223_v30 = vadd.s32 168, %v12795_v45  ;;  %6885 = vmatpush.bf16.msra.mxu2 %v9170_v44  ;;  %v13196_v44 = vld [vmem:[#allocation2 + $0x108] sm:$0xff] }
 0x91c   : > { %7054 = vmatpush.bf16.msra.mxu3 %v9178_v51  ;;  %16559 = vst [vmem:[#allocation197_spill] sm:$0xff] %v13196_v44 }
 0x91d   : > { %v5157_v23 = vpop.xlane.xlu0 %5156  ;;  %vm4280_vm3 = vcmp.le.s32.totalorder %v13040_v16, %v4223_v30 }
 0x91e   : > { %v13167_v29 = vmax.f32 %v13160_v5, %v5157_v23  ;;  %v4893_v23 = vpop.f32.mrf.mxu1  ;;  %v9169_v5 = vld [vmem:[%s10678_s0] sm:$0xff]  ;;  %v13186_v3 = vsel %vm4280_vm3, 0.0, %v16532_v32  ;;  %v13190_v33 = vpop.f32.mrf.mxu0 }
 0x91f   : > { %16557 = vst [vmem:[#allocation195_spill] sm:$0xff] %v13186_v3  ;;  %6886 = vmatpush.bf16.msra.mxu2 %v9169_v5  ;;  %v13194_v30 = vadd.f32 %v13114_v48, %v13186_v3  ;;  %v13206_v5 = vsel %vm4276_vm4, 0.0, %v16532_v32  ;;  %v9138_v48 = vld [vmem:[%s10680_s20 + $0x88] sm:$0xff] }
 0x920   : > { %6667 = vst [vmem:[#allocation2 + $0x120] sm:$0xff] %v13167_v29  ;;  %7055 = vmatpush.bf16.msra.mxu3 %v9177_v38  ;;  %v13214_v43 = vadd.f32 %v13069_v24, %v13206_v5  ;;  %4746 = vmatmul.bf16.gmra.mxu0 %v9138_v48  ;;  %v4227_v24 = vadd.s32 200, %v12795_v45 }
 0x921   : > { %16558 = vst [vmem:[#allocation196_spill] sm:$0xff] %v13194_v30  ;;  %v5182_v25 = vmax.f32 %v13120_v52, %v13194_v30  ;;  %4915 = vmatmul.bf16.gmra.mxu1 %v9138_v48  ;;  %v4222_v52 = vadd.s32 160, %v12795_v45 }
 0x922   : > { %16560 = vst [vmem:[#allocation198_spill] sm:$0xff] %v13206_v5  ;;  %vm4288_vm7 = vcmp.le.s32.totalorder %v13040_v16, %v4227_v24 }
 0x923   : > { %16561 = vst [vmem:[#allocation199_spill] sm:$0xff] %v13214_v43  ;;  %vm4278_vm6 = vcmp.le.s32.totalorder %v13040_v16, %v4222_v52 }
 0x925   : > { %v5160_v56 = vpop.xlane.xlu1 %5159 }
 0x926   : > { %v13183_v18 = vmax.f32 %v13175_v36, %v5160_v56  ;;  %v4224_v56 = vadd.s32 176, %v12795_v45  ;;  %v13208_v38 = vpop.f32.mrf.mxu1  ;;  %v13219_v30 = vpop.f32.mrf.mxu0 }
 0x928   : > { %6668 = vst [vmem:[#allocation2 + $0x150] sm:$0xff] %v13183_v18  ;;  %vm4282_vm5 = vcmp.le.s32.totalorder %v13040_v16, %v4224_v56  ;;  %v5176_v56 = vmax.f32 %v13086_v37, %v13214_v43  ;;  %v9139_v37 = vld [vmem:[%s10680_s20 + $0x90] sm:$0xff] }
 0x92d   : > { %v5163_v51 = vpop.xlane.xlu2 %5162 }
 0x92e   : > { %v13201_v36 = vmax.f32 %v13196_v44, %v5163_v51 }
 0x930   : > { %6669 = vst [vmem:[#allocation2 + $0x108] sm:$0xff] %v13201_v36  ;;  %5183 = vmax.xlane.f32.xlu0 %v5182_v25  ;;  %v13223_v25 = vsel %vm4282_vm5, 0.0, %v16532_v32  ;;  %4751 = vmatmul.bf16.gmra.mxu0 %v9139_v37 }
 0x931   : > { %16562 = vst [vmem:[#allocation200_spill] sm:$0xff] %v13223_v25  ;;  %4920 = vmatmul.bf16.gmra.mxu1 %v9139_v37 }
 0x932   : > { %v5570_v51 = vpop.permute.xlu0 %5569 }
 0x933   : > { %v5887_v3 = vsub.f32 %v12807_v12, %v5570_v51  ;;  %v5888_v44 = vsub.f32 %v12809_v21, %v5570_v51  ;;  %v13231_v12 = vadd.f32 %v13128_v26, %v13223_v25  ;;  %v4898_v21 = vpop.f32.mrf.mxu1  ;;  %v13242_v51 = vpop.f32.mrf.mxu0  ;;  %v4229_v25 = vadd.s32 216, %v12795_v45 }
 0x935   : > { %v6015_v31 = vmul.f32 1.442695, %v5887_v3  ;;  %v6017_v61 = vmul.f32 1.442695, %v5888_v44  ;;  %16563 = vst [vmem:[#allocation201_spill] sm:$0xff] %v13231_v12  ;;  %v13235_v3 = vsel %vm4278_vm6, 0.0, %v16532_v32  ;;  %v5185_v44 = vmax.f32 %v13135_v39, %v13231_v12 }
 0x936   : > { %16564 = vst [vmem:[#allocation202_spill] sm:$0xff] %v13235_v3  ;;  %vm4292_vm8 = vcmp.le.s32.totalorder %v13040_v16, %v4229_v25 }
 0x937   : > { %9707 = vpow2.f32 %v6015_v31  ;;  %v13240_v31 = vsel %vm4288_vm7, 0.0, %v16532_v32 }
 0x938   : > { %9709 = vpow2.f32 %v6017_v61  ;;  %5177 = vmax.xlane.f32.xlu1 %v5176_v56  ;;  %16565 = vst [vmem:[#allocation203_spill] sm:$0xff] %v13240_v31  ;;  %v13246_v61 = vadd.f32 %v13098_v58, %v13235_v3  ;;  %v13254_v12 = vadd.f32 %v4893_v23, %v13240_v31  ;;  %v13266_v23 = vsel %vm4292_vm8, 0.0, %v16532_v32 }
 0x939   : > { %16567 = vst [vmem:[#allocation205_spill] sm:$0xff] %v13266_v23  ;;  %v4225_v31 = vadd.s32 184, %v12795_v45 }
 0x93a   : > { %v5179_v58 = vmax.f32 %v13106_v53, %v13246_v61 }
 0x93b   : > { %v13269_v25 = vpop.f32.mrf.mxu0  ;;  %vm4284_vm11 = vcmp.le.s32.totalorder %v13040_v16, %v4225_v31 }
 0x93d   : > { %v9708_v48 = vpop.eup %9707  ;;  %v5575_v52 = vpop.permute.xlu1 %5574 }
 0x93e   : > { %v9710_v26 = vpop.eup %9709  ;;  %v5889_v24 = vsub.f32 %v12819_v1, %v5575_v52  ;;  %v5890_v56 = vsub.f32 %v12821_v6, %v5575_v52  ;;  %v13260_v1 = vpop.f32.mrf.mxu1  ;;  %v5194_v6 = vmax.f32 %v13190_v33, %v13254_v12 }
 0x93f   : > { %v13251_v5 = vadd.f32 %v9710_v26, %v9708_v48 }
 0x940   : > { %v6019_v39 = vmul.f32 1.442695, %v5889_v24  ;;  %v6021_v43 = vmul.f32 1.442695, %v5890_v56  ;;  %5186 = vmax.xlane.f32.xlu1 %v5185_v44 }
 0x941   : > { %16566 = vst [vmem:[#allocation204_spill] sm:$0xff] %v13251_v5 }
 0x942   : > { %9711 = vpow2.f32 %v6019_v39  ;;  %v4231_v39 = vadd.s32 232, %v12795_v45 }
 0x943   : > { %9713 = vpow2.f32 %v6021_v43  ;;  %v13272_v43 = vadd.f32 %v4898_v21, %v13266_v23 }
 0x944   : > { %5180 = vmax.xlane.f32.xlu2 %v5179_v58  ;;  %5609 = vperm.xlu0 %9704, %v13117_v46   ;;  %vm4296_vm9 = vcmp.le.s32.totalorder %v13040_v16, %v4231_v39  ;;  %v4226_v39 = vadd.s32 192, %v12795_v45 }
 0x945   : > { %v5200_v56 = vmax.f32 %v13242_v51, %v13272_v43  ;;  %v13280_v58 = vsel %vm4296_vm9, 0.0, %v16532_v32 }
 0x946   : > { %16569 = vst [vmem:[#allocation207_spill] sm:$0xff] %v13280_v58  ;;  %v4903_v5 = vpop.f32.mrf.mxu1  ;;  %vm4286_vm10 = vcmp.le.s32.totalorder %v13040_v16, %v4226_v39 }
 0x947   : > { %v13283_v21 = vadd.f32 %v4903_v5, %v13280_v58  ;;  %v13299_v5 = vsel %vm4286_vm10, 0.0, %v16532_v32 }
 0x948   : > { %v9712_v44 = vpop.eup %9711  ;;  %5195 = vmax.xlane.f32.xlu1 %v5194_v6  ;;  %v13285_v6 = vpop.f32.mrf.mxu0  ;;  %16572 = vst [vmem:[#allocation210_spill] sm:$0xff] %v13299_v5 }
 0x949   : > { %v9714_v52 = vpop.eup %9713  ;;  %v6719_v37 = vpack.c.bf16 %v9712_v44, %v9708_v48  ;;  %16570 = vst [vmem:[#allocation208_spill] sm:$0xff] %v13283_v21  ;;  %v5206_v48 = vmax.f32 %v13285_v6, %v13283_v21  ;;  %v9140_v21 = vld [vmem:[%s10680_s20 + $0x98] sm:$0xff] }
 0x94a   : > { %v6720_v24 = vpack.c.bf16 %v9714_v52, %v9710_v26  ;;  %v13275_v46 = vadd.f32 %v9714_v52, %v9712_v44  ;;  %16571 = vst [vmem:[#allocation209_spill] sm:$0xff] %v13285_v6  ;;  %v13289_v26 = vld [vmem:[#allocation2 + $0x60] sm:$0xff]  ;;  %4756 = vmatmul.bf16.gmra.mxu0 %v9140_v21  ;;  %4925 = vmatmul.bf16.gmra.mxu1 %v9140_v21 }
 0x94b   : > { %6887 = vmatmul.bf16.vlgmr.msra.gmra.mxu2 %v6719_v37  ;;  %v13301_v37 = vld [vmem:[#allocation2 + $0x138] sm:$0xff] }
 0x94c   : > { %16568 = vst [vmem:[#allocation206_spill] sm:$0xff] %v13275_v46  ;;  %7056 = vmatmul.bf16.vlgmr.msra.gmra.mxu3 %v6720_v24 }
 0x94d   : > { %16573 = vst [vmem:[#allocation211_spill] sm:$0xff] %v13301_v37 }
 0x950   : > { %5201 = vmax.xlane.f32.xlu1 %v5200_v56  ;;  %v13305_v56 = vadd.f32 %v13162_v14, %v13299_v5  ;;  %v13321_v5 = vld [vmem:[#allocation2 + $0x188] sm:$0xff] }
 0x951   : > { %16575 = vst [vmem:[#allocation213_spill] sm:$0xff] %v13321_v5 }
 0x952   : > { %v5191_v58 = vmax.f32 %v13169_v11, %v13305_v56 }
 0x958   : > { %5207 = vmax.xlane.f32.xlu1 %v5206_v48  ;;  %v5580_v48 = vpop.permute.xlu2 %5579 }
 0x959   : > { %v5891_v3 = vsub.f32 %v12832_v57, %v5580_v48 }
 0x95b   : > { %v6023_v14 = vmul.f32 1.442695, %v5891_v3  ;;  %v13338_v3 = vpop.f32.mrf.mxu0 }
 0x95c   : > { %5604 = vperm.xlu2 %9706, %v13104_v19   ;;  %16577 = vst [vmem:[#allocation215_spill] sm:$0xff] %v13338_v3 }
 0x95d   : > { %v5166_v44 = vpop.xlane.xlu0 %5165  ;;  %9715 = vpow2.f32 %v6023_v14 }
 0x95e   : > { %v13294_v52 = vmax.f32 %v13289_v26, %v5166_v44  ;;  %v13310_v44 = vld [vmem:[#allocation2 + $0xe0] sm:$0xff] }
 0x95f   : > { %16574 = vst [vmem:[#allocation212_spill] sm:$0xff] %v13310_v44 }
 0x960   : > { %6670 = vst [vmem:[#allocation2 + $0x60] sm:$0xff] %v13294_v52 }
 0x963   : > { %v13346_v21 = vpop.eup %9715 }
 0x964   : > { %16578 = vst [vmem:[#allocation216_spill] sm:$0xff] %v13346_v21 }
 0x965   : > { %v5175_v24 = vpop.xlane.xlu0 %5174 }
 0x966   : > { %v13308_v19 = vmax.f32 %v13301_v37, %v5175_v24 }
 0x968   : > { %6673 = vst [vmem:[#allocation2 + $0x138] sm:$0xff] %v13308_v19  ;;  %v5169_v39 = vpop.xlane.xlu1 %5168 }
 0x969   : > { %v13314_v46 = vmax.f32 %v13310_v44, %v5169_v39  ;;  %v5892_v39 = vsub.f32 %v12834_v41, %v5580_v48  ;;  %v13336_v41 = vsel %vm4284_vm11, 0.0, %v16532_v32  ;;  %v13340_v48 = vpop.f32.mrf.mxu1 }
 0x96a   : > { %16576 = vst [vmem:[#allocation214_spill] sm:$0xff] %v13336_v41 }
 0x96b   : > { %6671 = vst [vmem:[#allocation2 + $0xe0] sm:$0xff] %v13314_v46  ;;  %v6025_v6 = vmul.f32 1.442695, %v5892_v39 }
 0x96d   : > { %9717 = vpow2.f32 %v6025_v6 }
 0x96e   : > { %v5172_v24 = vpop.xlane.xlu2 %5171  ;;  %5192 = vmax.xlane.f32.xlu0 %v5191_v58 }
 0x96f   : > { %v13324_v23 = vmax.f32 %v13321_v5, %v5172_v24 }
 0x971   : > { %6672 = vst [vmem:[#allocation2 + $0x188] sm:$0xff] %v13324_v23  ;;  %5649 = vperm.xlu1 %9705, %v13314_v46  }
 0x976   : > { %v5585_v37 = vpop.permute.xlu2 %5584 }
 0x977   : > { %v5893_v44 = vsub.f32 %v12844_v54, %v5585_v37  ;;  %v5894_v58 = vsub.f32 %v12846_v27, %v5585_v37  ;;  %v13344_v54 = vadd.f32 %v13144_v20, %v13336_v41  ;;  %v13350_v37 = vpop.eup %9717 }
 0x978   : > { %16579 = vst [vmem:[#allocation217_spill] sm:$0xff] %v13350_v37 }
 0x979   : > { %v6027_v57 = vmul.f32 1.442695, %v5893_v44  ;;  %v6029_v24 = vmul.f32 1.442695, %v5894_v58 }
 0x97b   : > { %9719 = vpow2.f32 %v6027_v57 }
 0x97c   : > { %9721 = vpow2.f32 %v6029_v24 }
 0x97e   : > { %v5595_v27 = vpop.permute.xlu2 %5594 }
 0x97f   : > { %v5897_v31 = vsub.f32 %v12869_v10, %v5595_v27  ;;  %v5898_v6 = vsub.f32 %v12871_v63, %v5595_v27  ;;  %v5188_v10 = vmax.f32 %v13151_v47, %v13344_v54 }
 0x980   : > { %v5590_v44 = vpop.permute.xlu1 %5589 }
 0x981   : > { %v9720_v14 = vpop.eup %9719  ;;  %v6035_v39 = vmul.f32 1.442695, %v5897_v31  ;;  %v6037_v58 = vmul.f32 1.442695, %v5898_v6  ;;  %v5895_v57 = vsub.f32 %v12856_v50, %v5590_v44  ;;  %v5896_v24 = vsub.f32 %v12858_v22, %v5590_v44  ;;  %v13361_v50 = vpop.f32.mrf.mxu0 }
 0x982   : > { %v9722_v5 = vpop.eup %9721  ;;  %5619 = vperm.xlu0 %9704, %v13139_v15   ;;  %v6721_v20 = vpack.c.bf16 %v9720_v14, %v13346_v21  ;;  %v13363_v22 = vpop.f32.mrf.mxu1  ;;  %v9141_v15 = vld [vmem:[%s10680_s20 + $0xa0] sm:$0xff] }
 0x983   : > { %9723 = vpow2.f32 %v6035_v39  ;;  %v6031_v63 = vmul.f32 1.442695, %v5895_v57  ;;  %v6033_v27 = vmul.f32 1.442695, %v5896_v24  ;;  %v6722_v41 = vpack.c.bf16 %v9722_v5, %v13350_v37  ;;  %4761 = vmatmul.bf16.gmra.mxu0 %v9141_v15  ;;  %4930 = vmatmul.bf16.gmra.mxu1 %v9141_v15  ;;  %v13380_v15 = vld [vmem:[#allocation2 + $0x1a8] sm:$0xff] }
 0x984   : > { %9725 = vpow2.f32 %v6037_v58  ;;  %6892 = vmatmul.bf16.gmra.mxu2 %v6721_v20  ;;  %v13359_v31 = vadd.f32 %v9722_v5, %v9720_v14  ;;  %16585 = vst [vmem:[#allocation223_spill] sm:$0xff] %v13380_v15 }
 0x985   : > { %9727 = vpow2.f32 %v6031_v63  ;;  %7061 = vmatmul.bf16.gmra.mxu3 %v6722_v41  ;;  %5189 = vmax.xlane.f32.xlu2 %v5188_v10 }
 0x986   : > { %16580 = vst [vmem:[#allocation218_spill] sm:$0xff] %v13359_v31  ;;  %9729 = vpow2.f32 %v6033_v27  ;;  %v5600_v27 = vpop.permute.xlu0 %5599 }
 0x987   : > { %v5900_v21 = vsub.f32 %v12883_v35, %v5600_v27 }
 0x989   : > { %v9724_v6 = vpop.eup %9723  ;;  %v4742_v41 = vpop.f32.mrf.mxu0 }
 0x98a   : > { %v9726_v44 = vpop.eup %9725  ;;  %5629 = vperm.xlu0 %9704, %v13167_v29   ;;  %v4911_v57 = vpop.f32.mrf.mxu1  ;;  %v13373_v10 = vadd.f32 %v4742_v41, %v12802_v42  ;;  %v13387_v42 = vld [vmem:[#allocation2 + $0x140] sm:$0xff] }
 0x98b   : > { %v9728_v39 = vpop.eup %9727  ;;  %v13367_v58 = vadd.f32 %v9726_v44, %v9724_v6  ;;  %v13375_v63 = vadd.f32 -1e+30, %v4911_v57 }
 0x98c   : > { %v9730_v5 = vpop.eup %9729  ;;  %v6723_v24 = vpack.c.bf16 %v9724_v6, %v9728_v39  ;;  %16583 = vst [vmem:[#allocation221_spill] sm:$0xff] %v13373_v10  ;;  %v4232_v6 = vadd.s32 240, %v12795_v45 }
 0x98d   : > { %16581 = vst [vmem:[#allocation219_spill] sm:$0xff] %v13367_v58  ;;  %v13369_v14 = vadd.f32 %v9730_v5, %v9728_v39  ;;  %v6724_v20 = vpack.c.bf16 %v9726_v44, %v9730_v5  ;;  %v5215_v29 = vmax.f32 %v13373_v10, %v13375_v63 }
 0x98e   : > { %16584 = vst [vmem:[#allocation222_spill] sm:$0xff] %v13375_v63  ;;  %vm4298_vm12 = vcmp.le.s32.totalorder %v13040_v16, %v4232_v6 }
 0x98f   : > { %16582 = vst [vmem:[#allocation220_spill] sm:$0xff] %v13369_v14 }
 0x992   : > { %5639 = vperm.xlu0 %9704, %v13201_v36  }
 0x994   : > { %6897 = vmatmul.bf16.gmra.mxu2 %v6723_v24  ;;  %v13409_v24 = vld [vmem:[#allocation2 + $0x80] sm:$0xff] }
 0x995   : > { %7066 = vmatmul.bf16.gmra.mxu3 %v6724_v20  ;;  %16589 = vst [vmem:[#allocation227_spill] sm:$0xff] %v13409_v24 }
 0x99b   : > { %5216 = vmax.xlane.f32.xlu1 %v5215_v29 }
 0x99d   : > { %5614 = vperm.xlu2 %9706, %v13125_v34   ;;  %v5899_v34 = vsub.f32 %v12881_v9, %v5600_v27  ;;  %v4228_v9 = vadd.s32 208, %v12795_v45 }
 0x99f   : > { %v6039_v58 = vmul.f32 1.442695, %v5899_v34  ;;  %vm4290_vm13 = vcmp.le.s32.totalorder %v13040_v16, %v4228_v9 }
 0x9a1   : > { %9731 = vpow2.f32 %v6039_v58 }
 0x9a3   : > { %v5184_v37 = vpop.xlane.xlu0 %5183 }
 0x9a4   : > { %v13383_v36 = vmax.f32 %v13380_v15, %v5184_v37  ;;  %v13398_v37 = vsel %vm4298_vm12, 0.0, %v16532_v32  ;;  %v16623_v15 = vld [vmem:[#allocation170_spill] sm:$0xff] }
 0x9a5   : > { %5624 = vperm.xlu2 %9706, %v13154_v59   ;;  %16586 = vst [vmem:[#allocation224_spill] sm:$0xff] %v13398_v37  ;;  %v13400_v59 = vld [vmem:[#allocation2 + $0x1b8] sm:$0xff]  ;;  %v13404_v41 = vadd.f32 %v13340_v48, %v13398_v37  ;;  %v6041_v48 = vmul.f32 1.442695, %v5900_v21 }
 0x9a6   : > { %6676 = vst [vmem:[#allocation2 + $0x1a8] sm:$0xff] %v13383_v36 }
 0x9a7   : > { %16587 = vst [vmem:[#allocation225_spill] sm:$0xff] %v13400_v59  ;;  %v5209_v6 = vmax.f32 %v13338_v3, %v13404_v41  ;;  %9733 = vpow2.f32 %v6041_v48  ;;  %v9142_v48 = vld [vmem:[%s10680_s20 + $0xa8] sm:$0xff] }
 0x9a8   : > { %16588 = vst [vmem:[#allocation226_spill] sm:$0xff] %v13404_v41  ;;  %v13436_v41 = vld [vmem:[#allocation2 + $0x30] sm:$0xff]  ;;  %4766 = vmatmul.bf16.gmra.mxu0 %v9142_v48  ;;  %4935 = vmatmul.bf16.gmra.mxu1 %v9142_v48 }
 0x9a9   : > { %16592 = vst [vmem:[#allocation230_spill] sm:$0xff] %v13436_v41 }
 0x9ab   : > { %v5178_v44 = vpop.xlane.xlu1 %5177 }
 0x9ac   : > { %v13391_v39 = vmax.f32 %v13387_v42, %v5178_v44  ;;  %v13417_v44 = vld [vmem:[#allocation2 + $0xf8] sm:$0xff] }
 0x9ad   : > { %16591 = vst [vmem:[#allocation229_spill] sm:$0xff] %v13417_v44 }
 0x9ae   : > { %6674 = vst [vmem:[#allocation2 + $0x140] sm:$0xff] %v13391_v39 }
 0x9b3   : > { %v5187_v5 = vpop.xlane.xlu1 %5186 }
 0x9b4   : > { %v13407_v57 = vmax.f32 %v13400_v59, %v5187_v5  ;;  %v13424_v5 = vpop.f32.mrf.mxu0 }
 0x9b6   : > { %6677 = vst [vmem:[#allocation2 + $0x1b8] sm:$0xff] %v13407_v57 }
 0x9b7   : > { %v5181_v20 = vpop.xlane.xlu2 %5180 }
 0x9b8   : > { %v13413_v29 = vmax.f32 %v13409_v24, %v5181_v20  ;;  %v13427_v20 = vpop.f32.mrf.mxu1 }
 0x9ba   : > { %16590 = vst [vmem:[#allocation228_spill] sm:$0xff] %v13413_v29  ;;  %5669 = vperm.xlu1 %9705, %v13413_v29  }
 0x9bb   : > { %6675 = vst [vmem:[#allocation2 + $0x80] sm:$0xff] %v13413_v29  ;;  %v5196_v14 = vpop.xlane.xlu1 %5195 }
 0x9bc   : > { %5210 = vmax.xlane.f32.xlu0 %v5209_v6  ;;  %v13430_v31 = vmax.f32 %v13417_v44, %v5196_v14  ;;  %v16593_v14 = vsub.f32 %v12986_v7, %v12989_v28  ;;  %v13442_v21 = vpop.f32.mrf.mxu0  ;;  %v13453_v7 = vpop.eup %9731  ;;  %v7217_v44 = vld [vmem:[#allocation4 + $0xc0] sm:$0xff] }
 0x9bd   : > { %16595 = vst [vmem:[#allocation232_spill] sm:$0xff] %v13453_v7 }
 0x9be   : > { %6680 = vst [vmem:[#allocation2 + $0xf8] sm:$0xff] %v13430_v31  ;;  %v5439_v6 = vmul.f32 1.442695, %v16593_v14 }
 0x9bf   : > { %v5605_v37 = vpop.permute.xlu2 %5604 }
 0x9c0   : > { %v5901_v63 = vsub.f32 %v12894_v40, %v5605_v37  ;;  %v5902_v10 = vsub.f32 %v12896_v17, %v5605_v37  ;;  %v13448_v17 = vsel %vm4290_vm13, 0.0, %v16532_v32  ;;  %v13450_v58 = vpop.f32.mrf.mxu1 }
 0x9c1   : > { %16594 = vst [vmem:[#allocation231_spill] sm:$0xff] %v13448_v17  ;;  %v13457_v28 = vadd.f32 %v13208_v38, %v13448_v17 }
 0x9c2   : > { %v6043_v35 = vmul.f32 1.442695, %v5901_v63  ;;  %v6045_v27 = vmul.f32 1.442695, %v5902_v10  ;;  %v13459_v10 = vpop.eup %9733  ;;  %v13461_v63 = vld [vmem:[#allocation2] sm:$0xff] }
 0x9c3   : > { %v5202_v34 = vpop.xlane.xlu1 %5201  ;;  %16596 = vst [vmem:[#allocation233_spill] sm:$0xff] %v13459_v10  ;;  %v5197_v38 = vmax.f32 %v13219_v30, %v13457_v28 }
 0x9c4   : > { %9735 = vpow2.f32 %v6043_v35  ;;  %v13445_v40 = vmax.f32 %v13436_v41, %v5202_v34  ;;  %16597 = vst [vmem:[#allocation234_spill] sm:$0xff] %v13461_v63  ;;  %v16598_v35 = vsub.f32 %v12995_v49, %v12998_v4  ;;  %v13478_v4 = vpop.f32.mrf.mxu0 }
 0x9c5   : > { %9737 = vpow2.f32 %v6045_v27 }
 0x9c6   : > { %6682 = vst [vmem:[#allocation2 + $0x30] sm:$0xff] %v13445_v40  ;;  %9739 = vpow2.f32 %v5439_v6  ;;  %v5441_v27 = vmul.f32 1.442695, %v16598_v35 }
 0x9c8   : > { %9741 = vpow2.f32 %v5441_v27 }
 0x9ca   : > { %v9736_v37 = vpop.eup %9735 }
 0x9cb   : > { %v9738_v9 = vpop.eup %9737  ;;  %v6725_v14 = vpack.c.bf16 %v9736_v37, %v13453_v7  ;;  %v5208_v6 = vpop.xlane.xlu1 %5207 }
 0x9cc   : > { %v6726_v34 = vpack.c.bf16 %v9738_v9, %v13459_v10  ;;  %v13472_v41 = vmax.f32 %v13461_v63, %v5208_v6  ;;  %v13474_v17 = vpop.eup %9739  ;;  %v13476_v3 = vadd.f32 %v9738_v9, %v9736_v37  ;;  %v13481_v10 = vpop.f32.mrf.mxu1  ;;  %v7218_v9 = vld [vmem:[#allocation4 + $0x138] sm:$0xff] }
 0x9cd   : > { %16599 = vst [vmem:[#allocation235_spill] sm:$0xff] %v13474_v17  ;;  %6902 = vmatmul.bf16.gmra.mxu2 %v6725_v14  ;;  %v7281_v48 = vmul.f32 %v13474_v17, %v7217_v44  ;;  %v5610_v7 = vpop.permute.xlu0 %5609  ;;  %v4752_v27 = vpop.f32.mrf.mxu0 }
 0x9ce   : > { %16600 = vst [vmem:[#allocation236_spill] sm:$0xff] %v13476_v3  ;;  %7071 = vmatmul.bf16.gmra.mxu3 %v6726_v34  ;;  %5198 = vmax.xlane.f32.xlu2 %v5197_v38  ;;  %v6888_v49 = vpop.f32.mrf.mxu2  ;;  %v13485_v37 = vpop.eup %9741  ;;  %v13490_v44 = vadd.f32 %v4752_v27, %v12852_v60  ;;  %v16606_v27 = vsub.f32 %v13004_v13, %v13007_v0  ;;  %v4230_v13 = vadd.s32 224, %v12795_v45 }
 0x9cf   : > { %6684 = vst [vmem:[#allocation2] sm:$0xff] %v13472_v41  ;;  %v7057_v35 = vpop.f32.mrf.mxu3  ;;  %v7282_v63 = vmul.f32 %v13485_v37, %v7218_v9 }
 0x9d0   : > { %v7058_v6 = vadd.f32 %v7057_v35, %v6888_v49  ;;  %5654 = vperm.xlu0 %9704, %v13324_v23   ;;  %16601 = vst [vmem:[#allocation237_spill] sm:$0xff] %v13485_v37  ;;  %v13494_v35 = vld [vmem:[#allocation2 + $0x1e8] sm:$0xff]  ;;  %vm4294_vm14 = vcmp.le.s32.totalorder %v13040_v16, %v4230_v13 }
 0x9d1   : > { %16602 = vst [vmem:[#allocation238_spill] sm:$0xff] %v13490_v44 }
 0x9d2   : > { %v7345_v14 = vadd.f32 %v7281_v48, %v7058_v6  ;;  %16604 = vst [vmem:[#allocation240_spill] sm:$0xff] %v13494_v35 }
 0x9d4   : > { %7409 = vst [vmem:[#allocation4 + $0xc0] sm:$0xff] %v7345_v14  ;;  %v4921_v59 = vpop.f32.mrf.mxu1 }
 0x9d5   : > { %v13492_v23 = vadd.f32 -1e+30, %v4921_v59  ;;  %v13506_v59 = vld [vmem:[#allocation2 + $0x28] sm:$0xff] }
 0x9d6   : > { %v6890_v34 = vpop.f32.mrf.mxu2  ;;  %16605 = vst [vmem:[#allocation241_spill] sm:$0xff] %v13506_v59 }
 0x9d7   : > { %v7059_v38 = vpop.f32.mrf.mxu3  ;;  %16603 = vst [vmem:[#allocation239_spill] sm:$0xff] %v13492_v23  ;;  %v5227_v6 = vmax.f32 %v13490_v44, %v13492_v23 }
 0x9d8   : > { %v7060_v3 = vadd.f32 %v7059_v38, %v6890_v34  ;;  %5659 = vperm.xlu0 %9704, %v13308_v19  }
 0x9da   : > { %v7346_v49 = vadd.f32 %v7282_v63, %v7060_v3 }
 0x9dc   : > { %7410 = vst [vmem:[#allocation4 + $0x138] sm:$0xff] %v7346_v49  ;;  %v5903_v49 = vsub.f32 %v12906_v55, %v5610_v7  ;;  %v9143_v55 = vld [vmem:[%s10680_s20 + $0xb0] sm:$0xff] }
 0x9dd   : > { %4771 = vmatmul.bf16.gmra.mxu0 %v9143_v55  ;;  %4940 = vmatmul.bf16.gmra.mxu1 %v9143_v55 }
 0x9de   : > { %v6047_v0 = vmul.f32 1.442695, %v5903_v49  ;;  %v13541_v49 = vadd.f32 -1e+30, %v13450_v58 }
 0x9e0   : > { %5664 = vperm.xlu0 %9704, %v13391_v39  }
 0x9e1   : > { %v5193_v48 = vpop.xlane.xlu0 %5192 }
 0x9e2   : > { %v13500_v14 = vmax.f32 %v13494_v35, %v5193_v48  ;;  %v13522_v48 = vpop.f32.mrf.mxu1 }
 0x9e4   : > { %6679 = vst [vmem:[#allocation2 + $0x1e8] sm:$0xff] %v13500_v14  ;;  %5228 = vmax.xlane.f32.xlu1 %v5227_v6  ;;  %v13519_v6 = vpop.f32.mrf.mxu0 }
 0x9e6   : > { %5634 = vperm.xlu2 %9706, %v13183_v18   ;;  %v5443_v18 = vmul.f32 1.442695, %v16606_v27  ;;  %v16610_v27 = vld [vmem:[#allocation143_spill] sm:$0xff] }
 0x9e7   : > { %16612 = vst [vmem:[#allocation143_spill] sm:$0xff] %v13541_v49 }
 0x9ec   : > { %v13556_v13 = vpop.f32.mrf.mxu0 }
 0x9f4   : > { %v5620_v60 = vpop.permute.xlu0 %5619 }
 0x9f5   : > { %v5907_v19 = vsub.f32 %v12931_v2, %v5620_v60  ;;  %v5908_v3 = vsub.f32 %v12933_v62, %v5620_v60  ;;  %v5904_v62 = vsub.f32 %v12908_v8, %v5610_v7  ;;  %v16608_v8 = vld [vmem:[#allocation151_spill] sm:$0xff]  ;;  %v16613_v2 = vld [vmem:[#allocation166_spill] sm:$0xff] }
 0x9f7   : > { %v6055_v63 = vmul.f32 1.442695, %v5907_v19  ;;  %v6057_v9 = vmul.f32 1.442695, %v5908_v3  ;;  %v6049_v3 = vmul.f32 1.442695, %v5904_v62 }
 0x9f8   : > { %v5190_v34 = vpop.xlane.xlu2 %5189 }
 0x9f9   : > { %9743 = vpow2.f32 %v6055_v63  ;;  %v13509_v38 = vmax.f32 %v13506_v59, %v5190_v34 }
 0x9fa   : > { %9745 = vpow2.f32 %v6057_v9  ;;  %v16607_v9 = vld [vmem:[#allocation150_spill] sm:$0xff] }
 0x9fb   : > { %6678 = vst [vmem:[#allocation2 + $0x28] sm:$0xff] %v13509_v38  ;;  %9747 = vpow2.f32 %v5443_v18  ;;  %v13538_v18 = vadd.f32 %v13442_v21, %v16610_v27  ;;  %v13550_v21 = vsel %vm4294_vm14, 0.0, %v16532_v32  ;;  %v13552_v27 = vpop.permute.xlu1 %5649 }
 0x9fc   : > { %9749 = vpow2.f32 %v6047_v0 }
 0x9fd   : > { %5679 = vperm.xlu1 %9705, %v13407_v57   ;;  %16611 = vst [vmem:[#allocation151_spill] sm:$0xff] %v13538_v18  ;;  %9751 = vpow2.f32 %v6049_v3  ;;  %v5221_v58 = vmax.f32 %v13538_v18, %v13541_v49  ;;  %v16620_v49 = vld [vmem:[#allocation155_spill] sm:$0xff] }
 0x9ff   : > { %v13524_v60 = vpop.eup %9743 }
 0xa00   : > { %v13528_v19 = vpop.eup %9745  ;;  %v5615_v63 = vpop.permute.xlu2 %5614 }
 0xa01   : > { %v5905_v34 = vsub.f32 %v16607_v9, %v5615_v63  ;;  %v5906_v7 = vsub.f32 %v16608_v8, %v5615_v63  ;;  %v13534_v57 = vadd.f32 %v13528_v19, %v13524_v60  ;;  %v16614_v63 = vld [vmem:[#allocation167_spill] sm:$0xff]  ;;  %v13547_v37 = vpop.eup %9747 }
 0xa02   : > { %v16615_v8 = vsub.f32 %v16613_v2, %v16614_v63  ;;  %16616 = vst [vmem:[#allocation166_spill] sm:$0xff] %v13547_v37  ;;  %v13565_v63 = vadd.f32 %v13260_v1, %v13550_v21 }
 0xa03   : > { %16609 = vst [vmem:[#allocation150_spill] sm:$0xff] %v13534_v57  ;;  %v6051_v62 = vmul.f32 1.442695, %v5905_v34  ;;  %v6053_v9 = vmul.f32 1.442695, %v5906_v7  ;;  %v7219_v57 = vld [vmem:[#allocation4] sm:$0xff]  ;;  %v13558_v34 = vpop.f32.mrf.mxu1 }
 0xa04   : > { %v5445_v55 = vmul.f32 1.442695, %v16615_v8  ;;  %16617 = vst [vmem:[#allocation167_spill] sm:$0xff] %v13550_v21  ;;  %v7283_v3 = vmul.f32 %v13547_v37, %v7219_v57  ;;  %v16619_v8 = vld [vmem:[#allocation154_spill] sm:$0xff]  ;;  %v16622_v37 = vld [vmem:[#allocation168_spill] sm:$0xff] }
 0xa05   : > { %9753 = vpow2.f32 %v6051_v62  ;;  %v13561_v62 = vpop.eup %9749  ;;  %v16624_v29 = vsub.f32 %v16622_v37, %v16623_v15  ;;  %v7220_v15 = vld [vmem:[#allocation4 + $0xc8] sm:$0xff] }
 0xa06   : > { %9755 = vpow2.f32 %v6053_v9  ;;  %16618 = vst [vmem:[#allocation242_spill] sm:$0xff] %v13561_v62  ;;  %v13569_v23 = vpop.eup %9751 }
 0xa07   : > { %v6893_v0 = vpop.f32.mrf.mxu2  ;;  %9757 = vpow2.f32 %v5445_v55  ;;  %16621 = vst [vmem:[#allocation154_spill] sm:$0xff] %v13569_v23  ;;  %v5447_v24 = vmul.f32 1.442695, %v16624_v29 }
 0xa08   : > { %v7062_v2 = vpop.f32.mrf.mxu3  ;;  %v5625_v7 = vpop.permute.xlu2 %5624 }
 0xa09   : > { %v7063_v9 = vadd.f32 %v7062_v2, %v6893_v0  ;;  %v5909_v17 = vsub.f32 %v16619_v8, %v5625_v7  ;;  %v5910_v18 = vsub.f32 %v16620_v49, %v5625_v7  ;;  %v13575_v0 = vld [vmem:[#allocation2 + $0x148] sm:$0xff] }
 0xa0a   : > { %5222 = vmax.xlane.f32.xlu0 %v5221_v58  ;;  %16625 = vst [vmem:[#allocation155_spill] sm:$0xff] %v13575_v0  ;;  %v5203_v58 = vmax.f32 %v13269_v25, %v13565_v63 }
 0xa0b   : > { %v9754_v44 = vpop.eup %9753  ;;  %v7347_v55 = vadd.f32 %v7283_v3, %v7063_v9  ;;  %v6059_v35 = vmul.f32 1.442695, %v5909_v17  ;;  %v6061_v59 = vmul.f32 1.442695, %v5910_v18  ;;  %v9144_v3 = vld [vmem:[%s10680_s20 + $0xb8] sm:$0xff] }
 0xa0c   : > { %v9756_v57 = vpop.eup %9755  ;;  %v6727_v1 = vpack.c.bf16 %v9754_v44, %v13561_v62  ;;  %4776 = vmatmul.bf16.gmra.mxu0 %v9144_v3  ;;  %4945 = vmatmul.bf16.gmra.mxu1 %v9144_v3 }
 0xa0d   : > { %7411 = vst [vmem:[#allocation4] sm:$0xff] %v7347_v55  ;;  %9759 = vpow2.f32 %v6059_v35  ;;  %v6728_v49 = vpack.c.bf16 %v9756_v57, %v13569_v23  ;;  %v13580_v2 = vadd.f32 %v9756_v57, %v9754_v44  ;;  %v13582_v17 = vpop.eup %9757  ;;  %v13587_v44 = vpop.f32.mrf.mxu0 }
 0xa0e   : > { %16627 = vst [vmem:[#allocation170_spill] sm:$0xff] %v13582_v17  ;;  %9761 = vpow2.f32 %v6061_v59  ;;  %6907 = vmatmul.bf16.gmra.mxu2 %v6727_v1  ;;  %v5217_v29 = vpop.xlane.xlu1 %5216  ;;  %v7284_v9 = vmul.f32 %v13582_v17, %v7220_v15  ;;  %v13589_v59 = vpop.f32.mrf.mxu1  ;;  %v16628_v1 = vld [vmem:[#allocation172_spill] sm:$0xff] }
 0xa0f   : > { %16626 = vst [vmem:[#allocation168_spill] sm:$0xff] %v13580_v2  ;;  %7076 = vmatmul.bf16.gmra.mxu3 %v6728_v49  ;;  %5204 = vmax.xlane.f32.xlu2 %v5203_v58  ;;  %v6895_v37 = vpop.f32.mrf.mxu2  ;;  %v5343_v18 = vmax.f32 %v13575_v0, %v5217_v29  ;;  %9763 = vpow2.f32 %v5447_v24  ;;  %v16629_v49 = vld [vmem:[#allocation176_spill] sm:$0xff]  ;;  %v16646_v2 = vld [vmem:[#allocation157_spill] sm:$0xff] }
 0xa10   : > { %v7064_v35 = vpop.f32.mrf.mxu3  ;;  %v16630_v58 = vsub.f32 %v16628_v1, %v16629_v49  ;;  %v7221_v15 = vld [vmem:[#allocation4 + $0x1d0] sm:$0xff]  ;;  %v5630_v1 = vpop.permute.xlu0 %5629  ;;  %v9145_v49 = vld [vmem:[%s10680_s20 + $0xc0] sm:$0xff] }
 0xa11   : > { %v7065_v7 = vadd.f32 %v7064_v35, %v6895_v37  ;;  %6687 = vst [vmem:[#allocation2 + $0x148] sm:$0xff] %v5343_v18 }
 0xa12   : > { %v5449_v29 = vmul.f32 1.442695, %v16630_v58 }
 0xa13   : > { %v9760_v8 = vpop.eup %9759  ;;  %v7348_v55 = vadd.f32 %v7284_v9, %v7065_v7 }
 0xa14   : > { %v9762_v57 = vpop.eup %9761  ;;  %9765 = vpow2.f32 %v5449_v29  ;;  %v6729_v7 = vpack.c.bf16 %v9760_v8, %v13524_v60  ;;  %v7222_v29 = vld [vmem:[#allocation4 + $0x160] sm:$0xff] }
 0xa15   : > { %7412 = vst [vmem:[#allocation4 + $0xc8] sm:$0xff] %v7348_v55  ;;  %v13594_v24 = vadd.f32 %v9762_v57, %v9760_v8  ;;  %v13596_v37 = vpop.eup %9763  ;;  %v4762_v9 = vpop.f32.mrf.mxu0  ;;  %v6730_v55 = vpack.c.bf16 %v9762_v57, %v13528_v19 }
 0xa16   : > { %16632 = vst [vmem:[#allocation176_spill] sm:$0xff] %v13596_v37  ;;  %v7285_v17 = vmul.f32 %v13596_v37, %v7221_v15  ;;  %v4931_v62 = vpop.f32.mrf.mxu1  ;;  %v16644_v37 = vld [vmem:[#allocation181_spill] sm:$0xff] }
 0xa17   : > { %16631 = vst [vmem:[#allocation172_spill] sm:$0xff] %v13594_v24  ;;  %v6898_v18 = vpop.f32.mrf.mxu2 }
 0xa18   : > { %v7067_v3 = vpop.f32.mrf.mxu3 }
 0xa19   : > { %v7068_v35 = vadd.f32 %v7067_v3, %v6898_v18  ;;  %v16634_v3 = vld [vmem:[#allocation148_spill] sm:$0xff] }
 0xa1a   : > { %v13602_v58 = vpop.eup %9765  ;;  %v13606_v15 = vadd.f32 %v4762_v9, %v16634_v3  ;;  %v13623_v9 = vld [vmem:[#allocation2 + $0x160] sm:$0xff]  ;;  %v10219_v3 = vld [vmem:[#allocation2 + $0x48] sm:$0xff] }
 0xa1b   : > { %v7349_v23 = vadd.f32 %v7285_v17, %v7068_v35  ;;  %16633 = vst [vmem:[#allocation243_spill] sm:$0xff] %v13602_v58  ;;  %v13608_v17 = vadd.f32 -1e+30, %v4931_v62  ;;  %v13617_v62 = vld [vmem:[#allocation2 + $0xf0] sm:$0xff] }
 0xa1c   : > { %16635 = vst [vmem:[#allocation148_spill] sm:$0xff] %v13606_v15  ;;  %4950 = vmatmul.bf16.gmra.mxu1 %v9145_v49  ;;  %4781 = vmatmul.bf16.gmra.mxu0 %v9145_v49 }
 0xa1d   : > { %7413 = vst [vmem:[#allocation4 + $0x1d0] sm:$0xff] %v7349_v23  ;;  %v7286_v23 = vmul.f32 %v13602_v58, %v7222_v29  ;;  %v5239_v57 = vmax.f32 %v13606_v15, %v13608_v17 }
 0xa1e   : > { %5674 = vperm.xlu0 %9704, %v13383_v36   ;;  %6912 = vmatmul.bf16.gmra.mxu2 %v6729_v7  ;;  %16636 = vst [vmem:[#allocation244_spill] sm:$0xff] %v13608_v17  ;;  %v13614_v36 = vpop.permute.xlu0 %5639 }
 0xa1f   : > { %7081 = vmatmul.bf16.gmra.mxu3 %v6730_v55  ;;  %v6900_v18 = vpop.f32.mrf.mxu2  ;;  %16637 = vst [vmem:[#allocation245_spill] sm:$0xff] %v13617_v62  ;;  %v4233_v55 = vadd.s32 248, %v12795_v45  ;;  %v5911_v45 = vsub.f32 %v16646_v2, %v5630_v1 }
 0xa20   : > { %v7069_v60 = vpop.f32.mrf.mxu3  ;;  %16638 = vst [vmem:[#allocation246_spill] sm:$0xff] %v13623_v9 }
 0xa21   : > { %v7070_v8 = vadd.f32 %v7069_v60, %v6900_v18  ;;  %vm4300_vm15 = vcmp.le.s32.totalorder %v13040_v16, %v4233_v55  ;;  %v6063_v16 = vmul.f32 1.442695, %v5911_v45  ;;  %v16654_v45 = vld [vmem:[#allocation175_spill] sm:$0xff] }
 0xa23   : > { %v7350_v19 = vadd.f32 %v7286_v23, %v7070_v8  ;;  %v16641_v8 = vld [vmem:[#allocation169_spill] sm:$0xff] }
 0xa25   : > { %7414 = vst [vmem:[#allocation4 + $0x160] sm:$0xff] %v7350_v19  ;;  %v16642_v19 = vld [vmem:[#allocation186_spill] sm:$0xff] }
 0xa26   : > { %5684 = vperm.xlu0 %9704, %v13509_v38  }
 0xa27   : > { %5644 = vperm.xlu2 %9706, %v13294_v52   ;;  %5240 = vmax.xlane.f32.xlu1 %v5239_v57  ;;  %v16640_v52 = vld [vmem:[#allocation185_spill] sm:$0xff] }
 0xa28   : > { %v5382_v60 = vsub.f32 %v16640_v52, %v10219_v3  ;;  %v16647_v3 = vld [vmem:[#allocation158_spill] sm:$0xff] }
 0xa29   : > { %v5912_v52 = vsub.f32 %v16647_v3, %v5630_v1 }
 0xa2b   : > { %v6065_v55 = vmul.f32 1.442695, %v5912_v52 }
 0xa2f   : > { %v5211_v35 = vpop.xlane.xlu0 %5210 }
 0xa30   : > { %v13620_v7 = vmax.f32 %v13617_v62, %v5211_v35  ;;  %v16643_v35 = vld [vmem:[#allocation179_spill] sm:$0xff] }
 0xa31   : > { %v16645_v24 = vsub.f32 %v16643_v35, %v16644_v37  ;;  %v13650_v37 = vadd.f32 -1e+30, %v13558_v34 }
 0xa32   : > { %6685 = vst [vmem:[#allocation2 + $0xf0] sm:$0xff] %v13620_v7 }
 0xa33   : > { %v5451_v58 = vmul.f32 1.442695, %v16645_v24  ;;  %v16649_v24 = vld [vmem:[#allocation146_spill] sm:$0xff]  ;;  %16651 = vst [vmem:[#allocation186_spill] sm:$0xff] %v13650_v37 }
 0xa34   : > { %v13647_v2 = vadd.f32 %v13556_v13, %v16649_v24  ;;  %v16655_v13 = vld [vmem:[#allocation178_spill] sm:$0xff] }
 0xa36   : > { %16650 = vst [vmem:[#allocation169_spill] sm:$0xff] %v13647_v2 }
 0xa41   : > { %v5199_v49 = vpop.xlane.xlu2 %5198 }
 0xa42   : > { %v13627_v29 = vmax.f32 %v13623_v9, %v5199_v49  ;;  %v5655_v18 = vpop.permute.xlu0 %5654 }
 0xa43   : > { %v5921_v23 = vsub.f32 %v16641_v8, %v5655_v18  ;;  %v5922_v57 = vsub.f32 %v16642_v19, %v5655_v18  ;;  %v5453_v18 = vmul.f32 1.442695, %v5382_v60  ;;  %v13643_v19 = vsel %vm4300_vm15, 0.0, %v16532_v32  ;;  %v16652_v60 = vld [vmem:[#allocation160_spill] sm:$0xff] }
 0xa44   : > { %16639 = vst [vmem:[#allocation247_spill] sm:$0xff] %v13627_v29  ;;  %5699 = vperm.xlu1 %9705, %v13627_v29   ;;  %v13654_v1 = vadd.f32 %v13363_v22, %v13643_v19 }
 0xa45   : > { %6681 = vst [vmem:[#allocation2 + $0x160] sm:$0xff] %v13627_v29  ;;  %v6083_v8 = vmul.f32 1.442695, %v5921_v23  ;;  %v6085_v0 = vmul.f32 1.442695, %v5922_v57  ;;  %v16653_v23 = vld [vmem:[#allocation161_spill] sm:$0xff] }
 0xa46   : > { %16648 = vst [vmem:[#allocation185_spill] sm:$0xff] %v13643_v19 }
 0xa47   : > { %9767 = vpow2.f32 %v6083_v8 }
 0xa48   : > { %9769 = vpow2.f32 %v5451_v58 }
 0xa49   : > { %9771 = vpow2.f32 %v6085_v0  ;;  %v5635_v35 = vpop.permute.xlu2 %5634  ;;  %v5233_v0 = vmax.f32 %v13647_v2, %v13650_v37 }
 0xa4a   : > { %v5913_v32 = vsub.f32 %v16652_v60, %v5635_v35  ;;  %v5914_v57 = vsub.f32 %v16653_v23, %v5635_v35  ;;  %v5660_v58 = vpop.permute.xlu0 %5659  ;;  %9773 = vpow2.f32 %v5453_v18  ;;  %v5212_v18 = vmax.f32 %v13361_v50, %v13654_v1  ;;  %v13670_v23 = vpop.permute.xlu1 %5669 }
 0xa4b   : > { %v5923_v3 = vsub.f32 %v16654_v45, %v5660_v58  ;;  %v5924_v8 = vsub.f32 %v16655_v13, %v5660_v58  ;;  %9775 = vpow2.f32 %v6063_v16  ;;  %v7223_v16 = vld [vmem:[#allocation4 + $0x1f0] sm:$0xff] }
 0xa4c   : > { %v6067_v34 = vmul.f32 1.442695, %v5913_v32  ;;  %v6069_v24 = vmul.f32 1.442695, %v5914_v57  ;;  %9777 = vpow2.f32 %v6065_v55 }
 0xa4d   : > { %v13662_v52 = vpop.eup %9767  ;;  %v6087_v22 = vmul.f32 1.442695, %v5923_v3  ;;  %v6089_v49 = vmul.f32 1.442695, %v5924_v8  ;;  %v16660_v3 = vld [vmem:[#allocation142_spill] sm:$0xff] }
 0xa4e   : > { %v13664_v60 = vpop.eup %9769  ;;  %9779 = vpow2.f32 %v6067_v34  ;;  %v13682_v13 = vadd.f32 %v13424_v5, %v16660_v3  ;;  %v13685_v8 = vadd.f32 -1e+30, %v13427_v20  ;;  %v13693_v3 = vld [vmem:[#allocation2 + $0x40] sm:$0xff]  ;;  %v9146_v20 = vld [vmem:[%s10680_s20 + $0xc8] sm:$0xff] }
 0xa4f   : > { %16656 = vst [vmem:[#allocation179_spill] sm:$0xff] %v13664_v60  ;;  %v13668_v35 = vpop.eup %9771  ;;  %9781 = vpow2.f32 %v6069_v24  ;;  %v7287_v24 = vmul.f32 %v13664_v60, %v7223_v16  ;;  %4955 = vmatmul.bf16.gmra.mxu1 %v9146_v20  ;;  %4786 = vmatmul.bf16.gmra.mxu0 %v9146_v20 }
 0xa50   : > { %9783 = vpow2.f32 %v6087_v22  ;;  %5213 = vmax.xlane.f32.xlu2 %v5212_v18  ;;  %v6903_v32 = vpop.f32.mrf.mxu2  ;;  %5234 = vmax.xlane.f32.xlu0 %v5233_v0  ;;  %v13674_v55 = vadd.f32 %v13668_v35, %v13662_v52  ;;  %v13676_v57 = vpop.eup %9773  ;;  %16661 = vst [vmem:[#allocation146_spill] sm:$0xff] %v13682_v13  ;;  %v16664_v18 = vld [vmem:[#allocation183_spill] sm:$0xff] }
 0xa51   : > { %16658 = vst [vmem:[#allocation157_spill] sm:$0xff] %v13676_v57  ;;  %9785 = vpow2.f32 %v6089_v49  ;;  %v7072_v58 = vpop.f32.mrf.mxu3  ;;  %v13678_v45 = vpop.eup %9775  ;;  %v16665_v49 = vld [vmem:[#allocation199_spill] sm:$0xff] }
 0xa52   : > { %16657 = vst [vmem:[#allocation181_spill] sm:$0xff] %v13674_v55  ;;  %v7073_v34 = vadd.f32 %v7072_v58, %v6903_v32  ;;  %v5665_v0 = vpop.permute.xlu0 %5664  ;;  %v13688_v22 = vpop.eup %9777  ;;  %v5218_v58 = vmax.f32 %v13682_v13, %v13685_v8 }
 0xa53   : > { %16659 = vst [vmem:[#allocation158_spill] sm:$0xff] %v13678_v45  ;;  %v5925_v55 = vsub.f32 %v16664_v18, %v5665_v0  ;;  %v5926_v19 = vsub.f32 %v16665_v49, %v5665_v0 }
 0xa54   : > { %16662 = vst [vmem:[#allocation160_spill] sm:$0xff] %v13685_v8  ;;  %v9780_v17 = vpop.eup %9779  ;;  %v7351_v15 = vadd.f32 %v7287_v24, %v7073_v34  ;;  %v4764_v24 = vpop.f32.mrf.mxu0 }
 0xa55   : > { %16663 = vst [vmem:[#allocation161_spill] sm:$0xff] %v13688_v22  ;;  %v9782_v37 = vpop.eup %9781  ;;  %v6091_v2 = vmul.f32 1.442695, %v5925_v55  ;;  %v6093_v21 = vmul.f32 1.442695, %v5926_v19  ;;  %v6731_v5 = vpack.c.bf16 %v9780_v17, %v13678_v45  ;;  %v7224_v19 = vld [vmem:[#allocation4 + $0xe8] sm:$0xff] }
 0xa56   : > { %16666 = vst [vmem:[#allocation175_spill] sm:$0xff] %v13693_v3  ;;  %v13696_v32 = vpop.eup %9783  ;;  %v6732_v16 = vpack.c.bf16 %v9782_v37, %v13688_v22  ;;  %v13701_v18 = vadd.f32 %v9782_v37, %v9780_v17  ;;  %v4933_v37 = vpop.f32.mrf.mxu1 }
 0xa57   : > { %7415 = vst [vmem:[#allocation4 + $0x1f0] sm:$0xff] %v7351_v15  ;;  %v13703_v0 = vpop.eup %9785  ;;  %9787 = vpow2.f32 %v6091_v2  ;;  %6917 = vmatmul.bf16.gmra.mxu2 %v6731_v5  ;;  %v5229_v55 = vpop.xlane.xlu1 %5228  ;;  %v16669_v2 = vld [vmem:[#allocation144_spill] sm:$0xff] }
 0xa58   : > { %16667 = vst [vmem:[#allocation178_spill] sm:$0xff] %v13701_v18  ;;  %9789 = vpow2.f32 %v6093_v21  ;;  %7086 = vmatmul.bf16.gmra.mxu3 %v6732_v16  ;;  %5219 = vmax.xlane.f32.xlu2 %v5218_v58  ;;  %v6905_v34 = vpop.f32.mrf.mxu2  ;;  %v13706_v15 = vmax.f32 %v13693_v3, %v5229_v55  ;;  %v13710_v49 = vadd.f32 %v13703_v0, %v13696_v32  ;;  %v13717_v21 = vadd.f32 -1e+30, %v13481_v10  ;;  %v16673_v10 = vld [vmem:[#allocation145_spill] sm:$0xff]  ;;  %v16687_v3 = vld [vmem:[#allocation163_spill] sm:$0xff] }
 0xa59   : > { %v7074_v17 = vpop.f32.mrf.mxu3  ;;  %v13714_v5 = vadd.f32 %v13478_v4, %v16669_v2  ;;  %v7288_v58 = vmul.f32 %v13676_v57, %v7224_v19  ;;  %v13736_v19 = vadd.f32 -1e+30, %v13522_v48  ;;  %v13751_v48 = vadd.f32 -1e+30, %v13589_v59 }
 0xa5a   : > { %16668 = vst [vmem:[#allocation142_spill] sm:$0xff] %v13710_v49  ;;  %v7075_v16 = vadd.f32 %v7074_v17, %v6905_v34  ;;  %v13733_v34 = vadd.f32 %v13519_v6, %v16673_v10 }
 0xa5b   : > { %16670 = vst [vmem:[#allocation183_spill] sm:$0xff] %v13714_v5  ;;  %v5224_v20 = vmax.f32 %v13714_v5, %v13717_v21 }
 0xa5c   : > { %16671 = vst [vmem:[#allocation199_spill] sm:$0xff] %v13717_v21  ;;  %v7352_v55 = vadd.f32 %v7288_v58, %v7075_v16  ;;  %v4767_v17 = vpop.f32.mrf.mxu0  ;;  %v5230_v16 = vmax.f32 %v13733_v34, %v13736_v19  ;;  %v16675_v58 = vld [vmem:[#allocation152_spill] sm:$0xff]  ;;  %v16693_v21 = vld [vmem:[#allocation173_spill] sm:$0xff] }
 0xa5d   : > { %6691 = vst [vmem:[#allocation2 + $0x40] sm:$0xff] %v13706_v15  ;;  %v13721_v60 = vpop.eup %9787 }
 0xa5e   : > { %v13723_v18 = vpop.eup %9789  ;;  %7416 = vst [vmem:[#allocation4 + $0xe8] sm:$0xff] %v7352_v55  ;;  %v4936_v2 = vpop.f32.mrf.mxu1  ;;  %v13742_v55 = vadd.f32 %v4767_v17, %v16675_v58  ;;  %v16681_v17 = vld [vmem:[#allocation191_spill] sm:$0xff] }
 0xa5f   : > { %v13729_v4 = vadd.f32 %v13723_v18, %v13721_v60  ;;  %16674 = vst [vmem:[#allocation145_spill] sm:$0xff] %v13736_v19  ;;  %v13744_v57 = vadd.f32 -1e+30, %v4936_v2  ;;  %v16682_v2 = vld [vmem:[#allocation201_spill] sm:$0xff] }
 0xa60   : > { %5225 = vmax.xlane.f32.xlu2 %v5224_v20  ;;  %16676 = vst [vmem:[#allocation152_spill] sm:$0xff] %v13742_v55  ;;  %v16678_v20 = vld [vmem:[#allocation147_spill] sm:$0xff] }
 0xa61   : > { %16672 = vst [vmem:[#allocation144_spill] sm:$0xff] %v13729_v4  ;;  %v13748_v6 = vadd.f32 %v13587_v44, %v16678_v20  ;;  %v5245_v10 = vmax.f32 %v13742_v55, %v13744_v57  ;;  %v13763_v20 = vld [vmem:[#allocation2 + $0x100] sm:$0xff]  ;;  %v16688_v55 = vld [vmem:[#allocation164_spill] sm:$0xff] }
 0xa62   : > { %16677 = vst [vmem:[#allocation248_spill] sm:$0xff] %v13744_v57 }
 0xa63   : > { %16679 = vst [vmem:[#allocation147_spill] sm:$0xff] %v13748_v6 }
 0xa64   : > { %5689 = vperm.xlu0 %9704, %v13500_v14   ;;  %16680 = vst [vmem:[#allocation249_spill] sm:$0xff] %v13751_v48  ;;  %v5236_v14 = vmax.f32 %v13748_v6, %v13751_v48  ;;  %v16690_v6 = vld [vmem:[#allocation149_spill] sm:$0xff] }
 0xa65   : > { %16683 = vst [vmem:[#allocation191_spill] sm:$0xff] %v13763_v20  ;;  %v13793_v62 = vadd.f32 %v4764_v24, %v16690_v6  ;;  %v9147_v6 = vld [vmem:[%s10680_s20 + $0xd0] sm:$0xff] }
 0xa66   : > { %4960 = vmatmul.bf16.gmra.mxu1 %v9147_v6  ;;  %4791 = vmatmul.bf16.gmra.mxu0 %v9147_v6 }
 0xa68   : > { %5231 = vmax.xlane.f32.xlu2 %v5230_v16 }
 0xa6e   : > { %5246 = vmax.xlane.f32.xlu1 %v5245_v10 }
 0xa6f   : > { %v5680_v4 = vpop.permute.xlu1 %5679 }
 0xa70   : > { %v5931_v58 = vsub.f32 %v16681_v17, %v5680_v4  ;;  %v5932_v49 = vsub.f32 %v16682_v2, %v5680_v4  ;;  %5237 = vmax.xlane.f32.xlu2 %v5236_v14  ;;  %v13773_v4 = vld [vmem:[#allocation2 + $0x1e0] sm:$0xff] }
 0xa71   : > { %16685 = vst [vmem:[#allocation250_spill] sm:$0xff] %v13773_v4 }
 0xa72   : > { %v6103_v16 = vmul.f32 1.442695, %v5931_v58  ;;  %v6105_v22 = vmul.f32 1.442695, %v5932_v49  ;;  %v10220_v49 = vld [vmem:[#allocation2 + $0x180] sm:$0xff] }
 0xa74   : > { %9791 = vpow2.f32 %v6103_v16  ;;  %v13779_v16 = vpop.f32.mrf.mxu1 }
 0xa75   : > { %9793 = vpow2.f32 %v6105_v22  ;;  %v16686_v22 = vld [vmem:[#allocation187_spill] sm:$0xff] }
 0xa76   : > { %v5383_v14 = vsub.f32 %v16686_v22, %v10220_v49  ;;  %v5916_v49 = vsub.f32 %v16688_v55, %v13614_v36  ;;  %v10221_v22 = vld [vmem:[#allocation2 + $0x110] sm:$0xff]  ;;  %16691 = vst [vmem:[#allocation187_spill] sm:$0xff] %v13793_v62 }
 0xa78   : > { %v5455_v57 = vmul.f32 1.442695, %v5383_v14 }
 0xa7a   : > { %v13759_v44 = vpop.eup %9791  ;;  %9795 = vpow2.f32 %v5455_v57 }
 0xa7b   : > { %v13761_v59 = vpop.eup %9793 }
 0xa7c   : > { %v13767_v10 = vadd.f32 %v13761_v59, %v13759_v44 }
 0xa7d   : > { %v5223_v45 = vpop.xlane.xlu0 %5222 }
 0xa7e   : > { %16684 = vst [vmem:[#allocation201_spill] sm:$0xff] %v13767_v10  ;;  %v13770_v17 = vmax.f32 %v13763_v20, %v5223_v45  ;;  %v5915_v10 = vsub.f32 %v16687_v3, %v13614_v36  ;;  %v13786_v20 = vpop.f32.mrf.mxu0  ;;  %v13795_v3 = vadd.f32 -1e+30, %v4933_v37  ;;  %v16694_v36 = vld [vmem:[#allocation174_spill] sm:$0xff]  ;;  %v13803_v37 = vpop.f32.mrf.mxu1 }
 0xa80   : > { %6689 = vst [vmem:[#allocation2 + $0x100] sm:$0xff] %v13770_v17  ;;  %v6071_v45 = vmul.f32 1.442695, %v5915_v10  ;;  %v5242_v29 = vmax.f32 %v13793_v62, %v13795_v3  ;;  %v13807_v57 = vpop.eup %9795  ;;  %v16696_v10 = vld [vmem:[#allocation188_spill] sm:$0xff] }
 0xa81   : > { %16692 = vst [vmem:[#allocation163_spill] sm:$0xff] %v13795_v3 }
 0xa82   : > { %v5205_v58 = vpop.xlane.xlu2 %5204  ;;  %9797 = vpow2.f32 %v6071_v45  ;;  %16695 = vst [vmem:[#allocation164_spill] sm:$0xff] %v13807_v57 }
 0xa83   : > { %v13777_v2 = vmax.f32 %v13773_v4, %v5205_v58  ;;  %v16689_v58 = vld [vmem:[#allocation189_spill] sm:$0xff]  ;;  %v6073_v4 = vmul.f32 1.442695, %v5916_v49 }
 0xa84   : > { %v5384_v48 = vsub.f32 %v16689_v58, %v10221_v22 }
 0xa85   : > { %6683 = vst [vmem:[#allocation2 + $0x1e0] sm:$0xff] %v13777_v2  ;;  %9799 = vpow2.f32 %v6073_v4  ;;  %v10222_v4 = vld [vmem:[#allocation2 + $0x118] sm:$0xff] }
 0xa87   : > { %5719 = vperm.xlu1 %9705, %v13620_v7   ;;  %v5457_v7 = vmul.f32 1.442695, %v5384_v48  ;;  %v7225_v48 = vld [vmem:[#allocation4 + $0x100] sm:$0xff] }
 0xa88   : > { %5694 = vperm.xlu2 %9706, %v13430_v31   ;;  %v13805_v31 = vpop.f32.mrf.mxu0  ;;  %v7289_v62 = vmul.f32 %v13807_v57, %v7225_v48  ;;  %v10223_v57 = vld [vmem:[#allocation2 + $0x98] sm:$0xff] }
 0xa8a   : > { %v5645_v14 = vpop.permute.xlu2 %5644 }
 0xa8b   : > { %v5917_v5 = vsub.f32 %v16693_v21, %v5645_v14  ;;  %v5918_v55 = vsub.f32 %v16694_v36, %v5645_v14 }
 0xa8d   : > { %v6075_v22 = vmul.f32 1.442695, %v5917_v5  ;;  %v6077_v24 = vmul.f32 1.442695, %v5918_v55  ;;  %v16697_v5 = vld [vmem:[#allocation196_spill] sm:$0xff]  ;;  %v13812_v55 = vpop.eup %9797 }
 0xa8e   : > { %5243 = vmax.xlane.f32.xlu0 %v5242_v29  ;;  %v16698_v29 = vld [vmem:[#allocation190_spill] sm:$0xff]  ;;  %16699 = vst [vmem:[#allocation189_spill] sm:$0xff] %v13812_v55 }
 0xa8f   : > { %9801 = vpow2.f32 %v6075_v22  ;;  %v5385_v14 = vsub.f32 %v16698_v29, %v10222_v4 }
 0xa90   : > { %9803 = vpow2.f32 %v6077_v24  ;;  %v5675_v21 = vpop.permute.xlu0 %5674  ;;  %v13815_v24 = vpop.eup %9799 }
 0xa91   : > { %9805 = vpow2.f32 %v5457_v7  ;;  %v5929_v45 = vsub.f32 %v16696_v10, %v5675_v21  ;;  %v5930_v49 = vsub.f32 %v16697_v5, %v5675_v21  ;;  %v6908_v58 = vpop.f32.mrf.mxu2  ;;  %16700 = vst [vmem:[#allocation149_spill] sm:$0xff] %v13815_v24  ;;  %v5459_v8 = vmul.f32 1.442695, %v5385_v14  ;;  %v16701_v21 = vld [vmem:[#allocation165_spill] sm:$0xff]  ;;  %v4943_v14 = vpop.f32.mrf.mxu1 }
 0xa92   : > { %v7077_v36 = vpop.f32.mrf.mxu3  ;;  %v5919_v5 = vsub.f32 %v16701_v21, %v13552_v27 }
 0xa93   : > { %v6099_v22 = vmul.f32 1.442695, %v5929_v45  ;;  %v6101_v3 = vmul.f32 1.442695, %v5930_v49  ;;  %v7078_v6 = vadd.f32 %v7077_v36, %v6908_v58  ;;  %v7226_v49 = vld [vmem:[#allocation4 + $0xd0] sm:$0xff]  ;;  %v16704_v58 = vld [vmem:[#allocation182_spill] sm:$0xff] }
 0xa94   : > { %v5920_v36 = vsub.f32 %v16704_v58, %v13552_v27 }
 0xa95   : > { %v9802_v9 = vpop.eup %9801  ;;  %9807 = vpow2.f32 %v6099_v22  ;;  %v7353_v7 = vadd.f32 %v7289_v62, %v7078_v6  ;;  %v13827_v22 = vld [vmem:[#allocation2 + $0x1a0] sm:$0xff] }
 0xa96   : > { %v9804_v10 = vpop.eup %9803  ;;  %9809 = vpow2.f32 %v6101_v3  ;;  %v6733_v4 = vpack.c.bf16 %v9802_v9, %v13812_v55  ;;  %16705 = vst [vmem:[#allocation188_spill] sm:$0xff] %v13827_v22 }
 0xa97   : > { %v13820_v29 = vpop.eup %9805  ;;  %7417 = vst [vmem:[#allocation4 + $0x100] sm:$0xff] %v7353_v7  ;;  %v6734_v45 = vpack.c.bf16 %v9804_v10, %v13815_v24  ;;  %v13823_v48 = vadd.f32 %v9804_v10, %v9802_v9  ;;  %v4774_v7 = vpop.f32.mrf.mxu0  ;;  %9811 = vpow2.f32 %v5459_v8  ;;  %v16706_v9 = vld [vmem:[#allocation192_spill] sm:$0xff]  ;;  %v6079_v24 = vmul.f32 1.442695, %v5919_v5  ;;  %v9148_v8 = vld [vmem:[%s10680_s20 + $0xd8] sm:$0xff] }
 0xa98   : > { %16702 = vst [vmem:[#allocation173_spill] sm:$0xff] %v13820_v29  ;;  %6922 = vmatmul.bf16.gmra.mxu2 %v6733_v4  ;;  %v5685_v62 = vpop.permute.xlu0 %5684  ;;  %v5386_v10 = vsub.f32 %v16706_v9, %v10223_v57  ;;  %v7290_v27 = vmul.f32 %v13820_v29, %v7226_v49  ;;  %4965 = vmatmul.bf16.gmra.mxu1 %v9148_v8  ;;  %v7227_v49 = vld [vmem:[#allocation4 + $0x70] sm:$0xff] }
 0xa99   : > { %16703 = vst [vmem:[#allocation174_spill] sm:$0xff] %v13823_v48  ;;  %7091 = vmatmul.bf16.gmra.mxu3 %v6734_v45  ;;  %v5933_v3 = vsub.f32 %v13151_v47, %v5685_v62  ;;  %v5934_v6 = vsub.f32 %v13344_v54, %v5685_v62  ;;  %v6910_v21 = vpop.f32.mrf.mxu2  ;;  %v6081_v62 = vmul.f32 1.442695, %v5920_v36  ;;  %4796 = vmatmul.bf16.gmra.mxu0 %v9148_v8  ;;  %v7228_v8 = vld [vmem:[#allocation4 + $0x168] sm:$0xff] }
 0xa9a   : > { %v7079_v55 = vpop.f32.mrf.mxu3  ;;  %v5241_v4 = vpop.xlane.xlu1 %5240  ;;  %v5461_v57 = vmul.f32 1.442695, %v5386_v10 }
 0xa9b   : > { %v13833_v58 = vpop.eup %9807  ;;  %v6107_v48 = vmul.f32 1.442695, %v5933_v3  ;;  %v6109_v45 = vmul.f32 1.442695, %v5934_v6  ;;  %v7080_v13 = vadd.f32 %v7079_v55, %v6910_v21  ;;  %v13836_v47 = vmax.f32 %v13827_v22, %v5241_v4  ;;  %v16752_v22 = vld [vmem:[#allocation209_spill] sm:$0xff] }
 0xa9c   : > { %v13838_v54 = vpop.eup %9809 }
 0xa9d   : > { %9813 = vpow2.f32 %v6107_v48  ;;  %v7354_v19 = vadd.f32 %v7290_v27, %v7080_v13  ;;  %6695 = vst [vmem:[#allocation2 + $0x1a0] sm:$0xff] %v13836_v47  ;;  %v13844_v5 = vadd.f32 %v13838_v54, %v13833_v58  ;;  %v13846_v55 = vpop.eup %9811  ;;  %v13849_v13 = vpop.f32.mrf.mxu1 }
 0xa9e   : > { %9815 = vpow2.f32 %v6109_v45  ;;  %16708 = vst [vmem:[#allocation190_spill] sm:$0xff] %v13846_v55  ;;  %v7291_v21 = vmul.f32 %v13846_v55, %v7227_v49 }
 0xa9f   : > { %16707 = vst [vmem:[#allocation196_spill] sm:$0xff] %v13844_v5  ;;  %9817 = vpow2.f32 %v6079_v24 }
 0xaa0   : > { %7418 = vst [vmem:[#allocation4 + $0xd0] sm:$0xff] %v7354_v19  ;;  %9819 = vpow2.f32 %v6081_v62  ;;  %v13856_v19 = vpop.f32.mrf.mxu0 }
 0xaa1   : > { %v6913_v36 = vpop.f32.mrf.mxu2  ;;  %9821 = vpow2.f32 %v5461_v57  ;;  %v16713_v57 = vld [vmem:[#allocation153_spill] sm:$0xff] }
 0xaa2   : > { %v7082_v48 = vpop.f32.mrf.mxu3  ;;  %5704 = vperm.xlu0 %9704, %v13445_v40   ;;  %v13874_v49 = vadd.f32 %v13786_v20, %v16713_v57 }
 0xaa3   : > { %v13851_v3 = vpop.eup %9813  ;;  %v7083_v6 = vadd.f32 %v7082_v48, %v6913_v36  ;;  %v13877_v36 = vadd.f32 -1e+30, %v13779_v16  ;;  %v16714_v48 = vld [vmem:[#allocation159_spill] sm:$0xff] }
 0xaa4   : > { %v13854_v24 = vpop.eup %9815 }
 0xaa5   : > { %v13858_v9 = vpop.eup %9817  ;;  %v7355_v10 = vadd.f32 %v7291_v21, %v7083_v6  ;;  %v13862_v27 = vadd.f32 %v13854_v24, %v13851_v3  ;;  %v13880_v6 = vadd.f32 %v4774_v7, %v16714_v48  ;;  %v4948_v55 = vpop.f32.mrf.mxu1  ;;  %v5248_v20 = vmax.f32 %v13874_v49, %v13877_v36  ;;  %v9149_v7 = vld [vmem:[%s10680_s20 + $0xe0] sm:$0xff] }
 0xaa6   : > { %16709 = vst [vmem:[#allocation165_spill] sm:$0xff] %v13858_v9  ;;  %v13864_v4 = vpop.eup %9819  ;;  %v6735_v40 = vpack.c.bf16 %v13662_v52, %v13858_v9  ;;  %v13882_v52 = vadd.f32 -1e+30, %v4943_v14  ;;  %v16715_v14 = vld [vmem:[#allocation171_spill] sm:$0xff]  ;;  %v13894_v48 = vadd.f32 -1e+30, %v4948_v55 }
 0xaa7   : > { %16710 = vst [vmem:[#allocation182_spill] sm:$0xff] %v13862_v27  ;;  %v6736_v45 = vpack.c.bf16 %v13668_v35, %v13864_v4  ;;  %v13870_v62 = vpop.eup %9821  ;;  %v16716_v55 = vld [vmem:[#allocation180_spill] sm:$0xff]  ;;  %v13972_v27 = vld [vmem:[#allocation2 + $0x1f8] sm:$0xff] }
 0xaa8   : > { %16711 = vst [vmem:[#allocation192_spill] sm:$0xff] %v13864_v4  ;;  %6927 = vmatmul.bf16.gmra.mxu2 %v6735_v40  ;;  %v7292_v40 = vmul.f32 %v13870_v62, %v7228_v8  ;;  %v5254_v16 = vmax.f32 %v13880_v6, %v13882_v52  ;;  %v4779_v57 = vpop.f32.mrf.mxu0  ;;  %4970 = vmatmul.bf16.gmra.mxu1 %v9149_v7 }
 0xaa9   : > { %7419 = vst [vmem:[#allocation4 + $0x70] sm:$0xff] %v7355_v10  ;;  %7096 = vmatmul.bf16.gmra.mxu3 %v6736_v45  ;;  %v6915_v21 = vpop.f32.mrf.mxu2  ;;  %4801 = vmatmul.bf16.gmra.mxu0 %v9149_v7  ;;  %v13892_v45 = vadd.f32 %v4779_v57, %v16715_v14 }
 0xaaa   : > { %16712 = vst [vmem:[#allocation251_spill] sm:$0xff] %v13870_v62  ;;  %v7084_v35 = vpop.f32.mrf.mxu3  ;;  %5709 = vperm.xlu0 %9704, %v13777_v2  }
 0xaab   : > { %v7085_v10 = vadd.f32 %v7084_v35, %v6915_v21  ;;  %v5260_v8 = vmax.f32 %v13892_v45, %v13894_v48  ;;  %v6737_v21 = vpack.c.bf16 %v13721_v60, %v13696_v32 }
 0xaad   : > { %v7356_v29 = vadd.f32 %v7292_v40, %v7085_v10  ;;  %v4951_v35 = vpop.f32.mrf.mxu1  ;;  %v5927_v10 = vsub.f32 %v13106_v53, %v13670_v23  ;;  %v5928_v40 = vsub.f32 %v13246_v61, %v13670_v23  ;;  %v13913_v53 = vld [vmem:[#allocation2 + $0x8] sm:$0xff] }
 0xaaf   : > { %7420 = vst [vmem:[#allocation4 + $0x168] sm:$0xff] %v7356_v29  ;;  %v6738_v29 = vpack.c.bf16 %v13723_v18, %v13703_v0  ;;  %v6095_v7 = vmul.f32 1.442695, %v5927_v10  ;;  %v6097_v60 = vmul.f32 1.442695, %v5928_v40  ;;  %v13915_v18 = vld [vmem:[#allocation2 + $0x20] sm:$0xff] }
 0xab0   : > { %v10224_v40 = vld [vmem:[#allocation2 + $0x120] sm:$0xff] }
 0xab1   : > { %5249 = vmax.xlane.f32.xlu2 %v5248_v20  ;;  %5255 = vmax.xlane.f32.xlu1 %v5254_v16  ;;  %v13907_v20 = vadd.f32 %v4951_v35, %v16716_v55  ;;  %v13909_v16 = vpop.f32.mrf.mxu0  ;;  %9823 = vpow2.f32 %v6095_v7  ;;  %v16719_v55 = vld [vmem:[#allocation193_spill] sm:$0xff] }
 0xab2   : > { %9825 = vpow2.f32 %v6097_v60  ;;  %v5387_v7 = vsub.f32 %v16719_v55, %v10224_v40  ;;  %v16721_v40 = vld [vmem:[#allocation194_spill] sm:$0xff] }
 0xab3   : > { %v5263_v32 = vmax.f32 %v13909_v16, %v13907_v20 }
 0xab7   : > { %v13923_v14 = vpop.eup %9823 }
 0xab8   : > { %6932 = vmatmul.bf16.gmra.mxu2 %v6737_v21  ;;  %16717 = vst [vmem:[#allocation153_spill] sm:$0xff] %v13923_v14  ;;  %v6739_v35 = vpack.c.bf16 %v13833_v58, %v13923_v14  ;;  %v13944_v58 = vadd.f32 -1e+30, %v13803_v37 }
 0xab9   : > { %7101 = vmatmul.bf16.gmra.mxu3 %v6738_v29  ;;  %5261 = vmax.xlane.f32.xlu1 %v5260_v8  ;;  %v13925_v8 = vpop.eup %9825  ;;  %v13936_v29 = vld [vmem:[#allocation2 + $0x1d0] sm:$0xff]  ;;  %v14001_v14 = vpop.f32.mrf.mxu0 }
 0xaba   : > { %16718 = vst [vmem:[#allocation159_spill] sm:$0xff] %v13925_v8  ;;  %v6740_v10 = vpack.c.bf16 %v13838_v54, %v13925_v8  ;;  %v6741_v54 = vpack.c.bf16 %v13851_v3, %v13759_v44 }
 0xabb   : > { %16727 = vst [vmem:[#allocation252_spill] sm:$0xff] %v14001_v14 }
 0xac1   : > { %5264 = vmax.xlane.f32.xlu1 %v5263_v32  ;;  %v16720_v32 = vld [vmem:[#allocation156_spill] sm:$0xff] }
 0xac3   : > { %v5214_v61 = vpop.xlane.xlu2 %5213  ;;  %v5235_v23 = vpop.xlane.xlu0 %5234 }
 0xac4   : > { %v13918_v0 = vmax.f32 %v13913_v53, %v5214_v61  ;;  %v13921_v57 = vmax.f32 %v13915_v18, %v5235_v23  ;;  %v13941_v61 = vadd.f32 %v13805_v31, %v16720_v32  ;;  %v10225_v31 = vld [vmem:[#allocation2 + $0x150] sm:$0xff] }
 0xac5   : > { %v5388_v37 = vsub.f32 %v16721_v40, %v10225_v31  ;;  %v6742_v31 = vpack.c.bf16 %v13854_v24, %v13761_v59  ;;  %v13970_v40 = vpop.permute.xlu1 %5699 }
 0xac6   : > { %6686 = vst [vmem:[#allocation2 + $0x8] sm:$0xff] %v13918_v0 }
 0xac7   : > { %6693 = vst [vmem:[#allocation2 + $0x20] sm:$0xff] %v13921_v57  ;;  %v5465_v32 = vmul.f32 1.442695, %v5388_v37 }
 0xac8   : > { %6937 = vmatmul.bf16.gmra.mxu2 %v6739_v35  ;;  %v5251_v35 = vmax.f32 %v13941_v61, %v13944_v58 }
 0xac9   : > { %7106 = vmatmul.bf16.gmra.mxu3 %v6740_v10  ;;  %5714 = vperm.xlu2 %9706, %v13472_v41   ;;  %v5463_v41 = vmul.f32 1.442695, %v5387_v7  ;;  %v13955_v10 = vld [vmem:[#allocation2 + $0xc8] sm:$0xff] }
 0xacb   : > { %v5220_v60 = vpop.xlane.xlu2 %5219  ;;  %9827 = vpow2.f32 %v5463_v41 }
 0xacc   : > { %v13947_v23 = vmax.f32 %v13936_v29, %v5220_v60  ;;  %9829 = vpow2.f32 %v5465_v32 }
 0xace   : > { %6688 = vst [vmem:[#allocation2 + $0x1d0] sm:$0xff] %v13947_v23 }
 0xad1   : > { %5734 = vperm.xlu2 %9706, %v13947_v23   ;;  %v13968_v41 = vpop.eup %9827 }
 0xad2   : > { %16722 = vst [vmem:[#allocation171_spill] sm:$0xff] %v13968_v41  ;;  %v13984_v32 = vpop.eup %9829 }
 0xad3   : > { %v5226_v55 = vpop.xlane.xlu2 %5225  ;;  %16724 = vst [vmem:[#allocation193_spill] sm:$0xff] %v13984_v32 }
 0xad4   : > { %v13959_v60 = vmax.f32 %v13955_v10, %v5226_v55  ;;  %5252 = vmax.xlane.f32.xlu0 %v5251_v35  ;;  %v7229_v55 = vld [vmem:[#allocation4 + $0x158] sm:$0xff] }
 0xad5   : > { %v7293_v3 = vmul.f32 %v13968_v41, %v7229_v55  ;;  %v4953_v41 = vpop.f32.mrf.mxu1 }
 0xad6   : > { %6690 = vst [vmem:[#allocation2 + $0xc8] sm:$0xff] %v13959_v60  ;;  %v5690_v7 = vpop.permute.xlu0 %5689 }
 0xad7   : > { %v5935_v21 = vsub.f32 %v13169_v11, %v5690_v7  ;;  %v5936_v62 = vsub.f32 %v13305_v56, %v5690_v7  ;;  %v7230_v7 = vld [vmem:[#allocation4 + $0x190] sm:$0xff] }
 0xad8   : > { %6942 = vmatmul.bf16.gmra.mxu2 %v6741_v54  ;;  %v13982_v54 = vld [vmem:[#allocation2 + $0xe8] sm:$0xff] }
 0xad9   : > { %v6111_v35 = vmul.f32 1.442695, %v5935_v21  ;;  %v6113_v37 = vmul.f32 1.442695, %v5936_v62  ;;  %7111 = vmatmul.bf16.gmra.mxu3 %v6742_v31  ;;  %16723 = vst [vmem:[#allocation180_spill] sm:$0xff] %v13982_v54  ;;  %v13986_v31 = vld [vmem:[#allocation2 + $0x128] sm:$0xff]  ;;  %v7294_v62 = vmul.f32 %v13984_v32, %v7230_v7 }
 0xada   : > { %v6918_v44 = vpop.f32.mrf.mxu2  ;;  %5739 = vperm.xlu1 %9705, %v13770_v17   ;;  %16725 = vst [vmem:[#allocation156_spill] sm:$0xff] %v13986_v31 }
 0xadb   : > { %9831 = vpow2.f32 %v6111_v35  ;;  %v7087_v11 = vpop.f32.mrf.mxu3  ;;  %v5232_v56 = vpop.xlane.xlu2 %5231 }
 0xadc   : > { %9833 = vpow2.f32 %v6113_v37  ;;  %v7088_v59 = vadd.f32 %v7087_v11, %v6918_v44  ;;  %v13977_v24 = vmax.f32 %v13972_v27, %v5232_v56 }
 0xadd   : > { %v14005_v4 = vpop.f32.mrf.mxu1 }
 0xade   : > { %v7357_v21 = vadd.f32 %v7293_v3, %v7088_v59  ;;  %6692 = vst [vmem:[#allocation2 + $0x1f8] sm:$0xff] %v13977_v24 }
 0xae0   : > { %7421 = vst [vmem:[#allocation4 + $0x158] sm:$0xff] %v7357_v21 }
 0xae1   : > { %v9832_v17 = vpop.eup %9831  ;;  %v5247_v35 = vpop.xlane.xlu1 %5246 }
 0xae2   : > { %v9834_v37 = vpop.eup %9833  ;;  %v6920_v55 = vpop.f32.mrf.mxu2  ;;  %v13989_v44 = vmax.f32 %v13982_v54, %v5247_v35  ;;  %v9150_v35 = vld [vmem:[%s10680_s20 + $0xe8] sm:$0xff] }
 0xae3   : > { %v7089_v11 = vpop.f32.mrf.mxu3  ;;  %v5238_v56 = vpop.xlane.xlu2 %5237  ;;  %v13991_v59 = vadd.f32 %v9834_v37, %v9832_v17  ;;  %4975 = vmatmul.bf16.gmra.mxu1 %v9150_v35  ;;  %4806 = vmatmul.bf16.gmra.mxu0 %v9150_v35 }
 0xae4   : > { %v7090_v3 = vadd.f32 %v7089_v11, %v6920_v55  ;;  %v13995_v21 = vmax.f32 %v13986_v31, %v5238_v56  ;;  %6697 = vst [vmem:[#allocation2 + $0xe8] sm:$0xff] %v13989_v44 }
 0xae5   : > { %16726 = vst [vmem:[#allocation194_spill] sm:$0xff] %v13991_v59 }
 0xae6   : > { %v7358_v8 = vadd.f32 %v7294_v62, %v7090_v3  ;;  %6694 = vst [vmem:[#allocation2 + $0x128] sm:$0xff] %v13995_v21  ;;  %v16728_v62 = vld [vmem:[#allocation184_spill] sm:$0xff]  ;;  %v14010_v3 = vpop.f32.mrf.mxu0 }
 0xae8   : > { %7422 = vst [vmem:[#allocation4 + $0x190] sm:$0xff] %v7358_v8  ;;  %5724 = vperm.xlu0 %9704, %v13918_v0   ;;  %v14008_v8 = vadd.f32 %v4953_v41, %v16728_v62 }
 0xaea   : > { %16729 = vst [vmem:[#allocation184_spill] sm:$0xff] %v14008_v8  ;;  %v5266_v35 = vmax.f32 %v14001_v14, %v14008_v8 }
 0xaeb   : > { %v5695_v55 = vpop.permute.xlu2 %5694 }
 0xaec   : > { %v5937_v7 = vsub.f32 %v13190_v33, %v5695_v55  ;;  %v5938_v11 = vsub.f32 %v13254_v12, %v5695_v55  ;;  %v4958_v12 = vpop.f32.mrf.mxu1  ;;  %v16731_v55 = vld [vmem:[#allocation198_spill] sm:$0xff] }
 0xaee   : > { %v6115_v56 = vmul.f32 1.442695, %v5937_v7  ;;  %v6117_v32 = vmul.f32 1.442695, %v5938_v11  ;;  %v14019_v41 = vpop.f32.mrf.mxu0  ;;  %v14021_v7 = vld [vmem:[#allocation2 + $0x1f0] sm:$0xff] }
 0xaef   : > { %16733 = vst [vmem:[#allocation254_spill] sm:$0xff] %v14019_v41 }
 0xaf0   : > { %9835 = vpow2.f32 %v6115_v56  ;;  %16734 = vst [vmem:[#allocation255_spill] sm:$0xff] %v14021_v7 }
 0xaf1   : > { %9837 = vpow2.f32 %v6117_v32  ;;  %v14017_v32 = vadd.f32 %v4958_v12, %v16731_v55  ;;  %v5940_v55 = vsub.f32 %v13457_v28, %v13970_v40 }
 0xaf3   : > { %16732 = vst [vmem:[#allocation198_spill] sm:$0xff] %v14017_v32  ;;  %v5272_v11 = vmax.f32 %v14019_v41, %v14017_v32  ;;  %v16753_v41 = vld [vmem:[#allocation208_spill] sm:$0xff] }
 0xaf6   : > { %v9836_v9 = vpop.eup %9835 }
 0xaf7   : > { %v9838_v59 = vpop.eup %9837  ;;  %v6743_v5 = vpack.c.bf16 %v9836_v9, %v9832_v17 }
 0xaf8   : > { %v6744_v33 = vpack.c.bf16 %v9838_v59, %v9834_v37  ;;  %v14014_v54 = vadd.f32 %v9838_v59, %v9836_v9  ;;  %v16735_v9 = vld [vmem:[#allocation197_spill] sm:$0xff]  ;;  %v16736_v59 = vld [vmem:[#allocation162_spill] sm:$0xff] }
 0xaf9   : > { %6947 = vmatmul.bf16.gmra.mxu2 %v6743_v5  ;;  %v10226_v5 = vld [vmem:[#allocation2 + $0x108] sm:$0xff]  ;;  %v14032_v62 = vadd.f32 %v13856_v19, %v16736_v59  ;;  %v10227_v19 = vld [vmem:[#allocation2 + $0x60] sm:$0xff] }
 0xafa   : > { %16730 = vst [vmem:[#allocation253_spill] sm:$0xff] %v14014_v54  ;;  %7116 = vmatmul.bf16.gmra.mxu3 %v6744_v33  ;;  %5267 = vmax.xlane.f32.xlu2 %v5266_v35  ;;  %v5389_v37 = vsub.f32 %v16735_v9, %v10226_v5  ;;  %v14035_v35 = vadd.f32 -1e+30, %v13849_v13  ;;  %v5939_v33 = vsub.f32 %v13219_v30, %v13970_v40  ;;  %v6121_v13 = vmul.f32 1.442695, %v5940_v55  ;;  %v14047_v54 = vpop.f32.mrf.mxu1 }
 0xafb   : > { %v5390_v5 = vsub.f32 %v13289_v26, %v10227_v19  ;;  %v7231_v26 = vld [vmem:[#allocation4 + $0x88] sm:$0xff] }
 0xafc   : > { %v5467_v12 = vmul.f32 1.442695, %v5389_v37 }
 0xafd   : > { %v5469_v40 = vmul.f32 1.442695, %v5390_v5 }
 0xafe   : > { %9839 = vpow2.f32 %v5467_v12 }
 0xb01   : > { %v5244_v56 = vpop.xlane.xlu0 %5243 }
 0xb02   : > { %v14026_v17 = vmax.f32 %v14021_v7, %v5244_v56  ;;  %v6119_v56 = vmul.f32 1.442695, %v5939_v33 }
 0xb04   : > { %6696 = vst [vmem:[#allocation2 + $0x1f0] sm:$0xff] %v14026_v17  ;;  %5273 = vmax.xlane.f32.xlu1 %v5272_v11  ;;  %v5257_v11 = vmax.f32 %v14032_v62, %v14035_v35  ;;  %9841 = vpow2.f32 %v6119_v56 }
 0xb05   : > { %9843 = vpow2.f32 %v6121_v13 }
 0xb12   : > { %5749 = vperm.xlu2 %9706, %v13706_v15   ;;  %5258 = vmax.xlane.f32.xlu0 %v5257_v11  ;;  %v14049_v15 = vpop.eup %9839 }
 0xb13   : > { %16737 = vst [vmem:[#allocation197_spill] sm:$0xff] %v14049_v15  ;;  %v14052_v55 = vpop.eup %9841  ;;  %v7295_v56 = vmul.f32 %v14049_v15, %v7231_v26 }
 0xb14   : > { %v5705_v9 = vpop.permute.xlu0 %5704  ;;  %16738 = vst [vmem:[#allocation162_spill] sm:$0xff] %v14052_v55  ;;  %v14060_v13 = vpop.eup %9843 }
 0xb15   : > { %v5941_v59 = vsub.f32 %v13242_v51, %v5705_v9  ;;  %v5942_v30 = vsub.f32 %v13272_v43, %v5705_v9  ;;  %v14054_v43 = vpop.permute.xlu1 %5719  ;;  %16739 = vst [vmem:[#allocation256_spill] sm:$0xff] %v14060_v13  ;;  %v14062_v9 = vpop.f32.mrf.mxu0 }
 0xb16   : > { %16740 = vst [vmem:[#allocation257_spill] sm:$0xff] %v14062_v9 }
 0xb17   : > { %v6123_v37 = vmul.f32 1.442695, %v5941_v59  ;;  %v6125_v28 = vmul.f32 1.442695, %v5942_v30  ;;  %v16741_v30 = vld [vmem:[#allocation212_spill] sm:$0xff] }
 0xb19   : > { %9845 = vpow2.f32 %v6123_v37  ;;  %v16742_v37 = vsub.f32 %v16741_v30, %v13314_v46  ;;  %v7232_v46 = vld [vmem:[#allocation4 + $0x60] sm:$0xff] }
 0xb1a   : > { %9847 = vpow2.f32 %v6125_v28  ;;  %5754 = vperm.xlu2 %9706, %v13977_v24  }
 0xb1b   : > { %v6923_v33 = vpop.f32.mrf.mxu2  ;;  %9849 = vpow2.f32 %v5469_v40  ;;  %v5471_v28 = vmul.f32 1.442695, %v16742_v37 }
 0xb1c   : > { %v7092_v12 = vpop.f32.mrf.mxu3  ;;  %v5710_v51 = vpop.permute.xlu0 %5709 }
 0xb1d   : > { %v7093_v11 = vadd.f32 %v7092_v12, %v6923_v33  ;;  %v5943_v19 = vsub.f32 %v13269_v25, %v5710_v51  ;;  %v5944_v5 = vsub.f32 %v13565_v63, %v5710_v51  ;;  %5759 = vperm.xlu1 %9705, %v13921_v57   ;;  %v14074_v51 = vld [vmem:[#allocation2 + $0x78] sm:$0xff] }
 0xb1e   : > { %16745 = vst [vmem:[#allocation259_spill] sm:$0xff] %v14074_v51 }
 0xb1f   : > { %v9846_v59 = vpop.eup %9845  ;;  %v7359_v40 = vadd.f32 %v7295_v56, %v7093_v11  ;;  %v6127_v7 = vmul.f32 1.442695, %v5943_v19  ;;  %v6129_v33 = vmul.f32 1.442695, %v5944_v5  ;;  %v14076_v56 = vpop.f32.mrf.mxu1  ;;  %v14078_v19 = vld [vmem:[#allocation2 + $0x90] sm:$0xff]  ;;  %v16747_v5 = vld [vmem:[#allocation213_spill] sm:$0xff] }
 0xb20   : > { %v9848_v12 = vpop.eup %9847  ;;  %v6745_v26 = vpack.c.bf16 %v9846_v59, %v14052_v55  ;;  %16746 = vst [vmem:[#allocation260_spill] sm:$0xff] %v14078_v19  ;;  %v10230_v55 = vld [vmem:[#allocation2 + $0x138] sm:$0xff] }
 0xb21   : > { %7423 = vst [vmem:[#allocation4 + $0x88] sm:$0xff] %v7359_v40  ;;  %9851 = vpow2.f32 %v6127_v7  ;;  %v6746_v25 = vpack.c.bf16 %v9848_v12, %v14060_v13  ;;  %v14069_v63 = vadd.f32 %v9848_v12, %v9846_v59  ;;  %v14071_v57 = vpop.eup %9849  ;;  %v10228_v7 = vld [vmem:[#allocation2 + $0x188] sm:$0xff]  ;;  %v14099_v13 = vld [vmem:[#allocation2 + $0xd0] sm:$0xff] }
 0xb22   : > { %16744 = vst [vmem:[#allocation258_spill] sm:$0xff] %v14071_v57  ;;  %9853 = vpow2.f32 %v6129_v33  ;;  %5769 = vperm.xlu2 %9706, %v13836_v47   ;;  %6952 = vmatmul.bf16.gmra.mxu2 %v6745_v26  ;;  %v5392_v59 = vsub.f32 %v16747_v5, %v10228_v7  ;;  %v7296_v33 = vmul.f32 %v14071_v57, %v7232_v46  ;;  %v14085_v26 = vld [vmem:[#allocation2 + $0x148] sm:$0xff]  ;;  %v14092_v5 = vpop.f32.mrf.mxu0 }
 0xb23   : > { %16743 = vst [vmem:[#allocation212_spill] sm:$0xff] %v14069_v63  ;;  %9855 = vpow2.f32 %v5471_v28  ;;  %7121 = vmatmul.bf16.gmra.mxu3 %v6746_v25  ;;  %v6925_v11 = vpop.f32.mrf.mxu2 }
 0xb24   : > { %v7094_v30 = vpop.f32.mrf.mxu3  ;;  %v5250_v37 = vpop.xlane.xlu2 %5249  ;;  %16750 = vst [vmem:[#allocation262_spill] sm:$0xff] %v14099_v13 }
 0xb25   : > { %v7095_v40 = vadd.f32 %v7094_v30, %v6925_v11  ;;  %v14083_v47 = vmax.f32 %v14074_v51, %v5250_v37  ;;  %v5256_v12 = vpop.xlane.xlu1 %5255  ;;  %v5473_v11 = vmul.f32 1.442695, %v5392_v59  ;;  %v7233_v30 = vld [vmem:[#allocation4 + $0x68] sm:$0xff] }
 0xb26   : > { %5729 = vperm.xlu0 %9704, %v14085_v26   ;;  %v14089_v28 = vmax.f32 %v14078_v19, %v5256_v12  ;;  %v9151_v12 = vld [vmem:[%s10680_s20 + $0xf0] sm:$0xff] }
 0xb27   : > { %v9852_v25 = vpop.eup %9851  ;;  %v7360_v15 = vadd.f32 %v7296_v33, %v7095_v40  ;;  %6698 = vst [vmem:[#allocation2 + $0x78] sm:$0xff] %v14083_v47  ;;  %v16751_v40 = vld [vmem:[#allocation211_spill] sm:$0xff]  ;;  %9857 = vpow2.f32 %v5473_v11  ;;  %4980 = vmatmul.bf16.gmra.mxu1 %v9151_v12  ;;  %4811 = vmatmul.bf16.gmra.mxu0 %v9151_v12 }
 0xb28   : > { %v9854_v7 = vpop.eup %9853  ;;  %6700 = vst [vmem:[#allocation2 + $0x90] sm:$0xff] %v14089_v28  ;;  %v5393_v33 = vsub.f32 %v16751_v40, %v10230_v55 }
 0xb29   : > { %v14095_v46 = vpop.eup %9855  ;;  %7424 = vst [vmem:[#allocation4 + $0x60] sm:$0xff] %v7360_v15  ;;  %v14097_v37 = vadd.f32 %v9854_v7, %v9852_v25 }
 0xb2a   : > { %16748 = vst [vmem:[#allocation213_spill] sm:$0xff] %v14095_v46  ;;  %v7297_v59 = vmul.f32 %v14095_v46, %v7233_v30  ;;  %v5475_v14 = vmul.f32 1.442695, %v5393_v33  ;;  %v16764_v46 = vld [vmem:[#allocation214_spill] sm:$0xff] }
 0xb2b   : > { %16749 = vst [vmem:[#allocation261_spill] sm:$0xff] %v14097_v37  ;;  %v6928_v57 = vpop.f32.mrf.mxu2  ;;  %v4966_v37 = vpop.f32.mrf.mxu1 }
 0xb2c   : > { %v7097_v63 = vpop.f32.mrf.mxu3  ;;  %v5715_v19 = vpop.permute.xlu2 %5714 }
 0xb2d   : > { %v7098_v51 = vadd.f32 %v7097_v63, %v6928_v57  ;;  %v5945_v32 = vsub.f32 %v16752_v22, %v5715_v19  ;;  %v5946_v15 = vsub.f32 %v16753_v41, %v5715_v19  ;;  %v5262_v31 = vpop.xlane.xlu1 %5261  ;;  %v14111_v22 = vpop.eup %9857  ;;  %v7234_v41 = vld [vmem:[#allocation4 + $0xd8] sm:$0xff] }
 0xb2e   : > { %5744 = vperm.xlu0 %9704, %v13959_v60   ;;  %v14108_v8 = vmax.f32 %v14099_v13, %v5262_v31  ;;  %16754 = vst [vmem:[#allocation211_spill] sm:$0xff] %v14111_v22  ;;  %v14113_v63 = vpop.f32.mrf.mxu0  ;;  %v14115_v60 = vld [vmem:[#allocation2 + $0xb8] sm:$0xff] }
 0xb2f   : > { %v7361_v55 = vadd.f32 %v7297_v59, %v7098_v51  ;;  %v6131_v11 = vmul.f32 1.442695, %v5945_v32  ;;  %v6133_v40 = vmul.f32 1.442695, %v5946_v15  ;;  %16755 = vst [vmem:[#allocation209_spill] sm:$0xff] %v14115_v60  ;;  %v7298_v32 = vmul.f32 %v14111_v22, %v7234_v41 }
 0xb30   : > { %6702 = vst [vmem:[#allocation2 + $0xd0] sm:$0xff] %v14108_v8  ;;  %v16756_v15 = vsub.f32 %v13387_v42, %v13391_v39 }
 0xb31   : > { %7425 = vst [vmem:[#allocation4 + $0x68] sm:$0xff] %v7361_v55  ;;  %9859 = vpow2.f32 %v6131_v11 }
 0xb32   : > { %9861 = vpow2.f32 %v6133_v40  ;;  %v5477_v55 = vmul.f32 1.442695, %v16756_v15 }
 0xb33   : > { %v6930_v57 = vpop.f32.mrf.mxu2  ;;  %9863 = vpow2.f32 %v5475_v14  ;;  %v4968_v40 = vpop.f32.mrf.mxu1 }
 0xb34   : > { %v7099_v31 = vpop.f32.mrf.mxu3  ;;  %9865 = vpow2.f32 %v5477_v55 }
 0xb35   : > { %v7100_v19 = vadd.f32 %v7099_v31, %v6930_v57  ;;  %v5265_v51 = vpop.xlane.xlu1 %5264  ;;  %v7235_v31 = vld [vmem:[#allocation4 + $0xf0] sm:$0xff] }
 0xb36   : > { %v14119_v30 = vmax.f32 %v14115_v60, %v5265_v51 }
 0xb37   : > { %v9860_v12 = vpop.eup %9859  ;;  %v7362_v33 = vadd.f32 %v7298_v32, %v7100_v19  ;;  %v14129_v32 = vpop.f32.mrf.mxu0 }
 0xb38   : > { %v9862_v59 = vpop.eup %9861  ;;  %v6747_v11 = vpack.c.bf16 %v9860_v12, %v9852_v25  ;;  %6703 = vst [vmem:[#allocation2 + $0xb8] sm:$0xff] %v14119_v30  ;;  %v16759_v25 = vld [vmem:[#allocation195_spill] sm:$0xff] }
 0xb39   : > { %7426 = vst [vmem:[#allocation4 + $0xd8] sm:$0xff] %v7362_v33  ;;  %v6748_v14 = vpack.c.bf16 %v9862_v59, %v9854_v7  ;;  %v14125_v57 = vadd.f32 %v9862_v59, %v9860_v12  ;;  %v14127_v41 = vpop.eup %9863  ;;  %v14134_v15 = vadd.f32 %v14076_v56, %v16759_v25  ;;  %v16760_v12 = vld [vmem:[#allocation227_spill] sm:$0xff]  ;;  %v16761_v33 = vld [vmem:[#allocation228_spill] sm:$0xff] }
 0xb3a   : > { %16758 = vst [vmem:[#allocation263_spill] sm:$0xff] %v14127_v41  ;;  %6957 = vmatmul.bf16.gmra.mxu2 %v6747_v11  ;;  %v7299_v39 = vmul.f32 %v14127_v41, %v7235_v31  ;;  %v16762_v59 = vsub.f32 %v16760_v12, %v16761_v33  ;;  %v14139_v11 = vpop.eup %9865  ;;  %v10231_v56 = vld [vmem:[#allocation2 + $0x1a8] sm:$0xff]  ;;  %v14150_v12 = vld [vmem:[#allocation2 + $0x70] sm:$0xff] }
 0xb3b   : > { %16757 = vst [vmem:[#allocation208_spill] sm:$0xff] %v14125_v57  ;;  %7126 = vmatmul.bf16.gmra.mxu3 %v6748_v14  ;;  %v6933_v51 = vpop.f32.mrf.mxu2  ;;  %v7236_v14 = vld [vmem:[#allocation4 + $0x80] sm:$0xff]  ;;  %v14141_v55 = vpop.f32.mrf.mxu1  ;;  %v14144_v57 = vadd.f32 %v4968_v40, %v16764_v46  ;;  %v5278_v31 = vmax.f32 %v14092_v5, %v14134_v15 }
 0xb3c   : > { %v7102_v19 = vpop.f32.mrf.mxu3  ;;  %v5479_v22 = vmul.f32 1.442695, %v16762_v59  ;;  %16763 = vst [vmem:[#allocation195_spill] sm:$0xff] %v14139_v11  ;;  %v16768_v59 = vld [vmem:[#allocation200_spill] sm:$0xff] }
 0xb3d   : > { %v7103_v42 = vadd.f32 %v7102_v19, %v6933_v51  ;;  %16765 = vst [vmem:[#allocation227_spill] sm:$0xff] %v14144_v57  ;;  %v16766_v19 = vld [vmem:[#allocation223_spill] sm:$0xff]  ;;  %v14155_v41 = vadd.f32 %v4966_v37, %v16768_v59  ;;  %v5284_v60 = vmax.f32 %v14129_v32, %v14144_v57  ;;  %v7237_v37 = vld [vmem:[#allocation4 + $0x78] sm:$0xff] }
 0xb3e   : > { %9867 = vpow2.f32 %v5479_v22  ;;  %16767 = vst [vmem:[#allocation228_spill] sm:$0xff] %v14150_v12 }
 0xb3f   : > { %v7363_v7 = vadd.f32 %v7299_v39, %v7103_v42  ;;  %v5396_v42 = vsub.f32 %v16766_v19, %v10231_v56  ;;  %v14152_v33 = vpop.f32.mrf.mxu0  ;;  %v10232_v56 = vld [vmem:[#allocation2 + $0x1b8] sm:$0xff] }
 0xb40   : > { %v16771_v19 = vld [vmem:[#allocation225_spill] sm:$0xff] }
 0xb41   : > { %7427 = vst [vmem:[#allocation4 + $0xf0] sm:$0xff] %v7363_v7  ;;  %v7300_v7 = vmul.f32 %v14139_v11, %v7236_v14  ;;  %v5481_v13 = vmul.f32 1.442695, %v5396_v42  ;;  %v5281_v42 = vmax.f32 %v14113_v63, %v14155_v41  ;;  %v16772_v14 = vld [vmem:[#allocation203_spill] sm:$0xff] }
 0xb43   : > { %v6935_v51 = vpop.f32.mrf.mxu2  ;;  %9869 = vpow2.f32 %v5481_v13  ;;  %v7238_v13 = vld [vmem:[#allocation4 + $0x180] sm:$0xff] }
 0xb44   : > { %v7104_v39 = vpop.f32.mrf.mxu3 }
 0xb45   : > { %v7105_v25 = vadd.f32 %v7104_v39, %v6935_v51  ;;  %v14162_v51 = vpop.eup %9867 }
 0xb46   : > { %16770 = vst [vmem:[#allocation223_spill] sm:$0xff] %v14162_v51 }
 0xb47   : > { %v7364_v46 = vadd.f32 %v7300_v7, %v7105_v25  ;;  %5279 = vmax.xlane.f32.xlu1 %v5278_v31  ;;  %v5253_v40 = vpop.xlane.xlu0 %5252  ;;  %v5397_v31 = vsub.f32 %v16771_v19, %v10232_v56  ;;  %v4973_v7 = vpop.f32.mrf.mxu1  ;;  %v16776_v56 = vld [vmem:[#allocation177_spill] sm:$0xff] }
 0xb48   : > { %v14160_v22 = vmax.f32 %v14150_v12, %v5253_v40  ;;  %v14172_v12 = vadd.f32 %v4973_v7, %v16772_v14  ;;  %v14174_v57 = vpop.f32.mrf.mxu0  ;;  %v14180_v19 = vadd.f32 %v14005_v4, %v16776_v56 }
 0xb49   : > { %7428 = vst [vmem:[#allocation4 + $0x80] sm:$0xff] %v7364_v46  ;;  %v7301_v46 = vmul.f32 %v14162_v51, %v7237_v37  ;;  %v5483_v40 = vmul.f32 1.442695, %v5397_v31 }
 0xb4a   : > { %16769 = vst [vmem:[#allocation214_spill] sm:$0xff] %v14160_v22  ;;  %v5290_v37 = vmax.f32 %v14174_v57, %v14172_v12  ;;  %v5269_v4 = vmax.f32 %v14010_v3, %v14180_v19 }
 0xb4b   : > { %6699 = vst [vmem:[#allocation2 + $0x70] sm:$0xff] %v14160_v22  ;;  %5285 = vmax.xlane.f32.xlu2 %v5284_v60  ;;  %v6938_v39 = vpop.f32.mrf.mxu2  ;;  %v14176_v60 = vpop.eup %9869  ;;  %9871 = vpow2.f32 %v5483_v40  ;;  %v16779_v40 = vld [vmem:[#allocation241_spill] sm:$0xff] }
 0xb4c   : > { %v7107_v25 = vpop.f32.mrf.mxu3  ;;  %16773 = vst [vmem:[#allocation200_spill] sm:$0xff] %v14172_v12  ;;  %v7302_v7 = vmul.f32 %v14176_v60, %v7238_v13  ;;  %v16780_v56 = vsub.f32 %v16779_v40, %v13509_v38  ;;  %v16781_v12 = vld [vmem:[#allocation202_spill] sm:$0xff] }
 0xb4d   : > { %v7108_v59 = vadd.f32 %v7107_v25, %v6938_v39  ;;  %16774 = vst [vmem:[#allocation225_spill] sm:$0xff] %v14174_v57  ;;  %v14196_v57 = vadd.f32 %v14047_v54, %v16781_v12 }
 0xb4e   : > { %16775 = vst [vmem:[#allocation203_spill] sm:$0xff] %v14176_v60  ;;  %v5485_v51 = vmul.f32 1.442695, %v16780_v56 }
 0xb4f   : > { %v7365_v11 = vadd.f32 %v7301_v46, %v7108_v59  ;;  %5282 = vmax.xlane.f32.xlu1 %v5281_v42  ;;  %v16777_v42 = vld [vmem:[#allocation215_spill] sm:$0xff]  ;;  %16782 = vst [vmem:[#allocation177_spill] sm:$0xff] %v14196_v57  ;;  %v5275_v54 = vmax.f32 %v14062_v9, %v14196_v57  ;;  %v16813_v57 = vld [vmem:[#allocation222_spill] sm:$0xff] }
 0xb50   : > { %v5947_v14 = vsub.f32 %v16777_v42, %v14054_v43  ;;  %9873 = vpow2.f32 %v5485_v51 }
 0xb51   : > { %7429 = vst [vmem:[#allocation4 + $0x78] sm:$0xff] %v7365_v11  ;;  %v16778_v11 = vld [vmem:[#allocation226_spill] sm:$0xff] }
 0xb52   : > { %v5948_v59 = vsub.f32 %v16778_v11, %v14054_v43  ;;  %v6135_v13 = vmul.f32 1.442695, %v5947_v14 }
 0xb53   : > { %v6940_v39 = vpop.f32.mrf.mxu2 }
 0xb54   : > { %v7109_v31 = vpop.f32.mrf.mxu3  ;;  %v6137_v43 = vmul.f32 1.442695, %v5948_v59  ;;  %9875 = vpow2.f32 %v6135_v13 }
 0xb55   : > { %v7110_v25 = vadd.f32 %v7109_v31, %v6940_v39  ;;  %v14198_v39 = vpop.eup %9871  ;;  %v7239_v31 = vld [vmem:[#allocation4 + $0x18] sm:$0xff] }
 0xb56   : > { %16783 = vst [vmem:[#allocation215_spill] sm:$0xff] %v14198_v39  ;;  %9877 = vpow2.f32 %v6137_v43 }
 0xb57   : > { %v7366_v46 = vadd.f32 %v7302_v7, %v7110_v25  ;;  %5291 = vmax.xlane.f32.xlu1 %v5290_v37  ;;  %v7303_v7 = vmul.f32 %v14198_v39, %v7239_v31  ;;  %v14212_v31 = vpop.permute.xlu2 %5734 }
 0xb58   : > { %5270 = vmax.xlane.f32.xlu0 %v5269_v4 }
 0xb59   : > { %7430 = vst [vmem:[#allocation4 + $0x180] sm:$0xff] %v7366_v46 }
 0xb5a   : > { %v5725_v42 = vpop.permute.xlu0 %5724 }
 0xb5b   : > { %v5949_v11 = vsub.f32 %v13361_v50, %v5725_v42  ;;  %v5950_v37 = vsub.f32 %v13654_v1, %v5725_v42  ;;  %v6943_v25 = vpop.f32.mrf.mxu2  ;;  %v14205_v50 = vpop.eup %9873  ;;  %v7240_v1 = vld [vmem:[#allocation4 + $0x148] sm:$0xff] }
 0xb5c   : > { %v7112_v38 = vpop.f32.mrf.mxu3  ;;  %16784 = vst [vmem:[#allocation226_spill] sm:$0xff] %v14205_v50  ;;  %v14207_v51 = vpop.eup %9875  ;;  %v7304_v42 = vmul.f32 %v14205_v50, %v7240_v1 }
 0xb5d   : > { %v6139_v12 = vmul.f32 1.442695, %v5949_v11  ;;  %v6141_v4 = vmul.f32 1.442695, %v5950_v37  ;;  %v7113_v14 = vadd.f32 %v7112_v38, %v6943_v25  ;;  %16785 = vst [vmem:[#allocation241_spill] sm:$0xff] %v14207_v51  ;;  %v14210_v40 = vpop.eup %9877  ;;  %v14226_v1 = vpop.permute.xlu1 %5739 }
 0xb5e   : > { %16786 = vst [vmem:[#allocation202_spill] sm:$0xff] %v14210_v40 }
 0xb5f   : > { %9879 = vpow2.f32 %v6139_v12  ;;  %v7367_v59 = vadd.f32 %v7303_v7, %v7113_v14  ;;  %v16789_v12 = vld [vmem:[#allocation240_spill] sm:$0xff] }
 0xb60   : > { %9881 = vpow2.f32 %v6141_v4  ;;  %5276 = vmax.xlane.f32.xlu0 %v5275_v54  ;;  %v10233_v54 = vld [vmem:[#allocation2 + $0x1e8] sm:$0xff] }
 0xb61   : > { %7431 = vst [vmem:[#allocation4 + $0x18] sm:$0xff] %v7367_v59  ;;  %v5399_v4 = vsub.f32 %v16789_v12, %v10233_v54 }
 0xb63   : > { %v6945_v46 = vpop.f32.mrf.mxu2  ;;  %5774 = vperm.xlu2 %9706, %v14026_v17   ;;  %v14220_v17 = vld [vmem:[#allocation2 + $0x88] sm:$0xff] }
 0xb64   : > { %v7114_v56 = vpop.f32.mrf.mxu3  ;;  %16788 = vst [vmem:[#allocation265_spill] sm:$0xff] %v14220_v17 }
 0xb65   : > { %v9880_v13 = vpop.eup %9879  ;;  %v7115_v43 = vadd.f32 %v7114_v56, %v6945_v46  ;;  %v5487_v46 = vmul.f32 1.442695, %v5399_v4  ;;  %v10234_v56 = vld [vmem:[#allocation2 + $0xf8] sm:$0xff] }
 0xb66   : > { %v9882_v11 = vpop.eup %9881  ;;  %v6749_v37 = vpack.c.bf16 %v9880_v13, %v14207_v51 }
 0xb67   : > { %v7368_v25 = vadd.f32 %v7304_v42, %v7115_v43  ;;  %v6750_v38 = vpack.c.bf16 %v9882_v11, %v14210_v40  ;;  %v14217_v7 = vadd.f32 %v9882_v11, %v9880_v13  ;;  %9883 = vpow2.f32 %v5487_v46  ;;  %v14232_v42 = vld [vmem:[#allocation2 + $0x1c8] sm:$0xff]  ;;  %v16792_v11 = vld [vmem:[#allocation238_spill] sm:$0xff] }
 0xb68   : > { %6962 = vmatmul.bf16.gmra.mxu2 %v6749_v37  ;;  %16791 = vst [vmem:[#allocation240_spill] sm:$0xff] %v14232_v42  ;;  %v7241_v46 = vld [vmem:[#allocation4 + $0x1c8] sm:$0xff] }
 0xb69   : > { %16787 = vst [vmem:[#allocation264_spill] sm:$0xff] %v14217_v7  ;;  %7131 = vmatmul.bf16.gmra.mxu3 %v6750_v38 }
 0xb6a   : > { %7432 = vst [vmem:[#allocation4 + $0x148] sm:$0xff] %v7368_v25  ;;  %v16793_v25 = vld [vmem:[#allocation239_spill] sm:$0xff] }
 0xb6b   : > { %5779 = vperm.xlu2 %9706, %v13989_v44   ;;  %v16790_v44 = vld [vmem:[#allocation229_spill] sm:$0xff] }
 0xb6c   : > { %v5400_v13 = vsub.f32 %v16790_v44, %v10234_v56 }
 0xb6d   : > { %v5268_v14 = vpop.xlane.xlu2 %5267 }
 0xb6e   : > { %v14224_v59 = vmax.f32 %v14220_v17, %v5268_v14  ;;  %v5489_v4 = vmul.f32 1.442695, %v5400_v13 }
 0xb70   : > { %6704 = vst [vmem:[#allocation2 + $0x88] sm:$0xff] %v14224_v59  ;;  %5789 = vperm.xlu1 %9705, %v14160_v22  }
 0xb74   : > { %5764 = vperm.xlu0 %9704, %v13995_v21   ;;  %v14240_v21 = vpop.eup %9883 }
 0xb75   : > { %v5750_v43 = vpop.permute.xlu2 %5749  ;;  %16794 = vst [vmem:[#allocation229_spill] sm:$0xff] %v14240_v21 }
 0xb76   : > { %v5959_v37 = vsub.f32 %v16792_v11, %v5750_v43  ;;  %v5960_v38 = vsub.f32 %v16793_v25, %v5750_v43  ;;  %v7305_v43 = vmul.f32 %v14240_v21, %v7241_v46  ;;  %v16795_v25 = vld [vmem:[#allocation145_spill] sm:$0xff]  ;;  %v7242_v46 = vld [vmem:[#allocation4 + $0x188] sm:$0xff] }
 0xb77   : > { %v5274_v54 = vpop.xlane.xlu1 %5273 }
 0xb78   : > { %v6159_v12 = vmul.f32 1.442695, %v5959_v37  ;;  %v6161_v14 = vmul.f32 1.442695, %v5960_v38  ;;  %v14237_v50 = vmax.f32 %v14232_v42, %v5274_v54 }
 0xb7a   : > { %9885 = vpow2.f32 %v6159_v12  ;;  %6706 = vst [vmem:[#allocation2 + $0x1c8] sm:$0xff] %v14237_v50 }
 0xb7b   : > { %9887 = vpow2.f32 %v6161_v14 }
 0xb7c   : > { %v6948_v56 = vpop.f32.mrf.mxu2  ;;  %9889 = vpow2.f32 %v5489_v4 }
 0xb7d   : > { %v7117_v44 = vpop.f32.mrf.mxu3  ;;  %v5755_v11 = vpop.permute.xlu2 %5754 }
 0xb7e   : > { %v7118_v39 = vadd.f32 %v7117_v44, %v6948_v56  ;;  %v5961_v37 = vsub.f32 %v13733_v34, %v5755_v11  ;;  %v5962_v38 = vsub.f32 %v16795_v25, %v5755_v11  ;;  %v14255_v56 = vld [vmem:[#allocation2 + $0x1d8] sm:$0xff] }
 0xb7f   : > { %16798 = vst [vmem:[#allocation145_spill] sm:$0xff] %v14255_v56 }
 0xb80   : > { %v14245_v54 = vpop.eup %9885  ;;  %v7369_v13 = vadd.f32 %v7305_v43, %v7118_v39  ;;  %v6163_v12 = vmul.f32 1.442695, %v5961_v37  ;;  %v6165_v60 = vmul.f32 1.442695, %v5962_v38 }
 0xb81   : > { %v14247_v7 = vpop.eup %9887 }
 0xb82   : > { %7433 = vst [vmem:[#allocation4 + $0x1c8] sm:$0xff] %v7369_v13  ;;  %9891 = vpow2.f32 %v6163_v12  ;;  %v14251_v14 = vadd.f32 %v14247_v7, %v14245_v54  ;;  %v14253_v4 = vpop.eup %9889  ;;  %v4976_v12 = vpop.f32.mrf.mxu1 }
 0xb83   : > { %16797 = vst [vmem:[#allocation239_spill] sm:$0xff] %v14253_v4  ;;  %9893 = vpow2.f32 %v6165_v60  ;;  %v7306_v11 = vmul.f32 %v14253_v4, %v7242_v46  ;;  %v14272_v46 = vpop.f32.mrf.mxu0  ;;  %v16803_v60 = vld [vmem:[#allocation146_spill] sm:$0xff] }
 0xb84   : > { %16796 = vst [vmem:[#allocation238_spill] sm:$0xff] %v14251_v14  ;;  %v6950_v34 = vpop.f32.mrf.mxu2  ;;  %v5953_v21 = vsub.f32 %v16803_v60, %v14212_v31 }
 0xb85   : > { %v7119_v44 = vpop.f32.mrf.mxu3  ;;  %v5259_v43 = vpop.xlane.xlu0 %5258  ;;  %16800 = vst [vmem:[#allocation267_spill] sm:$0xff] %v14272_v46 }
 0xb86   : > { %v7120_v39 = vadd.f32 %v7119_v44, %v6950_v34  ;;  %v14259_v37 = vmax.f32 %v14255_v56, %v5259_v43  ;;  %v16801_v44 = vld [vmem:[#allocation231_spill] sm:$0xff]  ;;  %v16811_v56 = vld [vmem:[#allocation210_spill] sm:$0xff] }
 0xb87   : > { %v14275_v43 = vadd.f32 %v4976_v12, %v16801_v44  ;;  %v16808_v12 = vld [vmem:[#allocation246_spill] sm:$0xff]  ;;  %v16809_v44 = vld [vmem:[#allocation247_spill] sm:$0xff]  ;;  %v14294_v22 = vadd.f32 %v14141_v55, %v16811_v56  ;;  %v10235_v55 = vld [vmem:[#allocation2 + $0x30] sm:$0xff] }
 0xb88   : > { %v14261_v25 = vpop.eup %9891  ;;  %v7370_v38 = vadd.f32 %v7306_v11, %v7120_v39  ;;  %6701 = vst [vmem:[#allocation2 + $0x1d8] sm:$0xff] %v14259_v37  ;;  %v9152_v11 = vld [vmem:[%s10680_s20 + $0xf8] sm:$0xff]  ;;  %v16810_v40 = vsub.f32 %v16808_v12, %v16809_v44  ;;  %v16814_v56 = vld [vmem:[#allocation230_spill] sm:$0xff]  ;;  %v16818_v44 = vld [vmem:[#allocation199_spill] sm:$0xff] }
 0xb89   : > { %v14263_v13 = vpop.eup %9893  ;;  %16802 = vst [vmem:[#allocation231_spill] sm:$0xff] %v14275_v43  ;;  %v5293_v39 = vmax.f32 %v14272_v46, %v14275_v43  ;;  %4985 = vmatmul.bf16.gmra.mxu1 %v9152_v11  ;;  %4816 = vmatmul.bf16.gmra.mxu0 %v9152_v11  ;;  %v6147_v11 = vmul.f32 1.442695, %v5953_v21  ;;  %v16812_v43 = vld [vmem:[#allocation221_spill] sm:$0xff] }
 0xb8a   : > { %7434 = vst [vmem:[#allocation4 + $0x188] sm:$0xff] %v7370_v38  ;;  %v14270_v34 = vadd.f32 %v14263_v13, %v14261_v25  ;;  %v4978_v4 = vpop.f32.mrf.mxu1  ;;  %v16804_v38 = vld [vmem:[#allocation205_spill] sm:$0xff]  ;;  %v5491_v51 = vmul.f32 1.442695, %v16810_v40 }
 0xb8b   : > { %v14283_v42 = vadd.f32 %v4978_v4, %v16804_v38  ;;  %v14285_v17 = vpop.f32.mrf.mxu0 }
 0xb8c   : > { %16799 = vst [vmem:[#allocation266_spill] sm:$0xff] %v14270_v34  ;;  %v16807_v34 = vld [vmem:[#allocation160_spill] sm:$0xff]  ;;  %9895 = vpow2.f32 %v5491_v51  ;;  %v16817_v51 = vld [vmem:[#allocation183_spill] sm:$0xff] }
 0xb8d   : > { %16805 = vst [vmem:[#allocation146_spill] sm:$0xff] %v14283_v42  ;;  %v5954_v14 = vsub.f32 %v16807_v34, %v14212_v31  ;;  %v5296_v60 = vmax.f32 %v14285_v17, %v14283_v42  ;;  %v5287_v31 = vmax.f32 %v14152_v33, %v14294_v22  ;;  %9897 = vpow2.f32 %v6147_v11 }
 0xb8e   : > { %16806 = vst [vmem:[#allocation205_spill] sm:$0xff] %v14285_v17 }
 0xb8f   : > { %v6149_v4 = vmul.f32 1.442695, %v5954_v14 }
 0xb91   : > { %9899 = vpow2.f32 %v6149_v4  ;;  %v7243_v4 = vld [vmem:[#allocation4 + $0x150] sm:$0xff] }
 0xb92   : > { %v14303_v21 = vpop.eup %9895 }
 0xb93   : > { %16815 = vst [vmem:[#allocation160_spill] sm:$0xff] %v14303_v21 }
 0xb94   : > { %5294 = vmax.xlane.f32.xlu2 %v5293_v39  ;;  %v5402_v39 = vsub.f32 %v16814_v56, %v10235_v55 }
 0xb96   : > { %v5493_v14 = vmul.f32 1.442695, %v5402_v39 }
 0xb98   : > { %v5730_v38 = vpop.permute.xlu0 %5729 }
 0xb99   : > { %v5951_v46 = vsub.f32 %v16812_v43, %v5730_v38  ;;  %v5952_v9 = vsub.f32 %v16813_v57, %v5730_v38  ;;  %v14305_v57 = vpop.eup %9897 }
 0xb9a   : > { %5297 = vmax.xlane.f32.xlu1 %v5296_v60  ;;  %16816 = vst [vmem:[#allocation246_spill] sm:$0xff] %v14305_v57  ;;  %v14309_v11 = vpop.eup %9899 }
 0xb9b   : > { %v6143_v40 = vmul.f32 1.442695, %v5951_v46  ;;  %v6145_v34 = vmul.f32 1.442695, %v5952_v9  ;;  %16819 = vst [vmem:[#allocation247_spill] sm:$0xff] %v14309_v11 }
 0xb9d   : > { %9901 = vpow2.f32 %v6143_v40  ;;  %v16820_v40 = vld [vmem:[#allocation151_spill] sm:$0xff] }
 0xb9e   : > { %9903 = vpow2.f32 %v6145_v34  ;;  %5288 = vmax.xlane.f32.xlu0 %v5287_v31  ;;  %v5955_v34 = vsub.f32 %v16820_v40, %v14226_v1 }
 0xb9f   : > { %9905 = vpow2.f32 %v5493_v14  ;;  %v7307_v14 = vmul.f32 %v14303_v21, %v7243_v4  ;;  %v7246_v21 = vld [vmem:[#allocation4 + $0x50] sm:$0xff] }
 0xba0   : > { %v5745_v43 = vpop.permute.xlu0 %5744 }
 0xba1   : > { %v5957_v12 = vsub.f32 %v16817_v51, %v5745_v43  ;;  %v5958_v60 = vsub.f32 %v16818_v44, %v5745_v43  ;;  %v16822_v43 = vld [vmem:[#allocation143_spill] sm:$0xff] }
 0xba2   : > { %v5956_v44 = vsub.f32 %v16822_v43, %v14226_v1 }
 0xba3   : > { %v9902_v9 = vpop.eup %9901  ;;  %v6155_v46 = vmul.f32 1.442695, %v5957_v12  ;;  %v6157_v38 = vmul.f32 1.442695, %v5958_v60 }
 0xba4   : > { %v9904_v55 = vpop.eup %9903  ;;  %v6751_v31 = vpack.c.bf16 %v14305_v57, %v9902_v9  ;;  %v6151_v57 = vmul.f32 1.442695, %v5955_v34 }
 0xba5   : > { %9907 = vpow2.f32 %v6155_v46  ;;  %v6953_v56 = vpop.f32.mrf.mxu2  ;;  %v6752_v39 = vpack.c.bf16 %v14309_v11, %v9904_v55  ;;  %v14315_v51 = vadd.f32 %v9904_v55, %v9902_v9  ;;  %v14320_v17 = vpop.eup %9905  ;;  %v6153_v46 = vmul.f32 1.442695, %v5956_v44  ;;  %v7244_v9 = vld [vmem:[#allocation4 + $0xa8] sm:$0xff] }
 0xba6   : > { %9909 = vpow2.f32 %v6157_v38  ;;  %v7122_v12 = vpop.f32.mrf.mxu3  ;;  %6967 = vmatmul.bf16.gmra.mxu2 %v6751_v31  ;;  %16823 = vst [vmem:[#allocation221_spill] sm:$0xff] %v14320_v17  ;;  %v7308_v4 = vmul.f32 %v14320_v17, %v7244_v9  ;;  %v14329_v44 = vpop.permute.xlu1 %5759  ;;  %v16836_v17 = vld [vmem:[#allocation187_spill] sm:$0xff] }
 0xba7   : > { %16821 = vst [vmem:[#allocation210_spill] sm:$0xff] %v14315_v51  ;;  %v7123_v60 = vadd.f32 %v7122_v12, %v6953_v56  ;;  %7136 = vmatmul.bf16.gmra.mxu3 %v6752_v39  ;;  %9911 = vpow2.f32 %v6151_v57  ;;  %v16825_v56 = vld [vmem:[#allocation250_spill] sm:$0xff] }
 0xba8   : > { %9913 = vpow2.f32 %v6153_v46  ;;  %v16826_v39 = vsub.f32 %v16825_v56, %v13777_v2  ;;  %v16829_v46 = vld [vmem:[#allocation234_spill] sm:$0xff]  ;;  %v14341_v2 = vld [vmem:[#allocation2 + $0x178] sm:$0xff] }
 0xba9   : > { %v7371_v42 = vadd.f32 %v7307_v14, %v7123_v60  ;;  %v10236_v14 = vld [vmem:[#allocation2] sm:$0xff]  ;;  %16830 = vst [vmem:[#allocation199_spill] sm:$0xff] %v14341_v2 }
 0xbaa   : > { %v5495_v43 = vmul.f32 1.442695, %v16826_v39  ;;  %v5404_v9 = vsub.f32 %v16829_v46, %v10236_v14  ;;  %v14356_v14 = vld [vmem:[#allocation2 + $0x68] sm:$0xff] }
 0xbab   : > { %v9908_v40 = vpop.eup %9907  ;;  %7435 = vst [vmem:[#allocation4 + $0x150] sm:$0xff] %v7371_v42 }
 0xbac   : > { %v9910_v11 = vpop.eup %9909  ;;  %5799 = vperm.xlu2 %9706, %v14259_v37   ;;  %9915 = vpow2.f32 %v5495_v43  ;;  %16833 = vst [vmem:[#allocation250_spill] sm:$0xff] %v14356_v14 }
 0xbad   : > { %v6955_v1 = vpop.f32.mrf.mxu2  ;;  %v14323_v38 = vadd.f32 %v9910_v11, %v9908_v40  ;;  %v14332_v42 = vpop.eup %9911 }
 0xbae   : > { %v7124_v55 = vpop.f32.mrf.mxu3  ;;  %16827 = vst [vmem:[#allocation230_spill] sm:$0xff] %v14332_v42  ;;  %v14334_v57 = vpop.eup %9913  ;;  %v6753_v12 = vpack.c.bf16 %v9908_v40, %v14332_v42 }
 0xbaf   : > { %16824 = vst [vmem:[#allocation222_spill] sm:$0xff] %v14323_v38  ;;  %v7125_v31 = vadd.f32 %v7124_v55, %v6955_v1  ;;  %v6754_v60 = vpack.c.bf16 %v9910_v11, %v14334_v57  ;;  %v14339_v1 = vpop.permute.xlu2 %5769  ;;  %v7245_v11 = vld [vmem:[#allocation4 + $0x108] sm:$0xff]  ;;  %v14376_v38 = vld [vmem:[#allocation2 + $0x38] sm:$0xff] }
 0xbb0   : > { %16828 = vst [vmem:[#allocation183_spill] sm:$0xff] %v14334_v57  ;;  %v16850_v57 = vld [vmem:[#allocation249_spill] sm:$0xff] }
 0xbb1   : > { %v7372_v34 = vadd.f32 %v7308_v4, %v7125_v31  ;;  %v14349_v4 = vld [vmem:[#allocation2 + $0x190] sm:$0xff]  ;;  %16838 = vst [vmem:[#allocation187_spill] sm:$0xff] %v14376_v38 }
 0xbb2   : > { %5784 = vperm.xlu0 %9704, %v14083_v47   ;;  %v5497_v47 = vmul.f32 1.442695, %v5404_v9  ;;  %v14347_v40 = vpop.eup %9915  ;;  %16832 = vst [vmem:[#allocation143_spill] sm:$0xff] %v14349_v4 }
 0xbb3   : > { %7436 = vst [vmem:[#allocation4 + $0xa8] sm:$0xff] %v7372_v34 }
 0xbb4   : > { %16831 = vst [vmem:[#allocation151_spill] sm:$0xff] %v14347_v40  ;;  %9917 = vpow2.f32 %v5497_v47 }
 0xbb6   : > { %6972 = vmatmul.bf16.gmra.mxu2 %v6753_v12  ;;  %v7309_v12 = vmul.f32 %v14347_v40, %v7245_v11  ;;  %v6755_v11 = vpack.c.bf16 %v14261_v25, %v14245_v54  ;;  %v16837_v54 = vld [vmem:[#allocation163_spill] sm:$0xff] }
 0xbb7   : > { %7141 = vmatmul.bf16.gmra.mxu3 %v6754_v60  ;;  %v4981_v60 = vpop.f32.mrf.mxu1 }
 0xbba   : > { %5794 = vperm.xlu0 %9704, %v14089_v28   ;;  %v5280_v55 = vpop.xlane.xlu1 %5279  ;;  %v14362_v47 = vpop.eup %9917 }
 0xbbb   : > { %v14345_v31 = vmax.f32 %v14341_v2, %v5280_v55  ;;  %16835 = vst [vmem:[#allocation268_spill] sm:$0xff] %v14362_v47  ;;  %v7310_v40 = vmul.f32 %v14362_v47, %v7246_v21  ;;  %v14378_v2 = vld [vmem:[#allocation2 + $0xa8] sm:$0xff] }
 0xbbc   : > { %16839 = vst [vmem:[#allocation163_spill] sm:$0xff] %v14378_v2  ;;  %v16841_v21 = vld [vmem:[#allocation207_spill] sm:$0xff] }
 0xbbd   : > { %v6958_v34 = vpop.f32.mrf.mxu2  ;;  %6708 = vst [vmem:[#allocation2 + $0x178] sm:$0xff] %v14345_v31 }
 0xbbe   : > { %v7127_v56 = vpop.f32.mrf.mxu3  ;;  %v5286_v39 = vpop.xlane.xlu2 %5285 }
 0xbbf   : > { %v7128_v43 = vadd.f32 %v7127_v56, %v6958_v34  ;;  %v14354_v28 = vmax.f32 %v14349_v4, %v5286_v39  ;;  %v14366_v34 = vpop.f32.mrf.mxu0  ;;  %v6756_v39 = vpack.c.bf16 %v14263_v13, %v14247_v7 }
 0xbc1   : > { %v7373_v46 = vadd.f32 %v7309_v12, %v7128_v43  ;;  %6710 = vst [vmem:[#allocation2 + $0x190] sm:$0xff] %v14354_v28  ;;  %v4983_v43 = vpop.f32.mrf.mxu1 }
 0xbc2   : > { %v5283_v9 = vpop.xlane.xlu1 %5282 }
 0xbc3   : > { %7437 = vst [vmem:[#allocation4 + $0x108] sm:$0xff] %v7373_v46  ;;  %v14360_v55 = vmax.f32 %v14356_v14, %v5283_v9 }
 0xbc5   : > { %16834 = vst [vmem:[#allocation234_spill] sm:$0xff] %v14360_v55  ;;  %v6960_v56 = vpop.f32.mrf.mxu2 }
 0xbc6   : > { %6709 = vst [vmem:[#allocation2 + $0x68] sm:$0xff] %v14360_v55  ;;  %v7129_v12 = vpop.f32.mrf.mxu3  ;;  %v5775_v46 = vpop.permute.xlu2 %5774  ;;  %6977 = vmatmul.bf16.gmra.mxu2 %v6755_v11 }
 0xbc7   : > { %v7130_v9 = vadd.f32 %v7129_v12, %v6960_v56  ;;  %v5969_v4 = vsub.f32 %v16836_v17, %v5775_v46  ;;  %v5970_v25 = vsub.f32 %v16837_v54, %v5775_v46  ;;  %7146 = vmatmul.bf16.gmra.mxu3 %v6756_v39  ;;  %v14387_v39 = vadd.f32 %v4983_v43, %v16841_v21 }
 0xbc9   : > { %v7374_v51 = vadd.f32 %v7310_v40, %v7130_v9  ;;  %v6179_v7 = vmul.f32 1.442695, %v5969_v4  ;;  %v6181_v13 = vmul.f32 1.442695, %v5970_v25  ;;  %v10237_v25 = vld [vmem:[#allocation2 + $0xf0] sm:$0xff] }
 0xbca   : > { %v5292_v14 = vpop.xlane.xlu1 %5291 }
 0xbcb   : > { %7438 = vst [vmem:[#allocation4 + $0x50] sm:$0xff] %v7374_v51  ;;  %9919 = vpow2.f32 %v6179_v7  ;;  %v5271_v11 = vpop.xlane.xlu0 %5270  ;;  %v14381_v56 = vmax.f32 %v14376_v38, %v5292_v14  ;;  %v14394_v51 = vpop.f32.mrf.mxu0  ;;  %v14398_v14 = vld [vmem:[#allocation2 + $0x170] sm:$0xff]  ;;  %v16844_v7 = vld [vmem:[#allocation245_spill] sm:$0xff] }
 0xbcc   : > { %9921 = vpow2.f32 %v6181_v13  ;;  %v14384_v17 = vmax.f32 %v14378_v2, %v5271_v11  ;;  %16842 = vst [vmem:[#allocation207_spill] sm:$0xff] %v14398_v14  ;;  %v5302_v12 = vmax.f32 %v14394_v51, %v14387_v39  ;;  %v5405_v13 = vsub.f32 %v16844_v7, %v10237_v25  ;;  %v16845_v11 = vld [vmem:[#allocation167_spill] sm:$0xff]  ;;  %v16846_v38 = vld [vmem:[#allocation169_spill] sm:$0xff] }
 0xbcd   : > { %6712 = vst [vmem:[#allocation2 + $0x38] sm:$0xff] %v14381_v56  ;;  %v14415_v21 = vadd.f32 %v4981_v60, %v16845_v11  ;;  %v16849_v11 = vld [vmem:[#allocation147_spill] sm:$0xff] }
 0xbce   : > { %16840 = vst [vmem:[#allocation269_spill] sm:$0xff] %v14384_v17  ;;  %5819 = vperm.xlu1 %9705, %v14384_v17   ;;  %v5499_v40 = vmul.f32 1.442695, %v5405_v13 }
 0xbcf   : > { %6705 = vst [vmem:[#allocation2 + $0xa8] sm:$0xff] %v14384_v17  ;;  %v5299_v47 = vmax.f32 %v14366_v34, %v14415_v21 }
 0xbd0   : > { %9923 = vpow2.f32 %v5499_v40 }
 0xbd1   : > { %v14396_v4 = vpop.eup %9919 }
 0xbd2   : > { %v14402_v43 = vpop.eup %9921 }
 0xbd3   : > { %v5277_v46 = vpop.xlane.xlu0 %5276  ;;  %v14406_v9 = vadd.f32 %v14402_v43, %v14396_v4 }
 0xbd4   : > { %v14409_v54 = vmax.f32 %v14398_v14, %v5277_v46  ;;  %v16847_v46 = vld [vmem:[#allocation186_spill] sm:$0xff] }
 0xbd5   : > { %16843 = vst [vmem:[#allocation270_spill] sm:$0xff] %v14406_v9  ;;  %5303 = vmax.xlane.f32.xlu2 %v5302_v12  ;;  %v5963_v9 = vsub.f32 %v16846_v38, %v14329_v44  ;;  %v5964_v12 = vsub.f32 %v16847_v46, %v14329_v44  ;;  %v7247_v44 = vld [vmem:[#allocation4 + $0xb8] sm:$0xff] }
 0xbd6   : > { %6707 = vst [vmem:[#allocation2 + $0x170] sm:$0xff] %v14409_v54  ;;  %5839 = vperm.xlu1 %9705, %v14360_v55   ;;  %v16848_v55 = vsub.f32 %v13913_v53, %v13918_v0  ;;  %v14428_v2 = vpop.eup %9923 }
 0xbd7   : > { %v6167_v25 = vmul.f32 1.442695, %v5963_v9  ;;  %v6169_v7 = vmul.f32 1.442695, %v5964_v12  ;;  %v7248_v12 = vld [vmem:[#allocation4 + $0x28] sm:$0xff] }
 0xbd8   : > { %v5501_v14 = vmul.f32 1.442695, %v16848_v55  ;;  %v7311_v55 = vmul.f32 %v14428_v2, %v7247_v44 }
 0xbda   : > { %9925 = vpow2.f32 %v5501_v14 }
 0xbdb   : > { %9927 = vpow2.f32 %v6167_v25  ;;  %v16852_v25 = vld [vmem:[#allocation148_spill] sm:$0xff] }
 0xbdc   : > { %9929 = vpow2.f32 %v6169_v7  ;;  %v5967_v7 = vsub.f32 %v16852_v25, %v14339_v1 }
 0xbe4   : > { %5300 = vmax.xlane.f32.xlu0 %v5299_v47  ;;  %v14432_v47 = vpop.eup %9925 }
 0xbe5   : > { %16851 = vst [vmem:[#allocation245_spill] sm:$0xff] %v14432_v47 }
 0xbe6   : > { %v5765_v60 = vpop.permute.xlu0 %5764 }
 0xbe7   : > { %v5965_v13 = vsub.f32 %v16849_v11, %v5765_v60  ;;  %v5966_v42 = vsub.f32 %v16850_v57, %v5765_v60  ;;  %v14434_v57 = vpop.eup %9927 }
 0xbe8   : > { %v14436_v9 = vpop.eup %9929 }
 0xbe9   : > { %v6171_v17 = vmul.f32 1.442695, %v5965_v13  ;;  %v6173_v38 = vmul.f32 1.442695, %v5966_v42  ;;  %v16853_v13 = vld [vmem:[#allocation244_spill] sm:$0xff] }
 0xbeb   : > { %9931 = vpow2.f32 %v6171_v17  ;;  %v6963_v40 = vpop.f32.mrf.mxu2 }
 0xbec   : > { %9933 = vpow2.f32 %v6173_v38  ;;  %v7132_v53 = vpop.f32.mrf.mxu3  ;;  %v5968_v38 = vsub.f32 %v16853_v13, %v14339_v1 }
 0xbed   : > { %v7133_v0 = vadd.f32 %v7132_v53, %v6963_v40  ;;  %5804 = vperm.xlu2 %9706, %v14108_v8   ;;  %v7312_v53 = vmul.f32 %v14432_v47, %v7248_v12 }
 0xbef   : > { %v7375_v14 = vadd.f32 %v7311_v55, %v7133_v0  ;;  %v6175_v0 = vmul.f32 1.442695, %v5967_v7  ;;  %v14467_v7 = vpop.permute.xlu1 %5789 }
 0xbf1   : > { %v9932_v42 = vpop.eup %9931  ;;  %7439 = vst [vmem:[#allocation4 + $0xb8] sm:$0xff] %v7375_v14  ;;  %v6177_v14 = vmul.f32 1.442695, %v5968_v38  ;;  %9935 = vpow2.f32 %v6175_v0  ;;  %v16859_v0 = vld [vmem:[#allocation152_spill] sm:$0xff] }
 0xbf2   : > { %v9934_v46 = vpop.eup %9933  ;;  %v6757_v17 = vpack.c.bf16 %v9932_v42, %v14434_v57 }
 0xbf3   : > { %v6965_v60 = vpop.f32.mrf.mxu2  ;;  %v6758_v11 = vpack.c.bf16 %v9934_v46, %v14436_v9  ;;  %v14442_v8 = vadd.f32 %v9934_v46, %v9932_v42  ;;  %9937 = vpow2.f32 %v6177_v14  ;;  %v5780_v42 = vpop.permute.xlu2 %5779  ;;  %v16860_v14 = vld [vmem:[#allocation248_spill] sm:$0xff] }
 0xbf4   : > { %v7134_v44 = vpop.f32.mrf.mxu3  ;;  %6982 = vmatmul.bf16.gmra.mxu2 %v6757_v17  ;;  %v14458_v17 = vld [vmem:[#allocation2 + $0xc0] sm:$0xff] }
 0xbf5   : > { %v7135_v40 = vadd.f32 %v7134_v44, %v6965_v60  ;;  %7151 = vmatmul.bf16.gmra.mxu3 %v6758_v11  ;;  %5809 = vperm.xlu2 %9706, %v14119_v30   ;;  %16854 = vst [vmem:[#allocation167_spill] sm:$0xff] %v14458_v17  ;;  %v16857_v44 = vld [vmem:[#allocation155_spill] sm:$0xff] }
 0xbf7   : > { %v7376_v55 = vadd.f32 %v7312_v53, %v7135_v40  ;;  %v14450_v1 = vpop.eup %9935  ;;  %v16858_v53 = vld [vmem:[#allocation204_spill] sm:$0xff] }
 0xbf8   : > { %5814 = vperm.xlu0 %9704, %v14224_v59   ;;  %v6759_v12 = vpack.c.bf16 %v14396_v4, %v14450_v1  ;;  %v14469_v4 = vld [vmem:[#allocation2 + $0x198] sm:$0xff] }
 0xbf9   : > { %7440 = vst [vmem:[#allocation4 + $0x28] sm:$0xff] %v7376_v55  ;;  %v14452_v46 = vpop.eup %9937  ;;  %v5971_v55 = vsub.f32 %v16859_v0, %v5780_v42 }
 0xbfa   : > { %v6760_v30 = vpack.c.bf16 %v14402_v43, %v14452_v46 }
 0xc00   : > { %5824 = vperm.xlu0 %9704, %v14237_v50  }
 0xc04   : > { %6987 = vmatmul.bf16.gmra.mxu2 %v6759_v12  ;;  %v5972_v12 = vsub.f32 %v16860_v14, %v5780_v42  ;;  %v10238_v42 = vld [vmem:[#allocation2 + $0x100] sm:$0xff] }
 0xc05   : > { %7156 = vmatmul.bf16.gmra.mxu3 %v6760_v30  ;;  %v16861_v30 = vsub.f32 %v13936_v29, %v13947_v23  ;;  %v7249_v29 = vld [vmem:[#allocation4 + $0x38] sm:$0xff] }
 0xc07   : > { %v5295_v59 = vpop.xlane.xlu2 %5294 }
 0xc08   : > { %v14461_v25 = vmax.f32 %v14458_v17, %v5295_v59  ;;  %5834 = vperm.xlu0 %9704, %v14345_v31   ;;  %v14479_v31 = vld [vmem:[#allocation2 + $0x1c0] sm:$0xff]  ;;  %v5505_v59 = vmul.f32 1.442695, %v16861_v30  ;;  %v16866_v17 = vld [vmem:[#allocation224_spill] sm:$0xff] }
 0xc09   : > { %16856 = vst [vmem:[#allocation186_spill] sm:$0xff] %v14479_v31 }
 0xc0a   : > { %16855 = vst [vmem:[#allocation169_spill] sm:$0xff] %v14461_v25 }
 0xc0b   : > { %6713 = vst [vmem:[#allocation2 + $0xc0] sm:$0xff] %v14461_v25 }
 0xc0d   : > { %v5298_v13 = vpop.xlane.xlu1 %5297 }
 0xc0e   : > { %v14482_v38 = vmax.f32 %v14479_v31, %v5298_v13  ;;  %v6185_v13 = vmul.f32 1.442695, %v5972_v12  ;;  %v7250_v31 = vld [vmem:[#allocation4 + $0x40] sm:$0xff] }
 0xc10   : > { %5844 = vperm.xlu0 %9704, %v14354_v28   ;;  %v5407_v28 = vsub.f32 %v16857_v44, %v14085_v26  ;;  %6714 = vst [vmem:[#allocation2 + $0x1c0] sm:$0xff] %v14482_v38  ;;  %v4986_v44 = vpop.f32.mrf.mxu1 }
 0xc11   : > { %v5289_v43 = vpop.xlane.xlu0 %5288 }
 0xc12   : > { %v14473_v60 = vmax.f32 %v14469_v4, %v5289_v43  ;;  %v5503_v40 = vmul.f32 1.442695, %v5407_v28  ;;  %v6183_v43 = vmul.f32 1.442695, %v5971_v55  ;;  %v14498_v55 = vpop.f32.mrf.mxu0 }
 0xc14   : > { %6711 = vst [vmem:[#allocation2 + $0x198] sm:$0xff] %v14473_v60  ;;  %5849 = vperm.xlu1 %9705, %v14473_v60   ;;  %9939 = vpow2.f32 %v5503_v40  ;;  %v16863_v40 = vld [vmem:[#allocation191_spill] sm:$0xff] }
 0xc15   : > { %9941 = vpow2.f32 %v5505_v59  ;;  %v5409_v14 = vsub.f32 %v16863_v40, %v10238_v42 }
 0xc16   : > { %9943 = vpow2.f32 %v6183_v43 }
 0xc17   : > { %9945 = vpow2.f32 %v6185_v13 }
 0xc1a   : > { %v14495_v0 = vpop.eup %9939 }
 0xc1b   : > { %16862 = vst [vmem:[#allocation147_spill] sm:$0xff] %v14495_v0 }
 0xc1e   : > { %6336 = vadd.xlane.f32.xlu2 %v16858_v53 }
 0xc24   : > { %v5785_v50 = vpop.permute.xlu0 %5784 }
 0xc25   : > { %v5973_v11 = vsub.f32 %v13874_v49, %v5785_v50  ;;  %v5974_v26 = vsub.f32 %v13877_v36, %v5785_v50  ;;  %v7313_v36 = vmul.f32 %v14495_v0, %v7249_v29  ;;  %v14501_v50 = vpop.eup %9941  ;;  %v10239_v29 = vld [vmem:[#allocation2 + $0xc8] sm:$0xff] }
 0xc26   : > { %v14503_v59 = vpop.eup %9943 }
 0xc27   : > { %v6187_v28 = vmul.f32 1.442695, %v5973_v11  ;;  %v6189_v53 = vmul.f32 1.442695, %v5974_v26  ;;  %v5507_v11 = vmul.f32 1.442695, %v5409_v14  ;;  %v5410_v14 = vsub.f32 %v13955_v10, %v10239_v29 }
 0xc29   : > { %9947 = vpow2.f32 %v6187_v28  ;;  %v6968_v23 = vpop.f32.mrf.mxu2  ;;  %v14507_v28 = vpop.eup %9945 }
 0xc2a   : > { %9949 = vpow2.f32 %v6189_v53  ;;  %v7137_v49 = vpop.f32.mrf.mxu3 }
 0xc2b   : > { %v7138_v12 = vadd.f32 %v7137_v49, %v6968_v23  ;;  %v4988_v23 = vpop.f32.mrf.mxu1  ;;  %9951 = vpow2.f32 %v5507_v11 }
 0xc2c   : > { %v5795_v30 = vpop.permute.xlu0 %5794 }
 0xc2d   : > { %v7377_v43 = vadd.f32 %v7313_v36, %v7138_v12  ;;  %v5977_v26 = vsub.f32 %v13880_v6, %v5795_v30  ;;  %v5978_v13 = vsub.f32 %v13882_v52, %v5795_v30  ;;  %v5975_v6 = vsub.f32 %v13941_v61, %v14467_v7  ;;  %v14522_v61 = vpop.f32.mrf.mxu0 }
 0xc2e   : > { %v5976_v30 = vsub.f32 %v13944_v58, %v14467_v7  ;;  %v14527_v58 = vadd.f32 %v4986_v44, %v16866_v17 }
 0xc2f   : > { %v9948_v42 = vpop.eup %9947  ;;  %7441 = vst [vmem:[#allocation4 + $0x38] sm:$0xff] %v7377_v43  ;;  %v6195_v53 = vmul.f32 1.442695, %v5977_v26  ;;  %v6197_v40 = vmul.f32 1.442695, %v5978_v13  ;;  %v16864_v43 = vld [vmem:[#allocation185_spill] sm:$0xff]  ;;  %v7314_v13 = vmul.f32 %v14501_v50, %v7250_v31 }
 0xc30   : > { %v9950_v49 = vpop.eup %9949  ;;  %v6761_v47 = vpack.c.bf16 %v9948_v42, %v14503_v59  ;;  %v14519_v10 = vadd.f32 %v4988_v23, %v16864_v43  ;;  %v6191_v29 = vmul.f32 1.442695, %v5975_v6  ;;  %v10240_v23 = vld [vmem:[#allocation2 + $0x40] sm:$0xff] }
 0xc31   : > { %9953 = vpow2.f32 %v6195_v53  ;;  %v6970_v52 = vpop.f32.mrf.mxu2  ;;  %v6762_v12 = vpack.c.bf16 %v9950_v49, %v14507_v28  ;;  %v14514_v36 = vadd.f32 %v9950_v49, %v9948_v42  ;;  %v5509_v53 = vmul.f32 1.442695, %v5410_v14  ;;  %v14524_v42 = vpop.eup %9951  ;;  %v16867_v14 = vld [vmem:[#allocation175_spill] sm:$0xff] }
 0xc32   : > { %9955 = vpow2.f32 %v6197_v40  ;;  %v7139_v11 = vpop.f32.mrf.mxu3  ;;  %6992 = vmatmul.bf16.gmra.mxu2 %v6761_v47  ;;  %16865 = vst [vmem:[#allocation249_spill] sm:$0xff] %v14524_v42  ;;  %v6193_v49 = vmul.f32 1.442695, %v5976_v30  ;;  %v5308_v47 = vmax.f32 %v14522_v61, %v14519_v10  ;;  %v7251_v40 = vld [vmem:[#allocation4 + $0x98] sm:$0xff]  ;;  %v5411_v6 = vsub.f32 %v16867_v14, %v10240_v23 }
 0xc33   : > { %v7140_v26 = vadd.f32 %v7139_v11, %v6970_v52  ;;  %7161 = vmatmul.bf16.gmra.mxu3 %v6762_v12  ;;  %9957 = vpow2.f32 %v5509_v53  ;;  %v7315_v30 = vmul.f32 %v14524_v42, %v7251_v40  ;;  %v5800_v53 = vpop.permute.xlu2 %5799 }
 0xc34   : > { %9959 = vpow2.f32 %v6191_v29 }
 0xc35   : > { %v7378_v0 = vadd.f32 %v7314_v13, %v7140_v26  ;;  %9961 = vpow2.f32 %v6193_v49  ;;  %v7252_v49 = vld [vmem:[#allocation4 + $0x90] sm:$0xff] }
 0xc36   : > { %5829 = vperm.xlu2 %9706, %v14409_v54   ;;  %v5305_v54 = vmax.f32 %v14498_v55, %v14527_v58 }
 0xc37   : > { %v9954_v7 = vpop.eup %9953  ;;  %7442 = vst [vmem:[#allocation4 + $0x40] sm:$0xff] %v7378_v0  ;;  %v5511_v0 = vmul.f32 1.442695, %v5411_v6 }
 0xc38   : > { %v9956_v31 = vpop.eup %9955 }
 0xc39   : > { %v6973_v52 = vpop.f32.mrf.mxu2  ;;  %v14533_v12 = vadd.f32 %v9956_v31, %v9954_v7  ;;  %v14538_v43 = vpop.eup %9957  ;;  %9963 = vpow2.f32 %v5511_v0 }
 0xc3a   : > { %v7142_v17 = vpop.f32.mrf.mxu3  ;;  %5309 = vmax.xlane.f32.xlu0 %v5308_v47  ;;  %16868 = vst [vmem:[#allocation148_spill] sm:$0xff] %v14538_v43  ;;  %v14541_v26 = vpop.eup %9959 }
 0xc3b   : > { %v7143_v44 = vadd.f32 %v7142_v17, %v6973_v52  ;;  %v14543_v13 = vpop.eup %9961  ;;  %v6763_v47 = vpack.c.bf16 %v9954_v7, %v14541_v26  ;;  %v16869_v52 = vld [vmem:[#allocation206_spill] sm:$0xff]  ;;  %v16870_v7 = vsub.f32 %v13972_v27, %v13977_v24 }
 0xc3c   : > { %v6764_v6 = vpack.c.bf16 %v9956_v31, %v14543_v13 }
 0xc3d   : > { %v7379_v11 = vadd.f32 %v7315_v30, %v7143_v44  ;;  %v7316_v30 = vmul.f32 %v14538_v43, %v7252_v49  ;;  %v5513_v0 = vmul.f32 1.442695, %v16870_v7 }
 0xc3e   : > { %5854 = vperm.xlu2 %9706, %v14381_v56   ;;  %5306 = vmax.xlane.f32.xlu1 %v5305_v54 }
 0xc3f   : > { %7443 = vst [vmem:[#allocation4 + $0x98] sm:$0xff] %v7379_v11  ;;  %v14557_v31 = vpop.eup %9963  ;;  %v7253_v11 = vld [vmem:[#allocation4 + $0x30] sm:$0xff] }
 0xc40   : > { %v5820_v29 = vpop.permute.xlu1 %5819  ;;  %16872 = vst [vmem:[#allocation155_spill] sm:$0xff] %v14557_v31 }
 0xc41   : > { %v5987_v40 = vsub.f32 %v14010_v3, %v5820_v29  ;;  %v5988_v23 = vsub.f32 %v14180_v19, %v5820_v29  ;;  %v6975_v14 = vpop.f32.mrf.mxu2  ;;  %v14555_v19 = vld [vmem:[#allocation2 + $0x10] sm:$0xff] }
 0xc42   : > { %v7144_v56 = vpop.f32.mrf.mxu3  ;;  %6339 = vadd.xlane.f32.xlu0 %v16869_v52  ;;  %6997 = vmatmul.bf16.gmra.mxu2 %v6763_v47  ;;  %16871 = vst [vmem:[#allocation244_spill] sm:$0xff] %v14555_v19 }
 0xc43   : > { %v6215_v17 = vmul.f32 1.442695, %v5987_v40  ;;  %v6217_v54 = vmul.f32 1.442695, %v5988_v23  ;;  %v7145_v44 = vadd.f32 %v7144_v56, %v6975_v14  ;;  %7166 = vmatmul.bf16.gmra.mxu3 %v6764_v6  ;;  %v5979_v23 = vsub.f32 %v14032_v62, %v5800_v53  ;;  %v16874_v56 = vld [vmem:[#allocation219_spill] sm:$0xff] }
 0xc44   : > { %v7317_v6 = vmul.f32 %v14557_v31, %v7253_v11  ;;  %v7254_v11 = vld [vmem:[#allocation4 + $0x140] sm:$0xff] }
 0xc45   : > { %9965 = vpow2.f32 %v6215_v17  ;;  %v7380_v3 = vadd.f32 %v7316_v30, %v7145_v44  ;;  %v16881_v17 = vld [vmem:[#allocation156_spill] sm:$0xff] }
 0xc46   : > { %9967 = vpow2.f32 %v6217_v54  ;;  %5859 = vperm.xlu2 %9706, %v14461_v25  }
 0xc47   : > { %7444 = vst [vmem:[#allocation4 + $0x90] sm:$0xff] %v7380_v3  ;;  %9969 = vpow2.f32 %v5513_v0  ;;  %v6199_v3 = vmul.f32 1.442695, %v5979_v23 }
 0xc48   : > { %v5304_v29 = vpop.xlane.xlu2 %5303  ;;  %v5840_v47 = vpop.permute.xlu1 %5839 }
 0xc49   : > { %v14560_v49 = vmax.f32 %v14555_v19, %v5304_v29  ;;  %v5995_v27 = vsub.f32 %v14113_v63, %v5840_v47  ;;  %v5996_v24 = vsub.f32 %v14155_v41, %v5840_v47  ;;  %v6978_v40 = vpop.f32.mrf.mxu2  ;;  %v5980_v41 = vsub.f32 %v14035_v35, %v5800_v53 }
 0xc4a   : > { %v7147_v14 = vpop.f32.mrf.mxu3  ;;  %6351 = vadd.xlane.f32.xlu0 %v16874_v56 }
 0xc4b   : > { %16873 = vst [vmem:[#allocation204_spill] sm:$0xff] %v14560_v49  ;;  %v14567_v52 = vpop.eup %9965  ;;  %v6231_v54 = vmul.f32 1.442695, %v5995_v27  ;;  %v6233_v44 = vmul.f32 1.442695, %v5996_v24  ;;  %v7148_v63 = vadd.f32 %v7147_v14, %v6978_v40  ;;  %v16876_v14 = vld [vmem:[#allocation236_spill] sm:$0xff] }
 0xc4c   : > { %6716 = vst [vmem:[#allocation2 + $0x10] sm:$0xff] %v14560_v49  ;;  %v14572_v30 = vpop.eup %9967  ;;  %v6201_v29 = vmul.f32 1.442695, %v5980_v41 }
 0xc4d   : > { %9971 = vpow2.f32 %v6231_v54  ;;  %v7381_v62 = vadd.f32 %v7317_v6, %v7148_v63  ;;  %v14577_v7 = vadd.f32 %v14572_v30, %v14567_v52  ;;  %v14579_v0 = vpop.eup %9969 }
 0xc4e   : > { %9973 = vpow2.f32 %v6233_v44  ;;  %16875 = vst [vmem:[#allocation152_spill] sm:$0xff] %v14579_v0  ;;  %v7318_v53 = vmul.f32 %v14579_v0, %v7254_v11 }
 0xc4f   : > { %7445 = vst [vmem:[#allocation4 + $0x30] sm:$0xff] %v7381_v62  ;;  %9975 = vpow2.f32 %v6199_v3 }
 0xc50   : > { %v5805_v47 = vpop.permute.xlu2 %5804  ;;  %9977 = vpow2.f32 %v6201_v29 }
 0xc51   : > { %v5981_v27 = vsub.f32 %v13892_v45, %v5805_v47  ;;  %v5982_v24 = vsub.f32 %v13894_v48, %v5805_v47  ;;  %v6980_v40 = vpop.f32.mrf.mxu2  ;;  %v14589_v45 = vld [vmem:[#allocation2 + $0x158] sm:$0xff] }
 0xc52   : > { %v7149_v35 = vpop.f32.mrf.mxu3  ;;  %6357 = vadd.xlane.f32.xlu0 %v16876_v14  ;;  %16877 = vst [vmem:[#allocation248_spill] sm:$0xff] %v14589_v45 }
 0xc53   : > { %v14585_v6 = vpop.eup %9971  ;;  %v6203_v56 = vmul.f32 1.442695, %v5981_v27  ;;  %v6205_v54 = vmul.f32 1.442695, %v5982_v24  ;;  %v7150_v23 = vadd.f32 %v7149_v35, %v6980_v40 }
 0xc54   : > { %v14587_v44 = vpop.eup %9973 }
 0xc55   : > { %9979 = vpow2.f32 %v6203_v56  ;;  %v7382_v63 = vadd.f32 %v7318_v53, %v7150_v23  ;;  %v14593_v48 = vadd.f32 %v14587_v44, %v14585_v6  ;;  %v14598_v11 = vpop.eup %9975 }
 0xc56   : > { %9981 = vpow2.f32 %v6205_v54  ;;  %v14602_v27 = vpop.eup %9977 }
 0xc57   : > { %7446 = vst [vmem:[#allocation4 + $0x140] sm:$0xff] %v7382_v63  ;;  %v5301_v41 = vpop.xlane.xlu0 %5300  ;;  %v10241_v63 = vld [vmem:[#allocation2 + $0x20] sm:$0xff] }
 0xc58   : > { %v14596_v62 = vmax.f32 %v14589_v45, %v5301_v41  ;;  %v5810_v3 = vpop.permute.xlu2 %5809  ;;  %v5413_v41 = vsub.f32 %v13915_v18, %v10241_v63  ;;  %v16882_v63 = vld [vmem:[#allocation254_spill] sm:$0xff] }
 0xc59   : > { %v5983_v47 = vsub.f32 %v13909_v16, %v5810_v3  ;;  %v5984_v29 = vsub.f32 %v13907_v20, %v5810_v3 }
 0xc5a   : > { %16878 = vst [vmem:[#allocation191_spill] sm:$0xff] %v14596_v62  ;;  %5869 = vperm.xlu2 %9706, %v14596_v62  }
 0xc5b   : > { %6715 = vst [vmem:[#allocation2 + $0x158] sm:$0xff] %v14596_v62  ;;  %v9980_v40 = vpop.eup %9979  ;;  %v6207_v35 = vmul.f32 1.442695, %v5983_v47  ;;  %v6209_v53 = vmul.f32 1.442695, %v5984_v29 }
 0xc5c   : > { %v9982_v14 = vpop.eup %9981  ;;  %v6765_v56 = vpack.c.bf16 %v9980_v40, %v14598_v11  ;;  %v5515_v47 = vmul.f32 1.442695, %v5413_v41 }
 0xc5d   : > { %9983 = vpow2.f32 %v6207_v35  ;;  %v6766_v16 = vpack.c.bf16 %v9982_v14, %v14602_v27  ;;  %v14610_v54 = vadd.f32 %v9982_v14, %v9980_v40  ;;  %v16879_v35 = vld [vmem:[#allocation252_spill] sm:$0xff] }
 0xc5e   : > { %7002 = vmatmul.bf16.gmra.mxu2 %v6765_v56  ;;  %9985 = vpow2.f32 %v6209_v53  ;;  %v16880_v40 = vld [vmem:[#allocation184_spill] sm:$0xff] }
 0xc5f   : > { %7171 = vmatmul.bf16.gmra.mxu3 %v6766_v16  ;;  %9987 = vpow2.f32 %v5515_v47  ;;  %v10242_v16 = vld [vmem:[#allocation2 + $0x128] sm:$0xff] }
 0xc60   : > { %v5414_v62 = vsub.f32 %v16881_v17, %v10242_v16 }
 0xc62   : > { %5874 = vperm.xlu2 %9706, %v14560_v49   ;;  %v5517_v45 = vmul.f32 1.442695, %v5414_v62  ;;  %v16883_v49 = vld [vmem:[#allocation198_spill] sm:$0xff] }
 0xc63   : > { %v9984_v20 = vpop.eup %9983 }
 0xc64   : > { %v9986_v23 = vpop.eup %9985 }
 0xc65   : > { %v14615_v3 = vadd.f32 %v9986_v23, %v9984_v20  ;;  %v14622_v41 = vpop.eup %9987 }
 0xc66   : > { %5864 = vperm.xlu0 %9704, %v14482_v38   ;;  %16884 = vst [vmem:[#allocation185_spill] sm:$0xff] %v14622_v41 }
 0xc6a   : > { %v5815_v29 = vpop.permute.xlu0 %5814 }
 0xc6b   : > { %v5985_v24 = vsub.f32 %v16879_v35, %v5815_v29  ;;  %v5986_v14 = vsub.f32 %v16880_v40, %v5815_v29  ;;  %v16885_v40 = vld [vmem:[#allocation188_spill] sm:$0xff] }
 0xc6d   : > { %v6211_v56 = vmul.f32 1.442695, %v5985_v24  ;;  %v6213_v53 = vmul.f32 1.442695, %v5986_v14  ;;  %v10243_v24 = vld [vmem:[#allocation2 + $0x1a0] sm:$0xff]  ;;  %v7255_v14 = vld [vmem:[#allocation4 + $0x1d8] sm:$0xff] }
 0xc6e   : > { %v5415_v47 = vsub.f32 %v16885_v40, %v10243_v24  ;;  %v16887_v40 = vld [vmem:[#allocation255_spill] sm:$0xff] }
 0xc6f   : > { %9989 = vpow2.f32 %v6211_v56 }
 0xc70   : > { %9991 = vpow2.f32 %v6213_v53 }
 0xc71   : > { %9993 = vpow2.f32 %v5517_v45 }
 0xc72   : > { %v5825_v18 = vpop.permute.xlu0 %5824 }
 0xc73   : > { %v5989_v38 = vsub.f32 %v16882_v63, %v5825_v18  ;;  %v5990_v19 = vsub.f32 %v16883_v49, %v5825_v18  ;;  %v7319_v18 = vmul.f32 %v14622_v41, %v7255_v14  ;;  %v7256_v14 = vld [vmem:[#allocation4 + $0x1e8] sm:$0xff] }
 0xc75   : > { %v9990_v0 = vpop.eup %9989  ;;  %v6219_v35 = vmul.f32 1.442695, %v5989_v38  ;;  %v6221_v43 = vmul.f32 1.442695, %v5990_v19  ;;  %v5519_v19 = vmul.f32 1.442695, %v5415_v47 }
 0xc76   : > { %v9992_v29 = vpop.eup %9991  ;;  %v6767_v17 = vpack.c.bf16 %v9990_v0, %v9984_v20 }
 0xc77   : > { %9995 = vpow2.f32 %v6219_v35  ;;  %v6983_v56 = vpop.f32.mrf.mxu2  ;;  %v6768_v62 = vpack.c.bf16 %v9992_v29, %v9986_v23  ;;  %v14625_v53 = vadd.f32 %v9992_v29, %v9990_v0  ;;  %v14630_v20 = vpop.eup %9993  ;;  %v10244_v29 = vld [vmem:[#allocation2 + $0x1f0] sm:$0xff] }
 0xc78   : > { %9997 = vpow2.f32 %v6221_v43  ;;  %v7152_v16 = vpop.f32.mrf.mxu3  ;;  %7007 = vmatmul.bf16.gmra.mxu2 %v6767_v17  ;;  %16886 = vst [vmem:[#allocation224_spill] sm:$0xff] %v14630_v20  ;;  %v5416_v17 = vsub.f32 %v16887_v40, %v10244_v29 }
 0xc79   : > { %v7153_v49 = vadd.f32 %v7152_v16, %v6983_v56  ;;  %7176 = vmatmul.bf16.gmra.mxu3 %v6768_v62  ;;  %9999 = vpow2.f32 %v5519_v19 }
 0xc7a   : > { %v5835_v63 = vpop.permute.xlu0 %5834  ;;  %v5521_v16 = vmul.f32 1.442695, %v5416_v17 }
 0xc7b   : > { %v7383_v38 = vadd.f32 %v7319_v18, %v7153_v49  ;;  %v5993_v24 = vsub.f32 %v14092_v5, %v5835_v63  ;;  %v5994_v45 = vsub.f32 %v14134_v15, %v5835_v63  ;;  %v7320_v15 = vmul.f32 %v14630_v20, %v7256_v14 }
 0xc7d   : > { %v9996_v35 = vpop.eup %9995  ;;  %7447 = vst [vmem:[#allocation4 + $0x1d8] sm:$0xff] %v7383_v38  ;;  %v6227_v0 = vmul.f32 1.442695, %v5993_v24  ;;  %v6229_v23 = vmul.f32 1.442695, %v5994_v45  ;;  %v16888_v38 = vld [vmem:[#allocation227_spill] sm:$0xff] }
 0xc7e   : > { %v9998_v43 = vpop.eup %9997  ;;  %v6769_v17 = vpack.c.bf16 %v9996_v35, %v14567_v52 }
 0xc7f   : > { %10001 = vpow2.f32 %v6227_v0  ;;  %v6985_v47 = vpop.f32.mrf.mxu2  ;;  %v14633_v56 = vadd.f32 %v9998_v43, %v9996_v35  ;;  %v14638_v24 = vpop.eup %9999  ;;  %v6770_v14 = vpack.c.bf16 %v9998_v43, %v14572_v30  ;;  %v16891_v35 = vld [vmem:[#allocation218_spill] sm:$0xff]  ;;  %v5055_v43 = vld [vmem:[#allocation3 + $0x68] sm:$0xff] }
 0xc80   : > { %10003 = vpow2.f32 %v6229_v23  ;;  %v7154_v5 = vpop.f32.mrf.mxu3  ;;  %16889 = vst [vmem:[#allocation175_spill] sm:$0xff] %v14638_v24 }
 0xc81   : > { %v7155_v62 = vadd.f32 %v7154_v5, %v6985_v47  ;;  %10005 = vpow2.f32 %v5521_v16  ;;  %v7257_v47 = vld [vmem:[#allocation4 + $0x1a8] sm:$0xff] }
 0xc82   : > { %v5845_v49 = vpop.permute.xlu0 %5844  ;;  %v7321_v52 = vmul.f32 %v14638_v24, %v7257_v47  ;;  %v16893_v47 = vld [vmem:[#allocation235_spill] sm:$0xff] }
 0xc83   : > { %v7384_v18 = vadd.f32 %v7320_v15, %v7155_v62  ;;  %v5997_v63 = vsub.f32 %v14129_v32, %v5845_v49  ;;  %v5998_v19 = vsub.f32 %v16888_v38, %v5845_v49 }
 0xc85   : > { %v14640_v45 = vpop.eup %10001  ;;  %7448 = vst [vmem:[#allocation4 + $0x1e8] sm:$0xff] %v7384_v18  ;;  %v6235_v0 = vmul.f32 1.442695, %v5997_v63  ;;  %v6237_v29 = vmul.f32 1.442695, %v5998_v19  ;;  %v7258_v19 = vld [vmem:[#allocation4 + $0x1e0] sm:$0xff] }
 0xc86   : > { %v14642_v40 = vpop.eup %10003  ;;  %v5850_v23 = vpop.permute.xlu1 %5849 }
 0xc87   : > { %10007 = vpow2.f32 %v6235_v0  ;;  %v5999_v32 = vsub.f32 %v14152_v33, %v5850_v23  ;;  %v6000_v5 = vsub.f32 %v14294_v22, %v5850_v23  ;;  %v6988_v62 = vpop.f32.mrf.mxu2  ;;  %v14650_v15 = vadd.f32 %v14642_v40, %v14640_v45  ;;  %v14654_v33 = vpop.eup %10005 }
 0xc88   : > { %10009 = vpow2.f32 %v6237_v29  ;;  %v7157_v49 = vpop.f32.mrf.mxu3  ;;  %7012 = vmatmul.bf16.gmra.mxu2 %v6769_v17  ;;  %16892 = vst [vmem:[#allocation219_spill] sm:$0xff] %v14654_v33  ;;  %v6271_v17 = vmul.f32 %v16893_v47, %v5055_v43  ;;  %v16897_v43 = vld [vmem:[#allocation233_spill] sm:$0xff] }
 0xc89   : > { %16890 = vst [vmem:[#allocation206_spill] sm:$0xff] %v14650_v15  ;;  %v6239_v16 = vmul.f32 1.442695, %v5999_v32  ;;  %v6241_v18 = vmul.f32 1.442695, %v6000_v5  ;;  %v7158_v63 = vadd.f32 %v7157_v49, %v6988_v62  ;;  %7181 = vmatmul.bf16.gmra.mxu3 %v6770_v14  ;;  %v7322_v5 = vmul.f32 %v14654_v33, %v7258_v19  ;;  %v16899_v19 = vld [vmem:[#allocation177_spill] sm:$0xff] }
 0xc8a   : > { %v7260_v15 = vld [vmem:[#allocation4 + $0x1b8] sm:$0xff] }
 0xc8b   : > { %10011 = vpow2.f32 %v6239_v16  ;;  %v7385_v30 = vadd.f32 %v7321_v52, %v7158_v63  ;;  %6345 = vadd.xlane.f32.xlu2 %v16891_v35  ;;  %v16894_v63 = vld [vmem:[#allocation220_spill] sm:$0xff] }
 0xc8c   : > { %10013 = vpow2.f32 %v6241_v18  ;;  %v16896_v35 = vld [vmem:[#allocation232_spill] sm:$0xff] }
 0xc8d   : > { %v14656_v22 = vpop.eup %10007  ;;  %7449 = vst [vmem:[#allocation4 + $0x1a8] sm:$0xff] %v7385_v30  ;;  %v6353_v47 = vadd.f32 %v16897_v43, %v16896_v35  ;;  %v10245_v43 = vld [vmem:[#allocation2 + $0xe8] sm:$0xff] }
 0xc8e   : > { %v14658_v38 = vpop.eup %10009 }
 0xc8f   : > { %v6990_v0 = vpop.f32.mrf.mxu2  ;;  %v14662_v29 = vadd.f32 %v14658_v38, %v14656_v22 }
 0xc90   : > { %v7159_v23 = vpop.f32.mrf.mxu3 }
 0xc91   : > { %v14665_v14 = vpop.eup %10011  ;;  %v7160_v32 = vadd.f32 %v7159_v23, %v6990_v0  ;;  %v6337_v62 = vpop.xlane.xlu2 %6336  ;;  %v16898_v0 = vld [vmem:[#allocation257_spill] sm:$0xff] }
 0xc92   : > { %v14668_v49 = vpop.eup %10013  ;;  %v6527_v16 = vadd.f32 %v6337_v62, %v6271_v17 }
 0xc93   : > { %v7386_v18 = vadd.f32 %v7322_v5, %v7160_v32  ;;  %6348 = vadd.xlane.f32.xlu2 %v16894_v63  ;;  %v14673_v52 = vadd.f32 %v14668_v49, %v14665_v14  ;;  %v16900_v5 = vld [vmem:[#allocation225_spill] sm:$0xff]  ;;  %v16901_v63 = vld [vmem:[#allocation200_spill] sm:$0xff] }
 0xc94   : > { %6591 = vst [vmem:[#allocation3 + $0x68] sm:$0xff] %v6527_v16  ;;  %v16902_v16 = vld [vmem:[#allocation168_spill] sm:$0xff] }
 0xc95   : > { %16895 = vst [vmem:[#allocation236_spill] sm:$0xff] %v14673_v52 }
 0xc96   : > { %7450 = vst [vmem:[#allocation4 + $0x1e0] sm:$0xff] %v7386_v18 }
 0xc99   : > { %v5830_v30 = vpop.permute.xlu2 %5829 }
 0xc9a   : > { %v5991_v23 = vsub.f32 %v16898_v0, %v5830_v30  ;;  %v5992_v33 = vsub.f32 %v16899_v19, %v5830_v30  ;;  %v16903_v0 = vld [vmem:[#allocation180_spill] sm:$0xff]  ;;  %v16904_v19 = vld [vmem:[#allocation158_spill] sm:$0xff] }
 0xc9b   : > { %6354 = vadd.xlane.f32.xlu2 %v6353_v47  ;;  %v5417_v42 = vsub.f32 %v16903_v0, %v10245_v43 }
 0xc9c   : > { %v6223_v20 = vmul.f32 1.442695, %v5991_v23  ;;  %v6225_v17 = vmul.f32 1.442695, %v5992_v33 }
 0xc9d   : > { %v5523_v47 = vmul.f32 1.442695, %v5417_v42  ;;  %v10246_v42 = vld [vmem:[#allocation2 + $0x78] sm:$0xff] }
 0xc9e   : > { %10015 = vpow2.f32 %v6223_v20 }
 0xc9f   : > { %10017 = vpow2.f32 %v6225_v17  ;;  %v16905_v17 = vld [vmem:[#allocation161_spill] sm:$0xff] }
 0xca1   : > { %v5855_v32 = vpop.permute.xlu2 %5854 }
 0xca2   : > { %v6001_v62 = vsub.f32 %v16900_v5, %v5855_v32  ;;  %v6002_v52 = vsub.f32 %v16901_v63, %v5855_v32  ;;  %v6371_v32 = vadd.f32 %v16905_v17, %v16904_v19  ;;  %v5056_v19 = vld [vmem:[#allocation3 + $0x150] sm:$0xff] }
 0xca3   : > { %6363 = vadd.xlane.f32.xlu2 %v16902_v16  ;;  %v14691_v16 = vld [vmem:[#allocation2 + $0xa0] sm:$0xff] }
 0xca4   : > { %v10016_v18 = vpop.eup %10015  ;;  %v6243_v24 = vmul.f32 1.442695, %v6001_v62  ;;  %v6245_v41 = vmul.f32 1.442695, %v6002_v52  ;;  %v16906_v52 = vld [vmem:[#allocation267_spill] sm:$0xff]  ;;  %16908 = vst [vmem:[#allocation252_spill] sm:$0xff] %v14691_v16 }
 0xca5   : > { %v10018_v35 = vpop.eup %10017  ;;  %v6771_v30 = vpack.c.bf16 %v14640_v45, %v10016_v18  ;;  %v16907_v62 = vld [vmem:[#allocation231_spill] sm:$0xff] }
 0xca6   : > { %10019 = vpow2.f32 %v6243_v24  ;;  %v6772_v20 = vpack.c.bf16 %v14642_v40, %v10018_v35  ;;  %v14685_v33 = vadd.f32 %v10018_v35, %v10016_v18  ;;  %v16909_v35 = vld [vmem:[#allocation259_spill] sm:$0xff] }
 0xca7   : > { %10021 = vpow2.f32 %v6245_v41  ;;  %7017 = vmatmul.bf16.gmra.mxu2 %v6771_v30  ;;  %v5418_v43 = vsub.f32 %v16909_v35, %v10246_v42 }
 0xca8   : > { %7186 = vmatmul.bf16.gmra.mxu3 %v6772_v20  ;;  %10023 = vpow2.f32 %v5523_v47  ;;  %v14705_v20 = vld [vmem:[#allocation2 + $0x58] sm:$0xff] }
 0xca9   : > { %v5860_v23 = vpop.permute.xlu2 %5859  ;;  %16911 = vst [vmem:[#allocation156_spill] sm:$0xff] %v14705_v20  ;;  %v5525_v17 = vmul.f32 1.442695, %v5418_v43 }
 0xcaa   : > { %v6003_v5 = vsub.f32 %v16906_v52, %v5860_v23  ;;  %v6004_v63 = vsub.f32 %v16907_v62, %v5860_v23 }
 0xcab   : > { %6372 = vadd.xlane.f32.xlu2 %v6371_v32 }
 0xcac   : > { %v14693_v24 = vpop.eup %10019  ;;  %v6247_v45 = vmul.f32 1.442695, %v6003_v5  ;;  %v6249_v40 = vmul.f32 1.442695, %v6004_v63  ;;  %v16914_v5 = vld [vmem:[#allocation174_spill] sm:$0xff]  ;;  %v6774_v63 = vpack.c.bf16 %v14658_v38, %v14587_v44 }
 0xcad   : > { %v14695_v18 = vpop.eup %10021  ;;  %v5310_v41 = vpop.xlane.xlu0 %5309 }
 0xcae   : > { %10025 = vpow2.f32 %v6247_v45  ;;  %v14699_v0 = vmax.f32 %v14691_v16, %v5310_v41  ;;  %v14703_v30 = vadd.f32 %v14695_v18, %v14693_v24  ;;  %v14714_v52 = vpop.eup %10023  ;;  %v16915_v41 = vld [vmem:[#allocation237_spill] sm:$0xff]  ;;  %v16919_v16 = vld [vmem:[#allocation142_spill] sm:$0xff] }
 0xcaf   : > { %10027 = vpow2.f32 %v6249_v40  ;;  %16913 = vst [vmem:[#allocation198_spill] sm:$0xff] %v14714_v52  ;;  %v7259_v40 = vld [vmem:[#allocation4 + $0x1b0] sm:$0xff]  ;;  %v6272_v42 = vmul.f32 %v16915_v41, %v5056_v19 }
 0xcb0   : > { %16910 = vst [vmem:[#allocation184_spill] sm:$0xff] %v14699_v0  ;;  %5884 = vperm.xlu0 %9704, %v14699_v0   ;;  %10029 = vpow2.f32 %v5525_v17  ;;  %v7323_v19 = vmul.f32 %v14714_v52, %v7259_v40  ;;  %v16917_v17 = vld [vmem:[#allocation214_spill] sm:$0xff]  ;;  %v16921_v52 = vld [vmem:[#allocation260_spill] sm:$0xff] }
 0xcb1   : > { %6718 = vst [vmem:[#allocation2 + $0xa0] sm:$0xff] %v14699_v0  ;;  %v5307_v47 = vpop.xlane.xlu1 %5306 }
 0xcb2   : > { %v14712_v32 = vmax.f32 %v14705_v20, %v5307_v47 }
 0xcb3   : > { %6381 = vadd.xlane.f32.xlu2 %v16914_v5  ;;  %v6773_v5 = vpack.c.bf16 %v14656_v22, %v14585_v6  ;;  %v5060_v6 = vld [vmem:[#allocation3 + $0xd8] sm:$0xff]  ;;  %v16916_v22 = vld [vmem:[#allocation228_spill] sm:$0xff] }
 0xcb4   : > { %16912 = vst [vmem:[#allocation254_spill] sm:$0xff] %v14712_v32  ;;  %v14717_v62 = vpop.eup %10025  ;;  %5879 = vperm.xlu1 %9705, %v14712_v32   ;;  %v14723_v45 = vpop.permute.xlu2 %5869 }
 0xcb5   : > { %6717 = vst [vmem:[#allocation2 + $0x58] sm:$0xff] %v14712_v32  ;;  %v14726_v35 = vpop.eup %10027  ;;  %v6993_v43 = vpop.f32.mrf.mxu2 }
 0xcb6   : > { %v6340_v47 = vpop.xlane.xlu0 %6339  ;;  %v7162_v23 = vpop.f32.mrf.mxu3  ;;  %v14736_v32 = vadd.f32 %v14726_v35, %v14717_v62 }
 0xcb7   : > { %v14730_v0 = vadd.f32 %v6340_v47, %v6272_v42  ;;  %v7163_v20 = vadd.f32 %v7162_v23, %v6993_v43  ;;  %7022 = vmatmul.bf16.gmra.mxu2 %v6773_v5  ;;  %v16918_v42 = vsub.f32 %v16916_v22, %v16917_v17  ;;  %v14744_v44 = vpop.eup %10029  ;;  %v16920_v23 = vld [vmem:[#allocation243_spill] sm:$0xff] }
 0xcb8   : > { %7191 = vmatmul.bf16.gmra.mxu3 %v6774_v63  ;;  %v6276_v43 = vmul.f32 %v16920_v23, %v5060_v6  ;;  %v7324_v25 = vmul.f32 %v14744_v44, %v7260_v15  ;;  %v5062_v6 = vld [vmem:[#allocation3 + $0x30] sm:$0xff]  ;;  %v16924_v23 = vld [vmem:[#allocation157_spill] sm:$0xff]  ;;  %v6775_v15 = vpack.c.bf16 %v14693_v24, %v14665_v14  ;;  %v16925_v24 = vld [vmem:[#allocation194_spill] sm:$0xff] }
 0xcb9   : > { %6592 = vst [vmem:[#allocation3 + $0x150] sm:$0xff] %v14730_v0  ;;  %v7387_v41 = vadd.f32 %v7323_v19, %v7163_v20  ;;  %v5527_v47 = vmul.f32 1.442695, %v16918_v42  ;;  %v10247_v19 = vld [vmem:[#allocation2 + $0x90] sm:$0xff] }
 0xcba   : > { %v5420_v31 = vsub.f32 %v16921_v52, %v10247_v19 }
 0xcbb   : > { %7451 = vst [vmem:[#allocation4 + $0x1b0] sm:$0xff] %v7387_v41  ;;  %6390 = vadd.xlane.f32.xlu2 %v16919_v16  ;;  %10031 = vpow2.f32 %v5527_v47  ;;  %v7261_v47 = vld [vmem:[#allocation4 + $0x110] sm:$0xff] }
 0xcbc   : > { %v5875_v38 = vpop.permute.xlu2 %5874 }
 0xcbd   : > { %v6009_v40 = vsub.f32 %v14394_v51, %v5875_v38  ;;  %v6010_v5 = vsub.f32 %v14387_v39, %v5875_v38  ;;  %v6995_v63 = vpop.f32.mrf.mxu2  ;;  %v5529_v39 = vmul.f32 1.442695, %v5420_v31  ;;  %v16923_v38 = vld [vmem:[#allocation196_spill] sm:$0xff] }
 0xcbe   : > { %v6352_v20 = vpop.xlane.xlu0 %6351  ;;  %v7164_v22 = vpop.f32.mrf.mxu3 }
 0xcbf   : > { %v14750_v41 = vadd.f32 %v6352_v20, %v6276_v43  ;;  %v6259_v16 = vmul.f32 1.442695, %v6009_v40  ;;  %v6261_v17 = vmul.f32 1.442695, %v6010_v5  ;;  %v7165_v42 = vadd.f32 %v7164_v22, %v6995_v63 }
 0xcc0   : > { %v6278_v43 = vmul.f32 %v16924_v23, %v5062_v6  ;;  %v16927_v23 = vld [vmem:[#allocation145_spill] sm:$0xff] }
 0xcc1   : > { %16922 = vst [vmem:[#allocation188_spill] sm:$0xff] %v14750_v41  ;;  %10033 = vpow2.f32 %v6259_v16  ;;  %v7388_v51 = vadd.f32 %v7324_v25, %v7165_v42  ;;  %v14755_v52 = vpop.eup %10031  ;;  %v6776_v25 = vpack.c.bf16 %v14695_v18, %v14668_v49  ;;  %v7262_v18 = vld [vmem:[#allocation4 + $0xa0] sm:$0xff] }
 0xcc2   : > { %6596 = vst [vmem:[#allocation3 + $0xd8] sm:$0xff] %v14750_v41  ;;  %10035 = vpow2.f32 %v6261_v17  ;;  %v7325_v22 = vmul.f32 %v14755_v52, %v7261_v47  ;;  %v16926_v47 = vld [vmem:[#allocation212_spill] sm:$0xff] }
 0xcc3   : > { %7452 = vst [vmem:[#allocation4 + $0x1b8] sm:$0xff] %v7388_v51  ;;  %6399 = vadd.xlane.f32.xlu2 %v16923_v38  ;;  %10037 = vpow2.f32 %v5529_v39  ;;  %v10248_v41 = vld [vmem:[#allocation2 + $0xd0] sm:$0xff] }
 0xcc5   : > { %v6998_v40 = vpop.f32.mrf.mxu2 }
 0xcc6   : > { %v6358_v5 = vpop.xlane.xlu0 %6357  ;;  %v7167_v63 = vpop.f32.mrf.mxu3 }
 0xcc7   : > { %v14760_v20 = vadd.f32 %v6358_v5, %v6278_v43  ;;  %v14764_v31 = vpop.eup %10033  ;;  %v7168_v19 = vadd.f32 %v7167_v63, %v6998_v40  ;;  %7027 = vmatmul.bf16.gmra.mxu2 %v6775_v15  ;;  %v16928_v43 = vsub.f32 %v16927_v23, %v14259_v37  ;;  %v16929_v15 = vld [vmem:[#allocation205_spill] sm:$0xff] }
 0xcc8   : > { %v14767_v16 = vpop.eup %10035  ;;  %7196 = vmatmul.bf16.gmra.mxu3 %v6776_v25  ;;  %v16930_v25 = vld [vmem:[#allocation146_spill] sm:$0xff]  ;;  %v16936_v37 = vld [vmem:[#allocation217_spill] sm:$0xff] }
 0xcc9   : > { %6598 = vst [vmem:[#allocation3 + $0x30] sm:$0xff] %v14760_v20  ;;  %v7389_v17 = vadd.f32 %v7325_v22, %v7168_v19  ;;  %v14772_v14 = vadd.f32 %v14767_v16, %v14764_v31  ;;  %v14775_v49 = vpop.eup %10037  ;;  %v5531_v40 = vmul.f32 1.442695, %v16928_v43  ;;  %v16931_v22 = vld [vmem:[#allocation241_spill] sm:$0xff] }
 0xcca   : > { %v7326_v39 = vmul.f32 %v14775_v49, %v7262_v18  ;;  %v16934_v18 = vld [vmem:[#allocation150_spill] sm:$0xff] }
 0xccb   : > { %7453 = vst [vmem:[#allocation4 + $0x110] sm:$0xff] %v7389_v17  ;;  %6408 = vadd.xlane.f32.xlu2 %v16925_v24  ;;  %v16932_v17 = vld [vmem:[#allocation202_spill] sm:$0xff]  ;;  %10039 = vpow2.f32 %v5531_v40 }
 0xccc   : > { %v6425_v24 = vadd.f32 %v16932_v17, %v16931_v22  ;;  %v16938_v22 = vld [vmem:[#allocation247_spill] sm:$0xff]  ;;  %v16939_v17 = vld [vmem:[#allocation178_spill] sm:$0xff] }
 0xccd   : > { %v7000_v42 = vpop.f32.mrf.mxu2 }
 0xcce   : > { %v7169_v51 = vpop.f32.mrf.mxu3 }
 0xccf   : > { %v7170_v6 = vadd.f32 %v7169_v51, %v7000_v42  ;;  %v16933_v42 = vld [vmem:[#allocation262_spill] sm:$0xff] }
 0xcd0   : > { %v5422_v51 = vsub.f32 %v16933_v42, %v10248_v41 }
 0xcd1   : > { %v7390_v38 = vadd.f32 %v7326_v39, %v7170_v6  ;;  %v14790_v43 = vpop.eup %10039 }
 0xcd2   : > { %v5533_v23 = vmul.f32 1.442695, %v5422_v51  ;;  %v16940_v51 = vld [vmem:[#allocation242_spill] sm:$0xff] }
 0xcd3   : > { %7454 = vst [vmem:[#allocation4 + $0xa0] sm:$0xff] %v7390_v38  ;;  %6417 = vadd.xlane.f32.xlu2 %v16926_v47  ;;  %v16935_v38 = vld [vmem:[#allocation216_spill] sm:$0xff] }
 0xcd4   : > { %v6341_v47 = vadd.f32 %v16936_v37, %v16935_v38  ;;  %v6007_v38 = vsub.f32 %v14366_v34, %v14723_v45 }
 0xcd8   : > { %v5865_v5 = vpop.permute.xlu0 %5864 }
 0xcd9   : > { %v6005_v63 = vsub.f32 %v16929_v15, %v5865_v5  ;;  %v6006_v19 = vsub.f32 %v16930_v25, %v5865_v5  ;;  %v7263_v5 = vld [vmem:[#allocation4 + $0x118] sm:$0xff]  ;;  %v16937_v25 = vld [vmem:[#allocation246_spill] sm:$0xff] }
 0xcda   : > { %6366 = vadd.xlane.f32.xlu0 %v16934_v18  ;;  %v6434_v41 = vadd.f32 %v16938_v22, %v16937_v25  ;;  %v16941_v18 = vld [vmem:[#allocation154_spill] sm:$0xff]  ;;  %v7264_v25 = vld [vmem:[#allocation4 + $0x198] sm:$0xff] }
 0xcdb   : > { %v6251_v6 = vmul.f32 1.442695, %v6005_v63  ;;  %v6253_v39 = vmul.f32 1.442695, %v6006_v19  ;;  %6426 = vadd.xlane.f32.xlu2 %v6425_v24  ;;  %v7327_v24 = vmul.f32 %v14790_v43, %v7263_v5  ;;  %v16942_v22 = vld [vmem:[#allocation165_spill] sm:$0xff] }
 0xcdd   : > { %10041 = vpow2.f32 %v6251_v6  ;;  %v6359_v6 = vadd.f32 %v16941_v18, %v16940_v51  ;;  %v16946_v18 = vld [vmem:[#allocation172_spill] sm:$0xff] }
 0xcde   : > { %10043 = vpow2.f32 %v6253_v39  ;;  %6342 = vadd.xlane.f32.xlu1 %v6341_v47 }
 0xcdf   : > { %10045 = vpow2.f32 %v5533_v23 }
 0xce1   : > { %v7003_v15 = vpop.f32.mrf.mxu2 }
 0xce2   : > { %v7172_v40 = vpop.f32.mrf.mxu3  ;;  %6375 = vadd.xlane.f32.xlu0 %v16939_v17 }
 0xce3   : > { %v10042_v63 = vpop.eup %10041  ;;  %v7173_v19 = vadd.f32 %v7172_v40, %v7003_v15  ;;  %6435 = vadd.xlane.f32.xlu2 %v6434_v41  ;;  %v6008_v15 = vsub.f32 %v14415_v21, %v14723_v45  ;;  %v6255_v40 = vmul.f32 1.442695, %v6007_v38  ;;  %v10249_v21 = vld [vmem:[#allocation2 + $0xb8] sm:$0xff] }
 0xce4   : > { %v10044_v42 = vpop.eup %10043  ;;  %v6777_v39 = vpack.c.bf16 %v10042_v63, %v14717_v62  ;;  %v16943_v62 = vld [vmem:[#allocation192_spill] sm:$0xff]  ;;  %v16945_v45 = vld [vmem:[#allocation209_spill] sm:$0xff] }
 0xce5   : > { %v7391_v37 = vadd.f32 %v7327_v24, %v7173_v19  ;;  %v6778_v47 = vpack.c.bf16 %v10044_v42, %v14726_v35  ;;  %v14802_v23 = vadd.f32 %v10044_v42, %v10042_v63  ;;  %v14806_v5 = vpop.eup %10045  ;;  %v6383_v41 = vadd.f32 %v16943_v62, %v16942_v22  ;;  %v16944_v24 = vld [vmem:[#allocation238_spill] sm:$0xff]  ;;  %v16949_v22 = vld [vmem:[#allocation189_spill] sm:$0xff] }
 0xce6   : > { %6360 = vadd.xlane.f32.xlu1 %v6359_v6  ;;  %7032 = vmatmul.bf16.gmra.mxu2 %v6777_v39  ;;  %v6257_v17 = vmul.f32 1.442695, %v6008_v15  ;;  %v7328_v63 = vmul.f32 %v14806_v5, %v7264_v25  ;;  %v5423_v42 = vsub.f32 %v16945_v45, %v10249_v21  ;;  %10047 = vpow2.f32 %v6255_v40  ;;  %v16947_v39 = vld [vmem:[#allocation144_spill] sm:$0xff]  ;;  %v16948_v15 = vld [vmem:[#allocation265_spill] sm:$0xff] }
 0xce7   : > { %7455 = vst [vmem:[#allocation4 + $0x118] sm:$0xff] %v7391_v37  ;;  %7201 = vmatmul.bf16.gmra.mxu3 %v6778_v47  ;;  %v10250_v47 = vld [vmem:[#allocation2 + $0x88] sm:$0xff]  ;;  %v16950_v62 = vld [vmem:[#allocation149_spill] sm:$0xff] }
 0xce8   : > { %10049 = vpow2.f32 %v6257_v17  ;;  %v5535_v6 = vmul.f32 1.442695, %v5423_v42  ;;  %v5424_v25 = vsub.f32 %v16948_v15, %v10250_v47  ;;  %v16952_v42 = vld [vmem:[#allocation170_spill] sm:$0xff]  ;;  %v16955_v47 = vld [vmem:[#allocation269_spill] sm:$0xff] }
 0xce9   : > { %v7005_v34 = vpop.f32.mrf.mxu2 }
 0xcea   : > { %v7174_v19 = vpop.f32.mrf.mxu3  ;;  %6384 = vadd.xlane.f32.xlu0 %v6383_v41  ;;  %10051 = vpow2.f32 %v5535_v6  ;;  %v6377_v41 = vadd.f32 %v16950_v62, %v16949_v22  ;;  %v5537_v17 = vmul.f32 1.442695, %v5424_v25  ;;  %v16957_v62 = vld [vmem:[#allocation253_spill] sm:$0xff] }
 0xceb   : > { %v7175_v35 = vadd.f32 %v7174_v19, %v7005_v34  ;;  %6444 = vadd.xlane.f32.xlu2 %v16944_v24  ;;  %v5058_v24 = vld [vmem:[#allocation3 + $0x160] sm:$0xff] }
 0xcec   : > { %v14815_v38 = vpop.eup %10047  ;;  %10053 = vpow2.f32 %v5537_v17  ;;  %v10251_v17 = vld [vmem:[#allocation2 + $0x1c8] sm:$0xff] }
 0xced   : > { %v7392_v51 = vadd.f32 %v7328_v63, %v7175_v35  ;;  %v6779_v40 = vpack.c.bf16 %v14764_v31, %v14815_v38  ;;  %v16951_v35 = vld [vmem:[#allocation201_spill] sm:$0xff] }
 0xcee   : > { %6369 = vadd.xlane.f32.xlu1 %v16946_v18  ;;  %v14818_v37 = vpop.eup %10049  ;;  %v7265_v63 = vld [vmem:[#allocation4 + $0x178] sm:$0xff] }
 0xcef   : > { %7456 = vst [vmem:[#allocation4 + $0x198] sm:$0xff] %v7392_v51  ;;  %v6780_v34 = vpack.c.bf16 %v14767_v16, %v14818_v37  ;;  %v6274_v51 = vmul.f32 %v16952_v42, %v5058_v24  ;;  %v16953_v18 = vld [vmem:[#allocation181_spill] sm:$0xff]  ;;  %v16961_v42 = vld [vmem:[#allocation176_spill] sm:$0xff] }
 0xcf0   : > { %v14829_v19 = vpop.eup %10051  ;;  %v16959_v24 = vld [vmem:[#allocation153_spill] sm:$0xff] }
 0xcf1   : > { %v7329_v16 = vmul.f32 %v14829_v19, %v7265_v63 }
 0xcf2   : > { %6393 = vadd.xlane.f32.xlu0 %v16947_v39  ;;  %v14840_v22 = vpop.eup %10053 }
 0xcf3   : > { %6453 = vadd.xlane.f32.xlu2 %v14442_v8  ;;  %v6461_v8 = vadd.f32 %v14507_v28, %v14503_v59  ;;  %v16954_v28 = vld [vmem:[#allocation163_spill] sm:$0xff] }
 0xcf4   : > { %v16956_v15 = vsub.f32 %v16954_v28, %v16955_v47  ;;  %v16962_v47 = vld [vmem:[#allocation261_spill] sm:$0xff] }
 0xcf6   : > { %6378 = vadd.xlane.f32.xlu1 %v6377_v41  ;;  %7037 = vmatmul.bf16.gmra.mxu2 %v6779_v40  ;;  %v5539_v25 = vmul.f32 1.442695, %v16956_v15  ;;  %v7266_v41 = vld [vmem:[#allocation4 + $0x58] sm:$0xff]  ;;  %v5059_v40 = vld [vmem:[#allocation3 + $0xd0] sm:$0xff]  ;;  %v7267_v15 = vld [vmem:[#allocation4 + $0x8] sm:$0xff] }
 0xcf7   : > { %7206 = vmatmul.bf16.gmra.mxu3 %v6780_v34 }
 0xcf8   : > { %10055 = vpow2.f32 %v5539_v25  ;;  %v5061_v25 = vld [vmem:[#allocation3 + $0x1e0] sm:$0xff] }
 0xcfa   : > { %6402 = vadd.xlane.f32.xlu0 %v16951_v35 }
 0xcfb   : > { %6462 = vadd.xlane.f32.xlu2 %v6461_v8  ;;  %v7008_v21 = vpop.f32.mrf.mxu2  ;;  %v16958_v8 = vld [vmem:[#allocation240_spill] sm:$0xff] }
 0xcfc   : > { %v7177_v31 = vpop.f32.mrf.mxu3  ;;  %v5426_v35 = vsub.f32 %v16958_v8, %v10251_v17  ;;  %v16963_v17 = vld [vmem:[#allocation179_spill] sm:$0xff] }
 0xcfd   : > { %v7178_v45 = vadd.f32 %v7177_v31, %v7008_v21  ;;  %v16960_v21 = vld [vmem:[#allocation159_spill] sm:$0xff]  ;;  %v6277_v8 = vmul.f32 %v16963_v17, %v5061_v25  ;;  %v16968_v25 = vld [vmem:[#allocation173_spill] sm:$0xff]  ;;  %v16969_v17 = vld [vmem:[#allocation230_spill] sm:$0xff] }
 0xcfe   : > { %6387 = vadd.xlane.f32.xlu1 %v16953_v18  ;;  %v6346_v6 = vpop.xlane.xlu2 %6345  ;;  %v6395_v31 = vadd.f32 %v16960_v21, %v16959_v24  ;;  %v14852_v28 = vpop.eup %10055 }
 0xcff   : > { %v7393_v39 = vadd.f32 %v7329_v16, %v7178_v45  ;;  %v14835_v59 = vadd.f32 %v6346_v6, %v6274_v51  ;;  %v7330_v16 = vmul.f32 %v14840_v22, %v7266_v41  ;;  %v6275_v51 = vmul.f32 %v16961_v42, %v5059_v40 }
 0xd01   : > { %7457 = vst [vmem:[#allocation4 + $0x178] sm:$0xff] %v7393_v39 }
 0xd02   : > { %6594 = vst [vmem:[#allocation3 + $0x160] sm:$0xff] %v14835_v59  ;;  %6411 = vadd.xlane.f32.xlu0 %v16957_v62 }
 0xd03   : > { %6471 = vadd.xlane.f32.xlu2 %v14533_v12  ;;  %v7010_v34 = vpop.f32.mrf.mxu2  ;;  %v5541_v12 = vmul.f32 1.442695, %v5426_v35  ;;  %v16964_v35 = vld [vmem:[#allocation182_spill] sm:$0xff] }
 0xd04   : > { %v7179_v63 = vpop.f32.mrf.mxu3 }
 0xd05   : > { %v7180_v45 = vadd.f32 %v7179_v63, %v7010_v34  ;;  %10057 = vpow2.f32 %v5541_v12  ;;  %v7331_v34 = vmul.f32 %v14852_v28, %v7267_v15 }
 0xd06   : > { %6396 = vadd.xlane.f32.xlu1 %v6395_v31  ;;  %v6349_v18 = vpop.xlane.xlu2 %6348 }
 0xd07   : > { %v7394_v6 = vadd.f32 %v7330_v16, %v7180_v45  ;;  %v14850_v39 = vadd.f32 %v6349_v18, %v6275_v51  ;;  %v7268_v45 = vld [vmem:[#allocation4 + $0x1c0] sm:$0xff]  ;;  %v5064_v16 = vld [vmem:[#allocation3 + $0x50] sm:$0xff] }
 0xd08   : > { %v16966_v18 = vld [vmem:[#allocation162_spill] sm:$0xff] }
 0xd09   : > { %7458 = vst [vmem:[#allocation4 + $0x58] sm:$0xff] %v7394_v6  ;;  %v16967_v6 = vld [vmem:[#allocation256_spill] sm:$0xff] }
 0xd0a   : > { %6595 = vst [vmem:[#allocation3 + $0xd0] sm:$0xff] %v14850_v39  ;;  %6420 = vadd.xlane.f32.xlu0 %v16962_v47  ;;  %v6413_v12 = vadd.f32 %v16967_v6, %v16966_v18 }
 0xd0b   : > { %6480 = vadd.xlane.f32.xlu2 %v14615_v3  ;;  %v7013_v62 = vpop.f32.mrf.mxu2  ;;  %v14862_v31 = vpop.eup %10057  ;;  %v16965_v3 = vld [vmem:[#allocation264_spill] sm:$0xff] }
 0xd0c   : > { %v7182_v41 = vpop.f32.mrf.mxu3  ;;  %v7332_v15 = vmul.f32 %v14862_v31, %v7268_v45  ;;  %v16972_v45 = vld [vmem:[#allocation171_spill] sm:$0xff] }
 0xd0d   : > { %v7183_v40 = vadd.f32 %v7182_v41, %v7013_v62  ;;  %v6280_v62 = vmul.f32 %v16968_v25, %v5064_v16  ;;  %v16975_v25 = vld [vmem:[#allocation266_spill] sm:$0xff] }
 0xd0e   : > { %6405 = vadd.xlane.f32.xlu1 %v16964_v35  ;;  %v6355_v63 = vpop.xlane.xlu2 %6354 }
 0xd0f   : > { %v7395_v24 = vadd.f32 %v7331_v34, %v7183_v40  ;;  %v14860_v21 = vadd.f32 %v6355_v63, %v6277_v8  ;;  %v16970_v8 = vld [vmem:[#allocation183_spill] sm:$0xff]  ;;  %v10252_v63 = vld [vmem:[#allocation2 + $0x170] sm:$0xff] }
 0xd10   : > { %v6437_v35 = vadd.f32 %v16970_v8, %v16969_v17 }
 0xd11   : > { %7459 = vst [vmem:[#allocation4 + $0x8] sm:$0xff] %v7395_v24  ;;  %v16971_v24 = vld [vmem:[#allocation207_spill] sm:$0xff] }
 0xd12   : > { %6597 = vst [vmem:[#allocation3 + $0x1e0] sm:$0xff] %v14860_v21  ;;  %6429 = vadd.xlane.f32.xlu0 %v16965_v3  ;;  %v5427_v3 = vsub.f32 %v16971_v24, %v10252_v63  ;;  %v16977_v24 = vld [vmem:[#allocation210_spill] sm:$0xff] }
 0xd13   : > { %v7015_v42 = vpop.f32.mrf.mxu2  ;;  %6489 = vadd.xlane.f32.xlu2 %v14633_v56  ;;  %v5067_v56 = vld [vmem:[#allocation3 + $0x190] sm:$0xff] }
 0xd14   : > { %v7184_v51 = vpop.f32.mrf.mxu3  ;;  %v6283_v16 = vmul.f32 %v16972_v45, %v5067_v56  ;;  %v5543_v18 = vmul.f32 1.442695, %v5427_v3 }
 0xd15   : > { %v7185_v47 = vadd.f32 %v7184_v51, %v7015_v42  ;;  %v16973_v42 = vld [vmem:[#allocation208_spill] sm:$0xff] }
 0xd16   : > { %6414 = vadd.xlane.f32.xlu1 %v6413_v12  ;;  %v6364_v41 = vpop.xlane.xlu2 %6363  ;;  %v10253_v12 = vld [vmem:[#allocation2 + $0x178] sm:$0xff]  ;;  %10059 = vpow2.f32 %v5543_v18 }
 0xd17   : > { %v7396_v40 = vadd.f32 %v7332_v15, %v7185_v47  ;;  %v14871_v34 = vadd.f32 %v6364_v41, %v6280_v62  ;;  %v16974_v47 = vld [vmem:[#allocation199_spill] sm:$0xff]  ;;  %v5070_v41 = vld [vmem:[#allocation3 + $0x38] sm:$0xff] }
 0xd18   : > { %v5428_v15 = vsub.f32 %v16974_v47, %v10253_v12  ;;  %v7269_v12 = vld [vmem:[#allocation4 + $0x1f8] sm:$0xff]  ;;  %v6515_v47 = vadd.f32 %v14818_v37, %v14815_v38  ;;  %v16981_v38 = vld [vmem:[#allocation250_spill] sm:$0xff] }
 0xd19   : > { %7460 = vst [vmem:[#allocation4 + $0x1c0] sm:$0xff] %v7396_v40  ;;  %v16982_v37 = vld [vmem:[#allocation234_spill] sm:$0xff] }
 0xd1a   : > { %6600 = vst [vmem:[#allocation3 + $0x50] sm:$0xff] %v14871_v34  ;;  %6438 = vadd.xlane.f32.xlu0 %v6437_v35  ;;  %v16976_v35 = vld [vmem:[#allocation258_spill] sm:$0xff]  ;;  %v5545_v63 = vmul.f32 1.442695, %v5428_v15 }
 0xd1b   : > { %6498 = vadd.xlane.f32.xlu2 %v14593_v48  ;;  %v6286_v56 = vmul.f32 %v16976_v35, %v5070_v41  ;;  %v16983_v35 = vsub.f32 %v16981_v38, %v16982_v37 }
 0xd1e   : > { %6423 = vadd.xlane.f32.xlu1 %v16973_v42  ;;  %v6373_v51 = vpop.xlane.xlu2 %6372 }
 0xd1f   : > { %v14880_v6 = vadd.f32 %v6373_v51, %v6283_v16 }
 0xd21   : > { %6603 = vst [vmem:[#allocation3 + $0x190] sm:$0xff] %v14880_v6 }
 0xd22   : > { %6447 = vadd.xlane.f32.xlu0 %v16975_v25  ;;  %v5885_v62 = vpop.permute.xlu0 %5884 }
 0xd23   : > { %v6013_v48 = vsub.f32 %v14522_v61, %v5885_v62  ;;  %v6014_v40 = vsub.f32 %v14519_v10, %v5885_v62  ;;  %6507 = vadd.xlane.f32.xlu2 %v14703_v30  ;;  %v6455_v10 = vadd.f32 %v14452_v46, %v14450_v1  ;;  %v14896_v61 = vpop.eup %10059  ;;  %v16979_v62 = vld [vmem:[#allocation263_spill] sm:$0xff] }
 0xd24   : > { %v7333_v1 = vmul.f32 %v14896_v61, %v7269_v12  ;;  %v10254_v12 = vld [vmem:[#allocation2 + $0x190] sm:$0xff] }
 0xd25   : > { %v6267_v17 = vmul.f32 1.442695, %v6013_v48  ;;  %v6269_v8 = vmul.f32 1.442695, %v6014_v40 }
 0xd26   : > { %6432 = vadd.xlane.f32.xlu1 %v16977_v24  ;;  %v5880_v3 = vpop.permute.xlu1 %5879  ;;  %v6382_v45 = vpop.xlane.xlu2 %6381 }
 0xd27   : > { %10061 = vpow2.f32 %v6267_v17  ;;  %v6011_v16 = vsub.f32 %v14498_v55, %v5880_v3  ;;  %v6012_v42 = vsub.f32 %v14527_v58, %v5880_v3  ;;  %v14892_v51 = vadd.f32 %v6382_v45, %v6286_v56  ;;  %v5073_v58 = vld [vmem:[#allocation3 + $0x1a8] sm:$0xff]  ;;  %v16980_v17 = vld [vmem:[#allocation222_spill] sm:$0xff]  ;;  %v7270_v45 = vld [vmem:[#allocation4 + $0x130] sm:$0xff] }
 0xd28   : > { %10063 = vpow2.f32 %v6269_v8  ;;  %v6289_v41 = vmul.f32 %v16979_v62, %v5073_v58  ;;  %v5547_v56 = vmul.f32 1.442695, %v16983_v35  ;;  %v7271_v35 = vld [vmem:[#allocation4 + $0x120] sm:$0xff] }
 0xd29   : > { %16978 = vst [vmem:[#allocation255_spill] sm:$0xff] %v14892_v51  ;;  %v6263_v30 = vmul.f32 1.442695, %v6011_v16  ;;  %v6265_v18 = vmul.f32 1.442695, %v6012_v42  ;;  %10065 = vpow2.f32 %v5545_v63 }
 0xd2a   : > { %6606 = vst [vmem:[#allocation3 + $0x38] sm:$0xff] %v14892_v51  ;;  %v7018_v55 = vpop.f32.mrf.mxu2  ;;  %6456 = vadd.xlane.f32.xlu0 %v6455_v10 }
 0xd2b   : > { %10067 = vpow2.f32 %v6263_v30  ;;  %v7187_v15 = vpop.f32.mrf.mxu3  ;;  %6516 = vadd.xlane.f32.xlu2 %v6515_v47  ;;  %v16984_v47 = vld [vmem:[#allocation143_spill] sm:$0xff] }
 0xd2c   : > { %10069 = vpow2.f32 %v6265_v18  ;;  %v7188_v25 = vadd.f32 %v7187_v15, %v7018_v55  ;;  %v5076_v18 = vld [vmem:[#allocation3 + $0x78] sm:$0xff]  ;;  %v5430_v55 = vsub.f32 %v16984_v47, %v10254_v12  ;;  %v7272_v47 = vld [vmem:[#allocation4 + $0x10] sm:$0xff] }
 0xd2d   : > { %v10062_v46 = vpop.eup %10061  ;;  %10071 = vpow2.f32 %v5547_v56 }
 0xd2e   : > { %v10064_v48 = vpop.eup %10063  ;;  %v7397_v40 = vadd.f32 %v7333_v1, %v7188_v25  ;;  %6441 = vadd.xlane.f32.xlu1 %v16980_v17  ;;  %v6391_v8 = vpop.xlane.xlu2 %6390 }
 0xd2f   : > { %v6545_v63 = vadd.f32 %v6391_v8, %v6289_v41  ;;  %v14907_v24 = vpop.eup %10065  ;;  %v6524_v16 = vadd.f32 %v10064_v48, %v10062_v46  ;;  %v6449_v41 = vadd.f32 %v14436_v9, %v14434_v57  ;;  %v5549_v8 = vmul.f32 1.442695, %v5430_v55 }
 0xd30   : > { %7461 = vst [vmem:[#allocation4 + $0x1f8] sm:$0xff] %v7397_v40  ;;  %v7334_v62 = vmul.f32 %v14907_v24, %v7270_v45  ;;  %v16986_v45 = vld [vmem:[#allocation229_spill] sm:$0xff] }
 0xd31   : > { %v10068_v3 = vpop.eup %10067  ;;  %6609 = vst [vmem:[#allocation3 + $0x1a8] sm:$0xff] %v6545_v63  ;;  %v5079_v63 = vld [vmem:[#allocation3 + $0x58] sm:$0xff]  ;;  %10073 = vpow2.f32 %v5549_v8 }
 0xd32   : > { %v10070_v42 = vpop.eup %10069  ;;  %v7020_v10 = vpop.f32.mrf.mxu2  ;;  %6465 = vadd.xlane.f32.xlu0 %v14514_v36  ;;  %v6781_v30 = vpack.c.bf16 %v10062_v46, %v10068_v3  ;;  %v16985_v36 = vld [vmem:[#allocation203_spill] sm:$0xff] }
 0xd33   : > { %v7189_v58 = vpop.f32.mrf.mxu3  ;;  %6525 = vadd.xlane.f32.xlu2 %v6524_v16  ;;  %v6782_v15 = vpack.c.bf16 %v10064_v48, %v10070_v42  ;;  %v14911_v25 = vadd.f32 %v10070_v42, %v10068_v3  ;;  %v6292_v46 = vmul.f32 %v16985_v36, %v5076_v18  ;;  %v6473_v48 = vadd.f32 %v14602_v27, %v14598_v11  ;;  %v14919_v37 = vpop.eup %10071 }
 0xd34   : > { %v7190_v1 = vadd.f32 %v7189_v58, %v7020_v10  ;;  %7042 = vmatmul.bf16.gmra.mxu2 %v6781_v30  ;;  %v7335_v3 = vmul.f32 %v14919_v37, %v7271_v35  ;;  %v6295_v16 = vmul.f32 %v16986_v45, %v5079_v63  ;;  %v16988_v10 = vld [vmem:[#allocation270_spill] sm:$0xff]  ;;  %v16989_v11 = vsub.f32 %v14469_v4, %v14473_v60  ;;  %v7273_v35 = vld [vmem:[#allocation4 + $0x170] sm:$0xff] }
 0xd35   : > { %7211 = vmatmul.bf16.gmra.mxu3 %v6782_v15  ;;  %v5082_v58 = vld [vmem:[#allocation3 + $0x1a0] sm:$0xff]  ;;  %v10255_v15 = vld [vmem:[#allocation2 + $0x38] sm:$0xff]  ;;  %v6467_v60 = vadd.f32 %v14543_v13, %v14541_v26 }
 0xd36   : > { %v7398_v40 = vadd.f32 %v7334_v62, %v7190_v1  ;;  %6450 = vadd.xlane.f32.xlu1 %v6449_v41  ;;  %v6400_v17 = vpop.xlane.xlu2 %6399  ;;  %v5551_v27 = vmul.f32 1.442695, %v16989_v11  ;;  %v16990_v1 = vld [vmem:[#allocation187_spill] sm:$0xff] }
 0xd37   : > { %v6548_v38 = vadd.f32 %v6400_v17, %v6292_v46  ;;  %v14930_v12 = vpop.eup %10073  ;;  %v5432_v62 = vsub.f32 %v16990_v1, %v10255_v15  ;;  %v16991_v46 = vld [vmem:[#allocation221_spill] sm:$0xff]  ;;  %v7274_v1 = vld [vmem:[#allocation4 + $0x20] sm:$0xff] }
 0xd38   : > { %7462 = vst [vmem:[#allocation4 + $0x130] sm:$0xff] %v7398_v40  ;;  %10075 = vpow2.f32 %v5551_v27  ;;  %v7336_v4 = vmul.f32 %v14930_v12, %v7272_v47  ;;  %v6298_v40 = vmul.f32 %v16991_v46, %v5082_v58  ;;  %v16993_v47 = vld [vmem:[#allocation166_spill] sm:$0xff] }
 0xd39   : > { %6612 = vst [vmem:[#allocation3 + $0x78] sm:$0xff] %v6548_v38  ;;  %v5553_v38 = vmul.f32 1.442695, %v5432_v62  ;;  %v5068_v62 = vld [vmem:[#allocation3 + $0x8] sm:$0xff] }
 0xd3a   : > { %v7023_v56 = vpop.f32.mrf.mxu2  ;;  %6474 = vadd.xlane.f32.xlu0 %v6473_v48 }
 0xd3b   : > { %v7192_v57 = vpop.f32.mrf.mxu3  ;;  %10077 = vpow2.f32 %v5553_v38 }
 0xd3c   : > { %v7193_v9 = vadd.f32 %v7192_v57, %v7023_v56  ;;  %v5065_v56 = vld [vmem:[#allocation3 + $0x1f0] sm:$0xff]  ;;  %v5085_v57 = vld [vmem:[#allocation3 + $0x168] sm:$0xff]  ;;  %10079 = vrcp.f32 %v14730_v0 }
 0xd3d   : > { %10081 = vrcp.f32 %v14850_v39 }
 0xd3e   : > { %v14923_v42 = vadd.f32 %v7335_v3, %v7193_v9  ;;  %6459 = vadd.xlane.f32.xlu1 %v16988_v10  ;;  %v6409_v30 = vpop.xlane.xlu2 %6408  ;;  %v16992_v3 = vld [vmem:[#allocation190_spill] sm:$0xff]  ;;  %v6301_v10 = vmul.f32 %v14428_v2, %v5085_v57 }
 0xd3f   : > { %v6551_v18 = vadd.f32 %v6409_v30, %v6295_v16  ;;  %v6281_v45 = vmul.f32 %v16992_v3, %v5065_v56  ;;  %v5057_v30 = vld [vmem:[#allocation3 + $0x70] sm:$0xff]  ;;  %v5071_v57 = vld [vmem:[#allocation3 + $0xe0] sm:$0xff] }
 0xd40   : > { %16987 = vst [vmem:[#allocation227_spill] sm:$0xff] %v14923_v42  ;;  %v5074_v3 = vld [vmem:[#allocation3 + $0xa0] sm:$0xff] }
 0xd41   : > { %7463 = vst [vmem:[#allocation4 + $0x120] sm:$0xff] %v14923_v42 }
 0xd42   : > { %6615 = vst [vmem:[#allocation3 + $0x58] sm:$0xff] %v6551_v18  ;;  %v7025_v55 = vpop.f32.mrf.mxu2  ;;  %6483 = vadd.xlane.f32.xlu0 %v14625_v53  ;;  %v14938_v53 = vpop.eup %10075 }
 0xd43   : > { %v7194_v41 = vpop.f32.mrf.mxu3  ;;  %v7337_v13 = vmul.f32 %v14938_v53, %v7273_v35  ;;  %v14949_v58 = vpop.eup %10077 }
 0xd44   : > { %v7195_v36 = vadd.f32 %v7194_v41, %v7025_v55  ;;  %v6273_v55 = vmul.f32 %v16993_v47, %v5057_v30  ;;  %v7338_v46 = vmul.f32 %v14949_v58, %v7274_v1  ;;  %v5080_v30 = vld [vmem:[#allocation3 + $0x48] sm:$0xff] }
 0xd45   : > { %v16998_v47 = vld [vmem:[#allocation251_spill] sm:$0xff] }
 0xd46   : > { %v7400_v17 = vadd.f32 %v7336_v4, %v7195_v36  ;;  %6468 = vadd.xlane.f32.xlu1 %v6467_v60  ;;  %v6418_v8 = vpop.xlane.xlu2 %6417  ;;  %v5088_v36 = vld [vmem:[#allocation3 + $0x28] sm:$0xff]  ;;  %v14953_v4 = vpop.eup %10079 }
 0xd47   : > { %v6554_v48 = vadd.f32 %v6418_v8, %v6298_v40  ;;  %v16994_v40 = vld [vmem:[#allocation193_spill] sm:$0xff]  ;;  %v6304_v38 = vmul.f32 %v14501_v50, %v5088_v36  ;;  %v16996_v50 = vld [vmem:[#allocation164_spill] sm:$0xff] }
 0xd48   : > { %7464 = vst [vmem:[#allocation4 + $0x10] sm:$0xff] %v7400_v17  ;;  %v6284_v17 = vmul.f32 %v16994_v40, %v5068_v62  ;;  %v5078_v62 = vld [vmem:[#allocation3 + $0x80] sm:$0xff]  ;;  %v17001_v40 = vld [vmem:[#allocation195_spill] sm:$0xff] }
 0xd49   : > { %6618 = vst [vmem:[#allocation3 + $0x1a0] sm:$0xff] %v6554_v48  ;;  %v5063_v48 = vld [vmem:[#allocation3 + $0x148] sm:$0xff] }
 0xd4a   : > { %v7028_v63 = vpop.f32.mrf.mxu2  ;;  %6492 = vadd.xlane.f32.xlu0 %v14685_v33 }
 0xd4b   : > { %v7197_v9 = vpop.f32.mrf.mxu3 }
 0xd4c   : > { %v7198_v26 = vadd.f32 %v7197_v9, %v7028_v63  ;;  %v5066_v9 = vld [vmem:[#allocation3 + $0x130] sm:$0xff] }
 0xd4d   : > { %v6367_v16 = vpop.xlane.xlu0 %6366 }
 0xd4e   : > { %v7401_v11 = vadd.f32 %v7337_v13, %v7198_v26  ;;  %v14945_v27 = vadd.f32 %v6367_v16, %v6281_v45  ;;  %6477 = vadd.xlane.f32.xlu1 %v14610_v54  ;;  %v6427_v33 = vpop.xlane.xlu2 %6426  ;;  %v5069_v26 = vld [vmem:[#allocation3 + $0x88] sm:$0xff]  ;;  %v5072_v45 = vld [vmem:[#allocation3 + $0x10] sm:$0xff]  ;;  %v6279_v16 = vmul.f32 %v16996_v50, %v5063_v48  ;;  %v5081_v48 = vld [vmem:[#allocation3 + $0x40] sm:$0xff] }
 0xd4f   : > { %v6557_v18 = vadd.f32 %v6427_v33, %v6301_v10  ;;  %v5077_v10 = vld [vmem:[#allocation3 + $0x108] sm:$0xff]  ;;  %v16997_v33 = vld [vmem:[#allocation213_spill] sm:$0xff] }
 0xd50   : > { %7465 = vst [vmem:[#allocation4 + $0x170] sm:$0xff] %v7401_v11  ;;  %v14968_v11 = vpop.eup %10081 }
 0xd51   : > { %6601 = vst [vmem:[#allocation3 + $0x1f0] sm:$0xff] %v14945_v27  ;;  %v6343_v15 = vpop.xlane.xlu1 %6342 }
 0xd52   : > { %6621 = vst [vmem:[#allocation3 + $0x168] sm:$0xff] %v6557_v18  ;;  %v6529_v2 = vadd.f32 %v6343_v15, %v6273_v55  ;;  %v7030_v41 = vpop.f32.mrf.mxu2  ;;  %6501 = vadd.xlane.f32.xlu0 %v14662_v29  ;;  %v7602_v29 = vmul.f32 %v14953_v4, %v14730_v0  ;;  %v5075_v0 = vld [vmem:[#allocation3 + $0x1c0] sm:$0xff]  ;;  %v6287_v18 = vmul.f32 %v16997_v33, %v5071_v57  ;;  %v16999_v15 = vld [vmem:[#allocation197_spill] sm:$0xff]  ;;  %v17003_v57 = vld [vmem:[#allocation215_spill] sm:$0xff] }
 0xd53   : > { %v7199_v54 = vpop.f32.mrf.mxu3  ;;  %v14973_v55 = vmul.f32 %v16998_v47, %v5066_v9  ;;  %v14976_v1 = vmul.f32 %v16999_v15, %v5069_v26  ;;  %v14988_v9 = vmul.f32 %v17003_v57, %v5077_v10  ;;  %v17004_v26 = vld [vmem:[#allocation239_spill] sm:$0xff]  ;;  %v17007_v47 = vld [vmem:[#allocation169_spill] sm:$0xff] }
 0xd54   : > { %6593 = vst [vmem:[#allocation3 + $0x70] sm:$0xff] %v6529_v2  ;;  %10083 = vrcp.f32 %v6529_v2  ;;  %v7200_v60 = vadd.f32 %v7199_v54, %v7030_v41  ;;  %v5084_v41 = vld [vmem:[#allocation3 + $0xe8] sm:$0xff]  ;;  %v7666_v54 = vsub.f32 2.0, %v7602_v29  ;;  %v14991_v50 = vmul.f32 %v17004_v26, %v5080_v30  ;;  %v17011_v30 = vld [vmem:[#allocation268_spill] sm:$0xff] }
 0xd55   : > { %v6376_v8 = vpop.xlane.xlu0 %6375  ;;  %v17005_v29 = vld [vmem:[#allocation223_spill] sm:$0xff] }
 0xd56   : > { %v14961_v35 = vadd.f32 %v7338_v46, %v7200_v60  ;;  %v14963_v56 = vadd.f32 %v6376_v8, %v6284_v17  ;;  %6486 = vadd.xlane.f32.xlu1 %v14577_v7  ;;  %v6436_v63 = vpop.xlane.xlu2 %6435  ;;  %v5091_v46 = vld [vmem:[#allocation3 + $0x1e8] sm:$0xff]  ;;  %v14982_v17 = vmul.f32 %v17001_v40, %v5074_v3  ;;  %v5086_v40 = vld [vmem:[#allocation3 + $0x158] sm:$0xff]  ;;  %v7730_v42 = vmul.f32 %v14953_v4, %v7666_v54 }
 0xd57   : > { %v6560_v13 = vadd.f32 %v6436_v63, %v6304_v38  ;;  %v17002_v8 = vld [vmem:[#allocation211_spill] sm:$0xff] }
 0xd58   : > { %16995 = vst [vmem:[#allocation218_spill] sm:$0xff] %v14961_v35  ;;  %v14985_v38 = vmul.f32 %v17002_v8, %v5072_v45  ;;  %v17006_v33 = vld [vmem:[#allocation167_spill] sm:$0xff]  ;;  %v17009_v45 = vld [vmem:[#allocation226_spill] sm:$0xff]  ;;  %v15005_v8 = vmul.f32 %v17011_v30, %v5084_v41  ;;  %v17017_v41 = vld [vmem:[#allocation249_spill] sm:$0xff] }
 0xd59   : > { %7466 = vst [vmem:[#allocation4 + $0x20] sm:$0xff] %v14961_v35  ;;  %10085 = vrcp.f32 %v6560_v13  ;;  %v6361_v7 = vpop.xlane.xlu1 %6360  ;;  %v17008_v3 = vsub.f32 %v17006_v33, %v17007_v47  ;;  %v15002_v10 = vmul.f32 %v17009_v45, %v5078_v62  ;;  %v17014_v47 = vld [vmem:[#allocation160_spill] sm:$0xff]  ;;  %v5093_v35 = vld [vmem:[#allocation3 + $0x60] sm:$0xff] }
 0xd5a   : > { %6604 = vst [vmem:[#allocation3 + $0x8] sm:$0xff] %v14963_v56  ;;  %v10084_v36 = vpop.eup %10083  ;;  %v14978_v60 = vadd.f32 %v6361_v7, %v6279_v16  ;;  %6510 = vadd.xlane.f32.xlu0 %v14736_v32  ;;  %v14994_v16 = vmul.f32 %v17005_v29, %v5075_v0  ;;  %v5089_v7 = vld [vmem:[#allocation3] sm:$0xff]  ;;  %v5087_v32 = vld [vmem:[#allocation3 + $0x1d8] sm:$0xff]  ;;  %10087 = vrcp.f32 %v14760_v20  ;;  %v7605_v0 = vmul.f32 %v14968_v11, %v14850_v39  ;;  %v17013_v29 = vld [vmem:[#allocation155_spill] sm:$0xff] }
 0xd5b   : > { %6624 = vst [vmem:[#allocation3 + $0x28] sm:$0xff] %v6560_v13  ;;  %v7603_v63 = vmul.f32 %v10084_v36, %v6529_v2  ;;  %v5555_v15 = vmul.f32 1.442695, %v17008_v3  ;;  %v5083_v2 = vld [vmem:[#allocation3 + $0x198] sm:$0xff]  ;;  %v6307_v33 = vmul.f32 %v17013_v29, %v5091_v46  ;;  %v15011_v3 = vmul.f32 %v17014_v47, %v5081_v48  ;;  %v17016_v45 = vld [vmem:[#allocation206_spill] sm:$0xff]  ;;  %v17022_v47 = vld [vmem:[#allocation151_spill] sm:$0xff] }
 0xd5c   : > { %17000 = vst [vmem:[#allocation235_spill] sm:$0xff] %v14978_v60  ;;  %v15018_v30 = vmul.f32 %v17017_v41, %v5089_v7  ;;  %v15028_v4 = vmul.f32 %v17022_v47, %v5083_v2  ;;  %v10256_v7 = vld [vmem:[#allocation2 + $0x1c0] sm:$0xff] }
 0xd5d   : > { %6599 = vst [vmem:[#allocation3 + $0x148] sm:$0xff] %v14978_v60  ;;  %v7667_v57 = vsub.f32 2.0, %v7603_v63  ;;  %v6385_v26 = vpop.xlane.xlu0 %6384  ;;  %v5095_v63 = vld [vmem:[#allocation3 + $0x1b8] sm:$0xff]  ;;  %v5090_v60 = vld [vmem:[#allocation3 + $0x1c8] sm:$0xff]  ;;  %10089 = vpow2.f32 %v5555_v15 }
 0xd5e   : > { %17010 = vst [vmem:[#allocation220_spill] sm:$0xff] %v15002_v10  ;;  %v15014_v51 = vadd.f32 %v6385_v26, %v6287_v18  ;;  %v6445_v62 = vpop.xlane.xlu2 %6444  ;;  %6495 = vadd.xlane.f32.xlu1 %v17016_v45  ;;  %v17023_v18 = vld [vmem:[#allocation245_spill] sm:$0xff]  ;;  %v5092_v26 = vld [vmem:[#allocation3 + $0x140] sm:$0xff]  ;;  %v17028_v15 = vld [vmem:[#allocation175_spill] sm:$0xff] }
 0xd5f   : > { %17012 = vst [vmem:[#allocation232_spill] sm:$0xff] %v15005_v8  ;;  %v17019_v8 = vld [vmem:[#allocation147_spill] sm:$0xff]  ;;  %v10086_v46 = vpop.eup %10085  ;;  %v15023_v29 = vmul.f32 %v10084_v36, %v7667_v57  ;;  %v15025_v48 = vadd.f32 %v6445_v62, %v6307_v33  ;;  %v15031_v54 = vmul.f32 %v17023_v18, %v5086_v40  ;;  %v17025_v45 = vld [vmem:[#allocation186_spill] sm:$0xff]  ;;  %v17026_v36 = vld [vmem:[#allocation185_spill] sm:$0xff]  ;;  %v7669_v62 = vsub.f32 2.0, %v7605_v0 }
 0xd60   : > { %17015 = vst [vmem:[#allocation233_spill] sm:$0xff] %v15011_v3  ;;  %v15021_v39 = vmul.f32 %v17019_v8, %v5087_v32  ;;  %v5434_v41 = vsub.f32 %v17025_v45, %v10256_v7  ;;  %v7634_v32 = vmul.f32 %v10086_v46, %v6560_v13  ;;  %v5094_v8 = vld [vmem:[#allocation3 + $0x98] sm:$0xff]  ;;  %v15036_v57 = vmul.f32 %v17026_v36, %v5093_v35  ;;  %v5096_v33 = vld [vmem:[#allocation3 + $0x100] sm:$0xff]  ;;  %v17030_v18 = vld [vmem:[#allocation148_spill] sm:$0xff]  ;;  %v15046_v45 = vpop.eup %10087 }
 0xd61   : > { %17018 = vst [vmem:[#allocation257_spill] sm:$0xff] %v15018_v30  ;;  %10091 = vrcp.f32 %v15025_v48  ;;  %v6370_v2 = vpop.xlane.xlu1 %6369  ;;  %v5100_v40 = vld [vmem:[#allocation3 + $0x180] sm:$0xff]  ;;  %v15041_v47 = vmul.f32 %v17028_v15, %v5095_v63  ;;  %v15044_v13 = vmul.f32 %v17030_v18, %v5090_v60  ;;  %v5098_v7 = vld [vmem:[#allocation3 + $0xf8] sm:$0xff]  ;;  %v17032_v15 = vld [vmem:[#allocation224_spill] sm:$0xff] }
 0xd62   : > { %17020 = vst [vmem:[#allocation177_spill] sm:$0xff] %v15021_v39  ;;  %v5097_v39 = vld [vmem:[#allocation3 + $0xc8] sm:$0xff]  ;;  %v10258_v35 = vld [vmem:[#allocation4 + $0x138] sm:$0xff]  ;;  %v7698_v36 = vsub.f32 2.0, %v7634_v32  ;;  %6519 = vadd.xlane.f32.xlu0 %v14772_v14  ;;  %v17033_v60 = vld [vmem:[#allocation198_spill] sm:$0xff] }
 0xd63   : > { %17021 = vst [vmem:[#allocation225_spill] sm:$0xff] %v15023_v29  ;;  %v15048_v29 = vld [vmem:[#allocation3 + $0x68] sm:$0xff]  ;;  %v7858_v0 = vmul.f32 %v10258_v35, %v7730_v42  ;;  %v5099_v63 = vld [vmem:[#allocation3 + $0x178] sm:$0xff]  ;;  %v15057_v18 = vmul.f32 %v17033_v60, %v5097_v39  ;;  %v5102_v10 = vld [vmem:[#allocation3 + $0x110] sm:$0xff]  ;;  %v5557_v42 = vmul.f32 1.442695, %v5434_v41 }
 0xd64   : > { %17024 = vst [vmem:[#allocation200_spill] sm:$0xff] %v15031_v54  ;;  %10093 = vrcp.f32 %v15048_v29  ;;  %v17035_v3 = vld [vmem:[#allocation219_spill] sm:$0xff]  ;;  %v7762_v32 = vmul.f32 %v10086_v46, %v7698_v36  ;;  %v5103_v14 = vld [vmem:[#allocation3 + $0x20] sm:$0xff]  ;;  %v5101_v39 = vld [vmem:[#allocation3 + $0xb0] sm:$0xff] }
 0xd65   : > { %6607 = vst [vmem:[#allocation3 + $0xe0] sm:$0xff] %v15014_v51  ;;  %v15063_v54 = vmul.f32 %v17035_v3, %v5096_v33  ;;  %v7733_v3 = vmul.f32 %v14968_v11, %v7669_v62  ;;  %10095 = vrcp.f32 %v14945_v27  ;;  %v6394_v41 = vpop.xlane.xlu0 %6393  ;;  %v5106_v46 = vld [vmem:[#allocation3 + $0x90] sm:$0xff]  ;;  %v15077_v33 = vmul.f32 %v14755_v52, %v5099_v63  ;;  %v5108_v11 = vld [vmem:[#allocation3 + $0xc0] sm:$0xff] }
 0xd66   : > { %17027 = vst [vmem:[#allocation168_spill] sm:$0xff] %v15036_v57  ;;  %v15052_v57 = vadd.f32 %v6370_v2, %v14973_v55  ;;  %v15067_v55 = vmul.f32 %v14775_v49, %v5100_v40  ;;  %v5104_v2 = vld [vmem:[#allocation3 + $0xb8] sm:$0xff]  ;;  %v15079_v49 = vpop.eup %10089  ;;  %v7890_v40 = vpack.c.bf16 %v7858_v0, %v7858_v0  ;;  %v6454_v35 = vpop.xlane.xlu2 %6453  ;;  %v17036_v36 = vld [vmem:[#allocation236_spill] sm:$0xff]  ;;  %v15089_v52 = vmul.f32 %v14829_v19, %v5103_v14 }
 0xd67   : > { %6627 = vst [vmem:[#allocation3 + $0x1e8] sm:$0xff] %v15025_v48  ;;  %6504 = vadd.xlane.f32.xlu1 %v17036_v36  ;;  %v10092_v62 = vpop.eup %10091  ;;  %v15092_v63 = vmul.f32 %v14790_v43, %v5101_v39  ;;  %v15095_v0 = vmul.f32 %v14840_v22, %v5104_v2  ;;  %10097 = vpow2.f32 %v5557_v42  ;;  %v15105_v39 = vmul.f32 %v14907_v24, %v5108_v11  ;;  %v17042_v11 = vld [vmem:[#allocation191_spill] sm:$0xff] }
 0xd68   : > { %17029 = vst [vmem:[#allocation180_spill] sm:$0xff] %v15041_v47  ;;  %v6310_v47 = vmul.f32 %v17032_v15, %v5094_v8  ;;  %v15070_v8 = vmul.f32 %v14744_v44, %v5098_v7  ;;  %v15082_v7 = vadd.f32 %v6394_v41, %v14982_v17  ;;  %v8018_v42 = vunpack.c.l.b16 %v7890_v40  ;;  %v17041_v40 = vld [vmem:[#allocation248_spill] sm:$0xff] }
 0xd69   : > { %17031 = vst [vmem:[#allocation158_spill] sm:$0xff] %v15044_v13  ;;  %v17034_v13 = vld [vmem:[#allocation152_spill] sm:$0xff]  ;;  %v6379_v43 = vpop.xlane.xlu1 %6378  ;;  %v7033_v22 = vpop.f32.mrf.mxu2 }
 0xd6a   : > { %v15060_v30 = vmul.f32 %v17034_v13, %v5092_v26  ;;  %6602 = vst [vmem:[#allocation3 + $0x130] sm:$0xff] %v15052_v57  ;;  %v7608_v26 = vmul.f32 %v15046_v45, %v14760_v20  ;;  %v10259_v13 = vld [vmem:[#allocation4 + $0x40] sm:$0xff]  ;;  %v15086_v20 = vmul.f32 %v14806_v5, %v5102_v10  ;;  %v6566_v15 = vadd.f32 %v6454_v35, %v6310_v47  ;;  %v15097_v17 = vpop.eup %10093  ;;  %v7275_v5 = vld [vmem:[#allocation4 + $0xf8] sm:$0xff]  ;;  %v10260_v47 = vld [vmem:[#allocation4 + $0x1d0] sm:$0xff] }
 0xd6b   : > { %v7922_v44 = vmul.f32 %v10259_v13, %v7762_v32  ;;  %v7637_v32 = vmul.f32 %v10092_v62, %v15025_v48  ;;  %6610 = vst [vmem:[#allocation3 + $0xa0] sm:$0xff] %v15082_v7  ;;  %v15102_v10 = vmul.f32 %v14862_v31, %v5106_v46  ;;  %v7861_v14 = vmul.f32 %v10260_v47, %v7733_v3  ;;  %v7202_v13 = vpop.f32.mrf.mxu3  ;;  %v15110_v31 = vpop.eup %10095  ;;  %v17039_v46 = vld [vmem:[#allocation204_spill] sm:$0xff] }
 0xd6c   : > { %v7672_v19 = vsub.f32 2.0, %v7608_v26  ;;  %6630 = vst [vmem:[#allocation3 + $0x98] sm:$0xff] %v6566_v15  ;;  %10099 = vrcp.f32 %v6566_v15  ;;  %v15108_v48 = vadd.f32 %v6379_v43, %v14976_v1  ;;  %v17038_v26 = vld [vmem:[#allocation244_spill] sm:$0xff]  ;;  %v7601_v36 = vmul.f32 %v15048_v29, %v15097_v17 }
 0xd6d   : > { %v7954_v60 = vpack.c.bf16 %v7922_v44, %v7922_v44  ;;  %17037 = vst [vmem:[#allocation161_spill] sm:$0xff] %v15105_v39  ;;  %v7701_v41 = vsub.f32 2.0, %v7637_v32  ;;  %v5105_v44 = vld [vmem:[#allocation3 + $0x120] sm:$0xff]  ;;  %v17040_v3 = vsub.f32 %v17038_v26, %v17039_v46  ;;  %v7203_v47 = vadd.f32 %v7202_v13, %v7033_v22  ;;  %v5107_v39 = vld [vmem:[#allocation3 + $0xa8] sm:$0xff]  ;;  %v6403_v29 = vpop.xlane.xlu0 %6402  ;;  %v5109_v22 = vld [vmem:[#allocation3 + $0x138] sm:$0xff]  ;;  %v15127_v13 = vpop.eup %10097 }
 0xd6e   : > { %v7339_v24 = vmul.f32 %v15079_v49, %v7275_v5  ;;  %10101 = vrcp.f32 %v14963_v56  ;;  %6605 = vst [vmem:[#allocation3 + $0x88] sm:$0xff] %v15108_v48  ;;  %v7736_v26 = vmul.f32 %v15046_v45, %v7672_v19  ;;  %v7893_v46 = vpack.c.bf16 %v7861_v14, %v7861_v14  ;;  %v6463_v45 = vpop.xlane.xlu2 %6462  ;;  %v5110_v19 = vld [vmem:[#allocation3 + $0x188] sm:$0xff] }
 0xd6f   : > { %v8082_v2 = vunpack.c.l.b16 %v7954_v60  ;;  %v5561_v35 = vmul.f32 1.442695, %v17040_v3  ;;  %v17043_v60 = vsub.f32 %v17041_v40, %v17042_v11  ;;  %v7765_v43 = vmul.f32 %v10092_v62, %v7701_v41  ;;  %17044 = vst [vmem:[#allocation267_spill] sm:$0xff] %v15127_v13  ;;  %v17045_v40 = vld [vmem:[#allocation188_spill] sm:$0xff]  ;;  %6513 = vadd.xlane.f32.xlu1 %v14802_v23  ;;  %v10262_v23 = vld [vmem:[#allocation4 + $0xe8] sm:$0xff] }
 0xd70   : > { %v7403_v3 = vadd.f32 %v7339_v24, %v7203_v47  ;;  %v15125_v5 = vmul.f32 %v14852_v28, %v5105_v44  ;;  %10103 = vrcp.f32 %v17045_v40  ;;  %v10261_v62 = vld [vmem:[#allocation4 + $0x30] sm:$0xff]  ;;  %v15134_v41 = vadd.f32 %v6403_v29, %v14988_v9  ;;  %v7276_v9 = vld [vmem:[#allocation4 + $0xe0] sm:$0xff] }
 0xd71   : > { %v5559_v1 = vmul.f32 1.442695, %v17043_v60  ;;  %v8114_v32 = vpack.c.b16 %v8082_v2, %v8018_v42  ;;  %v7611_v42 = vmul.f32 %v15110_v31, %v14945_v27  ;;  %v7925_v2 = vmul.f32 %v10261_v62, %v7765_v43  ;;  %v5111_v29 = vld [vmem:[#allocation3 + $0x1b0] sm:$0xff] }
 0xd72   : > { %v10100_v14 = vpop.eup %10099  ;;  %10105 = vpow2.f32 %v5561_v35  ;;  %v7665_v28 = vsub.f32 2.0, %v7601_v36  ;;  %7467 = vst [vmem:[#allocation4 + $0xf8] sm:$0xff] %v7403_v3  ;;  %v6569_v44 = vadd.f32 %v6463_v45, %v15057_v18  ;;  %v15139_v47 = vmul.f32 %v14896_v61, %v5107_v39  ;;  %v6388_v35 = vpop.xlane.xlu1 %6387  ;;  %v5112_v18 = vld [vmem:[#allocation3 + $0x18] sm:$0xff]  ;;  %v5113_v62 = vld [vmem:[#allocation3 + $0xf0] sm:$0xff] }
 0xd73   : > { %8178 = vst [vmem:[%s10682_s18 + $0x8] sm:$0xff] %v8114_v32  ;;  %10107 = vpow2.f32 %v5559_v1  ;;  %v7957_v27 = vpack.c.bf16 %v7925_v2, %v7925_v2  ;;  %v7640_v24 = vmul.f32 %v10100_v14, %v6566_v15  ;;  %v15143_v11 = vmul.f32 %v14919_v37, %v5109_v22  ;;  %v7035_v36 = vpop.f32.mrf.mxu2  ;;  %v7204_v37 = vpop.f32.mrf.mxu3 }
 0xd74   : > { %6613 = vst [vmem:[#allocation3 + $0x108] sm:$0xff] %v15134_v41  ;;  %v7864_v60 = vmul.f32 %v10262_v23, %v7736_v26  ;;  %v8021_v32 = vunpack.c.l.b16 %v7893_v46  ;;  %10109 = vrcp.f32 %v6569_v44  ;;  %v15146_v61 = vmul.f32 %v14930_v12, %v5110_v19  ;;  %v15148_v39 = vpop.eup %10101 }
 0xd75   : > { %6633 = vst [vmem:[#allocation3 + $0xc8] sm:$0xff] %v6569_v44  ;;  %v7675_v15 = vsub.f32 2.0, %v7611_v42  ;;  %v8085_v1 = vunpack.c.l.b16 %v7957_v27  ;;  %v7704_v43 = vsub.f32 2.0, %v7640_v24  ;;  %v15151_v3 = vadd.f32 %v6388_v35, %v14985_v38  ;;  %v7278_v27 = vld [vmem:[#allocation4 + $0xb0] sm:$0xff] }
 0xd76   : > { %v7729_v26 = vmul.f32 %v15097_v17, %v7665_v28  ;;  %10111 = vrcp.f32 %v14835_v59  ;;  %v7205_v46 = vadd.f32 %v7204_v37, %v7035_v36  ;;  %v7340_v22 = vmul.f32 %v15127_v13, %v7276_v9  ;;  %v15156_v40 = vpop.eup %10103  ;;  %v6412_v28 = vpop.xlane.xlu0 %6411  ;;  %v10264_v36 = vld [vmem:[#allocation4 + $0xc0] sm:$0xff] }
 0xd77   : > { %10113 = vrcp.f32 %v15014_v51  ;;  %v8117_v12 = vpack.c.b16 %v8085_v1, %v8021_v32  ;;  %v7768_v42 = vmul.f32 %v10100_v14, %v7704_v43  ;;  %6608 = vst [vmem:[#allocation3 + $0x10] sm:$0xff] %v15151_v3  ;;  %v15161_v38 = vmul.f32 %v14949_v58, %v5112_v18  ;;  %v10263_v58 = vld [vmem:[#allocation4 + $0x1e8] sm:$0xff]  ;;  %6522 = vadd.xlane.f32.xlu1 %v14911_v25 }
 0xd78   : > { %v15163_v2 = vpop.eup %10105  ;;  %v7896_v17 = vpack.c.bf16 %v7864_v60, %v7864_v60  ;;  %v7614_v45 = vmul.f32 %v15148_v39, %v14963_v56  ;;  %v7404_v19 = vadd.f32 %v7340_v22, %v7205_v46  ;;  %v15168_v24 = vmul.f32 %v14938_v53, %v5111_v29  ;;  %v6472_v60 = vpop.xlane.xlu2 %6471  ;;  %v7277_v56 = vld [vmem:[#allocation4 + $0x1a0] sm:$0xff]  ;;  %v10265_v53 = vld [vmem:[#allocation3 + $0xd8] sm:$0xff] }
 0xd79   : > { %17046 = vst [vmem:[#allocation231_spill] sm:$0xff] %v15163_v2  ;;  %v10108_v9 = vpop.eup %10107  ;;  %10115 = vrcp.f32 %v14860_v21  ;;  %v7739_v14 = vmul.f32 %v15110_v31, %v7675_v15  ;;  %v7928_v23 = vmul.f32 %v10263_v58, %v7768_v42  ;;  %v15174_v32 = vadd.f32 %v6412_v28, %v14991_v50  ;;  %v17048_v58 = vld [vmem:[#allocation252_spill] sm:$0xff] }
 0xd7a   : > { %17047 = vst [vmem:[#allocation259_spill] sm:$0xff] %v15168_v24  ;;  %v10110_v35 = vpop.eup %10109  ;;  %v7857_v18 = vmul.f32 %v10264_v36, %v7729_v26  ;;  %v7606_v1 = vmul.f32 %v10265_v53, %v15156_v40  ;;  %v6572_v43 = vadd.f32 %v6472_v60, %v15067_v55  ;;  %v15180_v31 = vmul.f32 %v15079_v49, %v5113_v62  ;;  %v6397_v46 = vpop.xlane.xlu1 %6396  ;;  %v5115_v53 = vld [vmem:[#allocation3 + $0x1f8] sm:$0xff] }
 0xd7b   : > { %8181 = vst [vmem:[%s10682_s18 + $0x20] sm:$0xff] %v8117_v12  ;;  %10117 = vrcp.f32 %v14871_v34  ;;  %v7960_v50 = vpack.c.bf16 %v7928_v23, %v7928_v23  ;;  %v7643_v15 = vmul.f32 %v10110_v35, %v6569_v44  ;;  %v15185_v25 = vmul.f32 %v15163_v2, %v7278_v27  ;;  %v7038_v55 = vpop.f32.mrf.mxu2  ;;  %v10266_v12 = vld [vmem:[#allocation4 + $0x70] sm:$0xff]  ;;  %v7207_v28 = vpop.f32.mrf.mxu3 }
 0xd7c   : > { %7468 = vst [vmem:[#allocation4 + $0xe0] sm:$0xff] %v7404_v19  ;;  %v15187_v37 = vpop.eup %10111  ;;  %v8024_v29 = vunpack.c.l.b16 %v7896_v17  ;;  %v7678_v26 = vsub.f32 2.0, %v7614_v45  ;;  %10119 = vrcp.f32 %v6572_v43  ;;  %v7341_v22 = vmul.f32 %v10108_v9, %v7277_v56  ;;  %v17049_v23 = vld [vmem:[#allocation184_spill] sm:$0xff] }
 0xd7d   : > { %6616 = vst [vmem:[#allocation3 + $0x48] sm:$0xff] %v15174_v32  ;;  %v15189_v49 = vpop.eup %10113  ;;  %v7867_v42 = vmul.f32 %v10266_v12, %v7739_v14  ;;  %v8088_v62 = vunpack.c.l.b16 %v7960_v50  ;;  %v7707_v44 = vsub.f32 2.0, %v7643_v15  ;;  %v15192_v19 = vadd.f32 %v6397_v46, %v14994_v16 }
 0xd7e   : > { %6636 = vst [vmem:[#allocation3 + $0x180] sm:$0xff] %v6572_v43  ;;  %v7889_v27 = vpack.c.bf16 %v7857_v18, %v7857_v18  ;;  %v17050_v17 = vsub.f32 %v17048_v58, %v17049_v23  ;;  %v7670_v60 = vsub.f32 2.0, %v7606_v1  ;;  %v7208_v36 = vadd.f32 %v7207_v28, %v7038_v55  ;;  %v6421_v46 = vpop.xlane.xlu0 %6420 }
 0xd7f   : > { %v15197_v56 = vpop.eup %10115  ;;  %v7604_v14 = vmul.f32 %v15187_v37, %v14835_v59  ;;  %10121 = vrcp.f32 %v14880_v6  ;;  %v8120_v50 = vpack.c.b16 %v8088_v62, %v8024_v29  ;;  %v7771_v16 = vmul.f32 %v10110_v35, %v7707_v44  ;;  %6611 = vst [vmem:[#allocation3 + $0x1c0] sm:$0xff] %v15192_v19  ;;  %v10267_v59 = vld [vmem:[#allocation4 + $0x1b0] sm:$0xff]  ;;  %v17052_v44 = vld [vmem:[#allocation254_spill] sm:$0xff] }
 0xd80   : > { %v5565_v45 = vmul.f32 1.442695, %v17050_v17  ;;  %v7742_v18 = vmul.f32 %v15148_v39, %v7678_v26  ;;  %v7617_v15 = vmul.f32 %v15189_v49, %v15014_v51  ;;  %10123 = vrcp.f32 %v15082_v7  ;;  %v6481_v29 = vpop.xlane.xlu2 %6480 }
 0xd81   : > { %v15207_v1 = vadd.f32 %v7341_v22, %v7208_v36  ;;  %v15209_v55 = vpop.eup %10117  ;;  %v7899_v12 = vpack.c.bf16 %v7867_v42, %v7867_v42  ;;  %8184 = vst [vmem:[%s10682_s18 + $0x38] sm:$0xff] %v8120_v50  ;;  %v7931_v28 = vmul.f32 %v10267_v59, %v7771_v16  ;;  %v15213_v35 = vadd.f32 %v6421_v46, %v15028_v4  ;;  %v17051_v42 = vld [vmem:[#allocation156_spill] sm:$0xff] }
 0xd82   : > { %v15215_v62 = vmul.f32 %v10108_v9, %v5115_v53  ;;  %v10120_v39 = vpop.eup %10119  ;;  %v15217_v26 = vunpack.c.l.b16 %v7889_v27  ;;  %10125 = vpow2.f32 %v5565_v45  ;;  %v7607_v51 = vmul.f32 %v15197_v56, %v14860_v21  ;;  %v10268_v27 = vld [vmem:[#allocation4 + $0x190] sm:$0xff]  ;;  %v6406_v21 = vpop.xlane.xlu1 %6405 }
 0xd83   : > { %7469 = vst [vmem:[#allocation4 + $0x1a0] sm:$0xff] %v15207_v1  ;;  %v6575_v22 = vadd.f32 %v6481_v29, %v15089_v52  ;;  %v17053_v58 = vsub.f32 %v17051_v42, %v17052_v44  ;;  %v7668_v4 = vsub.f32 2.0, %v7604_v14  ;;  %v7963_v17 = vpack.c.bf16 %v7931_v28, %v7931_v28  ;;  %v7040_v50 = vpop.f32.mrf.mxu2  ;;  %v17054_v29 = vld [vmem:[#allocation220_spill] sm:$0xff] }
 0xd84   : > { %v7646_v36 = vmul.f32 %v10120_v39, %v6572_v43  ;;  %6619 = vst [vmem:[#allocation3 + $0x198] sm:$0xff] %v15213_v35  ;;  %v7734_v9 = vmul.f32 %v15156_v40, %v7670_v60  ;;  %v7870_v45 = vmul.f32 %v10268_v27, %v7742_v18  ;;  %v7681_v53 = vsub.f32 2.0, %v7617_v15  ;;  %v7209_v43 = vpop.f32.mrf.mxu3  ;;  %v17055_v15 = vld [vmem:[#allocation235_spill] sm:$0xff] }
 0xd85   : > { %v5563_v23 = vmul.f32 1.442695, %v17053_v58  ;;  %6639 = vst [vmem:[#allocation3 + $0x20] sm:$0xff] %v6575_v22  ;;  %10127 = vrcp.f32 %v6575_v22  ;;  %v15228_v16 = vpop.eup %10121  ;;  %v8027_v52 = vunpack.c.l.b16 %v7899_v12  ;;  %v8091_v46 = vunpack.c.l.b16 %v7963_v17 }
 0xd86   : > { %v7710_v59 = vsub.f32 2.0, %v7646_v36  ;;  %v15231_v14 = vadd.f32 %v6406_v21, %v17054_v29  ;;  %v15233_v28 = vpop.eup %10123  ;;  %v7671_v42 = vsub.f32 2.0, %v7607_v51  ;;  %v7610_v40 = vmul.f32 %v15209_v55, %v14871_v34  ;;  %v6430_v27 = vpop.xlane.xlu0 %6429  ;;  %v5118_v21 = vld [vmem:[#allocation3 + $0x118] sm:$0xff] }
 0xd87   : > { %10129 = vrcp.f32 %v15134_v41  ;;  %v7210_v60 = vadd.f32 %v7209_v43, %v7040_v50  ;;  %v7732_v18 = vmul.f32 %v15187_v37, %v7668_v4  ;;  %v8123_v12 = vpack.c.b16 %v8091_v46, %v8027_v52  ;;  %v17057_v50 = vld [vmem:[#allocation200_spill] sm:$0xff] }
 0xd88   : > { %10131 = vrcp.f32 %v17055_v15  ;;  %v7774_v44 = vmul.f32 %v10120_v39, %v7710_v59  ;;  %6614 = vst [vmem:[#allocation3 + $0x80] sm:$0xff] %v15231_v14  ;;  %v10126_v58 = vpop.eup %10125  ;;  %v7613_v17 = vmul.f32 %v15228_v16, %v14880_v6  ;;  %v7902_v51 = vpack.c.bf16 %v7870_v45, %v7870_v45  ;;  %v10269_v39 = vld [vmem:[#allocation4 + $0xa0] sm:$0xff]  ;;  %v6490_v46 = vpop.xlane.xlu2 %6489 }
 0xd89   : > { %v7745_v36 = vmul.f32 %v15189_v49, %v7681_v53  ;;  %v15245_v34 = vadd.f32 %v15185_v25, %v7210_v60  ;;  %10133 = vpow2.f32 %v5563_v23  ;;  %v7620_v37 = vmul.f32 %v15233_v28, %v15082_v7  ;;  %8187 = vst [vmem:[%s10682_s18 + $0x50] sm:$0xff] %v8123_v12  ;;  %v10270_v45 = vld [vmem:[#allocation4 + $0x160] sm:$0xff]  ;;  %v10271_v53 = vld [vmem:[#allocation4 + $0xc8] sm:$0xff] }
 0xd8a   : > { %v7934_v4 = vmul.f32 %v10269_v39, %v7774_v44  ;;  %v15251_v52 = vadd.f32 %v6430_v27, %v17057_v50  ;;  %v15253_v59 = vmul.f32 %v10270_v45, %v7734_v9  ;;  %v7735_v25 = vmul.f32 %v15197_v56, %v7671_v42  ;;  %v7280_v12 = vld [vmem:[#allocation4 + $0x128] sm:$0xff] }
 0xd8b   : > { %17056 = vst [vmem:[#allocation174_spill] sm:$0xff] %v15245_v34  ;;  %v10128_v6 = vpop.eup %10127  ;;  %v7674_v49 = vsub.f32 2.0, %v7610_v40  ;;  %v6578_v23 = vadd.f32 %v6490_v46, %v15102_v10  ;;  %v15258_v7 = vmul.f32 %v10271_v53, %v7732_v18  ;;  %v15261_v60 = vmul.f32 %v10126_v58, %v5118_v21  ;;  %v10272_v56 = vld [vmem:[#allocation4 + $0x68] sm:$0xff]  ;;  %v6415_v40 = vpop.xlane.xlu1 %6414  ;;  %v10273_v46 = vld [vmem:[#allocation4 + $0x1f0] sm:$0xff] }
 0xd8c   : > { %7470 = vst [vmem:[#allocation4 + $0xb0] sm:$0xff] %v15245_v34  ;;  %v7966_v29 = vpack.c.bf16 %v7934_v4, %v7934_v4  ;;  %v7649_v43 = vmul.f32 %v10128_v6, %v6575_v22  ;;  %v7677_v9 = vsub.f32 2.0, %v7613_v17  ;;  %v8030_v27 = vunpack.c.l.b16 %v7902_v51  ;;  %v17058_v22 = vld [vmem:[#allocation233_spill] sm:$0xff] }
 0xd8d   : > { %6622 = vst [vmem:[#allocation3 + $0x158] sm:$0xff] %v15251_v52  ;;  %v15263_v44 = vpop.eup %10129  ;;  %v7873_v42 = vmul.f32 %v10272_v56, %v7745_v36  ;;  %10135 = vrcp.f32 %v6578_v23  ;;  %v7684_v18 = vsub.f32 2.0, %v7620_v37  ;;  %v15268_v50 = vadd.f32 %v6415_v40, %v17058_v22 }
 0xd8e   : > { %6642 = vst [vmem:[#allocation3 + $0x90] sm:$0xff] %v6578_v23  ;;  %v15265_v10 = vpop.eup %10131  ;;  %v8094_v39 = vunpack.c.l.b16 %v7966_v29  ;;  %v7713_v4 = vsub.f32 2.0, %v7649_v43  ;;  %v7894_v21 = vpack.c.bf16 %v15253_v59, %v15253_v59  ;;  %v7863_v45 = vmul.f32 %v10273_v46, %v7735_v25  ;;  %v17060_v43 = vld [vmem:[#allocation255_spill] sm:$0xff] }
 0xd8f   : > { %v7738_v17 = vmul.f32 %v15209_v55, %v7674_v49  ;;  %v15273_v51 = vmul.f32 %v10126_v58, %v7280_v12  ;;  %v15275_v36 = vpop.eup %10133  ;;  %v7623_v37 = vmul.f32 %v15263_v44, %v15134_v41  ;;  %10137 = vrcp.f32 %v15174_v32  ;;  %6617 = vst [vmem:[#allocation3 + $0x40] sm:$0xff] %v15268_v50  ;;  %v6439_v49 = vpop.xlane.xlu0 %6438  ;;  %v10274_v12 = vld [vmem:[#allocation4 + $0x178] sm:$0xff] }
 0xd90   : > { %17059 = vst [vmem:[#allocation237_spill] sm:$0xff] %v15275_v36  ;;  %v8126_v53 = vpack.c.b16 %v8094_v39, %v8030_v27  ;;  %v7777_v29 = vmul.f32 %v10128_v6, %v7713_v4  ;;  %v7892_v59 = vpack.c.bf16 %v15258_v7, %v15258_v7  ;;  %v7741_v25 = vmul.f32 %v15228_v16, %v7677_v9  ;;  %v17061_v6 = vld [vmem:[#allocation257_spill] sm:$0xff]  ;;  %v6499_v40 = vpop.xlane.xlu2 %6498  ;;  %v10275_v7 = vld [vmem:[#allocation4 + $0xd0] sm:$0xff] }
 0xd91   : > { %v7609_v55 = vmul.f32 %v15265_v10, %v17055_v15  ;;  %v7905_v58 = vpack.c.bf16 %v7873_v42, %v7873_v42  ;;  %10139 = vrcp.f32 %v17060_v43  ;;  %v7748_v41 = vmul.f32 %v15233_v28, %v7684_v18  ;;  %v7279_v28 = vld [vmem:[#allocation4 + $0x48] sm:$0xff]  ;;  %v10276_v18 = vld [vmem:[#allocation4 + $0x158] sm:$0xff] }
 0xd92   : > { %8190 = vst [vmem:[%s10682_s18 + $0x68] sm:$0xff] %v8126_v53  ;;  %v7937_v27 = vmul.f32 %v10274_v12, %v7777_v29  ;;  %v6561_v56 = vadd.f32 %v6439_v49, %v17061_v6  ;;  %v7895_v4 = vpack.c.bf16 %v7863_v45, %v7863_v45  ;;  %v15290_v22 = vmul.f32 %v10275_v7, %v7738_v17  ;;  %v10277_v49 = vld [vmem:[#allocation4 + $0x80] sm:$0xff] }
 0xd93   : > { %v10136_v39 = vpop.eup %10135  ;;  %10141 = vrcp.f32 %v15052_v57  ;;  %v6581_v16 = vadd.f32 %v6499_v40, %v15143_v11  ;;  %v7687_v15 = vsub.f32 2.0, %v7623_v37  ;;  %v15294_v46 = vmul.f32 %v10276_v18, %v7741_v25  ;;  %v6424_v45 = vpop.xlane.xlu1 %6423  ;;  %v17062_v37 = vld [vmem:[#allocation232_spill] sm:$0xff]  ;;  %v10278_v25 = vld [vmem:[#allocation4] sm:$0xff]  ;;  %v17063_v40 = vld [vmem:[#allocation225_spill] sm:$0xff] }
 0xd94   : > { %v7969_v9 = vpack.c.bf16 %v7937_v27, %v7937_v27  ;;  %v7652_v42 = vmul.f32 %v10136_v39, %v6578_v23  ;;  %6625 = vst [vmem:[#allocation3] sm:$0xff] %v6561_v56  ;;  %10143 = vrcp.f32 %v6561_v56  ;;  %v7673_v53 = vsub.f32 2.0, %v7609_v55 }
 0xd95   : > { %v8033_v29 = vunpack.c.l.b16 %v7905_v58  ;;  %6645 = vst [vmem:[#allocation3 + $0x138] sm:$0xff] %v6581_v16  ;;  %10145 = vrcp.f32 %v6581_v16  ;;  %v15296_v17 = vpop.eup %10137  ;;  %v7876_v43 = vmul.f32 %v10277_v49, %v7748_v41  ;;  %v15299_v27 = vadd.f32 %v6424_v45, %v17062_v37 }
 0xd96   : > { %v8097_v12 = vunpack.c.l.b16 %v7969_v9  ;;  %v7716_v11 = vsub.f32 2.0, %v7652_v42  ;;  %v15301_v23 = vunpack.c.l.b16 %v7894_v21  ;;  %v15303_v6 = vunpack.c.l.b16 %v7892_v59  ;;  %v10281_v59 = vld [vmem:[#allocation4 + $0x18] sm:$0xff] }
 0xd97   : > { %v7859_v55 = vmul.f32 %v10278_v25, %v17063_v40  ;;  %v15307_v58 = vmul.f32 %v15275_v36, %v7279_v28  ;;  %v15309_v7 = vpop.eup %10139  ;;  %v15311_v18 = vunpack.c.l.b16 %v7895_v4  ;;  %v7751_v41 = vmul.f32 %v15263_v44, %v7687_v15  ;;  %6620 = vst [vmem:[#allocation3 + $0xe8] sm:$0xff] %v15299_v27  ;;  %v6448_v4 = vpop.xlane.xlu0 %6447  ;;  %v10279_v15 = vld [vmem:[#allocation4 + $0x1c0] sm:$0xff]  ;;  %v10280_v25 = vld [vmem:[#allocation3 + $0x38] sm:$0xff] }
 0xd98   : > { %v8129_v9 = vpack.c.b16 %v8097_v12, %v8033_v29  ;;  %v7780_v42 = vmul.f32 %v10136_v39, %v7716_v11  ;;  %v7737_v45 = vmul.f32 %v15265_v10, %v7673_v53  ;;  %v7626_v28 = vmul.f32 %v15296_v17, %v15174_v32  ;;  %v6508_v11 = vpop.xlane.xlu2 %6507 }
 0xd99   : > { %v15315_v21 = vpop.eup %10141  ;;  %10147 = vrcp.f32 %v15213_v35  ;;  %v7908_v39 = vpack.c.bf16 %v7876_v43, %v7876_v43  ;;  %v6564_v12 = vadd.f32 %v6448_v4, %v15060_v30  ;;  %v15328_v10 = vmul.f32 %v10280_v25, %v15309_v7  ;;  %v10282_v43 = vld [vmem:[#allocation4 + $0x100] sm:$0xff] }
 0xd9a   : > { %v10144_v49 = vpop.eup %10143  ;;  %8193 = vst [vmem:[%s10682_s18 + $0x80] sm:$0xff] %v8129_v9  ;;  %v7940_v29 = vmul.f32 %v10279_v15, %v7780_v42  ;;  %v7891_v32 = vpack.c.bf16 %v7859_v55, %v7859_v55  ;;  %v6584_v40 = vadd.f32 %v6508_v11, %v15161_v38  ;;  %v7879_v36 = vmul.f32 %v10281_v59, %v7751_v41  ;;  %v17064_v55 = vld [vmem:[#allocation177_spill] sm:$0xff]  ;;  %v15335_v41 = vld [vmem:[#allocation3 + $0x1a8] sm:$0xff] }
 0xd9b   : > { %v10146_v37 = vpop.eup %10145  ;;  %v7635_v53 = vmul.f32 %v10144_v49, %v6561_v56  ;;  %6628 = vst [vmem:[#allocation3 + $0x140] sm:$0xff] %v6564_v12  ;;  %10149 = vrcp.f32 %v6564_v12  ;;  %v7865_v9 = vmul.f32 %v10282_v43, %v7737_v45  ;;  %v7690_v42 = vsub.f32 2.0, %v7626_v28  ;;  %v6433_v4 = vpop.xlane.xlu1 %6432  ;;  %v10284_v11 = vld [vmem:[#allocation4 + $0x98] sm:$0xff] }
 0xd9c   : > { %v7972_v34 = vpack.c.bf16 %v7940_v29, %v7940_v29  ;;  %v7655_v44 = vmul.f32 %v10146_v37, %v6581_v16  ;;  %6648 = vst [vmem:[#allocation3 + $0x18] sm:$0xff] %v6584_v40  ;;  %10151 = vrcp.f32 %v6584_v40  ;;  %v8036_v15 = vunpack.c.l.b16 %v7908_v39 }
 0xd9d   : > { %v7699_v30 = vsub.f32 2.0, %v7635_v53  ;;  %v6559_v56 = vadd.f32 %v6433_v4, %v17064_v55  ;;  %v7680_v38 = vsub.f32 2.0, %v15328_v10  ;;  %10153 = vrcp.f32 %v15335_v41 }
 0xd9e   : > { %v8100_v25 = vunpack.c.l.b16 %v7972_v34  ;;  %v7719_v13 = vsub.f32 2.0, %v7655_v44  ;;  %v7612_v16 = vmul.f32 %v15315_v21, %v15052_v57  ;;  %v7911_v45 = vpack.c.bf16 %v7879_v36, %v7879_v36 }
 0xd9f   : > { %v15332_v24 = vpop.eup %10147  ;;  %v7763_v59 = vmul.f32 %v10144_v49, %v7699_v30  ;;  %6623 = vst [vmem:[#allocation3 + $0x1d8] sm:$0xff] %v6559_v56  ;;  %10155 = vrcp.f32 %v6559_v56  ;;  %v8019_v34 = vunpack.c.l.b16 %v7891_v32  ;;  %v7897_v44 = vpack.c.bf16 %v7865_v9, %v7865_v9  ;;  %v6457_v53 = vpop.xlane.xlu0 %6456  ;;  %v17065_v49 = vld [vmem:[#allocation227_spill] sm:$0xff]  ;;  %v17066_v30 = vld [vmem:[#allocation180_spill] sm:$0xff] }
 0xda0   : > { %v8132_v28 = vpack.c.b16 %v8100_v25, %v8036_v15  ;;  %v7783_v39 = vmul.f32 %v10146_v37, %v7719_v13  ;;  %v7754_v29 = vmul.f32 %v15296_v17, %v7690_v42  ;;  %10157 = vrcp.f32 %v15108_v48  ;;  %v6517_v37 = vpop.xlane.xlu2 %6516 }
 0xda1   : > { %v7923_v10 = vmul.f32 %v10284_v11, %v7763_v59  ;;  %v10150_v43 = vpop.eup %10149  ;;  %v7629_v57 = vmul.f32 %v15332_v24, %v15213_v35  ;;  %v6567_v13 = vadd.f32 %v6457_v53, %v17066_v30  ;;  %v7676_v32 = vsub.f32 2.0, %v7612_v16  ;;  %v10285_v35 = vld [vmem:[#allocation4 + $0x188] sm:$0xff] }
 0xda2   : > { %8196 = vst [vmem:[%s10682_s18 + $0x98] sm:$0xff] %v8132_v28  ;;  %v7943_v36 = vmul.f32 %v7783_v39, %v17065_v49  ;;  %v10152_v4 = vpop.eup %10151  ;;  %v7638_v15 = vmul.f32 %v10150_v43, %v6564_v12  ;;  %v6587_v17 = vadd.f32 %v6517_v37, %v15215_v62  ;;  %v8039_v42 = vunpack.c.l.b16 %v7911_v45  ;;  %v17067_v62 = vld [vmem:[#allocation158_spill] sm:$0xff] }
 0xda3   : > { %v7955_v9 = vpack.c.bf16 %v7923_v10, %v7923_v10  ;;  %v7658_v55 = vmul.f32 %v10152_v4, %v6584_v40  ;;  %6631 = vst [vmem:[#allocation3 + $0x1b8] sm:$0xff] %v6567_v13  ;;  %10159 = vrcp.f32 %v6567_v13  ;;  %v15348_v59 = vpop.eup %10153  ;;  %v7882_v28 = vmul.f32 %v10285_v35, %v7754_v29  ;;  %v6442_v53 = vpop.xlane.xlu1 %6441 }
 0xda4   : > { %v7975_v25 = vpack.c.bf16 %v7943_v36, %v7943_v36  ;;  %v7702_v39 = vsub.f32 2.0, %v7638_v15  ;;  %6651 = vst [vmem:[#allocation3 + $0x1f8] sm:$0xff] %v6587_v17  ;;  %10161 = vrcp.f32 %v6587_v17  ;;  %v7693_v16 = vsub.f32 2.0, %v7629_v57 }
 0xda5   : > { %v8083_v11 = vunpack.c.l.b16 %v7955_v9  ;;  %v10156_v49 = vpop.eup %10155  ;;  %v7722_v10 = vsub.f32 2.0, %v7658_v55  ;;  %v6562_v45 = vadd.f32 %v6442_v53, %v17067_v62  ;;  %v15352_v40 = vmul.f32 %v15309_v7, %v7680_v38  ;;  %v10286_v55 = vld [vmem:[#allocation4 + $0x140] sm:$0xff]  ;;  %v10287_v62 = vld [vmem:[#allocation4 + $0x38] sm:$0xff] }
 0xda6   : > { %v8103_v12 = vunpack.c.l.b16 %v7975_v25  ;;  %v7766_v30 = vmul.f32 %v10150_v43, %v7702_v39  ;;  %v7633_v37 = vmul.f32 %v10156_v49, %v6559_v56  ;;  %v15354_v2 = vpop.eup %10157  ;;  %v15356_v29 = vunpack.c.l.b16 %v7897_v44  ;;  %v17068_v44 = vld [vmem:[#allocation218_spill] sm:$0xff] }
 0xda7   : > { %v8115_v36 = vpack.c.b16 %v8083_v11, %v8019_v34  ;;  %v7786_v15 = vmul.f32 %v10152_v4, %v7722_v10  ;;  %6626 = vst [vmem:[#allocation3 + $0x1c8] sm:$0xff] %v6562_v45  ;;  %10163 = vrcp.f32 %v6562_v45  ;;  %v7740_v57 = vmul.f32 %v15315_v21, %v7676_v32  ;;  %v6466_v38 = vpop.xlane.xlu0 %6465 }
 0xda8   : > { %v8135_v9 = vpack.c.b16 %v8103_v12, %v8039_v42  ;;  %v7914_v25 = vpack.c.bf16 %v7882_v28, %v7882_v28  ;;  %v7926_v35 = vmul.f32 %v10286_v55, %v7766_v30  ;;  %v7697_v7 = vsub.f32 2.0, %v7633_v37  ;;  %v6526_v42 = vpop.xlane.xlu2 %6525 }
 0xda9   : > { %8179 = vst [vmem:[%s10682_s18 + $0x10] sm:$0xff] %v8115_v36  ;;  %v10160_v34 = vpop.eup %10159  ;;  %10165 = vrcp.f32 %v15151_v3  ;;  %v7757_v56 = vmul.f32 %v15332_v24, %v7693_v16  ;;  %v7946_v43 = vmul.f32 %v7786_v15, %v17068_v44  ;;  %v6570_v4 = vadd.f32 %v6466_v38, %v15070_v8  ;;  %v17069_v15 = vld [vmem:[#allocation168_spill] sm:$0xff] }
 0xdaa   : > { %8199 = vst [vmem:[%s10682_s18 + $0xb0] sm:$0xff] %v8135_v9  ;;  %v10162_v11 = vpop.eup %10161  ;;  %v7958_v39 = vpack.c.bf16 %v7926_v35, %v7926_v35  ;;  %v7761_v21 = vmul.f32 %v10156_v49, %v7697_v7  ;;  %v7641_v32 = vmul.f32 %v10160_v34, %v6567_v13  ;;  %v15366_v28 = vadd.f32 %v6526_v42, %v15261_v60  ;;  %v10288_v13 = vld [vmem:[#allocation4 + $0x108] sm:$0xff] }
 0xdab   : > { %v7615_v53 = vmul.f32 %v15354_v2, %v15108_v48  ;;  %v7978_v12 = vpack.c.bf16 %v7946_v43, %v7946_v43  ;;  %v7661_v10 = vmul.f32 %v10162_v11, %v6587_v17  ;;  %6634 = vst [vmem:[#allocation3 + $0xf8] sm:$0xff] %v6570_v4  ;;  %10167 = vrcp.f32 %v6570_v4  ;;  %v6451_v30 = vpop.xlane.xlu1 %6450  ;;  %v10289_v42 = vld [vmem:[#allocation4 + $0x1a8] sm:$0xff] }
 0xdac   : > { %v8042_v24 = vunpack.c.l.b16 %v7914_v25  ;;  %v8086_v16 = vunpack.c.l.b16 %v7958_v39  ;;  %v7921_v36 = vmul.f32 %v10287_v62, %v7761_v21  ;;  %v7705_v8 = vsub.f32 2.0, %v7641_v32  ;;  %6654 = vst [vmem:[#allocation3 + $0x118] sm:$0xff] %v15366_v28 }
 0xdad   : > { %v10164_v49 = vpop.eup %10163  ;;  %v7885_v60 = vmul.f32 %v10288_v13, %v7757_v56  ;;  %v8106_v37 = vunpack.c.l.b16 %v7978_v12  ;;  %v7725_v9 = vsub.f32 2.0, %v7661_v10  ;;  %v6565_v48 = vadd.f32 %v6451_v30, %v17069_v15  ;;  %v10290_v12 = vld [vmem:[#allocation4 + $0x168] sm:$0xff] }
 0xdae   : > { %v8118_v17 = vpack.c.b16 %v8086_v16, %v15301_v23  ;;  %v7953_v55 = vpack.c.bf16 %v7921_v36, %v7921_v36  ;;  %v7769_v35 = vmul.f32 %v10160_v34, %v7705_v8  ;;  %v7636_v25 = vmul.f32 %v10164_v49, %v6562_v45 }
 0xdaf   : > { %v15373_v7 = vpop.eup %10165  ;;  %v7679_v38 = vsub.f32 2.0, %v7615_v53  ;;  %v8138_v44 = vpack.c.b16 %v8106_v37, %v8042_v24  ;;  %v7789_v43 = vmul.f32 %v10162_v11, %v7725_v9  ;;  %6629 = vst [vmem:[#allocation3 + $0x60] sm:$0xff] %v6565_v48  ;;  %10169 = vrcp.f32 %v6565_v48  ;;  %v6475_v32 = vpop.xlane.xlu0 %6474 }
 0xdb0   : > { %10171 = vrcp.f32 %v15251_v52  ;;  %8182 = vst [vmem:[%s10682_s18 + $0x28] sm:$0xff] %v8118_v17  ;;  %v8081_v56 = vunpack.c.l.b16 %v7953_v55  ;;  %v7929_v39 = vmul.f32 %v10289_v42, %v7769_v35  ;;  %v7700_v21 = vsub.f32 2.0, %v7636_v25  ;;  %v10292_v35 = vld [vmem:[#allocation4 + $0x88] sm:$0xff] }
 0xdb1   : > { %v10168_v23 = vpop.eup %10167  ;;  %v7868_v45 = vmul.f32 %v10290_v12, %v7740_v57  ;;  %v7917_v34 = vpack.c.bf16 %v7885_v60, %v7885_v60  ;;  %8202 = vst [vmem:[%s10682_s18 + $0xc8] sm:$0xff] %v8138_v44  ;;  %v7949_v53 = vmul.f32 %v7789_v43, %v15207_v1  ;;  %v6573_v11 = vadd.f32 %v6475_v32, %v15092_v63  ;;  %v10291_v57 = vld [vmem:[#allocation4 + $0x90] sm:$0xff] }
 0xdb2   : > { %v8113_v10 = vpack.c.b16 %v8081_v56, %v15217_v26  ;;  %v7961_v24 = vpack.c.bf16 %v7929_v39, %v7929_v39  ;;  %v7764_v16 = vmul.f32 %v10164_v49, %v7700_v21  ;;  %v7644_v62 = vmul.f32 %v10168_v23, %v6570_v4  ;;  %v10293_v56 = vld [vmem:[#allocation4 + $0x1b8] sm:$0xff] }
 0xdb3   : > { %v7743_v36 = vmul.f32 %v15354_v2, %v7679_v38  ;;  %v15384_v8 = vmul.f32 %v15373_v7, %v15151_v3  ;;  %v7981_v30 = vpack.c.bf16 %v7949_v53, %v7949_v53  ;;  %6637 = vst [vmem:[#allocation3 + $0xb0] sm:$0xff] %v6573_v11  ;;  %10173 = vrcp.f32 %v6573_v11  ;;  %v6460_v26 = vpop.xlane.xlu1 %6459 }
 0xdb4   : > { %10175 = vrcp.f32 %v15192_v19  ;;  %8177 = vst [vmem:[%s10682_s18] sm:$0xff] %v8113_v10  ;;  %v8089_v1 = vunpack.c.l.b16 %v7961_v24  ;;  %v7924_v63 = vmul.f32 %v10291_v57, %v7764_v16  ;;  %v7708_v13 = vsub.f32 2.0, %v7644_v62  ;;  %v10294_v62 = vld [vmem:[#allocation4 + $0x60] sm:$0xff] }
 0xdb5   : > { %v10170_v60 = vpop.eup %10169  ;;  %v8045_v49 = vunpack.c.l.b16 %v7917_v34  ;;  %v8109_v4 = vunpack.c.l.b16 %v7981_v30  ;;  %10177 = vrcp.f32 %v15366_v28  ;;  %v6568_v3 = vadd.f32 %v6460_v26, %v15063_v54 }
 0xdb6   : > { %v15390_v2 = vpop.eup %10171  ;;  %v8121_v37 = vpack.c.b16 %v8089_v1, %v15356_v29  ;;  %v7956_v9 = vpack.c.bf16 %v7924_v63, %v7924_v63  ;;  %v7772_v15 = vmul.f32 %v10168_v23, %v7708_v13  ;;  %v7639_v17 = vmul.f32 %v10170_v60, %v6565_v48 }
 0xdb7   : > { %v7900_v55 = vpack.c.bf16 %v7868_v45, %v7868_v45  ;;  %v15393_v25 = vmul.f32 %v10292_v35, %v7743_v36  ;;  %v8141_v38 = vpack.c.b16 %v8109_v4, %v8045_v49  ;;  %6632 = vst [vmem:[#allocation3 + $0x100] sm:$0xff] %v6568_v3  ;;  %10179 = vrcp.f32 %v6568_v3  ;;  %v6484_v39 = vpop.xlane.xlu0 %6483  ;;  %v7043_v16 = vpop.f32.mrf.mxu2  ;;  %v10296_v35 = vld [vmem:[#allocation4 + $0x118] sm:$0xff] }
 0xdb8   : > { %v17070_v44 = vpack.c.bf16 %v15290_v22, %v15290_v22  ;;  %8185 = vst [vmem:[%s10682_s18 + $0x40] sm:$0xff] %v8121_v37  ;;  %v8084_v54 = vunpack.c.l.b16 %v7956_v9  ;;  %v7932_v29 = vmul.f32 %v10293_v56, %v7772_v15  ;;  %v7703_v42 = vsub.f32 2.0, %v7639_v17 }
 0xdb9   : > { %v10174_v48 = vpop.eup %10173  ;;  %v17071_v21 = vpack.c.bf16 %v15294_v46, %v15294_v46  ;;  %v7682_v23 = vsub.f32 2.0, %v15384_v8  ;;  %v7632_v12 = vmul.f32 %v15390_v2, %v15251_v52  ;;  %8205 = vst [vmem:[%s10682_s18 + $0xe0] sm:$0xff] %v8141_v38  ;;  %v6576_v22 = vadd.f32 %v6484_v39, %v15095_v0  ;;  %v7212_v0 = vpop.f32.mrf.mxu3 }
 0xdba   : > { %v15398_v43 = vunpack.c.l.b16 %v17070_v44  ;;  %v15411_v45 = vpop.eup %10175  ;;  %v8116_v34 = vpack.c.b16 %v8084_v54, %v15303_v6  ;;  %v7964_v53 = vpack.c.bf16 %v7932_v29, %v7932_v29  ;;  %v7767_v10 = vmul.f32 %v10170_v60, %v7703_v42  ;;  %v10295_v6 = vld [vmem:[#allocation4 + $0x1d8] sm:$0xff] }
 0xdbb   : > { %v15404_v32 = vunpack.c.l.b16 %v17071_v21  ;;  %v7647_v24 = vmul.f32 %v10174_v48, %v6573_v11  ;;  %v15414_v46 = vpop.eup %10177  ;;  %v15417_v36 = vmul.f32 %v10294_v62, %v15352_v40  ;;  %v8028_v8 = vunpack.c.l.b16 %v7900_v55  ;;  %6640 = vst [vmem:[#allocation3 + $0xb8] sm:$0xff] %v6576_v22  ;;  %v6469_v63 = vpop.xlane.xlu1 %6468 }
 0xdbc   : > { %v7903_v52 = vpack.c.bf16 %v15393_v25, %v15393_v25  ;;  %10181 = vrcp.f32 %v6576_v22  ;;  %8180 = vst [vmem:[%s10682_s18 + $0x18] sm:$0xff] %v8116_v34  ;;  %v8092_v30 = vunpack.c.l.b16 %v7964_v53  ;;  %v7927_v1 = vmul.f32 %v10295_v6, %v7767_v10  ;;  %v10299_v10 = vld [vmem:[#allocation4 + $0x1e0] sm:$0xff] }
 0xdbd   : > { %v7711_v57 = vsub.f32 2.0, %v7647_v24  ;;  %v7213_v11 = vadd.f32 %v7212_v0, %v7043_v16  ;;  %v10180_v13 = vpop.eup %10179  ;;  %v7746_v26 = vmul.f32 %v15373_v7, %v7682_v23  ;;  %10183 = vrcp.f32 %v15231_v14 }
 0xdbe   : > { %v7696_v40 = vsub.f32 2.0, %v7632_v12  ;;  %v6571_v60 = vadd.f32 %v6469_v63, %v15077_v33  ;;  %v8124_v49 = vpack.c.b16 %v8092_v30, %v8028_v8  ;;  %v7959_v4 = vpack.c.bf16 %v7927_v1, %v7927_v1 }
 0xdbf   : > { %v7775_v37 = vmul.f32 %v10174_v48, %v7711_v57  ;;  %v7642_v9 = vmul.f32 %v10180_v13, %v6568_v3  ;;  %v7621_v15 = vmul.f32 %v15411_v45, %v15192_v19  ;;  %v7664_v17 = vmul.f32 %v15414_v46, %v15366_v28  ;;  %v6493_v38 = vpop.xlane.xlu0 %6492  ;;  %v15437_v19 = vld [vmem:[#allocation3 + $0x78] sm:$0xff]  ;;  %v7045_v48 = vpop.f32.mrf.mxu2 }
 0xdc0   : > { %v15430_v55 = vadd.f32 %v15307_v58, %v7213_v11  ;;  %6635 = vst [vmem:[#allocation3 + $0x178] sm:$0xff] %v6571_v60  ;;  %10185 = vrcp.f32 %v6571_v60  ;;  %v15434_v7 = vmul.f32 %v15335_v41, %v15348_v59  ;;  %v8087_v33 = vunpack.c.l.b16 %v7959_v4  ;;  %v10298_v28 = vld [vmem:[#allocation4 + $0xd8] sm:$0xff] }
 0xdc1   : > { %8188 = vst [vmem:[%s10682_s18 + $0x58] sm:$0xff] %v8124_v49  ;;  %v7935_v25 = vmul.f32 %v10296_v35, %v7775_v37  ;;  %v7706_v3 = vsub.f32 2.0, %v7642_v9  ;;  %10187 = vrcp.f32 %v15437_v19  ;;  %v7874_v58 = vmul.f32 %v10298_v28, %v7746_v26  ;;  %v7214_v53 = vpop.f32.mrf.mxu3  ;;  %v10302_v28 = vld [vmem:[#allocation4 + $0x78] sm:$0xff] }
 0xdc2   : > { %v10182_v44 = vpop.eup %10181  ;;  %v7760_v54 = vmul.f32 %v15390_v2, %v7696_v40  ;;  %7471 = vst [vmem:[#allocation4 + $0x48] sm:$0xff] %v15430_v55  ;;  %v6579_v41 = vadd.f32 %v6493_v38, %v15139_v47  ;;  %v8119_v56 = vpack.c.b16 %v8087_v33, %v15311_v18  ;;  %v8031_v23 = vunpack.c.l.b16 %v7903_v52 }
 0xdc3   : > { %v7967_v29 = vpack.c.bf16 %v7935_v25, %v7935_v25  ;;  %v7770_v42 = vmul.f32 %v10180_v13, %v7706_v3  ;;  %v7650_v39 = vmul.f32 %v10182_v44, %v6576_v22  ;;  %v15444_v21 = vpop.eup %10183  ;;  %v7685_v12 = vsub.f32 2.0, %v7621_v15  ;;  %v6478_v62 = vpop.xlane.xlu1 %6477  ;;  %v10300_v22 = vld [vmem:[#allocation4 + $0x28] sm:$0xff] }
 0xdc4   : > { %v7728_v34 = vsub.f32 2.0, %v7664_v17  ;;  %6643 = vst [vmem:[#allocation3 + $0xa8] sm:$0xff] %v6579_v41  ;;  %10189 = vrcp.f32 %v6579_v41  ;;  %v7215_v47 = vadd.f32 %v7214_v53, %v7045_v48  ;;  %v7906_v8 = vpack.c.bf16 %v7874_v58, %v7874_v58 }
 0xdc5   : > { %8183 = vst [vmem:[%s10682_s18 + $0x30] sm:$0xff] %v8119_v56  ;;  %v8095_v2 = vunpack.c.l.b16 %v7967_v29  ;;  %v7930_v24 = vmul.f32 %v10299_v10, %v7770_v42  ;;  %v7714_v16 = vsub.f32 2.0, %v7650_v39  ;;  %v7888_v0 = vmul.f32 %v10300_v22, %v7760_v54  ;;  %v10303_v54 = vld [vmem:[#allocation4 + $0x110] sm:$0xff] }
 0xdc6   : > { %v10186_v18 = vpop.eup %10185  ;;  %10191 = vrcp.f32 %v15268_v50  ;;  %v6574_v52 = vadd.f32 %v6478_v62, %v15086_v20  ;;  %v7624_v63 = vmul.f32 %v15444_v21, %v15231_v14  ;;  %v7792_v13 = vmul.f32 %v15414_v46, %v7728_v34  ;;  %v10301_v20 = vld [vmem:[#allocation4 + $0x58] sm:$0xff] }
 0xdc7   : > { %v8127_v30 = vpack.c.b16 %v8095_v2, %v8031_v23  ;;  %v7962_v6 = vpack.c.bf16 %v7930_v24, %v7930_v24  ;;  %v7778_v1 = vmul.f32 %v10182_v44, %v7714_v16  ;;  %v7645_v57 = vmul.f32 %v10186_v18, %v6571_v60  ;;  %v15449_v11 = vpop.eup %10187  ;;  %v6502_v9 = vpop.xlane.xlu0 %6501 }
 0xdc8   : > { %v7408_v26 = vadd.f32 %v15273_v51, %v7215_v47  ;;  %6638 = vst [vmem:[#allocation3 + $0x110] sm:$0xff] %v6574_v52  ;;  %10193 = vrcp.f32 %v6574_v52  ;;  %v7749_v40 = vmul.f32 %v15411_v45, %v7685_v12  ;;  %v7683_v15 = vsub.f32 2.0, %v15434_v7  ;;  %v10304_v47 = vld [vmem:[#allocation4 + $0x1f8] sm:$0xff] }
 0xdc9   : > { %8191 = vst [vmem:[%s10682_s18 + $0x70] sm:$0xff] %v8127_v30  ;;  %v8090_v49 = vunpack.c.l.b16 %v7962_v6  ;;  %v7938_v4 = vmul.f32 %v10301_v20, %v7778_v1  ;;  %v7709_v37 = vsub.f32 2.0, %v7645_v57  ;;  %v7920_v17 = vpack.c.bf16 %v7888_v0, %v7888_v0  ;;  %v10305_v0 = vld [vmem:[#allocation3 + $0x58] sm:$0xff]  ;;  %v5116_v57 = vld [vmem:[#allocation3 + $0x170] sm:$0xff] }
 0xdca   : > { %v10190_v60 = vpop.eup %10189  ;;  %7472 = vst [vmem:[#allocation4 + $0x128] sm:$0xff] %v7408_v26  ;;  %v7952_v14 = vmul.f32 %v7792_v13, %v7408_v26  ;;  %v6582_v46 = vadd.f32 %v6502_v9, %v15146_v61  ;;  %v8034_v3 = vunpack.c.l.b16 %v7906_v8  ;;  %v7688_v38 = vsub.f32 2.0, %v7624_v63  ;;  %v10306_v13 = vld [vmem:[#allocation4 + $0x148] sm:$0xff]  ;;  %v10308_v9 = vld [vmem:[#allocation4 + $0xf0] sm:$0xff] }
 0xdcb   : > { %v8122_v51 = vpack.c.b16 %v8090_v49, %v15398_v43  ;;  %v7970_v33 = vpack.c.bf16 %v7938_v4, %v7938_v4  ;;  %v7773_v35 = vmul.f32 %v10186_v18, %v7709_v37  ;;  %v7653_v45 = vmul.f32 %v10190_v60, %v6579_v41  ;;  %v6487_v61 = vpop.xlane.xlu1 %6486 }
 0xdcc   : > { %v15460_v25 = vpop.eup %10191  ;;  %v7984_v44 = vpack.c.bf16 %v7952_v14, %v7952_v14  ;;  %6646 = vst [vmem:[#allocation3 + $0x188] sm:$0xff] %v6582_v46  ;;  %10195 = vrcp.f32 %v6582_v46  ;;  %v7877_v7 = vmul.f32 %v10302_v28, %v7749_v40  ;;  %v8048_v42 = vunpack.c.l.b16 %v7920_v17  ;;  %v17072_v17 = vld [vmem:[#allocation161_spill] sm:$0xff] }
 0xdcd   : > { %8186 = vst [vmem:[%s10682_s18 + $0x48] sm:$0xff] %v8122_v51  ;;  %v8098_v58 = vunpack.c.l.b16 %v7970_v33  ;;  %v7933_v56 = vmul.f32 %v10303_v54, %v7773_v35  ;;  %v7717_v29 = vsub.f32 2.0, %v7653_v45  ;;  %10197 = vrcp.f32 %v15299_v27  ;;  %v10309_v54 = vld [vmem:[#allocation4 + $0x10] sm:$0xff] }
 0xdce   : > { %v10194_v43 = vpop.eup %10193  ;;  %v8112_v41 = vunpack.c.l.b16 %v7984_v44  ;;  %v6577_v39 = vadd.f32 %v6487_v61, %v15125_v5  ;;  %v7752_v53 = vmul.f32 %v15444_v21, %v7688_v38  ;;  %v7627_v2 = vmul.f32 %v15460_v25, %v15268_v50 }
 0xdcf   : > { %v8130_v48 = vpack.c.b16 %v8098_v58, %v8034_v3  ;;  %v7965_v23 = vpack.c.bf16 %v7933_v56, %v7933_v56  ;;  %v7781_v12 = vmul.f32 %v10190_v60, %v7717_v29  ;;  %v7648_v34 = vmul.f32 %v10194_v43, %v6574_v52  ;;  %v6511_v5 = vpop.xlane.xlu0 %6510 }
 0xdd0   : > { %v8144_v10 = vpack.c.b16 %v8112_v41, %v8048_v42  ;;  %6641 = vst [vmem:[#allocation3 + $0x120] sm:$0xff] %v6577_v39  ;;  %10199 = vrcp.f32 %v6577_v39  ;;  %v7909_v24 = vpack.c.bf16 %v7877_v7, %v7877_v7  ;;  %v7747_v22 = vmul.f32 %v15348_v59, %v7683_v15 }
 0xdd1   : > { %8194 = vst [vmem:[%s10682_s18 + $0x88] sm:$0xff] %v8130_v48  ;;  %v8093_v16 = vunpack.c.l.b16 %v7965_v23  ;;  %v7941_v62 = vmul.f32 %v10304_v47, %v7781_v12  ;;  %v7712_v18 = vsub.f32 2.0, %v7648_v34  ;;  %v7622_v21 = vmul.f32 %v15437_v19, %v15449_v11  ;;  %v10312_v47 = vld [vmem:[#allocation4 + $0x8] sm:$0xff] }
 0xdd2   : > { %v10196_v8 = vpop.eup %10195  ;;  %10201 = vrcp.f32 %v10305_v0  ;;  %8208 = vst [vmem:[%s10682_s18 + $0xf8] sm:$0xff] %v8144_v10  ;;  %v6585_v50 = vadd.f32 %v6511_v5, %v15180_v31  ;;  %v7904_v59 = vpack.c.bf16 %v15417_v36, %v15417_v36  ;;  %v7880_v26 = vmul.f32 %v10306_v13, %v7752_v53  ;;  %v10307_v31 = vld [vmem:[#allocation4 + $0x198] sm:$0xff]  ;;  %v17073_v36 = vld [vmem:[#allocation231_spill] sm:$0xff] }
 0xdd3   : > { %v8125_v52 = vpack.c.b16 %v8093_v16, %v15404_v32  ;;  %v7973_v30 = vpack.c.bf16 %v7941_v62, %v7941_v62  ;;  %v7776_v6 = vmul.f32 %v10194_v43, %v7712_v18  ;;  %v7656_v1 = vmul.f32 %v10196_v8, %v6582_v46  ;;  %v15475_v63 = vpop.eup %10197  ;;  %v6496_v4 = vpop.xlane.xlu1 %6495 }
 0xdd4   : > { %v7691_v19 = vsub.f32 2.0, %v7627_v2  ;;  %6649 = vst [vmem:[#allocation3 + $0xf0] sm:$0xff] %v6585_v50  ;;  %10203 = vrcp.f32 %v6585_v50  ;;  %v8037_v40 = vunpack.c.l.b16 %v7909_v24  ;;  %v7875_v60 = vmul.f32 %v10308_v9, %v7747_v22  ;;  %v10311_v2 = vld [vmem:[#allocation4 + $0x150] sm:$0xff] }
 0xdd5   : > { %8189 = vst [vmem:[%s10682_s18 + $0x60] sm:$0xff] %v8125_v52  ;;  %v8101_v49 = vunpack.c.l.b16 %v7973_v30  ;;  %v7936_v20 = vmul.f32 %v10307_v31, %v7776_v6  ;;  %v7720_v32 = vsub.f32 2.0, %v7656_v1  ;;  %v7686_v15 = vsub.f32 2.0, %v7622_v21  ;;  %v17074_v21 = vld [vmem:[#allocation259_spill] sm:$0xff] }
 0xdd6   : > { %v10200_v37 = vpop.eup %10199  ;;  %v6580_v14 = vadd.f32 %v6496_v4, %v17072_v17  ;;  %v6332_v46 = vmul.f32 %v17073_v36, %v5116_v57  ;;  %v8032_v38 = vunpack.c.l.b16 %v7904_v59  ;;  %v7912_v44 = vpack.c.bf16 %v7880_v26, %v7880_v26  ;;  %v5114_v1 = vld [vmem:[#allocation3 + $0x128] sm:$0xff] }
 0xdd7   : > { %v8133_v51 = vpack.c.b16 %v8101_v49, %v8037_v40  ;;  %v7968_v33 = vpack.c.bf16 %v7936_v20, %v7936_v20  ;;  %v7784_v35 = vmul.f32 %v10196_v8, %v7720_v32  ;;  %v7651_v45 = vmul.f32 %v10200_v37, %v6577_v39  ;;  %v6520_v61 = vpop.xlane.xlu0 %6519  ;;  %v10310_v39 = vld [vmem:[#allocation3 + $0x1a0] sm:$0xff]  ;;  %v10314_v49 = vld [vmem:[#allocation4 + $0xf8] sm:$0xff] }
 0xdd8   : > { %v15482_v3 = vpop.eup %10201  ;;  %v7755_v28 = vmul.f32 %v15460_v25, %v7691_v19  ;;  %6644 = vst [vmem:[#allocation3 + $0xc0] sm:$0xff] %v6580_v14  ;;  %10205 = vrcp.f32 %v6580_v14  ;;  %v7630_v7 = vmul.f32 %v15475_v63, %v15299_v27  ;;  %v7907_v42 = vpack.c.bf16 %v7875_v60, %v7875_v60  ;;  %v10313_v8 = vld [vmem:[#allocation4 + $0x180] sm:$0xff] }
 0xdd9   : > { %8197 = vst [vmem:[%s10682_s18 + $0xa0] sm:$0xff] %v8133_v51  ;;  %v8096_v58 = vunpack.c.l.b16 %v7968_v33  ;;  %v7944_v56 = vmul.f32 %v10309_v54, %v7784_v35  ;;  %v7715_v29 = vsub.f32 2.0, %v7651_v45  ;;  %v7750_v41 = vmul.f32 %v15449_v11, %v7686_v15  ;;  %v10315_v51 = vld [vmem:[#allocation3 + $0x168] sm:$0xff]  ;;  %v10316_v33 = vld [vmem:[#allocation4 + $0x50] sm:$0xff] }
 0xdda   : > { %v10204_v43 = vpop.eup %10203  ;;  %10207 = vrcp.f32 %v10310_v39  ;;  %v6588_v48 = vadd.f32 %v6520_v61, %v6332_v46  ;;  %v7625_v27 = vmul.f32 %v10305_v0, %v15482_v3  ;;  %v8040_v53 = vunpack.c.l.b16 %v7912_v44 }
 0xddb   : > { %v8128_v25 = vpack.c.b16 %v8096_v58, %v8032_v38  ;;  %v7976_v23 = vpack.c.bf16 %v7944_v56, %v7944_v56  ;;  %v7779_v12 = vmul.f32 %v10200_v37, %v7715_v29  ;;  %v7659_v34 = vmul.f32 %v10204_v43, %v6585_v50  ;;  %v6505_v18 = vpop.xlane.xlu1 %6504  ;;  %v17075_v37 = vld [vmem:[#allocation267_spill] sm:$0xff]  ;;  %v10317_v38 = vld [vmem:[#allocation4 + $0x130] sm:$0xff] }
 0xddc   : > { %v7883_v10 = vmul.f32 %v10311_v2, %v7755_v28  ;;  %6652 = vst [vmem:[#allocation3 + $0x170] sm:$0xff] %v6588_v48  ;;  %10209 = vrcp.f32 %v6588_v48  ;;  %v7694_v24 = vsub.f32 2.0, %v7630_v7  ;;  %v7878_v22 = vmul.f32 %v10313_v8, %v7750_v41 }
 0xddd   : > { %8192 = vst [vmem:[%s10682_s18 + $0x78] sm:$0xff] %v8128_v25  ;;  %v8104_v16 = vunpack.c.l.b16 %v7976_v23  ;;  %v7939_v62 = vmul.f32 %v10312_v47, %v7779_v12  ;;  %v7723_v11 = vsub.f32 2.0, %v7659_v34  ;;  %v6583_v50 = vadd.f32 %v6505_v18, %v17074_v21  ;;  %v17076_v23 = vld [vmem:[#allocation174_spill] sm:$0xff] }
 0xdde   : > { %v10206_v5 = vpop.eup %10205  ;;  %v8035_v59 = vunpack.c.l.b16 %v7907_v42  ;;  %v7689_v13 = vsub.f32 2.0, %v7625_v27  ;;  %v7915_v26 = vpack.c.bf16 %v7883_v10, %v7883_v10  ;;  %v7758_v19 = vmul.f32 %v15475_v63, %v7694_v24  ;;  %v10318_v42 = vld [vmem:[#allocation4 + $0x1c8] sm:$0xff]  ;;  %v5117_v27 = vld [vmem:[#allocation3 + $0x1d0] sm:$0xff] }
 0xddf   : > { %v8136_v52 = vpack.c.b16 %v8104_v16, %v8040_v53  ;;  %v7971_v0 = vpack.c.bf16 %v7939_v62, %v7939_v62  ;;  %v7787_v30 = vmul.f32 %v10204_v43, %v7723_v11  ;;  %v7654_v6 = vmul.f32 %v10206_v5, %v6580_v14  ;;  %6647 = vst [vmem:[#allocation3 + $0x1b0] sm:$0xff] %v6583_v50  ;;  %v17077_v62 = vld [vmem:[#allocation237_spill] sm:$0xff] }
 0xde0   : > { %v10208_v57 = vpop.eup %10207  ;;  %10211 = vrcp.f32 %v6583_v50  ;;  %v7910_v4 = vpack.c.bf16 %v7878_v22, %v7878_v22  ;;  %v6330_v9 = vmul.f32 %v17075_v37, %v5114_v1  ;;  %v7753_v36 = vmul.f32 %v15482_v3, %v7689_v13  ;;  %v10319_v22 = vld [vmem:[#allocation4 + $0x170] sm:$0xff] }
 0xde1   : > { %8200 = vst [vmem:[%s10682_s18 + $0xb8] sm:$0xff] %v8136_v52  ;;  %v8099_v40 = vunpack.c.l.b16 %v7971_v0  ;;  %v7947_v31 = vmul.f32 %v10314_v49, %v7787_v30  ;;  %v7718_v20 = vsub.f32 2.0, %v7654_v6  ;;  %v7628_v46 = vmul.f32 %v10310_v39, %v10208_v57 }
 0xde2   : > { %v10210_v32 = vpop.eup %10209  ;;  %10213 = vrcp.f32 %v10315_v51  ;;  %v8043_v63 = vunpack.c.l.b16 %v7915_v26  ;;  %v7886_v35 = vmul.f32 %v10316_v33, %v7758_v19  ;;  %v8038_v3 = vunpack.c.l.b16 %v7910_v4  ;;  %v10321_v4 = vld [vmem:[#allocation4 + $0xe0] sm:$0xff] }
 0xde3   : > { %v8131_v60 = vpack.c.b16 %v8099_v40, %v8035_v59  ;;  %v7979_v15 = vpack.c.bf16 %v7947_v31, %v7947_v31  ;;  %v7782_v17 = vmul.f32 %v10206_v5, %v7718_v20  ;;  %v7662_v14 = vmul.f32 %v10210_v32, %v6588_v48  ;;  %v6514_v7 = vpop.xlane.xlu1 %6513 }
 0xde4   : > { %v6586_v54 = vadd.f32 %v6514_v7, %v6330_v9  ;;  %v7881_v41 = vmul.f32 %v10318_v42, %v7753_v36  ;;  %v7692_v39 = vsub.f32 2.0, %v7628_v46  ;;  %v7918_v48 = vpack.c.bf16 %v7886_v35, %v7886_v35 }
 0xde5   : > { %8195 = vst [vmem:[%s10682_s18 + $0x90] sm:$0xff] %v8131_v60  ;;  %v8107_v45 = vunpack.c.l.b16 %v7979_v15  ;;  %v7942_v44 = vmul.f32 %v10317_v38, %v7782_v17  ;;  %v7726_v28 = vsub.f32 2.0, %v7662_v14  ;;  %v6333_v11 = vmul.f32 %v17077_v62, %v5117_v27  ;;  %v10322_v14 = vld [vmem:[#allocation4 + $0xb8] sm:$0xff] }
 0xde6   : > { %v10212_v58 = vpop.eup %10211  ;;  %6650 = vst [vmem:[#allocation3 + $0x128] sm:$0xff] %v6586_v54  ;;  %10215 = vrcp.f32 %v6586_v54  ;;  %v7913_v16 = vpack.c.bf16 %v7881_v41, %v7881_v41  ;;  %v7756_v47 = vmul.f32 %v10208_v57, %v7692_v39  ;;  %v8046_v5 = vunpack.c.l.b16 %v7918_v48  ;;  %v10320_v57 = vld [vmem:[#allocation4 + $0xa8] sm:$0xff] }
 0xde7   : > { %v8139_v56 = vpack.c.b16 %v8107_v45, %v8043_v63  ;;  %v7974_v29 = vpack.c.bf16 %v7942_v44, %v7942_v44  ;;  %v7790_v61 = vmul.f32 %v10210_v32, %v7726_v28  ;;  %v7657_v43 = vmul.f32 %v10212_v58, %v6583_v50 }
 0xde8   : > { %v10214_v53 = vpop.eup %10213  ;;  %v8041_v59 = vunpack.c.l.b16 %v7913_v16  ;;  %v7884_v13 = vmul.f32 %v10320_v57, %v7756_v47 }
 0xde9   : > { %8203 = vst [vmem:[%s10682_s18 + $0xd0] sm:$0xff] %v8139_v56  ;;  %v8102_v25 = vunpack.c.l.b16 %v7974_v29  ;;  %v7950_v12 = vmul.f32 %v7790_v61, %v17076_v23  ;;  %v7721_v34 = vsub.f32 2.0, %v7657_v43  ;;  %v7631_v18 = vmul.f32 %v10315_v51, %v10214_v53 }
 0xdea   : > { %v7916_v20 = vpack.c.bf16 %v7884_v13, %v7884_v13 }
 0xdeb   : > { %v8134_v2 = vpack.c.b16 %v8102_v25, %v8038_v3  ;;  %v7982_v10 = vpack.c.bf16 %v7950_v12, %v7950_v12  ;;  %v7785_v24 = vmul.f32 %v10212_v58, %v7721_v34  ;;  %v6523_v50 = vpop.xlane.xlu1 %6522  ;;  %v7695_v26 = vsub.f32 2.0, %v7631_v18 }
 0xdec   : > { %v10216_v52 = vpop.eup %10215  ;;  %v6589_v0 = vadd.f32 %v6523_v50, %v6333_v11  ;;  %v8044_v17 = vunpack.c.l.b16 %v7916_v20 }
 0xded   : > { %8198 = vst [vmem:[%s10682_s18 + $0xa8] sm:$0xff] %v8134_v2  ;;  %v8110_v8 = vunpack.c.l.b16 %v7982_v10  ;;  %v7945_v21 = vmul.f32 %v10319_v22, %v7785_v24  ;;  %v7660_v1 = vmul.f32 %v10216_v52, %v6586_v54  ;;  %v7759_v32 = vmul.f32 %v10214_v53, %v7695_v26 }
 0xdee   : > { %6653 = vst [vmem:[#allocation3 + $0x1d0] sm:$0xff] %v6589_v0  ;;  %10217 = vrcp.f32 %v6589_v0 }
 0xdef   : > { %v8142_v30 = vpack.c.b16 %v8110_v8, %v8046_v5  ;;  %v7977_v6 = vpack.c.bf16 %v7945_v21, %v7945_v21  ;;  %v7724_v40 = vsub.f32 2.0, %v7660_v1  ;;  %v7887_v36 = vmul.f32 %v10322_v14, %v7759_v32 }
 0xdf1   : > { %8206 = vst [vmem:[%s10682_s18 + $0xe8] sm:$0xff] %v8142_v30  ;;  %v8105_v19 = vunpack.c.l.b16 %v7977_v6  ;;  %v7788_v31 = vmul.f32 %v10216_v52, %v7724_v40  ;;  %v7919_v35 = vpack.c.bf16 %v7887_v36, %v7887_v36 }
 0xdf3   : > { %v8137_v49 = vpack.c.b16 %v8105_v19, %v8041_v59  ;;  %v7948_v37 = vmul.f32 %v10321_v4, %v7788_v31  ;;  %v8047_v44 = vunpack.c.l.b16 %v7919_v35 }
 0xdf4   : > { %v10218_v9 = vpop.eup %10217 }
 0xdf5   : > { %8201 = vst [vmem:[%s10682_s18 + $0xc0] sm:$0xff] %v8137_v49  ;;  %v7980_v60 = vpack.c.bf16 %v7948_v37, %v7948_v37  ;;  %v7663_v15 = vmul.f32 %v10218_v9, %v6589_v0 }
 0xdf7   : > { %v8108_v46 = vunpack.c.l.b16 %v7980_v60  ;;  %v7727_v51 = vsub.f32 2.0, %v7663_v15 }
 0xdf9   : > { %v8140_v63 = vpack.c.b16 %v8108_v46, %v8044_v17  ;;  %v7791_v33 = vmul.f32 %v10218_v9, %v7727_v51 }
 0xdfb   : > { %8204 = vst [vmem:[%s10682_s18 + $0xd8] sm:$0xff] %v8140_v63  ;;  %v7951_v45 = vmul.f32 %v7791_v33, %v15430_v55 }
 0xdfd   : > { %v7983_v38 = vpack.c.bf16 %v7951_v45, %v7951_v45 }
 0xdff   : > { %v8111_v28 = vunpack.c.l.b16 %v7983_v38 }
 0xe01   : > { %v8143_v7 = vpack.c.b16 %v8111_v28, %v8047_v44 }
 0xe03   : > { %8207 = vst [vmem:[%s10682_s18 + $0xf0] sm:$0xff] %v8143_v7 }
 0xe04 PF: > { %8215 = sbr.rel (!%p10564_p8) target bundleno = 3631 (0xe2f), region = 89  ;;  %s8216_s2 = sld [smem:[#allocation6 + %s10411_s29]] (%p10564_p8)  ;;  %v8315_v55 = vld [vmem:[%s10682_s18] sm:$0xff] (%p10564_p8)  ;;  %v8317_v58 = vld [vmem:[%s10682_s18 + $0x8] sm:$0xff] (%p10564_p8)  ;;  %v8319_v54 = vld [vmem:[%s10682_s18 + $0x10] sm:$0xff] (%p10564_p8) }
 0xe05   : > { %s9051_s4 = sshll.u32 (%p10564_p8), %s10415_s1, 1  ;;  %s9053_s0 = sshll.u32 (%p10564_p8), %s10419_s30, 8  ;;  %v8321_v56 = vld [vmem:[%s10682_s18 + $0x18] sm:$0xff] (%p10564_p8)  ;;  %v8323_v29 = vld [vmem:[%s10682_s18 + $0x20] sm:$0xff] (%p10564_p8)  ;;  %v8325_v61 = vld [vmem:[%s10682_s18 + $0x28] sm:$0xff] (%p10564_p8) }
 0xe06   : > { %s17078_s5 = sld [smem:[#allocation273_spill]] (%p10564_p8)  ;;  %v8327_v43 = vld [vmem:[%s10682_s18 + $0x30] sm:$0xff] (%p10564_p8)  ;;  %v8329_v3 = vld [vmem:[%s10682_s18 + $0x38] sm:$0xff] (%p10564_p8)  ;;  %v8331_v42 = vld [vmem:[%s10682_s18 + $0x40] sm:$0xff] (%p10564_p8) }
 0xe07   : > { %v8333_v41 = vld [vmem:[%s10682_s18 + $0x48] sm:$0xff] (%p10564_p8)  ;;  %v8335_v39 = vld [vmem:[%s10682_s18 + $0x50] sm:$0xff] (%p10564_p8)  ;;  %v8337_v48 = vld [vmem:[%s10682_s18 + $0x58] sm:$0xff] (%p10564_p8) }
 0xe08   : > { %v8339_v25 = vld [vmem:[%s10682_s18 + $0x60] sm:$0xff] (%p10564_p8)  ;;  %v8341_v23 = vld [vmem:[%s10682_s18 + $0x68] sm:$0xff] (%p10564_p8)  ;;  %v8343_v12 = vld [vmem:[%s10682_s18 + $0x70] sm:$0xff] (%p10564_p8) }
 0xe09   : > { %v8345_v34 = vld [vmem:[%s10682_s18 + $0x78] sm:$0xff]  ;;  %v8347_v27 = vld [vmem:[%s10682_s18 + $0x80] sm:$0xff]  ;;  %v8349_v53 = vld [vmem:[%s10682_s18 + $0x88] sm:$0xff] }
 0xe0a   : > { %s9185_s6 = sshll.u32 %s8216_s2, 7  ;;  %v8351_v2 = vld [vmem:[%s10682_s18 + $0x90] sm:$0xff]  ;;  %v8353_v10 = vld [vmem:[%s10682_s18 + $0x98] sm:$0xff]  ;;  %v8355_v24 = vld [vmem:[%s10682_s18 + $0xa0] sm:$0xff] }
 0xe0b   : > { %s8220_s7 = sadd.s32 %s9185_s6, %s9051_s4  ;;  %v8357_v16 = vld [vmem:[%s10682_s18 + $0xa8] sm:$0xff]  ;;  %v8359_v47 = vld [vmem:[%s10682_s18 + $0xb0] sm:$0xff]  ;;  %v8361_v62 = vld [vmem:[%s10682_s18 + $0xb8] sm:$0xff] }
 0xe0c   : > { %s8222_s8 = sadd.s32 %s9053_s0, %s8220_s7  ;;  %v8363_v11 = vld [vmem:[%s10682_s18 + $0xc0] sm:$0xff]  ;;  %v8365_v18 = vld [vmem:[%s10682_s18 + $0xc8] sm:$0xff]  ;;  %v8367_v5 = vld [vmem:[%s10682_s18 + $0xd0] sm:$0xff] }
 0xe0d   : > { %s9054_s13 = sshll.u32 %s8222_s8, 2  ;;  %v8369_v8 = vld [vmem:[%s10682_s18 + $0xd8] sm:$0xff]  ;;  %v8371_v22 = vld [vmem:[%s10682_s18 + $0xe0] sm:$0xff]  ;;  %v8373_v21 = vld [vmem:[%s10682_s18 + $0xe8] sm:$0xff] }
 0xe0e   : > { %s15516_s21 = scalar_lea.vmem %s17078_s5, %s9054_s13  ;;  %v8375_v50 = vld [vmem:[%s10682_s18 + $0xf0] sm:$0xff]  ;;  %v8377_v52 = vld [vmem:[%s10682_s18 + $0xf8] sm:$0xff] }
 0xe0f   : > { %8316 = vst [vmem:[%s15516_s21] sm:$0xff] %v8315_v55 }
 0xe10   : > { %8318 = vst [vmem:[%s15516_s21 + $0x10] sm:$0xff] %v8317_v58 }
 0xe11   : > { %8320 = vst [vmem:[%s15516_s21 + $0x20] sm:$0xff] %v8319_v54 }
 0xe12   : > { %8322 = vst [vmem:[%s15516_s21 + $0x30] sm:$0xff] %v8321_v56 }
 0xe13   : > { %8324 = vst [vmem:[%s15516_s21 + $0x40] sm:$0xff] %v8323_v29 }
 0xe14   : > { %8326 = vst [vmem:[%s15516_s21 + $0x50] sm:$0xff] %v8325_v61 }
 0xe15   : > { %8328 = vst [vmem:[%s15516_s21 + $0x60] sm:$0xff] %v8327_v43 }
 0xe16   : > { %8330 = vst [vmem:[%s15516_s21 + $0x70] sm:$0xff] %v8329_v3 }
 0xe17   : > { %8332 = vst [vmem:[%s15516_s21 + $0x80] sm:$0xff] %v8331_v42 }
 0xe18   : > { %8334 = vst [vmem:[%s15516_s21 + $0x90] sm:$0xff] %v8333_v41 }
 0xe19   : > { %8336 = vst [vmem:[%s15516_s21 + $0xa0] sm:$0xff] %v8335_v39 }
 0xe1a   : > { %8338 = vst [vmem:[%s15516_s21 + $0xb0] sm:$0xff] %v8337_v48 }
 0xe1b   : > { %8340 = vst [vmem:[%s15516_s21 + $0xc0] sm:$0xff] %v8339_v25 }
 0xe1c   : > { %8342 = vst [vmem:[%s15516_s21 + $0xd0] sm:$0xff] %v8341_v23 }
 0xe1d   : > { %8344 = vst [vmem:[%s15516_s21 + $0xe0] sm:$0xff] %v8343_v12 }
 0xe1e   : > { %8346 = vst [vmem:[%s15516_s21 + $0xf0] sm:$0xff] %v8345_v34 }
 0xe1f   : > { %8348 = vst [vmem:[%s15516_s21 + $0x100] sm:$0xff] %v8347_v27 }
 0xe20   : > { %8350 = vst [vmem:[%s15516_s21 + $0x110] sm:$0xff] %v8349_v53 }
 0xe21   : > { %8352 = vst [vmem:[%s15516_s21 + $0x120] sm:$0xff] %v8351_v2 }
 0xe22   : > { %8354 = vst [vmem:[%s15516_s21 + $0x130] sm:$0xff] %v8353_v10 }
 0xe23   : > { %8356 = vst [vmem:[%s15516_s21 + $0x140] sm:$0xff] %v8355_v24 }
 0xe24   : > { %8358 = vst [vmem:[%s15516_s21 + $0x150] sm:$0xff] %v8357_v16 }
 0xe25   : > { %8360 = vst [vmem:[%s15516_s21 + $0x160] sm:$0xff] %v8359_v47 }
 0xe26   : > { %8362 = vst [vmem:[%s15516_s21 + $0x170] sm:$0xff] %v8361_v62 }
 0xe27   : > { %8364 = vst [vmem:[%s15516_s21 + $0x180] sm:$0xff] %v8363_v11 }
 0xe28   : > { %8366 = vst [vmem:[%s15516_s21 + $0x190] sm:$0xff] %v8365_v18 }
 0xe29   : > { %8368 = vst [vmem:[%s15516_s21 + $0x1a0] sm:$0xff] %v8367_v5 }
 0xe2a   : > { %8370 = vst [vmem:[%s15516_s21 + $0x1b0] sm:$0xff] %v8369_v8 }
 0xe2b   : > { %8372 = vst [vmem:[%s15516_s21 + $0x1c0] sm:$0xff] %v8371_v22 }
 0xe2c   : > { %8374 = vst [vmem:[%s15516_s21 + $0x1d0] sm:$0xff] %v8373_v21 }
 0xe2d   : > { %8376 = vst [vmem:[%s15516_s21 + $0x1e0] sm:$0xff] %v8375_v50 }
 0xe2e   : > { %8378 = vst [vmem:[%s15516_s21 + $0x1f0] sm:$0xff] %v8377_v52 }
 0xe2f PF: > { %s28_s9 = sadd.s32 1, %s10435_s9   ;;  %s17079_s28 = sld [smem:[#allocation11_spill]] }
 0xe30   : > { %p25_p8 = scmp.ge.s32.totalorder %s28_s9, 14   ;;  %s17080_s0 = sld [smem:[#allocation18_spill]] }
 0xe31   : > { %s17081_s29 = sld [smem:[#allocation12_spill]]  ;;  %s17087_s26 = smov %s10399_s27 }
 0xe32   : > { %s17082_s1 = sld [smem:[#allocation13_spill]]  ;;  %s17088_s27 = smov %s10574_s10 }
 0xe33   : > { %s17083_s30 = sld [smem:[#allocation14_spill]]  ;;  %27 = sbr.rel (!%p25_p8) target bundleno = 15 (0xf), region = 164 }
 0xe34   : > { %s17084_s6 = sld [smem:[#allocation15_spill]] }
 0xe35   : > { %s17085_s7 = sld [smem:[#allocation16_spill]] }
 0xe36   : > { %s17086_s8 = sld [smem:[#allocation17_spill]] }

</bundles_post_ra>
